<compile_context>
chip_gen: v5e
topology: v5e:2x2
jax: 0.10.0
libtpu: 0.0.40
codegen_flags: <defaults>
</compile_context>

<pallas_src>
import numpy as np
import jax
import jax.numpy as jnp
from jax.experimental import pallas as pl
from jax.experimental.pallas import tpu as pltpu

# ----- module-consistent hyperparameters ---------------------------------------
B          = 2
N_CHANNELS = 8                    # EEG channels (height of the NCHW picture)
N_CLASSES  = 4
T          = 256                  # input_window_size (divisible by 32)
K          = 8                    # kernel_length
F1         = T // 8               # 32 : time length after AvgPool(1,8)
F          = T // 32              # 8  : time length after AvgPool(1,4) (= GCN dim)
BN_EPS     = 1e-3                 # the module passes eps=0.001 explicitly
PAD_L      = (K - 1) // 2         # 3 : 'same' left pad along time
PAD_R      = (K - 1) - PAD_L      # 4 : 'same' right pad along time
PAD_T      = (N_CHANNELS - 1) // 2  # 3 : 'same' top pad of the (C,1) grouped conv
F1PAD      = F1 + K               # 40: 3 + 32 + 4 (=39) rounded up to a nice size
BC         = B * N_CHANNELS       # 16 rows (batch x channel) on sublanes


def _elu(v):
    # ELU(alpha=1); clamp before exp so the unselected branch stays finite.
    return jnp.where(v > 0, v, jnp.exp(jnp.minimum(v, 0.0)) - 1.0)


# ================================ kernel ========================================
def asgcnn_kernel(
    # --- VMEM (auto-pipelined) tensor inputs ---
    x_ref,      # (16, T+K-1)  f32   time-padded input, rows = (batch, eeg_channel)
    p8_ref,     # (T, 40)      bf16  AvgPool(1,8) matrix with 'same' zero-pad baked in
    a2v_ref,    # (1, 512)     f32   folded BN2 scale  (per output channel, tiled)
    c2v_ref,    # (1, 512)     f32   folded BN2 shift  (conv2 bias folded in)
    bda_ref,    # (16, 16)     f32   blockdiag_B(adjacency)
    bgv_ref,    # (1, 128)     f32   GCN bias tiled over the 16 feature maps
    sdh_ref,    # (8, 16, 16)  f32   per-dh sublane-shift (height pad) matrices
    asv_ref,    # (1, 128)     f32   folded BN_s scale
    csv_ref,    # (1, 128)     f32   folded BN_s shift
    poolb_ref,  # (2, 16)      f32   AvgPool(C,1) per batch element
    wl1_ref,    # (128, 64)    f32   Linear 1 weight (in, out)
    bl1_ref,    # (1, 64)      f32   Linear 1 bias
    wl2_ref,    # (64, NC)     f32   Linear 2 weight
    bl2_ref,    # (1, NC)      f32   Linear 2 bias
    # --- HBM (pl.ANY) inputs, manually DMA'd so they overlap early compute ---
    w2t_hbm,    # (8, 40, 512) bf16  stage-2 conv as per-input-channel Toeplitz blocks
    pw_hbm,     # (512, 128)   bf16  AvgPool(1,4) folded with blockdiag_16(GCN weight)
    rstk_hbm,   # (1024, 128)  bf16  grouped-(C,1)-conv weights, stacked over dh
    # --- SMEM scalar tables ---
    w1f_ref,    # (8*K,)       f32   conv1 weights with BN1 scale folded  [co*K + k]
    c1f_ref,    # (8,)         f32   folded BN1 shift (conv1 bias folded)
    # --- output ---
    out_ref,    # (B, NC)      f32
    # --- scratch ---
    w2t_vmem,   # VMEM (8, 40, 512) bf16
    pw_vmem,    # VMEM (512, 128)   bf16
    rstk_vmem,  # VMEM (1024, 128)  bf16
    dma_sem,    # DMA semaphores (3,)
):
    f32 = jnp.float32

    # Kick off the big-constant DMAs immediately so they overlap stage-1 compute.
    cp_w2t  = pltpu.make_async_copy(w2t_hbm,  w2t_vmem,  dma_sem.at[0])
    cp_pw   = pltpu.make_async_copy(pw_hbm,   pw_vmem,   dma_sem.at[1])
    cp_rstk = pltpu.make_async_copy(rstk_hbm, rstk_vmem, dma_sem.at[2])
    cp_w2t.start()
    cp_pw.start()
    cp_rstk.start()

    # ---- stage 1: Conv2d(1->8,(1,K),'same') + BN1 ------------------------------
    # Scalar-broadcast FMAs; each shifted input slice is loaded exactly once
    # (k-outer loop) so only the 8 accumulators stay live.  All SMEM scalar reads
    # happen here, before any DMA wait.
    accs = [jnp.zeros((BC, T), f32) for _ in range(8)]
    for k in range(K):
        xk = x_ref[:, k:k + T]
        for co in range(8):
            accs[co] = accs[co] + w1f_ref[co * K + k] * xk

    # Stack the 8 output channels on sublanes -> one (128, 256) map.  The concat
    # is at 16-row (2 sublane-tile) boundaries, i.e. pure vreg placement.
    h1 = jnp.concatenate([accs[co] + c1f_ref[co] for co in range(8)], axis=0)

    # ---- ELU + AvgPool(1,8) (+ zero pad for the next 'same' conv) as ONE matmul --
    pooled = jnp.dot(_elu(h1), p8_ref[...].astype(f32),
                     preferred_element_type=f32)                    # (128, 40)

    # ---- stage 2: Conv2d(8->16,(1,K),'same') as block-Toeplitz MXU matmuls ------
    cp_w2t.wait()
    y2 = jnp.dot(pooled[0:BC], w2t_vmem[0].astype(f32),
                 preferred_element_type=f32)
    for ci in range(1, 8):
        y2 = y2 + jnp.dot(pooled[ci * BC:(ci + 1) * BC],
                          w2t_vmem[ci].astype(f32),
                          preferred_element_type=f32)
    h2 = _elu(y2 * a2v_ref[...] + c2v_ref[...])                    # BN2 + ELU (16,512)

    # ---- AvgPool(1,4) + GCN fused:  ELU( BD(A) @ h2 @ (P4 @ BD(Wg)) + bg ) ------
    cp_pw.wait()
    ah2 = jnp.dot(bda_ref[...], h2, preferred_element_type=f32)    # (16, 512)
    gcn = _elu(jnp.dot(ah2, pw_vmem[...].astype(f32),
                       preferred_element_type=f32) + bgv_ref[...])  # (16, 128)

    # ---- grouped Conv2d(16->16,(C,1),groups=8,'same') ---------------------------
    # 8 sublane-shift matmuls build the shifted copies; one big matmul against the
    # stacked banded weight matrix does the whole grouped convolution.
    cp_rstk.wait()
    u = jnp.concatenate(
        [jnp.dot(sdh_ref[dh], gcn, preferred_element_type=f32)
         for dh in range(N_CHANNELS)], axis=1)                     # (16, 1024)
    y3 = jnp.dot(u, rstk_vmem[...].astype(f32),
                 preferred_element_type=f32)                       # (16, 128)
    cls = _elu(y3 * asv_ref[...] + csv_ref[...])                   # BN_s + ELU

    # ---- AvgPool(C,1) + Flatten + Linear(16F,64) + Linear(64,NC) ----------------
    flat = jnp.dot(poolb_ref[...], cls, preferred_element_type=f32)   # (B, 128)
    z = jnp.dot(flat, wl1_ref[...], preferred_element_type=f32) + bl1_ref[...]
    y = jnp.dot(z, wl2_ref[...], preferred_element_type=f32) + bl2_ref[...]
    out_ref[...] = y


# ============================ host-side setup ===================================
def get_adjacency_matrix(c):
    # TODO(synk): get_adjacency_matrix('DG') is not provided by the source; use a
    # deterministic row-normalized ring + self-loop graph as a stand-in.
    i = jnp.arange(c)
    d = jnp.abs(i[:, None] - i[None, :])
    ring = ((d == 1) | (d == c - 1)).astype(jnp.float32)
    a = jnp.eye(c, dtype=jnp.float32) + 0.5 * ring
    return a / jnp.sum(a, axis=1, keepdims=True)


def build_params(key):
    ks = jax.random.split(key, 24)
    n = lambda k, shape, s=1.0: s * jax.random.normal(k, shape, jnp.float32)
    p = {}
    p["adj"] = get_adjacency_matrix(N_CHANNELS)
    p["w1"] = n(ks[0], (8, K), 1.0 / K ** 0.5)             # Conv2d(1,8,(1,K)) weight
    p["b1"] = n(ks[1], (8,), 0.1)
    p["bn1_g"] = 1.0 + n(ks[2], (8,), 0.1)
    p["bn1_b"] = n(ks[3], (8,), 0.1)
    p["bn1_m"] = n(ks[4], (8,), 0.1)
    p["bn1_v"] = 0.5 + jnp.abs(n(ks[5], (8,)))
    p["w2"] = n(ks[6], (16, 8, K), 1.0 / (8 * K) ** 0.5)   # Conv2d(8,16,(1,K)) weight
    p["b2"] = n(ks[7], (16,), 0.1)
    p["bn2_g"] = 1.0 + n(ks[8], (16,), 0.1)
    p["bn2_b"] = n(ks[9], (16,), 0.1)
    p["bn2_m"] = n(ks[10], (16,), 0.1)
    p["bn2_v"] = 0.5 + jnp.abs(n(ks[11], (16,)))
    p["wg"] = n(ks[12], (F, F), 1.0 / F ** 0.5)            # GraphConvolution weight
    p["bg"] = n(ks[13], (F,), 0.1)
    p["ws"] = n(ks[14], (16, 2, N_CHANNELS), 1.0 / (2 * N_CHANNELS) ** 0.5)
    p["bns_g"] = 1.0 + n(ks[15], (16,), 0.1)
    p["bns_b"] = n(ks[16], (16,), 0.1)
    p["bns_m"] = n(ks[17], (16,), 0.1)
    p["bns_v"] = 0.5 + jnp.abs(n(ks[18], (16,)))
    p["wl1"] = n(ks[19], (16 * F, 64), 1.0 / (16 * F) ** 0.5)
    p["bl1"] = n(ks[20], (64,), 0.1)
    p["wl2"] = n(ks[21], (64, N_CLASSES), 1.0 / 8.0)
    p["wl2b"] = None
    p["bl2"] = n(ks[22], (N_CLASSES,), 0.1)
    return p


def build_constants(p):
    """Host-precomputed matmul constants (all small: ~1.5 MB f32 total)."""
    pn = {k: (None if v is None else np.asarray(v, np.float32)) for k, v in p.items()}
    C, Fn, F1n = N_CHANNELS, F, F1

    def fold(g, be, m, v, cb=None):        # eval-mode BN -> per-channel scale/shift
        s = g / np.sqrt(v + BN_EPS)
        sh = be - m * s
        if cb is not None:
            sh = sh + s * cb
        return s.astype(np.float32), sh.astype(np.float32)

    a1, c1 = fold(pn["bn1_g"], pn["bn1_b"], pn["bn1_m"], pn["bn1_v"], pn["b1"])
    a2, c2 = fold(pn["bn2_g"], pn["bn2_b"], pn["bn2_m"], pn["bn2_v"], pn["b2"])
    a_s, c_s = fold(pn["bns_g"], pn["bns_b"], pn["bns_m"], pn["bns_v"], None)

    # conv1 weights with the BN1 scale folded in (SMEM scalar table)
    w1f = (a1[:, None] * pn["w1"]).reshape(-1).astype(np.float32)          # (64,)

    # AvgPool(1,8) matrix; the next conv's 'same' zero padding (3 left, 4 right)
    # is baked into the output columns.  Entries are 1/8, exact in bf16.
    p8 = np.zeros((T, F1PAD), np.float32)
    for t in range(T):
        p8[t, PAD_L + t // 8] = 1.0 / 8.0

    # stage-2 conv (8->16,(1,K),'same') as per-input-channel Toeplitz blocks:
    # w2t[ci, tp, co*F1 + t] = w2[co, ci, tp - t]  for 0 <= tp - t < K
    w2 = pn["w2"]
    w2t = np.zeros((8, F1PAD, 16 * F1n), np.float32)
    for co in range(16):
        for ci in range(8):
            for t in range(F1n):
                for k in range(K):
                    w2t[ci, t + k, co * F1n + t] = w2[co, ci, k]

    a2v = np.repeat(a2, F1n).reshape(1, -1).astype(np.float32)             # (1,512)
    c2v = np.repeat(c2, F1n).reshape(1, -1).astype(np.float32)

    # GCN: blockdiag adjacency (left) and AvgPool(1,4) folded with blockdiag(Wg)
    bda = np.kron(np.eye(B, dtype=np.float32), pn["adj"]).astype(np.float32)
    pw = np.zeros((16 * F1n, 16 * Fn), np.float32)
    for ch in range(16):
        for t in range(F1n):
            pw[ch * F1n + t, ch * Fn:(ch + 1) * Fn] = 0.25 * pn["wg"][t // 4, :]
    bgv = np.tile(pn["bg"], 16).reshape(1, -1).astype(np.float32)          # (1,128)

    # grouped (C,1) conv: per-dh sublane-shift matrices (with 'same' height pad)
    sdh = np.zeros((C, BC, BC), np.float32)
    for dh in range(C):
        sh = np.zeros((C, C), np.float32)
        for c in range(C):
            cp = c + dh - PAD_T
            if 0 <= cp < C:
                sh[c, cp] = 1.0
        sdh[dh] = np.kron(np.eye(B, dtype=np.float32), sh)
    # ... and the stacked banded weight matrix (groups=8 -> 2 in / 2 out per group)
    ws = pn["ws"]                                                          # (16,2,C)
    rstk = np.zeros((C * 16 * Fn, 16 * Fn), np.float32)
    for dh in range(C):
        for co in range(16):
            g0 = 2 * (co // 2)
            for j in range(2):
                ch = g0 + j
                for f in range(Fn):
                    rstk[dh * 16 * Fn + ch * Fn + f, co * Fn + f] = ws[co, j, dh]

    asv = np.repeat(a_s, Fn).reshape(1, -1).astype(np.float32)             # (1,128)
    csv = np.repeat(c_s, Fn).reshape(1, -1).astype(np.float32)

    poolb = np.kron(np.eye(B, dtype=np.float32),
                    np.full((1, C), 1.0 / C, np.float32)).astype(np.float32)

    return dict(
        p8=p8, w2t=w2t, a2v=a2v, c2v=c2v, bda=bda, pw=pw, bgv=bgv,
        sdh=sdh, rstk=rstk, asv=asv, csv=csv, poolb=poolb,
        wl1=pn["wl1"], bl1=pn["bl1"].reshape(1, -1),
        wl2=pn["wl2"], bl2=pn["bl2"].reshape(1, -1),
        w1f=w1f, c1f=c1,
    )


def asgcnn_forward(x, p):
    f32, bf16 = jnp.float32, jnp.bfloat16
    assert x.shape == (B, N_CHANNELS, T)
    c = build_constants(p)

    # time-pad for the first 'same' conv and fold (batch, eeg-channel) onto sublanes
    x2d = jnp.pad(x.astype(f32), ((0, 0), (0, 0), (PAD_L, PAD_R))
                  ).reshape(BC, T + K - 1)

    vmem_inputs = [
        x2d,
        jnp.asarray(c["p8"], bf16),
        jnp.asarray(c["a2v"]), jnp.asarray(c["c2v"]),
        jnp.asarray(c["bda"]), jnp.asarray(c["bgv"]),
        jnp.asarray(c["sdh"]),
        jnp.asarray(c["asv"]), jnp.asarray(c["csv"]),
        jnp.asarray(c["poolb"]),
        jnp.asarray(c["wl1"]), jnp.asarray(c["bl1"]),
        jnp.asarray(c["wl2"]), jnp.asarray(c["bl2"]),
    ]
    # Large constants stay in HBM (bf16) and are DMA'd manually inside the kernel.
    hbm_inputs = [
        jnp.asarray(c["w2t"], bf16),
        jnp.asarray(c["pw"], bf16),
        jnp.asarray(c["rstk"], bf16),
    ]
    smem_inputs = [jnp.asarray(c["w1f"]), jnp.asarray(c["c1f"])]

    def full_spec(a):
        nd = a.ndim
        return pl.BlockSpec(a.shape, lambda i, _n=nd: (0,) * _n)

    in_specs = ([full_spec(a) for a in vmem_inputs]
                + [pl.BlockSpec(memory_space=pl.ANY)] * len(hbm_inputs)
                + [pl.BlockSpec(memory_space=pltpu.MemorySpace.SMEM)]
                  * len(smem_inputs))

    grid_spec = pltpu.PrefetchScalarGridSpec(
        num_scalar_prefetch=0,
        grid=(1,),                                  # whole batch fused in one step
        in_specs=in_specs,
        out_specs=pl.BlockSpec((B, N_CLASSES), lambda i: (0, 0)),
        scratch_shapes=[
            pltpu.VMEM((8, F1PAD, 16 * F1), bf16),            # w2t landing buffer
            pltpu.VMEM((16 * F1, 16 * F), bf16),              # pw  landing buffer
            pltpu.VMEM((N_CHANNELS * 16 * F, 16 * F), bf16),  # rstk landing buffer
            pltpu.SemaphoreType.DMA((3,)),
        ],
    )

    out = pl.pallas_call(
        asgcnn_kernel,
        out_shape=jax.ShapeDtypeStruct((B, N_CLASSES), f32),
        grid_spec=grid_spec,
        compiler_params=pltpu.CompilerParams(dimension_semantics=("arbitrary",)),
    )(*vmem_inputs, *hbm_inputs, *smem_inputs)
    return out


# =========================== pure NumPy reference ===============================
def reference_forward(x, p):
    pn = {k: (None if v is None else np.asarray(v, np.float32)) for k, v in p.items()}
    x = np.asarray(x, np.float32)
    Bn, C, Tn = x.shape
    F1n, Fn = Tn // 8, Tn // 32

    def elu(v):
        return np.where(v > 0, v, np.exp(np.minimum(v, 0.0)) - 1.0)

    def bn(h, g, be, m, v):
        s = g / np.sqrt(v + BN_EPS)
        return h * s[None, :, None, None] + (be - m * s)[None, :, None, None]

    # block_conv stage 1
    xp = np.pad(x, ((0, 0), (0, 0), (PAD_L, PAD_R)))
    h1 = np.zeros((Bn, 8, C, Tn), np.float32)
    for co in range(8):
        for k in range(K):
            h1[:, co] += pn["w1"][co, k] * xp[:, :, k:k + Tn]
        h1[:, co] += pn["b1"][co]
    h1 = elu(bn(h1, pn["bn1_g"], pn["bn1_b"], pn["bn1_m"], pn["bn1_v"]))
    h1 = h1.reshape(Bn, 8, C, F1n, 8).mean(-1)

    # block_conv stage 2
    h1p = np.pad(h1, ((0, 0), (0, 0), (0, 0), (PAD_L, PAD_R)))
    h2 = np.zeros((Bn, 16, C, F1n), np.float32)
    for co in range(16):
        for ci in range(8):
            for k in range(K):
                h2[:, co] += pn["w2"][co, ci, k] * h1p[:, ci, :, k:k + F1n]
        h2[:, co] += pn["b2"][co]
    h2 = elu(bn(h2, pn["bn2_g"], pn["bn2_b"], pn["bn2_m"], pn["bn2_v"]))
    h2 = h2.reshape(Bn, 16, C, Fn, 4).mean(-1)

    # block_gcn
    g = np.einsum("cd,bndf->bncf", pn["adj"], h2)
    g = np.einsum("bncf,fe->bnce", g, pn["wg"]) + pn["bg"][None, None, None, :]
    g = elu(g)

    # block_classifier: grouped Conv2d(16,16,(C,1),groups=8,bias=False,'same')
    gp = np.pad(g, ((0, 0), (0, 0), (PAD_T, C - 1 - PAD_T), (0, 0)))
    h3 = np.zeros((Bn, 16, C, Fn), np.float32)
    for co in range(16):
        base = 2 * (co // 2)
        for j in range(2):
            for r in range(C):
                h3[:, co] += pn["ws"][co, j, r] * gp[:, base + j, r:r + C, :]
    h3 = elu(bn(h3, pn["bns_g"], pn["bns_b"], pn["bns_m"], pn["bns_v"]))
    pooled = h3.mean(axis=2)                         # AvgPool(C,1)
    flat = pooled.reshape(Bn, 16 * Fn)               # Flatten (channel-major)
    z = flat @ pn["wl1"] + pn["bl1"]
    return z @ pn["wl2"] + pn["bl2"]


# ==================================== main ======================================
if __name__ == "__main__":
    key = jax.random.PRNGKey(0)
    kx, kp = jax.random.split(key)
    params = build_params(kp)
    x = jax.random.normal(kx, (B, N_CHANNELS, T), jnp.float32)  # (batch, eeg_ch, time)

    out = asgcnn_forward(x, params)
    out = jax.block_until_ready(out)

    assert out.shape == (B, N_CLASSES)
    assert bool(jnp.all(jnp.isfinite(out)))

    ref = reference_forward(np.asarray(x), params)
    np.testing.assert_allclose(np.asarray(out), ref, rtol=5e-2, atol=5e-2)
    print("KERNEL_OK")
</pallas_src>

<mosaic_0001>
module attributes {stable_mosaic.version = 11 : i64} {
  func.func @asgcnn_kernel(%arg0: i32, %arg1: memref<16x263xf32, #tpu.memory_space<vmem>>, %arg2: memref<256x40xbf16, #tpu.memory_space<vmem>>, %arg3: memref<1x512xf32, #tpu.memory_space<vmem>>, %arg4: memref<1x512xf32, #tpu.memory_space<vmem>>, %arg5: memref<16x16xf32, #tpu.memory_space<vmem>>, %arg6: memref<1x128xf32, #tpu.memory_space<vmem>>, %arg7: memref<8x16x16xf32, #tpu.memory_space<vmem>>, %arg8: memref<1x128xf32, #tpu.memory_space<vmem>>, %arg9: memref<1x128xf32, #tpu.memory_space<vmem>>, %arg10: memref<2x16xf32, #tpu.memory_space<vmem>>, %arg11: memref<128x64xf32, #tpu.memory_space<vmem>>, %arg12: memref<1x64xf32, #tpu.memory_space<vmem>>, %arg13: memref<64x4xf32, #tpu.memory_space<vmem>>, %arg14: memref<1x4xf32, #tpu.memory_space<vmem>>, %arg15: memref<8x40x512xbf16, #tpu.memory_space<any>>, %arg16: memref<512x128xbf16, #tpu.memory_space<any>>, %arg17: memref<1024x128xbf16, #tpu.memory_space<any>>, %arg18: memref<64xf32, #tpu.memory_space<smem>>, %arg19: memref<8xf32, #tpu.memory_space<smem>>, %arg20: memref<2x4xf32, #tpu.memory_space<vmem>>, %arg21: memref<8x40x512xbf16, #tpu.memory_space<vmem>>, %arg22: memref<512x128xbf16, #tpu.memory_space<vmem>>, %arg23: memref<1024x128xbf16, #tpu.memory_space<vmem>>, %arg24: memref<3x!tpu.dma_semaphore, #tpu.memory_space<semaphore_mem>>) attributes {dimension_semantics = [#tpu.dimension_semantics<arbitrary>], iteration_bounds = array<i64: 1>, scalar_prefetch = 0 : i64, scratch_operands = 4 : i64, tpu.core_type = #tpu.core_type<tc>, window_params = [{pipeline_mode = #tpu.pipeline_mode<synchronous>, transform_indices = @transform_0, window_bounds = array<i64: 16, 263>}, {pipeline_mode = #tpu.pipeline_mode<synchronous>, transform_indices = @transform_1, window_bounds = array<i64: 256, 40>}, {pipeline_mode = #tpu.pipeline_mode<synchronous>, transform_indices = @transform_2, window_bounds = array<i64: 1, 512>}, {pipeline_mode = #tpu.pipeline_mode<synchronous>, transform_indices = @transform_3, window_bounds = array<i64: 1, 512>}, {pipeline_mode = #tpu.pipeline_mode<synchronous>, transform_indices = @transform_4, window_bounds = array<i64: 16, 16>}, {pipeline_mode = #tpu.pipeline_mode<synchronous>, transform_indices = @transform_5, window_bounds = array<i64: 1, 128>}, {pipeline_mode = #tpu.pipeline_mode<synchronous>, transform_indices = @transform_6, window_bounds = array<i64: 8, 16, 16>}, {pipeline_mode = #tpu.pipeline_mode<synchronous>, transform_indices = @transform_7, window_bounds = array<i64: 1, 128>}, {pipeline_mode = #tpu.pipeline_mode<synchronous>, transform_indices = @transform_8, window_bounds = array<i64: 1, 128>}, {pipeline_mode = #tpu.pipeline_mode<synchronous>, transform_indices = @transform_9, window_bounds = array<i64: 2, 16>}, {pipeline_mode = #tpu.pipeline_mode<synchronous>, transform_indices = @transform_10, window_bounds = array<i64: 128, 64>}, {pipeline_mode = #tpu.pipeline_mode<synchronous>, transform_indices = @transform_11, window_bounds = array<i64: 1, 64>}, {pipeline_mode = #tpu.pipeline_mode<synchronous>, transform_indices = @transform_12, window_bounds = array<i64: 64, 4>}, {pipeline_mode = #tpu.pipeline_mode<synchronous>, transform_indices = @transform_13, window_bounds = array<i64: 1, 4>}, {}, {}, {}, {transform_indices = @transform_17, window_bounds = array<i64: 64>}, {transform_indices = @transform_18, window_bounds = array<i64: 8>}, {pipeline_mode = #tpu.pipeline_mode<synchronous>, transform_indices = @transform_19, window_bounds = array<i64: 2, 4>}]} {
    %c0_i32 = arith.constant 0 : i32
    %0 = tpu.memref_slice %arg24[%c0_i32] : memref<3x!tpu.dma_semaphore, #tpu.memory_space<semaphore_mem>> -> memref<1x!tpu.dma_semaphore, #tpu.memory_space<semaphore_mem>>
    %1 = tpu.memref_squeeze %0 : memref<1x!tpu.dma_semaphore, #tpu.memory_space<semaphore_mem>> -> memref<!tpu.dma_semaphore, #tpu.memory_space<semaphore_mem>>
    tpu.enqueue_dma source(%arg15 : memref<8x40x512xbf16, #tpu.memory_space<any>>) target(%arg21 : memref<8x40x512xbf16, #tpu.memory_space<vmem>>) target_semaphore(%1 : memref<!tpu.dma_semaphore, #tpu.memory_space<semaphore_mem>>)
    %c1_i32 = arith.constant 1 : i32
    %2 = tpu.memref_slice %arg24[%c1_i32] : memref<3x!tpu.dma_semaphore, #tpu.memory_space<semaphore_mem>> -> memref<1x!tpu.dma_semaphore, #tpu.memory_space<semaphore_mem>>
    %3 = tpu.memref_squeeze %2 : memref<1x!tpu.dma_semaphore, #tpu.memory_space<semaphore_mem>> -> memref<!tpu.dma_semaphore, #tpu.memory_space<semaphore_mem>>
    tpu.enqueue_dma source(%arg16 : memref<512x128xbf16, #tpu.memory_space<any>>) target(%arg22 : memref<512x128xbf16, #tpu.memory_space<vmem>>) target_semaphore(%3 : memref<!tpu.dma_semaphore, #tpu.memory_space<semaphore_mem>>)
    %c2_i32 = arith.constant 2 : i32
    %4 = tpu.memref_slice %arg24[%c2_i32] : memref<3x!tpu.dma_semaphore, #tpu.memory_space<semaphore_mem>> -> memref<1x!tpu.dma_semaphore, #tpu.memory_space<semaphore_mem>>
    %5 = tpu.memref_squeeze %4 : memref<1x!tpu.dma_semaphore, #tpu.memory_space<semaphore_mem>> -> memref<!tpu.dma_semaphore, #tpu.memory_space<semaphore_mem>>
    tpu.enqueue_dma source(%arg17 : memref<1024x128xbf16, #tpu.memory_space<any>>) target(%arg23 : memref<1024x128xbf16, #tpu.memory_space<vmem>>) target_semaphore(%5 : memref<!tpu.dma_semaphore, #tpu.memory_space<semaphore_mem>>)
    %cst = arith.constant 0.000000e+00 : f32
    %6 = vector.broadcast %cst : f32 to vector<16x256xf32>
    %cst_0 = arith.constant 0.000000e+00 : f32
    %7 = vector.broadcast %cst_0 : f32 to vector<16x256xf32>
    %cst_1 = arith.constant 0.000000e+00 : f32
    %8 = vector.broadcast %cst_1 : f32 to vector<16x256xf32>
    %cst_2 = arith.constant 0.000000e+00 : f32
    %9 = vector.broadcast %cst_2 : f32 to vector<16x256xf32>
    %cst_3 = arith.constant 0.000000e+00 : f32
    %10 = vector.broadcast %cst_3 : f32 to vector<16x256xf32>
    %cst_4 = arith.constant 0.000000e+00 : f32
    %11 = vector.broadcast %cst_4 : f32 to vector<16x256xf32>
    %cst_5 = arith.constant 0.000000e+00 : f32
    %12 = vector.broadcast %cst_5 : f32 to vector<16x256xf32>
    %cst_6 = arith.constant 0.000000e+00 : f32
    %13 = vector.broadcast %cst_6 : f32 to vector<16x256xf32>
    %c0 = arith.constant 0 : index
    %c0_7 = arith.constant 0 : index
    %14 = vector.load %arg1[%c0, %c0_7] : memref<16x263xf32, #tpu.memory_space<vmem>>, vector<16x256xf32>
    %c0_8 = arith.constant 0 : index
    %15 = memref.load %arg18[%c0_8] : memref<64xf32, #tpu.memory_space<smem>>
    %16 = vector.broadcast %15 : f32 to vector<16x256xf32>
    %17 = arith.mulf %16, %14 : vector<16x256xf32>
    %18 = arith.addf %6, %17 : vector<16x256xf32>
    %c8 = arith.constant 8 : index
    %19 = memref.load %arg18[%c8] : memref<64xf32, #tpu.memory_space<smem>>
    %20 = vector.broadcast %19 : f32 to vector<16x256xf32>
    %21 = arith.mulf %20, %14 : vector<16x256xf32>
    %22 = arith.addf %7, %21 : vector<16x256xf32>
    %c16 = arith.constant 16 : index
    %23 = memref.load %arg18[%c16] : memref<64xf32, #tpu.memory_space<smem>>
    %24 = vector.broadcast %23 : f32 to vector<16x256xf32>
    %25 = arith.mulf %24, %14 : vector<16x256xf32>
    %26 = arith.addf %8, %25 : vector<16x256xf32>
    %c24 = arith.constant 24 : index
    %27 = memref.load %arg18[%c24] : memref<64xf32, #tpu.memory_space<smem>>
    %28 = vector.broadcast %27 : f32 to vector<16x256xf32>
    %29 = arith.mulf %28, %14 : vector<16x256xf32>
    %30 = arith.addf %9, %29 : vector<16x256xf32>
    %c32 = arith.constant 32 : index
    %31 = memref.load %arg18[%c32] : memref<64xf32, #tpu.memory_space<smem>>
    %32 = vector.broadcast %31 : f32 to vector<16x256xf32>
    %33 = arith.mulf %32, %14 : vector<16x256xf32>
    %34 = arith.addf %10, %33 : vector<16x256xf32>
    %c40 = arith.constant 40 : index
    %35 = memref.load %arg18[%c40] : memref<64xf32, #tpu.memory_space<smem>>
    %36 = vector.broadcast %35 : f32 to vector<16x256xf32>
    %37 = arith.mulf %36, %14 : vector<16x256xf32>
    %38 = arith.addf %11, %37 : vector<16x256xf32>
    %c48 = arith.constant 48 : index
    %39 = memref.load %arg18[%c48] : memref<64xf32, #tpu.memory_space<smem>>
    %40 = vector.broadcast %39 : f32 to vector<16x256xf32>
    %41 = arith.mulf %40, %14 : vector<16x256xf32>
    %42 = arith.addf %12, %41 : vector<16x256xf32>
    %c56 = arith.constant 56 : index
    %43 = memref.load %arg18[%c56] : memref<64xf32, #tpu.memory_space<smem>>
    %44 = vector.broadcast %43 : f32 to vector<16x256xf32>
    %45 = arith.mulf %44, %14 : vector<16x256xf32>
    %46 = arith.addf %13, %45 : vector<16x256xf32>
    %c0_9 = arith.constant 0 : index
    %c1 = arith.constant 1 : index
    %47 = vector.load %arg1[%c0_9, %c1] : memref<16x263xf32, #tpu.memory_space<vmem>>, vector<16x256xf32>
    %c1_10 = arith.constant 1 : index
    %48 = memref.load %arg18[%c1_10] : memref<64xf32, #tpu.memory_space<smem>>
    %49 = vector.broadcast %48 : f32 to vector<16x256xf32>
    %50 = arith.mulf %49, %47 : vector<16x256xf32>
    %51 = arith.addf %18, %50 : vector<16x256xf32>
    %c9 = arith.constant 9 : index
    %52 = memref.load %arg18[%c9] : memref<64xf32, #tpu.memory_space<smem>>
    %53 = vector.broadcast %52 : f32 to vector<16x256xf32>
    %54 = arith.mulf %53, %47 : vector<16x256xf32>
    %55 = arith.addf %22, %54 : vector<16x256xf32>
    %c17 = arith.constant 17 : index
    %56 = memref.load %arg18[%c17] : memref<64xf32, #tpu.memory_space<smem>>
    %57 = vector.broadcast %56 : f32 to vector<16x256xf32>
    %58 = arith.mulf %57, %47 : vector<16x256xf32>
    %59 = arith.addf %26, %58 : vector<16x256xf32>
    %c25 = arith.constant 25 : index
    %60 = memref.load %arg18[%c25] : memref<64xf32, #tpu.memory_space<smem>>
    %61 = vector.broadcast %60 : f32 to vector<16x256xf32>
    %62 = arith.mulf %61, %47 : vector<16x256xf32>
    %63 = arith.addf %30, %62 : vector<16x256xf32>
    %c33 = arith.constant 33 : index
    %64 = memref.load %arg18[%c33] : memref<64xf32, #tpu.memory_space<smem>>
    %65 = vector.broadcast %64 : f32 to vector<16x256xf32>
    %66 = arith.mulf %65, %47 : vector<16x256xf32>
    %67 = arith.addf %34, %66 : vector<16x256xf32>
    %c41 = arith.constant 41 : index
    %68 = memref.load %arg18[%c41] : memref<64xf32, #tpu.memory_space<smem>>
    %69 = vector.broadcast %68 : f32 to vector<16x256xf32>
    %70 = arith.mulf %69, %47 : vector<16x256xf32>
    %71 = arith.addf %38, %70 : vector<16x256xf32>
    %c49 = arith.constant 49 : index
    %72 = memref.load %arg18[%c49] : memref<64xf32, #tpu.memory_space<smem>>
    %73 = vector.broadcast %72 : f32 to vector<16x256xf32>
    %74 = arith.mulf %73, %47 : vector<16x256xf32>
    %75 = arith.addf %42, %74 : vector<16x256xf32>
    %c57 = arith.constant 57 : index
    %76 = memref.load %arg18[%c57] : memref<64xf32, #tpu.memory_space<smem>>
    %77 = vector.broadcast %76 : f32 to vector<16x256xf32>
    %78 = arith.mulf %77, %47 : vector<16x256xf32>
    %79 = arith.addf %46, %78 : vector<16x256xf32>
    %c0_11 = arith.constant 0 : index
    %c2 = arith.constant 2 : index
    %80 = vector.load %arg1[%c0_11, %c2] : memref<16x263xf32, #tpu.memory_space<vmem>>, vector<16x256xf32>
    %c2_12 = arith.constant 2 : index
    %81 = memref.load %arg18[%c2_12] : memref<64xf32, #tpu.memory_space<smem>>
    %82 = vector.broadcast %81 : f32 to vector<16x256xf32>
    %83 = arith.mulf %82, %80 : vector<16x256xf32>
    %84 = arith.addf %51, %83 : vector<16x256xf32>
    %c10 = arith.constant 10 : index
    %85 = memref.load %arg18[%c10] : memref<64xf32, #tpu.memory_space<smem>>
    %86 = vector.broadcast %85 : f32 to vector<16x256xf32>
    %87 = arith.mulf %86, %80 : vector<16x256xf32>
    %88 = arith.addf %55, %87 : vector<16x256xf32>
    %c18 = arith.constant 18 : index
    %89 = memref.load %arg18[%c18] : memref<64xf32, #tpu.memory_space<smem>>
    %90 = vector.broadcast %89 : f32 to vector<16x256xf32>
    %91 = arith.mulf %90, %80 : vector<16x256xf32>
    %92 = arith.addf %59, %91 : vector<16x256xf32>
    %c26 = arith.constant 26 : index
    %93 = memref.load %arg18[%c26] : memref<64xf32, #tpu.memory_space<smem>>
    %94 = vector.broadcast %93 : f32 to vector<16x256xf32>
    %95 = arith.mulf %94, %80 : vector<16x256xf32>
    %96 = arith.addf %63, %95 : vector<16x256xf32>
    %c34 = arith.constant 34 : index
    %97 = memref.load %arg18[%c34] : memref<64xf32, #tpu.memory_space<smem>>
    %98 = vector.broadcast %97 : f32 to vector<16x256xf32>
    %99 = arith.mulf %98, %80 : vector<16x256xf32>
    %100 = arith.addf %67, %99 : vector<16x256xf32>
    %c42 = arith.constant 42 : index
    %101 = memref.load %arg18[%c42] : memref<64xf32, #tpu.memory_space<smem>>
    %102 = vector.broadcast %101 : f32 to vector<16x256xf32>
    %103 = arith.mulf %102, %80 : vector<16x256xf32>
    %104 = arith.addf %71, %103 : vector<16x256xf32>
    %c50 = arith.constant 50 : index
    %105 = memref.load %arg18[%c50] : memref<64xf32, #tpu.memory_space<smem>>
    %106 = vector.broadcast %105 : f32 to vector<16x256xf32>
    %107 = arith.mulf %106, %80 : vector<16x256xf32>
    %108 = arith.addf %75, %107 : vector<16x256xf32>
    %c58 = arith.constant 58 : index
    %109 = memref.load %arg18[%c58] : memref<64xf32, #tpu.memory_space<smem>>
    %110 = vector.broadcast %109 : f32 to vector<16x256xf32>
    %111 = arith.mulf %110, %80 : vector<16x256xf32>
    %112 = arith.addf %79, %111 : vector<16x256xf32>
    %c0_13 = arith.constant 0 : index
    %c3 = arith.constant 3 : index
    %113 = vector.load %arg1[%c0_13, %c3] : memref<16x263xf32, #tpu.memory_space<vmem>>, vector<16x256xf32>
    %c3_14 = arith.constant 3 : index
    %114 = memref.load %arg18[%c3_14] : memref<64xf32, #tpu.memory_space<smem>>
    %115 = vector.broadcast %114 : f32 to vector<16x256xf32>
    %116 = arith.mulf %115, %113 : vector<16x256xf32>
    %117 = arith.addf %84, %116 : vector<16x256xf32>
    %c11 = arith.constant 11 : index
    %118 = memref.load %arg18[%c11] : memref<64xf32, #tpu.memory_space<smem>>
    %119 = vector.broadcast %118 : f32 to vector<16x256xf32>
    %120 = arith.mulf %119, %113 : vector<16x256xf32>
    %121 = arith.addf %88, %120 : vector<16x256xf32>
    %c19 = arith.constant 19 : index
    %122 = memref.load %arg18[%c19] : memref<64xf32, #tpu.memory_space<smem>>
    %123 = vector.broadcast %122 : f32 to vector<16x256xf32>
    %124 = arith.mulf %123, %113 : vector<16x256xf32>
    %125 = arith.addf %92, %124 : vector<16x256xf32>
    %c27 = arith.constant 27 : index
    %126 = memref.load %arg18[%c27] : memref<64xf32, #tpu.memory_space<smem>>
    %127 = vector.broadcast %126 : f32 to vector<16x256xf32>
    %128 = arith.mulf %127, %113 : vector<16x256xf32>
    %129 = arith.addf %96, %128 : vector<16x256xf32>
    %c35 = arith.constant 35 : index
    %130 = memref.load %arg18[%c35] : memref<64xf32, #tpu.memory_space<smem>>
    %131 = vector.broadcast %130 : f32 to vector<16x256xf32>
    %132 = arith.mulf %131, %113 : vector<16x256xf32>
    %133 = arith.addf %100, %132 : vector<16x256xf32>
    %c43 = arith.constant 43 : index
    %134 = memref.load %arg18[%c43] : memref<64xf32, #tpu.memory_space<smem>>
    %135 = vector.broadcast %134 : f32 to vector<16x256xf32>
    %136 = arith.mulf %135, %113 : vector<16x256xf32>
    %137 = arith.addf %104, %136 : vector<16x256xf32>
    %c51 = arith.constant 51 : index
    %138 = memref.load %arg18[%c51] : memref<64xf32, #tpu.memory_space<smem>>
    %139 = vector.broadcast %138 : f32 to vector<16x256xf32>
    %140 = arith.mulf %139, %113 : vector<16x256xf32>
    %141 = arith.addf %108, %140 : vector<16x256xf32>
    %c59 = arith.constant 59 : index
    %142 = memref.load %arg18[%c59] : memref<64xf32, #tpu.memory_space<smem>>
    %143 = vector.broadcast %142 : f32 to vector<16x256xf32>
    %144 = arith.mulf %143, %113 : vector<16x256xf32>
    %145 = arith.addf %112, %144 : vector<16x256xf32>
    %c0_15 = arith.constant 0 : index
    %c4 = arith.constant 4 : index
    %146 = vector.load %arg1[%c0_15, %c4] : memref<16x263xf32, #tpu.memory_space<vmem>>, vector<16x256xf32>
    %c4_16 = arith.constant 4 : index
    %147 = memref.load %arg18[%c4_16] : memref<64xf32, #tpu.memory_space<smem>>
    %148 = vector.broadcast %147 : f32 to vector<16x256xf32>
    %149 = arith.mulf %148, %146 : vector<16x256xf32>
    %150 = arith.addf %117, %149 : vector<16x256xf32>
    %c12 = arith.constant 12 : index
    %151 = memref.load %arg18[%c12] : memref<64xf32, #tpu.memory_space<smem>>
    %152 = vector.broadcast %151 : f32 to vector<16x256xf32>
    %153 = arith.mulf %152, %146 : vector<16x256xf32>
    %154 = arith.addf %121, %153 : vector<16x256xf32>
    %c20 = arith.constant 20 : index
    %155 = memref.load %arg18[%c20] : memref<64xf32, #tpu.memory_space<smem>>
    %156 = vector.broadcast %155 : f32 to vector<16x256xf32>
    %157 = arith.mulf %156, %146 : vector<16x256xf32>
    %158 = arith.addf %125, %157 : vector<16x256xf32>
    %c28 = arith.constant 28 : index
    %159 = memref.load %arg18[%c28] : memref<64xf32, #tpu.memory_space<smem>>
    %160 = vector.broadcast %159 : f32 to vector<16x256xf32>
    %161 = arith.mulf %160, %146 : vector<16x256xf32>
    %162 = arith.addf %129, %161 : vector<16x256xf32>
    %c36 = arith.constant 36 : index
    %163 = memref.load %arg18[%c36] : memref<64xf32, #tpu.memory_space<smem>>
    %164 = vector.broadcast %163 : f32 to vector<16x256xf32>
    %165 = arith.mulf %164, %146 : vector<16x256xf32>
    %166 = arith.addf %133, %165 : vector<16x256xf32>
    %c44 = arith.constant 44 : index
    %167 = memref.load %arg18[%c44] : memref<64xf32, #tpu.memory_space<smem>>
    %168 = vector.broadcast %167 : f32 to vector<16x256xf32>
    %169 = arith.mulf %168, %146 : vector<16x256xf32>
    %170 = arith.addf %137, %169 : vector<16x256xf32>
    %c52 = arith.constant 52 : index
    %171 = memref.load %arg18[%c52] : memref<64xf32, #tpu.memory_space<smem>>
    %172 = vector.broadcast %171 : f32 to vector<16x256xf32>
    %173 = arith.mulf %172, %146 : vector<16x256xf32>
    %174 = arith.addf %141, %173 : vector<16x256xf32>
    %c60 = arith.constant 60 : index
    %175 = memref.load %arg18[%c60] : memref<64xf32, #tpu.memory_space<smem>>
    %176 = vector.broadcast %175 : f32 to vector<16x256xf32>
    %177 = arith.mulf %176, %146 : vector<16x256xf32>
    %178 = arith.addf %145, %177 : vector<16x256xf32>
    %c0_17 = arith.constant 0 : index
    %c5 = arith.constant 5 : index
    %179 = vector.load %arg1[%c0_17, %c5] : memref<16x263xf32, #tpu.memory_space<vmem>>, vector<16x256xf32>
    %c5_18 = arith.constant 5 : index
    %180 = memref.load %arg18[%c5_18] : memref<64xf32, #tpu.memory_space<smem>>
    %181 = vector.broadcast %180 : f32 to vector<16x256xf32>
    %182 = arith.mulf %181, %179 : vector<16x256xf32>
    %183 = arith.addf %150, %182 : vector<16x256xf32>
    %c13 = arith.constant 13 : index
    %184 = memref.load %arg18[%c13] : memref<64xf32, #tpu.memory_space<smem>>
    %185 = vector.broadcast %184 : f32 to vector<16x256xf32>
    %186 = arith.mulf %185, %179 : vector<16x256xf32>
    %187 = arith.addf %154, %186 : vector<16x256xf32>
    %c21 = arith.constant 21 : index
    %188 = memref.load %arg18[%c21] : memref<64xf32, #tpu.memory_space<smem>>
    %189 = vector.broadcast %188 : f32 to vector<16x256xf32>
    %190 = arith.mulf %189, %179 : vector<16x256xf32>
    %191 = arith.addf %158, %190 : vector<16x256xf32>
    %c29 = arith.constant 29 : index
    %192 = memref.load %arg18[%c29] : memref<64xf32, #tpu.memory_space<smem>>
    %193 = vector.broadcast %192 : f32 to vector<16x256xf32>
    %194 = arith.mulf %193, %179 : vector<16x256xf32>
    %195 = arith.addf %162, %194 : vector<16x256xf32>
    %c37 = arith.constant 37 : index
    %196 = memref.load %arg18[%c37] : memref<64xf32, #tpu.memory_space<smem>>
    %197 = vector.broadcast %196 : f32 to vector<16x256xf32>
    %198 = arith.mulf %197, %179 : vector<16x256xf32>
    %199 = arith.addf %166, %198 : vector<16x256xf32>
    %c45 = arith.constant 45 : index
    %200 = memref.load %arg18[%c45] : memref<64xf32, #tpu.memory_space<smem>>
    %201 = vector.broadcast %200 : f32 to vector<16x256xf32>
    %202 = arith.mulf %201, %179 : vector<16x256xf32>
    %203 = arith.addf %170, %202 : vector<16x256xf32>
    %c53 = arith.constant 53 : index
    %204 = memref.load %arg18[%c53] : memref<64xf32, #tpu.memory_space<smem>>
    %205 = vector.broadcast %204 : f32 to vector<16x256xf32>
    %206 = arith.mulf %205, %179 : vector<16x256xf32>
    %207 = arith.addf %174, %206 : vector<16x256xf32>
    %c61 = arith.constant 61 : index
    %208 = memref.load %arg18[%c61] : memref<64xf32, #tpu.memory_space<smem>>
    %209 = vector.broadcast %208 : f32 to vector<16x256xf32>
    %210 = arith.mulf %209, %179 : vector<16x256xf32>
    %211 = arith.addf %178, %210 : vector<16x256xf32>
    %c0_19 = arith.constant 0 : index
    %c6 = arith.constant 6 : index
    %212 = vector.load %arg1[%c0_19, %c6] : memref<16x263xf32, #tpu.memory_space<vmem>>, vector<16x256xf32>
    %c6_20 = arith.constant 6 : index
    %213 = memref.load %arg18[%c6_20] : memref<64xf32, #tpu.memory_space<smem>>
    %214 = vector.broadcast %213 : f32 to vector<16x256xf32>
    %215 = arith.mulf %214, %212 : vector<16x256xf32>
    %216 = arith.addf %183, %215 : vector<16x256xf32>
    %c14 = arith.constant 14 : index
    %217 = memref.load %arg18[%c14] : memref<64xf32, #tpu.memory_space<smem>>
    %218 = vector.broadcast %217 : f32 to vector<16x256xf32>
    %219 = arith.mulf %218, %212 : vector<16x256xf32>
    %220 = arith.addf %187, %219 : vector<16x256xf32>
    %c22 = arith.constant 22 : index
    %221 = memref.load %arg18[%c22] : memref<64xf32, #tpu.memory_space<smem>>
    %222 = vector.broadcast %221 : f32 to vector<16x256xf32>
    %223 = arith.mulf %222, %212 : vector<16x256xf32>
    %224 = arith.addf %191, %223 : vector<16x256xf32>
    %c30 = arith.constant 30 : index
    %225 = memref.load %arg18[%c30] : memref<64xf32, #tpu.memory_space<smem>>
    %226 = vector.broadcast %225 : f32 to vector<16x256xf32>
    %227 = arith.mulf %226, %212 : vector<16x256xf32>
    %228 = arith.addf %195, %227 : vector<16x256xf32>
    %c38 = arith.constant 38 : index
    %229 = memref.load %arg18[%c38] : memref<64xf32, #tpu.memory_space<smem>>
    %230 = vector.broadcast %229 : f32 to vector<16x256xf32>
    %231 = arith.mulf %230, %212 : vector<16x256xf32>
    %232 = arith.addf %199, %231 : vector<16x256xf32>
    %c46 = arith.constant 46 : index
    %233 = memref.load %arg18[%c46] : memref<64xf32, #tpu.memory_space<smem>>
    %234 = vector.broadcast %233 : f32 to vector<16x256xf32>
    %235 = arith.mulf %234, %212 : vector<16x256xf32>
    %236 = arith.addf %203, %235 : vector<16x256xf32>
    %c54 = arith.constant 54 : index
    %237 = memref.load %arg18[%c54] : memref<64xf32, #tpu.memory_space<smem>>
    %238 = vector.broadcast %237 : f32 to vector<16x256xf32>
    %239 = arith.mulf %238, %212 : vector<16x256xf32>
    %240 = arith.addf %207, %239 : vector<16x256xf32>
    %c62 = arith.constant 62 : index
    %241 = memref.load %arg18[%c62] : memref<64xf32, #tpu.memory_space<smem>>
    %242 = vector.broadcast %241 : f32 to vector<16x256xf32>
    %243 = arith.mulf %242, %212 : vector<16x256xf32>
    %244 = arith.addf %211, %243 : vector<16x256xf32>
    %c0_21 = arith.constant 0 : index
    %c7 = arith.constant 7 : index
    %245 = vector.load %arg1[%c0_21, %c7] : memref<16x263xf32, #tpu.memory_space<vmem>>, vector<16x256xf32>
    %c7_22 = arith.constant 7 : index
    %246 = memref.load %arg18[%c7_22] : memref<64xf32, #tpu.memory_space<smem>>
    %247 = vector.broadcast %246 : f32 to vector<16x256xf32>
    %248 = arith.mulf %247, %245 : vector<16x256xf32>
    %249 = arith.addf %216, %248 : vector<16x256xf32>
    %c15 = arith.constant 15 : index
    %250 = memref.load %arg18[%c15] : memref<64xf32, #tpu.memory_space<smem>>
    %251 = vector.broadcast %250 : f32 to vector<16x256xf32>
    %252 = arith.mulf %251, %245 : vector<16x256xf32>
    %253 = arith.addf %220, %252 : vector<16x256xf32>
    %c23 = arith.constant 23 : index
    %254 = memref.load %arg18[%c23] : memref<64xf32, #tpu.memory_space<smem>>
    %255 = vector.broadcast %254 : f32 to vector<16x256xf32>
    %256 = arith.mulf %255, %245 : vector<16x256xf32>
    %257 = arith.addf %224, %256 : vector<16x256xf32>
    %c31 = arith.constant 31 : index
    %258 = memref.load %arg18[%c31] : memref<64xf32, #tpu.memory_space<smem>>
    %259 = vector.broadcast %258 : f32 to vector<16x256xf32>
    %260 = arith.mulf %259, %245 : vector<16x256xf32>
    %261 = arith.addf %228, %260 : vector<16x256xf32>
    %c39 = arith.constant 39 : index
    %262 = memref.load %arg18[%c39] : memref<64xf32, #tpu.memory_space<smem>>
    %263 = vector.broadcast %262 : f32 to vector<16x256xf32>
    %264 = arith.mulf %263, %245 : vector<16x256xf32>
    %265 = arith.addf %232, %264 : vector<16x256xf32>
    %c47 = arith.constant 47 : index
    %266 = memref.load %arg18[%c47] : memref<64xf32, #tpu.memory_space<smem>>
    %267 = vector.broadcast %266 : f32 to vector<16x256xf32>
    %268 = arith.mulf %267, %245 : vector<16x256xf32>
    %269 = arith.addf %236, %268 : vector<16x256xf32>
    %c55 = arith.constant 55 : index
    %270 = memref.load %arg18[%c55] : memref<64xf32, #tpu.memory_space<smem>>
    %271 = vector.broadcast %270 : f32 to vector<16x256xf32>
    %272 = arith.mulf %271, %245 : vector<16x256xf32>
    %273 = arith.addf %240, %272 : vector<16x256xf32>
    %c63 = arith.constant 63 : index
    %274 = memref.load %arg18[%c63] : memref<64xf32, #tpu.memory_space<smem>>
    %275 = vector.broadcast %274 : f32 to vector<16x256xf32>
    %276 = arith.mulf %275, %245 : vector<16x256xf32>
    %277 = arith.addf %244, %276 : vector<16x256xf32>
    %c0_23 = arith.constant 0 : index
    %278 = memref.load %arg19[%c0_23] : memref<8xf32, #tpu.memory_space<smem>>
    %279 = vector.broadcast %278 : f32 to vector<16x256xf32>
    %280 = arith.addf %249, %279 : vector<16x256xf32>
    %c1_24 = arith.constant 1 : index
    %281 = memref.load %arg19[%c1_24] : memref<8xf32, #tpu.memory_space<smem>>
    %282 = vector.broadcast %281 : f32 to vector<16x256xf32>
    %283 = arith.addf %253, %282 : vector<16x256xf32>
    %c2_25 = arith.constant 2 : index
    %284 = memref.load %arg19[%c2_25] : memref<8xf32, #tpu.memory_space<smem>>
    %285 = vector.broadcast %284 : f32 to vector<16x256xf32>
    %286 = arith.addf %257, %285 : vector<16x256xf32>
    %c3_26 = arith.constant 3 : index
    %287 = memref.load %arg19[%c3_26] : memref<8xf32, #tpu.memory_space<smem>>
    %288 = vector.broadcast %287 : f32 to vector<16x256xf32>
    %289 = arith.addf %261, %288 : vector<16x256xf32>
    %c4_27 = arith.constant 4 : index
    %290 = memref.load %arg19[%c4_27] : memref<8xf32, #tpu.memory_space<smem>>
    %291 = vector.broadcast %290 : f32 to vector<16x256xf32>
    %292 = arith.addf %265, %291 : vector<16x256xf32>
    %c5_28 = arith.constant 5 : index
    %293 = memref.load %arg19[%c5_28] : memref<8xf32, #tpu.memory_space<smem>>
    %294 = vector.broadcast %293 : f32 to vector<16x256xf32>
    %295 = arith.addf %269, %294 : vector<16x256xf32>
    %c6_29 = arith.constant 6 : index
    %296 = memref.load %arg19[%c6_29] : memref<8xf32, #tpu.memory_space<smem>>
    %297 = vector.broadcast %296 : f32 to vector<16x256xf32>
    %298 = arith.addf %273, %297 : vector<16x256xf32>
    %c7_30 = arith.constant 7 : index
    %299 = memref.load %arg19[%c7_30] : memref<8xf32, #tpu.memory_space<smem>>
    %300 = vector.broadcast %299 : f32 to vector<16x256xf32>
    %301 = arith.addf %277, %300 : vector<16x256xf32>
    %302 = tpu.concatenate %280, %283, %286, %289, %292, %295, %298, %301 in 0 : vector<16x256xf32>, vector<16x256xf32>, vector<16x256xf32>, vector<16x256xf32>, vector<16x256xf32>, vector<16x256xf32>, vector<16x256xf32>, vector<16x256xf32> -> vector<128x256xf32>
    %cst_31 = arith.constant 0.000000e+00 : f32
    %303 = vector.broadcast %cst_31 : f32 to vector<128x256xf32>
    %304 = arith.cmpf ogt, %302, %303 : vector<128x256xf32>
    %cst_32 = arith.constant 0.000000e+00 : f32
    %305 = vector.broadcast %cst_32 : f32 to vector<128x256xf32>
    %306 = arith.minimumf %302, %305 : vector<128x256xf32>
    %307 = math.exp %306 : vector<128x256xf32>
    %cst_33 = arith.constant 1.000000e+00 : f32
    %308 = vector.broadcast %cst_33 : f32 to vector<128x256xf32>
    %309 = arith.subf %307, %308 : vector<128x256xf32>
    %310 = arith.select %304, %302, %309 : vector<128x256xi1>, vector<128x256xf32>
    %c0_34 = arith.constant 0 : index
    %c0_35 = arith.constant 0 : index
    %311 = vector.load %arg2[%c0_34, %c0_35] : memref<256x40xbf16, #tpu.memory_space<vmem>>, vector<256x40xbf16>
    %312 = arith.extf %311 : vector<256x40xbf16> to vector<256x40xf32>
    %cst_36 = arith.constant dense<0.000000e+00> : vector<128x40xf32>
    %313 = tpu.matmul %310, %312, %cst_36 {dimension_numbers = #tpu.dot_dimension_numbers<[1], [0], [0], [1], [0, 0, 1, 1], [], []>} : vector<128x256xf32>, vector<256x40xf32>, vector<128x40xf32> -> vector<128x40xf32>
    %c0_i32_37 = arith.constant 0 : i32
    %314 = tpu.memref_slice %arg24[%c0_i32_37] : memref<3x!tpu.dma_semaphore, #tpu.memory_space<semaphore_mem>> -> memref<1x!tpu.dma_semaphore, #tpu.memory_space<semaphore_mem>>
    %315 = tpu.memref_squeeze %314 : memref<1x!tpu.dma_semaphore, #tpu.memory_space<semaphore_mem>> -> memref<!tpu.dma_semaphore, #tpu.memory_space<semaphore_mem>>
    tpu.wait_dma2 semaphore(%315 : memref<!tpu.dma_semaphore, #tpu.memory_space<semaphore_mem>>) src(%arg15 : memref<8x40x512xbf16, #tpu.memory_space<any>>) dst(%arg21 : memref<8x40x512xbf16, #tpu.memory_space<vmem>>)
    %316 = vector.extract_strided_slice %313 {offsets = [0, 0], sizes = [16, 40], strides = [1, 1]} : vector<128x40xf32> to vector<16x40xf32>
    %c0_38 = arith.constant 0 : index
    %c0_39 = arith.constant 0 : index
    %c0_40 = arith.constant 0 : index
    %317 = vector.load %arg21[%c0_38, %c0_39, %c0_40] : memref<8x40x512xbf16, #tpu.memory_space<vmem>>, vector<1x40x512xbf16>
    %318 = vector.shape_cast %317 : vector<1x40x512xbf16> to vector<40x512xbf16>
    %319 = arith.extf %318 : vector<40x512xbf16> to vector<40x512xf32>
    %cst_41 = arith.constant dense<0.000000e+00> : vector<16x512xf32>
    %320 = tpu.matmul %316, %319, %cst_41 {dimension_numbers = #tpu.dot_dimension_numbers<[1], [0], [0], [1], [0, 0, 1, 1], [], []>} : vector<16x40xf32>, vector<40x512xf32>, vector<16x512xf32> -> vector<16x512xf32>
    %321 = vector.extract_strided_slice %313 {offsets = [16, 0], sizes = [16, 40], strides = [1, 1]} : vector<128x40xf32> to vector<16x40xf32>
    %c1_42 = arith.constant 1 : index
    %c0_43 = arith.constant 0 : index
    %c0_44 = arith.constant 0 : index
    %322 = vector.load %arg21[%c1_42, %c0_43, %c0_44] : memref<8x40x512xbf16, #tpu.memory_space<vmem>>, vector<1x40x512xbf16>
    %323 = vector.shape_cast %322 : vector<1x40x512xbf16> to vector<40x512xbf16>
    %324 = arith.extf %323 : vector<40x512xbf16> to vector<40x512xf32>
    %cst_45 = arith.constant dense<0.000000e+00> : vector<16x512xf32>
    %325 = tpu.matmul %321, %324, %cst_45 {dimension_numbers = #tpu.dot_dimension_numbers<[1], [0], [0], [1], [0, 0, 1, 1], [], []>} : vector<16x40xf32>, vector<40x512xf32>, vector<16x512xf32> -> vector<16x512xf32>
    %326 = arith.addf %320, %325 : vector<16x512xf32>
    %327 = vector.extract_strided_slice %313 {offsets = [32, 0], sizes = [16, 40], strides = [1, 1]} : vector<128x40xf32> to vector<16x40xf32>
    %c2_46 = arith.constant 2 : index
    %c0_47 = arith.constant 0 : index
    %c0_48 = arith.constant 0 : index
    %328 = vector.load %arg21[%c2_46, %c0_47, %c0_48] : memref<8x40x512xbf16, #tpu.memory_space<vmem>>, vector<1x40x512xbf16>
    %329 = vector.shape_cast %328 : vector<1x40x512xbf16> to vector<40x512xbf16>
    %330 = arith.extf %329 : vector<40x512xbf16> to vector<40x512xf32>
    %cst_49 = arith.constant dense<0.000000e+00> : vector<16x512xf32>
    %331 = tpu.matmul %327, %330, %cst_49 {dimension_numbers = #tpu.dot_dimension_numbers<[1], [0], [0], [1], [0, 0, 1, 1], [], []>} : vector<16x40xf32>, vector<40x512xf32>, vector<16x512xf32> -> vector<16x512xf32>
    %332 = arith.addf %326, %331 : vector<16x512xf32>
    %333 = vector.extract_strided_slice %313 {offsets = [48, 0], sizes = [16, 40], strides = [1, 1]} : vector<128x40xf32> to vector<16x40xf32>
    %c3_50 = arith.constant 3 : index
    %c0_51 = arith.constant 0 : index
    %c0_52 = arith.constant 0 : index
    %334 = vector.load %arg21[%c3_50, %c0_51, %c0_52] : memref<8x40x512xbf16, #tpu.memory_space<vmem>>, vector<1x40x512xbf16>
    %335 = vector.shape_cast %334 : vector<1x40x512xbf16> to vector<40x512xbf16>
    %336 = arith.extf %335 : vector<40x512xbf16> to vector<40x512xf32>
    %cst_53 = arith.constant dense<0.000000e+00> : vector<16x512xf32>
    %337 = tpu.matmul %333, %336, %cst_53 {dimension_numbers = #tpu.dot_dimension_numbers<[1], [0], [0], [1], [0, 0, 1, 1], [], []>} : vector<16x40xf32>, vector<40x512xf32>, vector<16x512xf32> -> vector<16x512xf32>
    %338 = arith.addf %332, %337 : vector<16x512xf32>
    %339 = vector.extract_strided_slice %313 {offsets = [64, 0], sizes = [16, 40], strides = [1, 1]} : vector<128x40xf32> to vector<16x40xf32>
    %c4_54 = arith.constant 4 : index
    %c0_55 = arith.constant 0 : index
    %c0_56 = arith.constant 0 : index
    %340 = vector.load %arg21[%c4_54, %c0_55, %c0_56] : memref<8x40x512xbf16, #tpu.memory_space<vmem>>, vector<1x40x512xbf16>
    %341 = vector.shape_cast %340 : vector<1x40x512xbf16> to vector<40x512xbf16>
    %342 = arith.extf %341 : vector<40x512xbf16> to vector<40x512xf32>
    %cst_57 = arith.constant dense<0.000000e+00> : vector<16x512xf32>
    %343 = tpu.matmul %339, %342, %cst_57 {dimension_numbers = #tpu.dot_dimension_numbers<[1], [0], [0], [1], [0, 0, 1, 1], [], []>} : vector<16x40xf32>, vector<40x512xf32>, vector<16x512xf32> -> vector<16x512xf32>
    %344 = arith.addf %338, %343 : vector<16x512xf32>
    %345 = vector.extract_strided_slice %313 {offsets = [80, 0], sizes = [16, 40], strides = [1, 1]} : vector<128x40xf32> to vector<16x40xf32>
    %c5_58 = arith.constant 5 : index
    %c0_59 = arith.constant 0 : index
    %c0_60 = arith.constant 0 : index
    %346 = vector.load %arg21[%c5_58, %c0_59, %c0_60] : memref<8x40x512xbf16, #tpu.memory_space<vmem>>, vector<1x40x512xbf16>
    %347 = vector.shape_cast %346 : vector<1x40x512xbf16> to vector<40x512xbf16>
    %348 = arith.extf %347 : vector<40x512xbf16> to vector<40x512xf32>
    %cst_61 = arith.constant dense<0.000000e+00> : vector<16x512xf32>
    %349 = tpu.matmul %345, %348, %cst_61 {dimension_numbers = #tpu.dot_dimension_numbers<[1], [0], [0], [1], [0, 0, 1, 1], [], []>} : vector<16x40xf32>, vector<40x512xf32>, vector<16x512xf32> -> vector<16x512xf32>
    %350 = arith.addf %344, %349 : vector<16x512xf32>
    %351 = vector.extract_strided_slice %313 {offsets = [96, 0], sizes = [16, 40], strides = [1, 1]} : vector<128x40xf32> to vector<16x40xf32>
    %c6_62 = arith.constant 6 : index
    %c0_63 = arith.constant 0 : index
    %c0_64 = arith.constant 0 : index
    %352 = vector.load %arg21[%c6_62, %c0_63, %c0_64] : memref<8x40x512xbf16, #tpu.memory_space<vmem>>, vector<1x40x512xbf16>
    %353 = vector.shape_cast %352 : vector<1x40x512xbf16> to vector<40x512xbf16>
    %354 = arith.extf %353 : vector<40x512xbf16> to vector<40x512xf32>
    %cst_65 = arith.constant dense<0.000000e+00> : vector<16x512xf32>
    %355 = tpu.matmul %351, %354, %cst_65 {dimension_numbers = #tpu.dot_dimension_numbers<[1], [0], [0], [1], [0, 0, 1, 1], [], []>} : vector<16x40xf32>, vector<40x512xf32>, vector<16x512xf32> -> vector<16x512xf32>
    %356 = arith.addf %350, %355 : vector<16x512xf32>
    %357 = vector.extract_strided_slice %313 {offsets = [112, 0], sizes = [16, 40], strides = [1, 1]} : vector<128x40xf32> to vector<16x40xf32>
    %c7_66 = arith.constant 7 : index
    %c0_67 = arith.constant 0 : index
    %c0_68 = arith.constant 0 : index
    %358 = vector.load %arg21[%c7_66, %c0_67, %c0_68] : memref<8x40x512xbf16, #tpu.memory_space<vmem>>, vector<1x40x512xbf16>
    %359 = vector.shape_cast %358 : vector<1x40x512xbf16> to vector<40x512xbf16>
    %360 = arith.extf %359 : vector<40x512xbf16> to vector<40x512xf32>
    %cst_69 = arith.constant dense<0.000000e+00> : vector<16x512xf32>
    %361 = tpu.matmul %357, %360, %cst_69 {dimension_numbers = #tpu.dot_dimension_numbers<[1], [0], [0], [1], [0, 0, 1, 1], [], []>} : vector<16x40xf32>, vector<40x512xf32>, vector<16x512xf32> -> vector<16x512xf32>
    %362 = arith.addf %356, %361 : vector<16x512xf32>
    %c0_70 = arith.constant 0 : index
    %c0_71 = arith.constant 0 : index
    %363 = vector.load %arg3[%c0_70, %c0_71] : memref<1x512xf32, #tpu.memory_space<vmem>>, vector<1x512xf32>
    %364 = vector.broadcast %363 : vector<1x512xf32> to vector<16x512xf32>
    %365 = arith.mulf %362, %364 : vector<16x512xf32>
    %c0_72 = arith.constant 0 : index
    %c0_73 = arith.constant 0 : index
    %366 = vector.load %arg4[%c0_72, %c0_73] : memref<1x512xf32, #tpu.memory_space<vmem>>, vector<1x512xf32>
    %367 = vector.broadcast %366 : vector<1x512xf32> to vector<16x512xf32>
    %368 = arith.addf %365, %367 : vector<16x512xf32>
    %cst_74 = arith.constant 0.000000e+00 : f32
    %369 = vector.broadcast %cst_74 : f32 to vector<16x512xf32>
    %370 = arith.cmpf ogt, %368, %369 : vector<16x512xf32>
    %cst_75 = arith.constant 0.000000e+00 : f32
    %371 = vector.broadcast %cst_75 : f32 to vector<16x512xf32>
    %372 = arith.minimumf %368, %371 : vector<16x512xf32>
    %373 = math.exp %372 : vector<16x512xf32>
    %cst_76 = arith.constant 1.000000e+00 : f32
    %374 = vector.broadcast %cst_76 : f32 to vector<16x512xf32>
    %375 = arith.subf %373, %374 : vector<16x512xf32>
    %376 = arith.select %370, %368, %375 : vector<16x512xi1>, vector<16x512xf32>
    %c1_i32_77 = arith.constant 1 : i32
    %377 = tpu.memref_slice %arg24[%c1_i32_77] : memref<3x!tpu.dma_semaphore, #tpu.memory_space<semaphore_mem>> -> memref<1x!tpu.dma_semaphore, #tpu.memory_space<semaphore_mem>>
    %378 = tpu.memref_squeeze %377 : memref<1x!tpu.dma_semaphore, #tpu.memory_space<semaphore_mem>> -> memref<!tpu.dma_semaphore, #tpu.memory_space<semaphore_mem>>
    tpu.wait_dma2 semaphore(%378 : memref<!tpu.dma_semaphore, #tpu.memory_space<semaphore_mem>>) src(%arg16 : memref<512x128xbf16, #tpu.memory_space<any>>) dst(%arg22 : memref<512x128xbf16, #tpu.memory_space<vmem>>)
    %c0_78 = arith.constant 0 : index
    %c0_79 = arith.constant 0 : index
    %379 = vector.load %arg5[%c0_78, %c0_79] : memref<16x16xf32, #tpu.memory_space<vmem>>, vector<16x16xf32>
    %cst_80 = arith.constant dense<0.000000e+00> : vector<16x512xf32>
    %380 = tpu.matmul %379, %376, %cst_80 {dimension_numbers = #tpu.dot_dimension_numbers<[1], [0], [0], [1], [0, 0, 1, 1], [], []>} : vector<16x16xf32>, vector<16x512xf32>, vector<16x512xf32> -> vector<16x512xf32>
    %c0_81 = arith.constant 0 : index
    %c0_82 = arith.constant 0 : index
    %381 = vector.load %arg22[%c0_81, %c0_82] : memref<512x128xbf16, #tpu.memory_space<vmem>>, vector<512x128xbf16>
    %382 = arith.extf %381 : vector<512x128xbf16> to vector<512x128xf32>
    %cst_83 = arith.constant dense<0.000000e+00> : vector<16x128xf32>
    %383 = tpu.matmul %380, %382, %cst_83 {dimension_numbers = #tpu.dot_dimension_numbers<[1], [0], [0], [1], [0, 0, 1, 1], [], []>} : vector<16x512xf32>, vector<512x128xf32>, vector<16x128xf32> -> vector<16x128xf32>
    %c0_84 = arith.constant 0 : index
    %c0_85 = arith.constant 0 : index
    %384 = vector.load %arg6[%c0_84, %c0_85] : memref<1x128xf32, #tpu.memory_space<vmem>>, vector<1x128xf32>
    %385 = vector.broadcast %384 : vector<1x128xf32> to vector<16x128xf32>
    %386 = arith.addf %383, %385 : vector<16x128xf32>
    %cst_86 = arith.constant 0.000000e+00 : f32
    %387 = vector.broadcast %cst_86 : f32 to vector<16x128xf32>
    %388 = arith.cmpf ogt, %386, %387 : vector<16x128xf32>
    %cst_87 = arith.constant 0.000000e+00 : f32
    %389 = vector.broadcast %cst_87 : f32 to vector<16x128xf32>
    %390 = arith.minimumf %386, %389 : vector<16x128xf32>
    %391 = math.exp %390 : vector<16x128xf32>
    %cst_88 = arith.constant 1.000000e+00 : f32
    %392 = vector.broadcast %cst_88 : f32 to vector<16x128xf32>
    %393 = arith.subf %391, %392 : vector<16x128xf32>
    %394 = arith.select %388, %386, %393 : vector<16x128xi1>, vector<16x128xf32>
    %c2_i32_89 = arith.constant 2 : i32
    %395 = tpu.memref_slice %arg24[%c2_i32_89] : memref<3x!tpu.dma_semaphore, #tpu.memory_space<semaphore_mem>> -> memref<1x!tpu.dma_semaphore, #tpu.memory_space<semaphore_mem>>
    %396 = tpu.memref_squeeze %395 : memref<1x!tpu.dma_semaphore, #tpu.memory_space<semaphore_mem>> -> memref<!tpu.dma_semaphore, #tpu.memory_space<semaphore_mem>>
    tpu.wait_dma2 semaphore(%396 : memref<!tpu.dma_semaphore, #tpu.memory_space<semaphore_mem>>) src(%arg17 : memref<1024x128xbf16, #tpu.memory_space<any>>) dst(%arg23 : memref<1024x128xbf16, #tpu.memory_space<vmem>>)
    %c0_90 = arith.constant 0 : index
    %c0_91 = arith.constant 0 : index
    %c0_92 = arith.constant 0 : index
    %397 = vector.load %arg7[%c0_90, %c0_91, %c0_92] : memref<8x16x16xf32, #tpu.memory_space<vmem>>, vector<1x16x16xf32>
    %398 = vector.shape_cast %397 : vector<1x16x16xf32> to vector<16x16xf32>
    %cst_93 = arith.constant dense<0.000000e+00> : vector<16x128xf32>
    %399 = tpu.matmul %398, %394, %cst_93 {dimension_numbers = #tpu.dot_dimension_numbers<[1], [0], [0], [1], [0, 0, 1, 1], [], []>} : vector<16x16xf32>, vector<16x128xf32>, vector<16x128xf32> -> vector<16x128xf32>
    %c1_94 = arith.constant 1 : index
    %c0_95 = arith.constant 0 : index
    %c0_96 = arith.constant 0 : index
    %400 = vector.load %arg7[%c1_94, %c0_95, %c0_96] : memref<8x16x16xf32, #tpu.memory_space<vmem>>, vector<1x16x16xf32>
    %401 = vector.shape_cast %400 : vector<1x16x16xf32> to vector<16x16xf32>
    %cst_97 = arith.constant dense<0.000000e+00> : vector<16x128xf32>
    %402 = tpu.matmul %401, %394, %cst_97 {dimension_numbers = #tpu.dot_dimension_numbers<[1], [0], [0], [1], [0, 0, 1, 1], [], []>} : vector<16x16xf32>, vector<16x128xf32>, vector<16x128xf32> -> vector<16x128xf32>
    %c2_98 = arith.constant 2 : index
    %c0_99 = arith.constant 0 : index
    %c0_100 = arith.constant 0 : index
    %403 = vector.load %arg7[%c2_98, %c0_99, %c0_100] : memref<8x16x16xf32, #tpu.memory_space<vmem>>, vector<1x16x16xf32>
    %404 = vector.shape_cast %403 : vector<1x16x16xf32> to vector<16x16xf32>
    %cst_101 = arith.constant dense<0.000000e+00> : vector<16x128xf32>
    %405 = tpu.matmul %404, %394, %cst_101 {dimension_numbers = #tpu.dot_dimension_numbers<[1], [0], [0], [1], [0, 0, 1, 1], [], []>} : vector<16x16xf32>, vector<16x128xf32>, vector<16x128xf32> -> vector<16x128xf32>
    %c3_102 = arith.constant 3 : index
    %c0_103 = arith.constant 0 : index
    %c0_104 = arith.constant 0 : index
    %406 = vector.load %arg7[%c3_102, %c0_103, %c0_104] : memref<8x16x16xf32, #tpu.memory_space<vmem>>, vector<1x16x16xf32>
    %407 = vector.shape_cast %406 : vector<1x16x16xf32> to vector<16x16xf32>
    %cst_105 = arith.constant dense<0.000000e+00> : vector<16x128xf32>
    %408 = tpu.matmul %407, %394, %cst_105 {dimension_numbers = #tpu.dot_dimension_numbers<[1], [0], [0], [1], [0, 0, 1, 1], [], []>} : vector<16x16xf32>, vector<16x128xf32>, vector<16x128xf32> -> vector<16x128xf32>
    %c4_106 = arith.constant 4 : index
    %c0_107 = arith.constant 0 : index
    %c0_108 = arith.constant 0 : index
    %409 = vector.load %arg7[%c4_106, %c0_107, %c0_108] : memref<8x16x16xf32, #tpu.memory_space<vmem>>, vector<1x16x16xf32>
    %410 = vector.shape_cast %409 : vector<1x16x16xf32> to vector<16x16xf32>
    %cst_109 = arith.constant dense<0.000000e+00> : vector<16x128xf32>
    %411 = tpu.matmul %410, %394, %cst_109 {dimension_numbers = #tpu.dot_dimension_numbers<[1], [0], [0], [1], [0, 0, 1, 1], [], []>} : vector<16x16xf32>, vector<16x128xf32>, vector<16x128xf32> -> vector<16x128xf32>
    %c5_110 = arith.constant 5 : index
    %c0_111 = arith.constant 0 : index
    %c0_112 = arith.constant 0 : index
    %412 = vector.load %arg7[%c5_110, %c0_111, %c0_112] : memref<8x16x16xf32, #tpu.memory_space<vmem>>, vector<1x16x16xf32>
    %413 = vector.shape_cast %412 : vector<1x16x16xf32> to vector<16x16xf32>
    %cst_113 = arith.constant dense<0.000000e+00> : vector<16x128xf32>
    %414 = tpu.matmul %413, %394, %cst_113 {dimension_numbers = #tpu.dot_dimension_numbers<[1], [0], [0], [1], [0, 0, 1, 1], [], []>} : vector<16x16xf32>, vector<16x128xf32>, vector<16x128xf32> -> vector<16x128xf32>
    %c6_114 = arith.constant 6 : index
    %c0_115 = arith.constant 0 : index
    %c0_116 = arith.constant 0 : index
    %415 = vector.load %arg7[%c6_114, %c0_115, %c0_116] : memref<8x16x16xf32, #tpu.memory_space<vmem>>, vector<1x16x16xf32>
    %416 = vector.shape_cast %415 : vector<1x16x16xf32> to vector<16x16xf32>
    %cst_117 = arith.constant dense<0.000000e+00> : vector<16x128xf32>
    %417 = tpu.matmul %416, %394, %cst_117 {dimension_numbers = #tpu.dot_dimension_numbers<[1], [0], [0], [1], [0, 0, 1, 1], [], []>} : vector<16x16xf32>, vector<16x128xf32>, vector<16x128xf32> -> vector<16x128xf32>
    %c7_118 = arith.constant 7 : index
    %c0_119 = arith.constant 0 : index
    %c0_120 = arith.constant 0 : index
    %418 = vector.load %arg7[%c7_118, %c0_119, %c0_120] : memref<8x16x16xf32, #tpu.memory_space<vmem>>, vector<1x16x16xf32>
    %419 = vector.shape_cast %418 : vector<1x16x16xf32> to vector<16x16xf32>
    %cst_121 = arith.constant dense<0.000000e+00> : vector<16x128xf32>
    %420 = tpu.matmul %419, %394, %cst_121 {dimension_numbers = #tpu.dot_dimension_numbers<[1], [0], [0], [1], [0, 0, 1, 1], [], []>} : vector<16x16xf32>, vector<16x128xf32>, vector<16x128xf32> -> vector<16x128xf32>
    %421 = tpu.concatenate %399, %402, %405, %408, %411, %414, %417, %420 in 1 : vector<16x128xf32>, vector<16x128xf32>, vector<16x128xf32>, vector<16x128xf32>, vector<16x128xf32>, vector<16x128xf32>, vector<16x128xf32>, vector<16x128xf32> -> vector<16x1024xf32>
    %c0_122 = arith.constant 0 : index
    %c0_123 = arith.constant 0 : index
    %422 = vector.load %arg23[%c0_122, %c0_123] : memref<1024x128xbf16, #tpu.memory_space<vmem>>, vector<1024x128xbf16>
    %423 = arith.extf %422 : vector<1024x128xbf16> to vector<1024x128xf32>
    %cst_124 = arith.constant dense<0.000000e+00> : vector<16x128xf32>
    %424 = tpu.matmul %421, %423, %cst_124 {dimension_numbers = #tpu.dot_dimension_numbers<[1], [0], [0], [1], [0, 0, 1, 1], [], []>} : vector<16x1024xf32>, vector<1024x128xf32>, vector<16x128xf32> -> vector<16x128xf32>
    %c0_125 = arith.constant 0 : index
    %c0_126 = arith.constant 0 : index
    %425 = vector.load %arg8[%c0_125, %c0_126] : memref<1x128xf32, #tpu.memory_space<vmem>>, vector<1x128xf32>
    %426 = vector.broadcast %425 : vector<1x128xf32> to vector<16x128xf32>
    %427 = arith.mulf %424, %426 : vector<16x128xf32>
    %c0_127 = arith.constant 0 : index
    %c0_128 = arith.constant 0 : index
    %428 = vector.load %arg9[%c0_127, %c0_128] : memref<1x128xf32, #tpu.memory_space<vmem>>, vector<1x128xf32>
    %429 = vector.broadcast %428 : vector<1x128xf32> to vector<16x128xf32>
    %430 = arith.addf %427, %429 : vector<16x128xf32>
    %cst_129 = arith.constant 0.000000e+00 : f32
    %431 = vector.broadcast %cst_129 : f32 to vector<16x128xf32>
    %432 = arith.cmpf ogt, %430, %431 : vector<16x128xf32>
    %cst_130 = arith.constant 0.000000e+00 : f32
    %433 = vector.broadcast %cst_130 : f32 to vector<16x128xf32>
    %434 = arith.minimumf %430, %433 : vector<16x128xf32>
    %435 = math.exp %434 : vector<16x128xf32>
    %cst_131 = arith.constant 1.000000e+00 : f32
    %436 = vector.broadcast %cst_131 : f32 to vector<16x128xf32>
    %437 = arith.subf %435, %436 : vector<16x128xf32>
    %438 = arith.select %432, %430, %437 : vector<16x128xi1>, vector<16x128xf32>
    %c0_132 = arith.constant 0 : index
    %c0_133 = arith.constant 0 : index
    %439 = vector.load %arg10[%c0_132, %c0_133] : memref<2x16xf32, #tpu.memory_space<vmem>>, vector<2x16xf32>
    %cst_134 = arith.constant dense<0.000000e+00> : vector<2x128xf32>
    %440 = tpu.matmul %439, %438, %cst_134 {dimension_numbers = #tpu.dot_dimension_numbers<[1], [0], [0], [1], [0, 0, 1, 1], [], []>} : vector<2x16xf32>, vector<16x128xf32>, vector<2x128xf32> -> vector<2x128xf32>
    %c0_135 = arith.constant 0 : index
    %c0_136 = arith.constant 0 : index
    %441 = vector.load %arg11[%c0_135, %c0_136] : memref<128x64xf32, #tpu.memory_space<vmem>>, vector<128x64xf32>
    %cst_137 = arith.constant dense<0.000000e+00> : vector<2x64xf32>
    %442 = tpu.matmul %440, %441, %cst_137 {dimension_numbers = #tpu.dot_dimension_numbers<[1], [0], [0], [1], [0, 0, 1, 1], [], []>} : vector<2x128xf32>, vector<128x64xf32>, vector<2x64xf32> -> vector<2x64xf32>
    %c0_138 = arith.constant 0 : index
    %c0_139 = arith.constant 0 : index
    %443 = vector.load %arg12[%c0_138, %c0_139] : memref<1x64xf32, #tpu.memory_space<vmem>>, vector<1x64xf32>
    %444 = vector.broadcast %443 : vector<1x64xf32> to vector<2x64xf32>
    %445 = arith.addf %442, %444 : vector<2x64xf32>
    %c0_140 = arith.constant 0 : index
    %c0_141 = arith.constant 0 : index
    %446 = vector.load %arg13[%c0_140, %c0_141] : memref<64x4xf32, #tpu.memory_space<vmem>>, vector<64x4xf32>
    %cst_142 = arith.constant dense<0.000000e+00> : vector<2x4xf32>
    %447 = tpu.matmul %445, %446, %cst_142 {dimension_numbers = #tpu.dot_dimension_numbers<[1], [0], [0], [1], [0, 0, 1, 1], [], []>} : vector<2x64xf32>, vector<64x4xf32>, vector<2x4xf32> -> vector<2x4xf32>
    %c0_143 = arith.constant 0 : index
    %c0_144 = arith.constant 0 : index
    %448 = vector.load %arg14[%c0_143, %c0_144] : memref<1x4xf32, #tpu.memory_space<vmem>>, vector<1x4xf32>
    %449 = vector.broadcast %448 : vector<1x4xf32> to vector<2x4xf32>
    %450 = arith.addf %447, %449 : vector<2x4xf32>
    %c0_145 = arith.constant 0 : index
    %c0_146 = arith.constant 0 : index
    %451 = vector.load %arg20[%c0_145, %c0_146] : memref<2x4xf32, #tpu.memory_space<vmem>>, vector<2x4xf32>
    tpu.vector_store %arg20[%c0_145, %c0_146], %450 {strides = array<i32>} : memref<2x4xf32, #tpu.memory_space<vmem>>, vector<2x4xf32>,
    return
  }
  func.func @transform_0(%arg0: i32) -> (i32, i32) {
    %c0_i32 = arith.constant 0 : i32
    %c0_i32_0 = arith.constant 0 : i32
    %c0_i32_1 = arith.constant 0 : i32
    return %c0_i32, %c0_i32_0 : i32, i32
  }
  func.func @transform_1(%arg0: i32) -> (i32, i32) {
    %c0_i32 = arith.constant 0 : i32
    %c0_i32_0 = arith.constant 0 : i32
    %c0_i32_1 = arith.constant 0 : i32
    return %c0_i32, %c0_i32_0 : i32, i32
  }
  func.func @transform_2(%arg0: i32) -> (i32, i32) {
    %c0_i32 = arith.constant 0 : i32
    %c0_i32_0 = arith.constant 0 : i32
    %c0_i32_1 = arith.constant 0 : i32
    return %c0_i32, %c0_i32_0 : i32, i32
  }
  func.func @transform_3(%arg0: i32) -> (i32, i32) {
    %c0_i32 = arith.constant 0 : i32
    %c0_i32_0 = arith.constant 0 : i32
    %c0_i32_1 = arith.constant 0 : i32
    return %c0_i32, %c0_i32_0 : i32, i32
  }
  func.func @transform_4(%arg0: i32) -> (i32, i32) {
    %c0_i32 = arith.constant 0 : i32
    %c0_i32_0 = arith.constant 0 : i32
    %c0_i32_1 = arith.constant 0 : i32
    return %c0_i32, %c0_i32_0 : i32, i32
  }
  func.func @transform_5(%arg0: i32) -> (i32, i32) {
    %c0_i32 = arith.constant 0 : i32
    %c0_i32_0 = arith.constant 0 : i32
    %c0_i32_1 = arith.constant 0 : i32
    return %c0_i32, %c0_i32_0 : i32, i32
  }
  func.func @transform_6(%arg0: i32) -> (i32, i32, i32) {
    %c0_i32 = arith.constant 0 : i32
    %c0_i32_0 = arith.constant 0 : i32
    %c0_i32_1 = arith.constant 0 : i32
    %c0_i32_2 = arith.constant 0 : i32
    return %c0_i32, %c0_i32_0, %c0_i32_1 : i32, i32, i32
  }
  func.func @transform_7(%arg0: i32) -> (i32, i32) {
    %c0_i32 = arith.constant 0 : i32
    %c0_i32_0 = arith.constant 0 : i32
    %c0_i32_1 = arith.constant 0 : i32
    return %c0_i32, %c0_i32_0 : i32, i32
  }
  func.func @transform_8(%arg0: i32) -> (i32, i32) {
    %c0_i32 = arith.constant 0 : i32
    %c0_i32_0 = arith.constant 0 : i32
    %c0_i32_1 = arith.constant 0 : i32
    return %c0_i32, %c0_i32_0 : i32, i32
  }
  func.func @transform_9(%arg0: i32) -> (i32, i32) {
    %c0_i32 = arith.constant 0 : i32
    %c0_i32_0 = arith.constant 0 : i32
    %c0_i32_1 = arith.constant 0 : i32
    return %c0_i32, %c0_i32_0 : i32, i32
  }
  func.func @transform_10(%arg0: i32) -> (i32, i32) {
    %c0_i32 = arith.constant 0 : i32
    %c0_i32_0 = arith.constant 0 : i32
    %c0_i32_1 = arith.constant 0 : i32
    return %c0_i32, %c0_i32_0 : i32, i32
  }
  func.func @transform_11(%arg0: i32) -> (i32, i32) {
    %c0_i32 = arith.constant 0 : i32
    %c0_i32_0 = arith.constant 0 : i32
    %c0_i32_1 = arith.constant 0 : i32
    return %c0_i32, %c0_i32_0 : i32, i32
  }
  func.func @transform_12(%arg0: i32) -> (i32, i32) {
    %c0_i32 = arith.constant 0 : i32
    %c0_i32_0 = arith.constant 0 : i32
    %c0_i32_1 = arith.constant 0 : i32
    return %c0_i32, %c0_i32_0 : i32, i32
  }
  func.func @transform_13(%arg0: i32) -> (i32, i32) {
    %c0_i32 = arith.constant 0 : i32
    %c0_i32_0 = arith.constant 0 : i32
    %c0_i32_1 = arith.constant 0 : i32
    return %c0_i32, %c0_i32_0 : i32, i32
  }
  func.func @transform_17(%arg0: i32) -> i32 {
    %c0_i32 = arith.constant 0 : i32
    %c0_i32_0 = arith.constant 0 : i32
    return %c0_i32 : i32
  }
  func.func @transform_18(%arg0: i32) -> i32 {
    %c0_i32 = arith.constant 0 : i32
    %c0_i32_0 = arith.constant 0 : i32
    return %c0_i32 : i32
  }
  func.func @transform_19(%arg0: i32) -> (i32, i32) {
    %c0_i32 = arith.constant 0 : i32
    %c0_i32_0 = arith.constant 0 : i32
    %c0_i32_1 = arith.constant 0 : i32
    return %c0_i32, %c0_i32_0 : i32, i32
  }
}

</mosaic_0001>

<bundles_post_ra>
// kernel: tpu_custom_call.1
= control target key start
LH: loop header
LB: loop body
LE: loop exit
PB: predicated region body
PF: predicated region fallthrough
CT: control target
= control target key end

     0   :  { %s9341_s0 = inlined_call_operand.vmem [shape: f32[16,263], index: 0, kind: input, shape index: {}]   ;;  %s9342_s1 = inlined_call_operand.vmem [shape: bf16[256,40], index: 1, kind: input, shape index: {}]   ;;  %s9343_s2 = inlined_call_operand.vmem [shape: f32[1,512], index: 2, kind: input, shape index: {}]   ;;  %s9344_s3 = inlined_call_operand.hbm [shape: f32[1,512], index: 3, kind: input, shape index: {}]   ;;  %s9345_s4 = inlined_call_operand.vmem [shape: f32[16,16], index: 4, kind: input, shape index: {}]   ;;  %s9346_s5 = inlined_call_operand.vmem [shape: f32[1,128], index: 5, kind: input, shape index: {}]   ;;  %s9347_s6 = inlined_call_operand.hbm [shape: f32[8,16,16], index: 6, kind: input, shape index: {}]   ;;  %s9348_s7 = inlined_call_operand.hbm [shape: f32[1,128], index: 7, kind: input, shape index: {}]   ;;  %s9349_s8 = inlined_call_operand.hbm [shape: f32[1,128], index: 8, kind: input, shape index: {}]   ;;  %s9350_s9 = inlined_call_operand.vmem [shape: f32[2,16], index: 9, kind: input, shape index: {}]   ;;  %s9351_s10 = inlined_call_operand.vmem [shape: f32[128,64], index: 10, kind: input, shape index: {}]   ;;  %s9352_s11 = inlined_call_operand.vmem [shape: f32[1,64], index: 11, kind: input, shape index: {}]   ;;  %s9353_s12 = inlined_call_operand.vmem [shape: f32[64,4], index: 12, kind: input, shape index: {}]   ;;  %s9354_s13 = inlined_call_operand.vmem [shape: f32[1,4], index: 13, kind: input, shape index: {}]   ;;  %s9355_s14 = inlined_call_operand.hbm [shape: bf16[8,40,512], index: 14, kind: input, shape index: {}]   ;;  %s9356_s15 = inlined_call_operand.vmem [shape: bf16[512,128], index: 15, kind: input, shape index: {}]   ;;  %s9357_s16 = inlined_call_operand.hbm [shape: bf16[1024,128], index: 16, kind: input, shape index: {}]   ;;  %s9358_s17 = inlined_call_operand.vmem [shape: f32[64], index: 17, kind: input, shape index: {}]   ;;  %s9359_s18 = inlined_call_operand.vmem [shape: f32[8], index: 18, kind: input, shape index: {}]   ;;  %s9360_s19 = inlined_call_operand.hbm [shape: f32[2,4], index: 19, kind: output, shape index: {}]  }
   0x1   :  { %9447 = sst [smem:[#allocation247_spill]] %s9341_s0 }
   0x2   :  { %9448 = sst [smem:[#allocation248_spill]] %s9342_s1 }
   0x3   :  { %9449 = sst [smem:[#allocation249_spill]] %s9343_s2 }
   0x4   :  { %9450 = sst [smem:[#allocation250_spill]] %s9344_s3 }
   0x5   :  { %9451 = sst [smem:[#allocation251_spill]] %s9360_s19 }
   0x6   :  { %24 = vsyncpa [#allocation7], 0 }
   0x7   :  { %25 = vsyncpa [#allocation11], 0 }
   0x8   :  { %26 = vsyncpa [#allocation14], 0 }
   0x9   :  { %27 = vsyncpa [#allocation9], 0 }
   0xa   :  { %28 = vsyncpa [#allocation17], 0  ;;  %s55_s20 = sshll.u32 %s9347_s6, 4  ;;  %s56_s20 = int_to_ptr.hbm [resolvable:$true] %s55_s20 }
   0xb   :  { %29 = vsyncpa [#allocation8], 0  ;;  %s6392_s21 = smov [#allocation10]   ;;  %s9452_s23 = sld [smem:[#allocation250_spill]] }
   0xc   :  { %s57_s1 = sshll.u32 %s6392_s21, 4  ;;  %s6393_s25 = smov 128   ;;  %s58_s1 = int_to_ptr.vmem [resolvable:$true] %s57_s1 }
   0xd   :  { %s6394_s3 = smov 8   ;;  %s6395_s26 = smov [#allocation6]  }
   0xe   :  { %63 = dma.hbm_to_vmem [thread:$0]  %s56_s20, 2048, %s58_s1, [#allocation11], %s6393_s25, %s6393_s25, %s6394_s3  }
   0xf   :  { %s43_s27 = sshll.u32 %s6395_s26, 4  ;;  %s69_s0 = sshll.u32 %s9348_s7, 4  ;;  %s44_s27 = int_to_ptr.vmem [resolvable:$true] %s43_s27  ;;  %s70_s0 = int_to_ptr.hbm [resolvable:$true] %s69_s0 }
  0x10   :  { %s80_s21 = sshll.u32 %s9349_s8, 4  ;;  %s6396_s19 = smov [#allocation12]   ;;  %s81_s21 = int_to_ptr.hbm [resolvable:$true] %s80_s21 }
  0x11   :  { %s41_s24 = sshll.u32 %s9452_s23, 4  ;;  %s71_s22 = sshll.u32 %s6396_s19, 4  ;;  %s42_s24 = int_to_ptr.hbm [resolvable:$true] %s41_s24  ;;  %s72_s22 = int_to_ptr.vmem [resolvable:$true] %s71_s22 }
  0x12   :  { %46 = dma.hbm_to_vmem [thread:$0]  %s42_s24, 64, %s44_s27, [#allocation7]  }
  0x13   :  { %74 = dma.hbm_to_vmem [thread:$0]  %s70_s0, 16, %s72_s22, [#allocation11]  }
  0x14   :  { %s6397_s20 = smov [#allocation13]   ;;  %s101_s25 = sshll.u32 %s9358_s17, 4  ;;  %s102_s25 = int_to_ptr.vmem [resolvable:$true] %s101_s25 }
  0x15   :  { %s82_s1 = sshll.u32 %s6397_s20, 4  ;;  %s110_s3 = sshll.u32 %s9359_s18, 4  ;;  %s83_s1 = int_to_ptr.vmem [resolvable:$true] %s82_s1  ;;  %s111_s3 = int_to_ptr.vmem [resolvable:$true] %s110_s3 }
  0x16   :  { %85 = dma.hbm_to_vmem [thread:$0]  %s81_s21, 16, %s83_s1, [#allocation14]  }
  0x17   :  { %s6398_s26 = smov [#allocation15]   ;;  %s6399_s8 = smov [#allocation16]  }
  0x18   :  { %104 = dma.vmem_to_smem %s102_s25, 16, %s6398_s26, [#allocation9]  }
  0x19   :  { %113 = dma.vmem_to_smem %s111_s3, 16, %s6399_s8, [#allocation17]  }
  0x1a   :  { %6374 = dma.done.wait [#allocation7], 64  }
  0x1b   :  { %6375 = vsyncadd [#allocation7], 4294967232 }
  0x1c   :  { %6376 = dma.done.wait [#allocation11], 2064  }
  0x1d   :  { %6377 = vsyncadd [#allocation11], 4294965232 }
  0x1e   :  { %6378 = dma.done.wait [#allocation14], 16  }
  0x1f   :  { %6379 = vsyncadd [#allocation14], 4294967280 }
  0x20   :  { %6380 = dma.done.wait [#allocation9], 16  }
  0x21   :  { %6381 = vsyncadd [#allocation9], 4294967280 }
  0x22   :  { %6382 = dma.done.wait [#allocation17], 16  }
  0x23   :  { %6383 = vsyncadd [#allocation17], 4294967280 }
  0x24   :  { %138 = sfence }
  0x25   :  { %s146_s18 = sshll.u32 %s9355_s14, 4  ;;  %v6534_v0 = vld [vmem:[%s9356_s15] sm:$0xff]  ;;  %v6539_v1 = vld [vmem:[%s9356_s15 + $0x8] sm:$0xff]  ;;  %v6544_v2 = vld [vmem:[%s9356_s15 + $0x10] sm:$0xff]  ;;  %s6400_s21 = smov [#allocation2]   ;;  %s147_s18 = int_to_ptr.hbm [resolvable:$true] %s146_s18 }
  0x26   :  { %9453 = vst [vmem:[#allocation35_spill] sm:$0xff] %v6534_v0  ;;  %s148_s22 = sshll.u32 %s6400_s21, 4  ;;  %v6549_v3 = vld [vmem:[%s9356_s15 + $0x18] sm:$0xff]  ;;  %v6554_v4 = vld [vmem:[%s9356_s15 + $0x20] sm:$0xff]  ;;  %v6559_v5 = vld [vmem:[%s9356_s15 + $0x28] sm:$0xff]  ;;  %s5293_s28 = sld [smem:[#allocation15 + $0x1]]  ;;  %s149_s22 = int_to_ptr.vmem [resolvable:$true] %s148_s22 }
  0x27   :  { %9454 = vst [vmem:[#allocation36_spill] sm:$0xff] %v6539_v1  ;;  %v6564_v6 = vld [vmem:[%s9356_s15 + $0x30] sm:$0xff]  ;;  %v6569_v7 = vld [vmem:[%s9356_s15 + $0x38] sm:$0xff]  ;;  %v6574_v8 = vld [vmem:[%s9356_s15 + $0x40] sm:$0xff]  ;;  %151 = dma.hbm_to_vmem [thread:$0]  %s147_s18, 10240, %s149_s22, [#allocation5] }
  0x28   :  { %9455 = vst [vmem:[#allocation37_spill] sm:$0xff] %v6544_v2  ;;  %v6579_v9 = vld [vmem:[%s9356_s15 + $0x48] sm:$0xff]  ;;  %v6584_v10 = vld [vmem:[%s9356_s15 + $0x50] sm:$0xff]  ;;  %v6589_v11 = vld [vmem:[%s9356_s15 + $0x58] sm:$0xff] }
  0x29   :  { %9456 = vst [vmem:[#allocation38_spill] sm:$0xff] %v6549_v3  ;;  %v6594_v12 = vld [vmem:[%s9356_s15 + $0x60] sm:$0xff]  ;;  %v6599_v13 = vld [vmem:[%s9356_s15 + $0x68] sm:$0xff]  ;;  %v6604_v14 = vld [vmem:[%s9356_s15 + $0x70] sm:$0xff] }
  0x2a   :  { %9457 = vst [vmem:[#allocation39_spill] sm:$0xff] %v6554_v4  ;;  %v6609_v15 = vld [vmem:[%s9356_s15 + $0x78] sm:$0xff]  ;;  %v6614_v16 = vld [vmem:[%s9356_s15 + $0x80] sm:$0xff]  ;;  %v6619_v17 = vld [vmem:[%s9356_s15 + $0x88] sm:$0xff] }
  0x2b   :  { %9458 = vst [vmem:[#allocation40_spill] sm:$0xff] %v6559_v5  ;;  %v6624_v18 = vld [vmem:[%s9356_s15 + $0x90] sm:$0xff]  ;;  %v6629_v19 = vld [vmem:[%s9356_s15 + $0x98] sm:$0xff]  ;;  %v6634_v20 = vld [vmem:[%s9356_s15 + $0xa0] sm:$0xff] }
  0x2c   :  { %9459 = vst [vmem:[#allocation41_spill] sm:$0xff] %v6564_v6  ;;  %v6639_v21 = vld [vmem:[%s9356_s15 + $0xa8] sm:$0xff]  ;;  %v6644_v22 = vld [vmem:[%s9356_s15 + $0xb0] sm:$0xff]  ;;  %v6649_v23 = vld [vmem:[%s9356_s15 + $0xb8] sm:$0xff] }
  0x2d   :  { %9460 = vst [vmem:[#allocation42_spill] sm:$0xff] %v6569_v7  ;;  %v6654_v24 = vld [vmem:[%s9356_s15 + $0xc0] sm:$0xff]  ;;  %v6659_v25 = vld [vmem:[%s9356_s15 + $0xc8] sm:$0xff]  ;;  %v6664_v26 = vld [vmem:[%s9356_s15 + $0xd0] sm:$0xff] }
  0x2e   :  { %9461 = vst [vmem:[#allocation43_spill] sm:$0xff] %v6574_v8  ;;  %v6669_v27 = vld [vmem:[%s9356_s15 + $0xd8] sm:$0xff]  ;;  %v6674_v28 = vld [vmem:[%s9356_s15 + $0xe0] sm:$0xff]  ;;  %v6679_v29 = vld [vmem:[%s9356_s15 + $0xe8] sm:$0xff] }
  0x2f   :  { %9462 = vst [vmem:[#allocation44_spill] sm:$0xff] %v6579_v9  ;;  %v6684_v30 = vld [vmem:[%s9356_s15 + $0xf0] sm:$0xff]  ;;  %v6689_v31 = vld [vmem:[%s9356_s15 + $0xf8] sm:$0xff] }
  0x30   :  { %9463 = vst [vmem:[#allocation45_spill] sm:$0xff] %v6584_v10 }
  0x31   :  { %9464 = vst [vmem:[#allocation46_spill] sm:$0xff] %v6589_v11 }
  0x32   :  { %9465 = vst [vmem:[#allocation47_spill] sm:$0xff] %v6594_v12 }
  0x33   :  { %9466 = vst [vmem:[#allocation48_spill] sm:$0xff] %v6599_v13 }
  0x34   :  { %9467 = vst [vmem:[#allocation49_spill] sm:$0xff] %v6604_v14 }
  0x35   :  { %9468 = vst [vmem:[#allocation50_spill] sm:$0xff] %v6609_v15 }
  0x36   :  { %9469 = vst [vmem:[#allocation51_spill] sm:$0xff] %v6614_v16 }
  0x37   :  { %9470 = vst [vmem:[#allocation52_spill] sm:$0xff] %v6619_v17 }
  0x38   :  { %9471 = vst [vmem:[#allocation53_spill] sm:$0xff] %v6624_v18 }
  0x39   :  { %9472 = vst [vmem:[#allocation54_spill] sm:$0xff] %v6629_v19 }
  0x3a   :  { %9473 = vst [vmem:[#allocation55_spill] sm:$0xff] %v6634_v20 }
  0x3b   :  { %9474 = vst [vmem:[#allocation56_spill] sm:$0xff] %v6639_v21 }
  0x3c   :  { %9475 = vst [vmem:[#allocation57_spill] sm:$0xff] %v6644_v22 }
  0x3d   :  { %9476 = vst [vmem:[#allocation58_spill] sm:$0xff] %v6649_v23 }
  0x3e   :  { %9477 = vst [vmem:[#allocation59_spill] sm:$0xff] %v6654_v24 }
  0x3f   :  { %9478 = vst [vmem:[#allocation60_spill] sm:$0xff] %v6659_v25 }
  0x40   :  { %9479 = vst [vmem:[#allocation61_spill] sm:$0xff] %v6664_v26 }
  0x41   :  { %9480 = vst [vmem:[#allocation62_spill] sm:$0xff] %v6669_v27 }
  0x42   :  { %9481 = vst [vmem:[#allocation63_spill] sm:$0xff] %v6674_v28 }
  0x43   :  { %9482 = vst [vmem:[#allocation64_spill] sm:$0xff] %v6679_v29 }
  0x44   :  { %9483 = vst [vmem:[#allocation65_spill] sm:$0xff] %v6684_v30 }
  0x45   :  { %9484 = vst [vmem:[#allocation66_spill] sm:$0xff] %v6689_v31 }
  0x46   :  { %232 = vsyncadd [#allocation5 + $0x1], 4096  ;;  %s9485_s6 = sld [smem:[#allocation247_spill]]  ;;  %v338_v35 = vstv %s5293_s28  ;;  %s6401_s15 = smov 127   ;;  %vm1278_vm0 = vcmask 1014784   ;;  %vm1583_vm1 = vcmask 1006592  }
  0x47   :  { %s5294_s23 = sld [smem:[#allocation15 + $0x9]]  ;;  %s6402_s28 = smov 126   ;;  %vm363_vm2 = vcmask 1039360   ;;  %vm668_vm3 = vcmask 1031168   ;;  %vm973_vm4 = vcmask 1022976   ;;  %vm1888_vm5 = vcmask 998400  }
  0x48   :  { %s5295_s24 = sld [smem:[#allocation15 + $0x11]]  ;;  %s6403_s14 = smov 125   ;;  %vm2193_vm6 = vcmask 990208  }
  0x49   :  { %s5296_s3 = sld [smem:[#allocation15 + $0x19]] }
  0x4a   :  { %s5297_s26 = sld [smem:[#allocation15 + $0x21]] }
  0x4b   :  { %s5298_s8 = sld [smem:[#allocation15 + $0x29]] }
  0x4c   :  { %v6694_v32 = vld [vmem:[%s9485_s6 + $0x10] sm:$0xff]  ;;  %v6699_v33 = vld [vmem:[%s9485_s6] sm:$0xff]  ;;  %v6714_v39 = vld [vmem:[%s9485_s6 + $0x18] sm:$0xff]  ;;  %s5299_s17 = sld [smem:[#allocation15 + $0x31]] }
  0x4d   :  { %v6704_v34 = vld [vmem:[%s9485_s6 + $0x20] sm:$0xff]  ;;  %v341_v36 = vmul.f32 %v338_v35, %v6694_v32  ;;  %v339_v37 = vmul.f32 %v338_v35, %v6699_v33  ;;  %v6719_v40 = vld [vmem:[%s9485_s6 + $0x8] sm:$0xff]  ;;  %v342_v42 = vmul.f32 %v338_v35, %v6714_v39  ;;  %v377_v45 = vstv %s5294_s23  ;;  %s5300_s19 = sld [smem:[#allocation15 + $0x39]] }
  0x4e   :  { %v343_v38 = vmul.f32 %v338_v35, %v6704_v34  ;;  %v6725_v41 = vld [vmem:[%s9485_s6 + $0x28] sm:$0xff]  ;;  %v340_v43 = vmul.f32 %v338_v35, %v6719_v40  ;;  %v379_v46 = vmul.f32 %v377_v45, %v6719_v40  ;;  %v378_v47 = vmul.f32 %v377_v45, %v6699_v33  ;;  %s5301_s27 = sld [smem:[#allocation15 + $0x2]] }
  0x4f   :  { %355 = vrot.lane.b32.xlu1 %v341_v36, %s6401_s15  ;;  %351 = vrot.lane.b32.xlu0 %v339_v37, %s6401_s15  ;;  %v344_v44 = vmul.f32 %v338_v35, %v6725_v41  ;;  %v380_v48 = vmul.f32 %v377_v45, %v6694_v32  ;;  %v382_v49 = vmul.f32 %v377_v45, %v6704_v34  ;;  %v415_v52 = vstv %s5295_s24  ;;  %s5302_s29 = sld [smem:[#allocation15 + $0xa]] }
  0x50   :  { %359 = vrot.lane.b32.xlu2 %v343_v38, %s6401_s15  ;;  %v381_v50 = vmul.f32 %v377_v45, %v6714_v39  ;;  %v383_v51 = vmul.f32 %v377_v45, %v6725_v41  ;;  %v417_v53 = vmul.f32 %v415_v52, %v6719_v40  ;;  %v416_v54 = vmul.f32 %v415_v52, %v6699_v33  ;;  %s5303_s0 = sld [smem:[#allocation15 + $0x12]] }
  0x51   :  { %v418_v55 = vmul.f32 %v415_v52, %v6694_v32  ;;  %v420_v56 = vmul.f32 %v415_v52, %v6704_v34  ;;  %v419_v57 = vmul.f32 %v415_v52, %v6714_v39  ;;  %v421_v58 = vmul.f32 %v415_v52, %v6725_v41  ;;  %s5304_s30 = sld [smem:[#allocation15 + $0x1a]] }
  0x52   :  { %v453_v59 = vstv %s5296_s3  ;;  %v491_v37 = vstv %s5297_s26  ;;  %s5305_s21 = sld [smem:[#allocation15 + $0x22]] }
  0x53   :  { %v455_v60 = vmul.f32 %v453_v59, %v6719_v40  ;;  %v454_v61 = vmul.f32 %v453_v59, %v6699_v33  ;;  %v456_v62 = vmul.f32 %v453_v59, %v6694_v32  ;;  %v458_v63 = vmul.f32 %v453_v59, %v6704_v34  ;;  %s5306_s18 = sld [smem:[#allocation15 + $0x2a]] }
  0x54   :  { %v457_v35 = vmul.f32 %v453_v59, %v6714_v39  ;;  %v459_v36 = vmul.f32 %v453_v59, %v6725_v41  ;;  %v493_v38 = vmul.f32 %v491_v37, %v6719_v40  ;;  %v495_v45 = vmul.f32 %v491_v37, %v6714_v39  ;;  %s5307_s22 = sld [smem:[#allocation15 + $0x32]] }
  0x55   :  { %s5309_s20 = sld [smem:[#allocation15 + $0x3]] }
  0x56   :  { %s5310_s1 = sld [smem:[#allocation15 + $0xb]] }
  0x57   :  { %357 = vrot.lane.b32.xlu1 %v342_v42, %s6401_s15  ;;  %353 = vrot.lane.b32.xlu0 %v340_v43, %s6401_s15  ;;  %v492_v42 = vmul.f32 %v491_v37, %v6699_v33  ;;  %v494_v43 = vmul.f32 %v491_v37, %v6694_v32  ;;  %s5311_s2 = sld [smem:[#allocation15 + $0x13]] }
  0x58   :  { %361 = vrot.lane.b32.xlu2 %v344_v44, %s6401_s15  ;;  %v496_v44 = vmul.f32 %v491_v37, %v6704_v34  ;;  %s5312_s23 = sld [smem:[#allocation15 + $0x1b]] }
  0x59   :  { %s5313_s25 = sld [smem:[#allocation15 + $0x23]] }
  0x5a   :  { %s5314_s7 = sld [smem:[#allocation15 + $0x2b]] }
  0x5b   :  { %s5315_s24 = sld [smem:[#allocation15 + $0x33]] }
  0x5c   :  { %s5316_s3 = sld [smem:[#allocation15 + $0x3b]] }
  0x5d   :  { %s5317_s26 = sld [smem:[#allocation15 + $0x4]] }
  0x5f   :  { %392 = vrot.lane.b32.xlu1 %v379_v46, %s6401_s15  ;;  %390 = vrot.lane.b32.xlu0 %v378_v47, %s6401_s15  ;;  %v497_v46 = vmul.f32 %v491_v37, %v6725_v41  ;;  %v529_v47 = vstv %s5298_s8  ;;  %s6404_s8 = smov 124  }
  0x60   :  { %394 = vrot.lane.b32.xlu2 %v380_v48, %s6401_s15  ;;  %v531_v48 = vmul.f32 %v529_v47, %v6719_v40  ;;  %v533_v52 = vmul.f32 %v529_v47, %v6714_v39 }
  0x67   :  { %398 = vrot.lane.b32.xlu1 %v382_v49, %s6401_s15  ;;  %396 = vrot.lane.b32.xlu0 %v381_v50, %s6401_s15  ;;  %v530_v49 = vmul.f32 %v529_v47, %v6699_v33  ;;  %v532_v50 = vmul.f32 %v529_v47, %v6694_v32 }
  0x68   :  { %400 = vrot.lane.b32.xlu2 %v383_v51, %s6401_s15  ;;  %v534_v51 = vmul.f32 %v529_v47, %v6704_v34 }
  0x6f   :  { %430 = vrot.lane.b32.xlu1 %v417_v53, %s6401_s15  ;;  %428 = vrot.lane.b32.xlu0 %v416_v54, %s6401_s15  ;;  %v535_v53 = vmul.f32 %v529_v47, %v6725_v41  ;;  %v567_v54 = vstv %s5299_s17  ;;  %s5318_s17 = sld [smem:[#allocation15 + $0xc]] }
  0x70   :  { %432 = vrot.lane.b32.xlu2 %v418_v55, %s6401_s15 }
  0x77   :  { %436 = vrot.lane.b32.xlu1 %v420_v56, %s6401_s15  ;;  %434 = vrot.lane.b32.xlu0 %v419_v57, %s6401_s15  ;;  %v569_v56 = vmul.f32 %v567_v54, %v6719_v40  ;;  %v568_v57 = vmul.f32 %v567_v54, %v6699_v33 }
  0x78   :  { %438 = vrot.lane.b32.xlu2 %v421_v58, %s6401_s15  ;;  %v570_v58 = vmul.f32 %v567_v54, %v6694_v32 }
  0x7f   :  { %468 = vrot.lane.b32.xlu1 %v455_v60, %s6401_s15  ;;  %466 = vrot.lane.b32.xlu0 %v454_v61, %s6401_s15  ;;  %v572_v60 = vmul.f32 %v567_v54, %v6704_v34  ;;  %v571_v61 = vmul.f32 %v567_v54, %v6714_v39 }
  0x80   :  { %470 = vrot.lane.b32.xlu2 %v456_v62, %s6401_s15  ;;  %v573_v62 = vmul.f32 %v567_v54, %v6725_v41 }
  0x87   :  { %474 = vrot.lane.b32.xlu1 %v458_v63, %s6401_s15  ;;  %472 = vrot.lane.b32.xlu0 %v457_v35, %s6401_s15  ;;  %v605_v63 = vstv %s5300_s19  ;;  %s5319_s19 = sld [smem:[#allocation15 + $0x14]] }
  0x88   :  { %476 = vrot.lane.b32.xlu2 %v459_v36, %s6401_s15  ;;  %v607_v36 = vmul.f32 %v605_v63, %v6719_v40  ;;  %v606_v37 = vmul.f32 %v605_v63, %v6699_v33  ;;  %v611_v47 = vmul.f32 %v605_v63, %v6725_v41 }
  0x8f   :  { %506 = vrot.lane.b32.xlu1 %v493_v38, %s6401_s15  ;;  %504 = vrot.lane.b32.xlu0 %v492_v42, %s6401_s15  ;;  %v608_v38 = vmul.f32 %v605_v63, %v6694_v32 }
  0x90   :  { %508 = vrot.lane.b32.xlu2 %v494_v43, %s6401_s15 }
  0x97   :  { %512 = vrot.lane.b32.xlu1 %v496_v44, %s6401_s15  ;;  %510 = vrot.lane.b32.xlu0 %v495_v45, %s6401_s15  ;;  %v610_v45 = vmul.f32 %v605_v63, %v6704_v34 }
  0x98   :  { %514 = vrot.lane.b32.xlu2 %v497_v46, %s6401_s15  ;;  %v609_v46 = vmul.f32 %v605_v63, %v6714_v39  ;;  %v682_v63 = vstv %s5302_s29  ;;  %s5331_s29 = sld [smem:[#allocation15 + $0x35]] }
  0x9f   :  { %544 = vrot.lane.b32.xlu1 %v531_v48, %s6401_s15  ;;  %542 = vrot.lane.b32.xlu0 %v530_v49, %s6401_s15  ;;  %v643_v48 = vstv %s5301_s27  ;;  %s5320_s27 = sld [smem:[#allocation15 + $0x1c]] }
  0xa0   :  { %546 = vrot.lane.b32.xlu2 %v532_v50, %s6401_s15  ;;  %v646_v54 = vmul.f32 %v643_v48, %v6694_v32 }
  0xa7   :  { %550 = vrot.lane.b32.xlu1 %v534_v51, %s6401_s15  ;;  %548 = vrot.lane.b32.xlu0 %v533_v52, %s6401_s15  ;;  %v645_v52 = vmul.f32 %v643_v48, %v6719_v40 }
  0xa8   :  { %552 = vrot.lane.b32.xlu2 %v535_v53, %s6401_s15  ;;  %v644_v53 = vmul.f32 %v643_v48, %v6699_v33 }
  0xaa   :  { %v6793_v55 = vpop.permute.xlu2 %359 }
  0xaf   :  { %582 = vrot.lane.b32.xlu1 %v569_v56, %s6401_s15  ;;  %580 = vrot.lane.b32.xlu0 %v568_v57, %s6401_s15 }
  0xb0   :  { %584 = vrot.lane.b32.xlu2 %v570_v58, %s6401_s15 }
  0xb2   :  { %v6801_v59 = vpop.permute.xlu2 %361 }
  0xb7   :  { %588 = vrot.lane.b32.xlu1 %v572_v60, %s6401_s15  ;;  %586 = vrot.lane.b32.xlu0 %v571_v61, %s6401_s15  ;;  %v648_v60 = vmul.f32 %v643_v48, %v6704_v34  ;;  %v647_v61 = vmul.f32 %v643_v48, %v6714_v39 }
  0xb8   :  { %590 = vrot.lane.b32.xlu2 %v573_v62, %s6401_s15  ;;  %v649_v62 = vmul.f32 %v643_v48, %v6725_v41 }
  0xba   :  { %v6809_v35 = vpop.permute.xlu2 %394 }
  0xbf   :  { %620 = vrot.lane.b32.xlu1 %v607_v36, %s6401_s15  ;;  %618 = vrot.lane.b32.xlu0 %v606_v37, %s6401_s15 }
  0xc0   :  { %622 = vrot.lane.b32.xlu2 %v608_v38, %s6401_s15 }
  0xc1   :  { %v6817_v42 = vpop.permute.xlu1 %355  ;;  %v6819_v43 = vpop.permute.xlu0 %351 }
  0xc2   :  { %v6821_v44 = vpop.permute.xlu2 %400 }
  0xc3   :  { %9486 = vst [vmem:[#allocation67_spill] sm:$0xff] %v6821_v44 }
  0xc7   :  { %626 = vrot.lane.b32.xlu1 %v610_v45, %s6401_s15  ;;  %624 = vrot.lane.b32.xlu0 %v609_v46, %s6401_s15  ;;  %v684_v45 = vmul.f32 %v682_v63, %v6719_v40  ;;  %v683_v46 = vmul.f32 %v682_v63, %v6699_v33 }
  0xc8   :  { %628 = vrot.lane.b32.xlu2 %v611_v47, %s6401_s15  ;;  %v685_v47 = vmul.f32 %v682_v63, %v6694_v32  ;;  %s5308_s15 = sld [smem:[#allocation15 + $0x3a]] }
  0xc9   :  { %v6829_v49 = vpop.permute.xlu1 %357  ;;  %v6831_v50 = vpop.permute.xlu0 %353 }
  0xca   :  { %v6833_v51 = vpop.permute.xlu2 %432 }
  0xcb   :  { %9487 = vst [vmem:[#allocation68_spill] sm:$0xff] %v6833_v51 }
  0xcf   :  { %658 = vrot.lane.b32.xlu1 %v645_v52, %s6402_s28  ;;  %656 = vrot.lane.b32.xlu0 %v644_v53, %s6402_s28 }
  0xd0   :  { %660 = vrot.lane.b32.xlu2 %v646_v54, %s6402_s28  ;;  %v687_v54 = vmul.f32 %v682_v63, %v6704_v34 }
  0xd1   :  { %v6841_v56 = vpop.permute.xlu1 %392  ;;  %v6843_v57 = vpop.permute.xlu0 %390 }
  0xd2   :  { %v6845_v58 = vpop.permute.xlu2 %438 }
  0xd3   :  { %9488 = vst [vmem:[#allocation69_spill] sm:$0xff] %v6845_v58 }
  0xd7   :  { %664 = vrot.lane.b32.xlu1 %v648_v60, %s6402_s28  ;;  %662 = vrot.lane.b32.xlu0 %v647_v61, %s6402_s28  ;;  %v686_v60 = vmul.f32 %v682_v63, %v6714_v39  ;;  %v688_v61 = vmul.f32 %v682_v63, %v6725_v41 }
  0xd8   :  { %666 = vrot.lane.b32.xlu2 %v649_v62, %s6402_s28  ;;  %v720_v62 = vstv %s5303_s0  ;;  %s5333_s0 = sld [smem:[#allocation15 + $0x6]] }
  0xd9   :  { %v6853_v36 = vpop.permute.xlu1 %398  ;;  %v6855_v37 = vpop.permute.xlu0 %396  ;;  %v722_v8 = vmul.f32 %v720_v62, %v6719_v40  ;;  %v721_v24 = vmul.f32 %v720_v62, %v6699_v33  ;;  %v723_v0 = vmul.f32 %v720_v62, %v6694_v32  ;;  %v724_v16 = vmul.f32 %v720_v62, %v6714_v39 }
  0xda   :  { %9489 = vst [vmem:[#allocation70_spill] sm:$0xff] %v6853_v36  ;;  %v6857_v38 = vpop.permute.xlu2 %470  ;;  %v726_v9 = vmul.f32 %v720_v62, %v6725_v41 }
  0xdb   :  { %9490 = vst [vmem:[#allocation71_spill] sm:$0xff] %v6855_v37 }
  0xdc   :  { %9491 = vst [vmem:[#allocation72_spill] sm:$0xff] %v6857_v38 }
  0xdf   :  { %697 = vrot.lane.b32.xlu1 %v684_v45, %s6402_s28  ;;  %695 = vrot.lane.b32.xlu0 %v683_v46, %s6402_s28 }
  0xe0   :  { %699 = vrot.lane.b32.xlu2 %v685_v47, %s6402_s28 }
  0xe1   :  { %v6865_v48 = vpop.permute.xlu1 %430  ;;  %v6867_v52 = vpop.permute.xlu0 %428 }
  0xe2   :  { %9492 = vst [vmem:[#allocation73_spill] sm:$0xff] %v6865_v48  ;;  %v6869_v53 = vpop.permute.xlu2 %476 }
  0xe3   :  { %9493 = vst [vmem:[#allocation74_spill] sm:$0xff] %v6867_v52 }
  0xe4   :  { %9494 = vst [vmem:[#allocation75_spill] sm:$0xff] %v6869_v53 }
  0xe7   :  { %703 = vrot.lane.b32.xlu1 %v687_v54, %s6402_s28  ;;  %701 = vrot.lane.b32.xlu0 %v686_v60, %s6402_s28 }
  0xe8   :  { %705 = vrot.lane.b32.xlu2 %v688_v61, %s6402_s28  ;;  %v725_v61 = vmul.f32 %v720_v62, %v6704_v34 }
  0xe9   :  { %v6877_v45 = vpop.permute.xlu1 %436  ;;  %v6879_v46 = vpop.permute.xlu0 %434 }
  0xea   :  { %9495 = vst [vmem:[#allocation76_spill] sm:$0xff] %v6877_v45  ;;  %v6881_v47 = vpop.permute.xlu2 %508 }
  0xeb   :  { %9496 = vst [vmem:[#allocation77_spill] sm:$0xff] %v6879_v46 }
  0xec   :  { %9497 = vst [vmem:[#allocation78_spill] sm:$0xff] %v6881_v47 }
  0xef   :  { %735 = vrot.lane.b32.xlu1 %v722_v8, %s6402_s28  ;;  %733 = vrot.lane.b32.xlu0 %v721_v24, %s6402_s28  ;;  %v758_v8 = vstv %s5304_s30  ;;  %s5341_s30 = sld [smem:[#allocation15 + $0x7]] }
  0xf0   :  { %737 = vrot.lane.b32.xlu2 %v723_v0, %s6402_s28  ;;  %v760_v1 = vmul.f32 %v758_v8, %v6719_v40  ;;  %v759_v17 = vmul.f32 %v758_v8, %v6699_v33  ;;  %v761_v10 = vmul.f32 %v758_v8, %v6694_v32  ;;  %v762_v26 = vmul.f32 %v758_v8, %v6714_v39 }
  0xf1   :  { %v6889_v63 = vpop.permute.xlu1 %468  ;;  %v6891_v54 = vpop.permute.xlu0 %466  ;;  %v764_v2 = vmul.f32 %v758_v8, %v6725_v41 }
  0xf2   :  { %9498 = vst [vmem:[#allocation79_spill] sm:$0xff] %v6889_v63  ;;  %v6893_v60 = vpop.permute.xlu2 %514 }
  0xf3   :  { %9499 = vst [vmem:[#allocation80_spill] sm:$0xff] %v6891_v54 }
  0xf4   :  { %9500 = vst [vmem:[#allocation81_spill] sm:$0xff] %v6893_v60 }
  0xf7   :  { %741 = vrot.lane.b32.xlu1 %v725_v61, %s6402_s28  ;;  %739 = vrot.lane.b32.xlu0 %v724_v16, %s6402_s28  ;;  %v763_v61 = vmul.f32 %v758_v8, %v6704_v34 }
  0xf8   :  { %743 = vrot.lane.b32.xlu2 %v726_v9, %s6402_s28 }
  0xf9   :  { %v6901_v0 = vpop.permute.xlu1 %474  ;;  %v6903_v24 = vpop.permute.xlu0 %472 }
  0xfa   :  { %9501 = vst [vmem:[#allocation82_spill] sm:$0xff] %v6901_v0  ;;  %v6905_v25 = vpop.permute.xlu2 %546 }
  0xfb   :  { %9502 = vst [vmem:[#allocation83_spill] sm:$0xff] %v6903_v24 }
  0xfc   :  { %9503 = vst [vmem:[#allocation84_spill] sm:$0xff] %v6905_v25 }
  0xff   :  { %773 = vrot.lane.b32.xlu1 %v760_v1, %s6402_s28  ;;  %771 = vrot.lane.b32.xlu0 %v759_v17, %s6402_s28  ;;  %v796_v1 = vstv %s5305_s21  ;;  %s5321_s21 = sld [smem:[#allocation15 + $0x24]] }
 0x100   :  { %775 = vrot.lane.b32.xlu2 %v761_v10, %s6402_s28  ;;  %v798_v11 = vmul.f32 %v796_v1, %v6719_v40  ;;  %v797_v27 = vmul.f32 %v796_v1, %v6699_v33  ;;  %v799_v3 = vmul.f32 %v796_v1, %v6694_v32  ;;  %v800_v19 = vmul.f32 %v796_v1, %v6714_v39 }
 0x101   :  { %v6913_v9 = vpop.permute.xlu1 %506  ;;  %v6915_v16 = vpop.permute.xlu0 %504  ;;  %v802_v12 = vmul.f32 %v796_v1, %v6725_v41 }
 0x102   :  { %9504 = vst [vmem:[#allocation85_spill] sm:$0xff] %v6913_v9  ;;  %v6917_v62 = vpop.permute.xlu2 %552 }
 0x103   :  { %9505 = vst [vmem:[#allocation86_spill] sm:$0xff] %v6915_v16 }
 0x104   :  { %9506 = vst [vmem:[#allocation87_spill] sm:$0xff] %v6917_v62 }
 0x107   :  { %779 = vrot.lane.b32.xlu1 %v763_v61, %s6402_s28  ;;  %777 = vrot.lane.b32.xlu0 %v762_v26, %s6402_s28  ;;  %v801_v61 = vmul.f32 %v796_v1, %v6704_v34 }
 0x108   :  { %781 = vrot.lane.b32.xlu2 %v764_v2, %s6402_s28 }
 0x109   :  { %v6925_v10 = vpop.permute.xlu1 %512  ;;  %v6927_v17 = vpop.permute.xlu0 %510 }
 0x10a   :  { %9507 = vst [vmem:[#allocation88_spill] sm:$0xff] %v6925_v10  ;;  %v6929_v18 = vpop.permute.xlu2 %584 }
 0x10b   :  { %9508 = vst [vmem:[#allocation89_spill] sm:$0xff] %v6927_v17 }
 0x10c   :  { %9509 = vst [vmem:[#allocation90_spill] sm:$0xff] %v6929_v18 }
 0x10f   :  { %811 = vrot.lane.b32.xlu1 %v798_v11, %s6402_s28  ;;  %809 = vrot.lane.b32.xlu0 %v797_v27, %s6402_s28  ;;  %v834_v11 = vstv %s5306_s18  ;;  %s6407_s18 = smov 121  }
 0x110   :  { %813 = vrot.lane.b32.xlu2 %v799_v3, %s6402_s28  ;;  %v836_v4 = vmul.f32 %v834_v11, %v6719_v40  ;;  %v835_v20 = vmul.f32 %v834_v11, %v6699_v33  ;;  %v837_v13 = vmul.f32 %v834_v11, %v6694_v32  ;;  %v838_v29 = vmul.f32 %v834_v11, %v6714_v39 }
 0x111   :  { %v6937_v2 = vpop.permute.xlu1 %544  ;;  %v6939_v26 = vpop.permute.xlu0 %542  ;;  %v840_v5 = vmul.f32 %v834_v11, %v6725_v41 }
 0x112   :  { %9510 = vst [vmem:[#allocation91_spill] sm:$0xff] %v6937_v2  ;;  %v6941_v8 = vpop.permute.xlu2 %590 }
 0x113   :  { %9511 = vst [vmem:[#allocation92_spill] sm:$0xff] %v6939_v26 }
 0x114   :  { %9512 = vst [vmem:[#allocation93_spill] sm:$0xff] %v6941_v8 }
 0x117   :  { %817 = vrot.lane.b32.xlu1 %v801_v61, %s6402_s28  ;;  %815 = vrot.lane.b32.xlu0 %v800_v19, %s6402_s28  ;;  %v839_v61 = vmul.f32 %v834_v11, %v6704_v34 }
 0x118   :  { %819 = vrot.lane.b32.xlu2 %v802_v12, %s6402_s28 }
 0x119   :  { %v6949_v3 = vpop.permute.xlu1 %550  ;;  %v6951_v27 = vpop.permute.xlu0 %548 }
 0x11a   :  { %9513 = vst [vmem:[#allocation94_spill] sm:$0xff] %v6949_v3  ;;  %v6953_v28 = vpop.permute.xlu2 %622 }
 0x11b   :  { %9514 = vst [vmem:[#allocation95_spill] sm:$0xff] %v6951_v27 }
 0x11c   :  { %9515 = vst [vmem:[#allocation96_spill] sm:$0xff] %v6953_v28 }
 0x11f   :  { %849 = vrot.lane.b32.xlu1 %v836_v4, %s6402_s28  ;;  %847 = vrot.lane.b32.xlu0 %v835_v20, %s6402_s28  ;;  %v872_v4 = vstv %s5307_s22  ;;  %s5334_s22 = sld [smem:[#allocation15 + $0xe]] }
 0x120   :  { %851 = vrot.lane.b32.xlu2 %v837_v13, %s6402_s28  ;;  %v874_v14 = vmul.f32 %v872_v4, %v6719_v40  ;;  %v873_v30 = vmul.f32 %v872_v4, %v6699_v33  ;;  %v875_v6 = vmul.f32 %v872_v4, %v6694_v32  ;;  %v876_v22 = vmul.f32 %v872_v4, %v6714_v39 }
 0x121   :  { %v6961_v12 = vpop.permute.xlu1 %582  ;;  %v6963_v19 = vpop.permute.xlu0 %580  ;;  %v878_v15 = vmul.f32 %v872_v4, %v6725_v41 }
 0x122   :  { %9516 = vst [vmem:[#allocation97_spill] sm:$0xff] %v6961_v12  ;;  %v6965_v1 = vpop.permute.xlu2 %628 }
 0x123   :  { %9517 = vst [vmem:[#allocation98_spill] sm:$0xff] %v6963_v19 }
 0x124   :  { %9518 = vst [vmem:[#allocation99_spill] sm:$0xff] %v6965_v1 }
 0x127   :  { %855 = vrot.lane.b32.xlu1 %v839_v61, %s6402_s28  ;;  %853 = vrot.lane.b32.xlu0 %v838_v29, %s6402_s28  ;;  %v877_v61 = vmul.f32 %v872_v4, %v6704_v34 }
 0x128   :  { %857 = vrot.lane.b32.xlu2 %v840_v5, %s6402_s28 }
 0x129   :  { %v6973_v13 = vpop.permute.xlu1 %588  ;;  %v6975_v20 = vpop.permute.xlu0 %586 }
 0x12a   :  { %9519 = vst [vmem:[#allocation100_spill] sm:$0xff] %v6973_v13  ;;  %v6977_v21 = vpop.permute.xlu2 %660 }
 0x12b   :  { %9520 = vst [vmem:[#allocation101_spill] sm:$0xff] %v6975_v20 }
 0x12f   :  { %887 = vrot.lane.b32.xlu1 %v874_v14, %s6402_s28  ;;  %885 = vrot.lane.b32.xlu0 %v873_v30, %s6402_s28  ;;  %v910_v14 = vstv %s5308_s15  ;;  %s5342_s15 = sld [smem:[#allocation15 + $0xf]] }
 0x130   :  { %889 = vrot.lane.b32.xlu2 %v875_v6, %s6402_s28  ;;  %v912_v7 = vmul.f32 %v910_v14, %v6719_v40  ;;  %v911_v23 = vmul.f32 %v910_v14, %v6699_v33  ;;  %v913_v1 = vmul.f32 %v910_v14, %v6694_v32 }
 0x131   :  { %v6985_v5 = vpop.permute.xlu1 %620  ;;  %v6987_v29 = vpop.permute.xlu0 %618 }
 0x132   :  { %9521 = vst [vmem:[#allocation102_spill] sm:$0xff] %v6985_v5  ;;  %v6989_v11 = vpop.permute.xlu2 %666 }
 0x133   :  { %9522 = vst [vmem:[#allocation103_spill] sm:$0xff] %v6987_v29 }
 0x137   :  { %893 = vrot.lane.b32.xlu1 %v877_v61, %s6402_s28  ;;  %891 = vrot.lane.b32.xlu0 %v876_v22, %s6402_s28  ;;  %v915_v61 = vmul.f32 %v910_v14, %v6704_v34 }
 0x138   :  { %895 = vrot.lane.b32.xlu2 %v878_v15, %s6402_s28 }
 0x139   :  { %v6997_v6 = vpop.permute.xlu1 %626  ;;  %v6999_v30 = vpop.permute.xlu0 %624 }
 0x13a   :  { %9523 = vst [vmem:[#allocation104_spill] sm:$0xff] %v6997_v6  ;;  %v7001_v31 = vpop.permute.xlu2 %699  ;;  %v916_v6 = vmul.f32 %v910_v14, %v6725_v41 }
 0x13b   :  { %9524 = vst [vmem:[#allocation105_spill] sm:$0xff] %v6999_v30  ;;  %v914_v30 = vmul.f32 %v910_v14, %v6714_v39 }
 0x13f   :  { %925 = vrot.lane.b32.xlu1 %v912_v7, %s6402_s28  ;;  %923 = vrot.lane.b32.xlu0 %v911_v23, %s6402_s28  ;;  %v948_v7 = vstv %s5309_s20  ;;  %s5335_s20 = sld [smem:[#allocation15 + $0x16]] }
 0x140   :  { %927 = vrot.lane.b32.xlu2 %v913_v1, %s6402_s28  ;;  %v950_v5 = vmul.f32 %v948_v7, %v6719_v40  ;;  %v949_v28 = vmul.f32 %v948_v7, %v6699_v33  ;;  %v951_v20 = vmul.f32 %v948_v7, %v6694_v32  ;;  %v952_v13 = vmul.f32 %v948_v7, %v6714_v39 }
 0x141   :  { %v7009_v15 = vpop.permute.xlu1 %658  ;;  %v7011_v22 = vpop.permute.xlu0 %656  ;;  %v954_v8 = vmul.f32 %v948_v7, %v6725_v41 }
 0x142   :  { %v7013_v4 = vpop.permute.xlu2 %705 }
 0x143   :  { %9525 = vst [vmem:[#allocation106_spill] sm:$0xff] %v7013_v4 }
 0x147   :  { %931 = vrot.lane.b32.xlu1 %v915_v61, %s6402_s28  ;;  %929 = vrot.lane.b32.xlu0 %v914_v30, %s6402_s28  ;;  %v953_v61 = vmul.f32 %v948_v7, %v6704_v34 }
 0x148   :  { %933 = vrot.lane.b32.xlu2 %v916_v6, %s6402_s28  ;;  %s5330_s28 = sld [smem:[#allocation15 + $0x2d]] }
 0x149   :  { %v7021_v23 = vpop.permute.xlu1 %664  ;;  %v7023_v1 = vpop.permute.xlu0 %662 }
 0x14a   :  { %v7025_v29 = vpop.permute.xlu2 %737 }
 0x14b   :  { %9526 = vst [vmem:[#allocation107_spill] sm:$0xff] %v7025_v29 }
 0x14f   :  { %963 = vrot.lane.b32.xlu1 %v950_v5, %s6403_s14  ;;  %961 = vrot.lane.b32.xlu0 %v949_v28, %s6403_s14  ;;  %v987_v28 = vstv %s5310_s1  ;;  %s5350_s1 = sld [smem:[#allocation16 + $0x2]] }
 0x150   :  { %965 = vrot.lane.b32.xlu2 %v951_v20, %s6403_s14  ;;  %v989_v12 = vmul.f32 %v987_v28, %v6719_v40  ;;  %v988_v18 = vmul.f32 %v987_v28, %v6699_v33  ;;  %v990_v27 = vmul.f32 %v987_v28, %v6694_v32  ;;  %v991_v3 = vmul.f32 %v987_v28, %v6714_v39 }
 0x151   :  { %v7033_v14 = vpop.permute.xlu1 %697  ;;  %v7035_v6 = vpop.permute.xlu0 %695  ;;  %v993_v62 = vmul.f32 %v987_v28, %v6725_v41 }
 0x152   :  { %v7037_v30 = vpop.permute.xlu2 %743 }
 0x153   :  { %9527 = vst [vmem:[#allocation108_spill] sm:$0xff] %v7037_v30 }
 0x157   :  { %969 = vrot.lane.b32.xlu1 %v953_v61, %s6403_s14  ;;  %967 = vrot.lane.b32.xlu0 %v952_v13, %s6403_s14  ;;  %v992_v61 = vmul.f32 %v987_v28, %v6704_v34 }
 0x158   :  { %971 = vrot.lane.b32.xlu2 %v954_v8, %s6403_s14 }
 0x159   :  { %v7045_v20 = vpop.permute.xlu1 %703  ;;  %v7047_v5 = vpop.permute.xlu0 %701 }
 0x15a   :  { %9528 = vst [vmem:[#allocation109_spill] sm:$0xff] %v7045_v20  ;;  %v7049_v19 = vpop.permute.xlu2 %775 }
 0x15b   :  { %9529 = vst [vmem:[#allocation110_spill] sm:$0xff] %v7047_v5 }
 0x15c   :  { %9530 = vst [vmem:[#allocation111_spill] sm:$0xff] %v7049_v19 }
 0x15f   :  { %1002 = vrot.lane.b32.xlu1 %v989_v12, %s6403_s14  ;;  %1000 = vrot.lane.b32.xlu0 %v988_v18, %s6403_s14  ;;  %v1025_v18 = vstv %s5311_s2  ;;  %s5322_s2 = sld [smem:[#allocation15 + $0x2c]] }
 0x160   :  { %1004 = vrot.lane.b32.xlu2 %v990_v27, %s6403_s14  ;;  %v1027_v2 = vmul.f32 %v1025_v18, %v6719_v40  ;;  %v1026_v25 = vmul.f32 %v1025_v18, %v6699_v33  ;;  %v1028_v17 = vmul.f32 %v1025_v18, %v6694_v32  ;;  %v1029_v10 = vmul.f32 %v1025_v18, %v6714_v39 }
 0x161   :  { %v7057_v8 = vpop.permute.xlu1 %735  ;;  %v7059_v13 = vpop.permute.xlu0 %733  ;;  %v1031_v60 = vmul.f32 %v1025_v18, %v6725_v41 }
 0x162   :  { %9531 = vst [vmem:[#allocation112_spill] sm:$0xff] %v7057_v8  ;;  %v7061_v7 = vpop.permute.xlu2 %781 }
 0x163   :  { %9532 = vst [vmem:[#allocation113_spill] sm:$0xff] %v7059_v13 }
 0x164   :  { %9533 = vst [vmem:[#allocation114_spill] sm:$0xff] %v7061_v7 }
 0x167   :  { %1008 = vrot.lane.b32.xlu1 %v992_v61, %s6403_s14  ;;  %1006 = vrot.lane.b32.xlu0 %v991_v3, %s6403_s14  ;;  %v1030_v61 = vmul.f32 %v1025_v18, %v6704_v34 }
 0x168   :  { %1010 = vrot.lane.b32.xlu2 %v993_v62, %s6403_s14 }
 0x169   :  { %v7069_v27 = vpop.permute.xlu1 %741  ;;  %v7071_v12 = vpop.permute.xlu0 %739 }
 0x16a   :  { %9534 = vst [vmem:[#allocation115_spill] sm:$0xff] %v7069_v27  ;;  %v7073_v26 = vpop.permute.xlu2 %813 }
 0x16b   :  { %9535 = vst [vmem:[#allocation116_spill] sm:$0xff] %v7071_v12 }
 0x16c   :  { %9536 = vst [vmem:[#allocation117_spill] sm:$0xff] %v7073_v26 }
 0x16f   :  { %1040 = vrot.lane.b32.xlu1 %v1027_v2, %s6403_s14  ;;  %1038 = vrot.lane.b32.xlu0 %v1026_v25, %s6403_s14  ;;  %v1063_v25 = vstv %s5312_s23  ;;  %s9660_s23 = sld [smem:[#allocation248_spill]] }
 0x170   :  { %1042 = vrot.lane.b32.xlu2 %v1028_v17, %s6403_s14  ;;  %v1064_v16 = vmul.f32 %v1063_v25, %v6699_v33  ;;  %v1066_v9 = vmul.f32 %v1063_v25, %v6694_v32  ;;  %v1069_v47 = vmul.f32 %v1063_v25, %v6725_v41 }
 0x171   :  { %v7081_v62 = vpop.permute.xlu1 %773  ;;  %v7083_v3 = vpop.permute.xlu0 %771 }
 0x172   :  { %9537 = vst [vmem:[#allocation118_spill] sm:$0xff] %v7081_v62  ;;  %v7085_v28 = vpop.permute.xlu2 %819 }
 0x173   :  { %9538 = vst [vmem:[#allocation119_spill] sm:$0xff] %v7083_v3 }
 0x174   :  { %9539 = vst [vmem:[#allocation120_spill] sm:$0xff] %v7085_v28  ;;  %v1065_v28 = vmul.f32 %v1063_v25, %v6719_v40 }
 0x177   :  { %1046 = vrot.lane.b32.xlu1 %v1030_v61, %s6403_s14  ;;  %1044 = vrot.lane.b32.xlu0 %v1029_v10, %s6403_s14  ;;  %v1068_v61 = vmul.f32 %v1063_v25, %v6704_v34 }
 0x178   :  { %1048 = vrot.lane.b32.xlu2 %v1031_v60, %s6403_s14 }
 0x179   :  { %v7093_v17 = vpop.permute.xlu1 %779  ;;  %v7095_v2 = vpop.permute.xlu0 %777 }
 0x17a   :  { %9540 = vst [vmem:[#allocation121_spill] sm:$0xff] %v7093_v17  ;;  %v7097_v26 = vpop.permute.xlu2 %851 }
 0x17b   :  { %9541 = vst [vmem:[#allocation122_spill] sm:$0xff] %v7095_v2 }
 0x17c   :  { %9542 = vst [vmem:[#allocation123_spill] sm:$0xff] %v7097_v26  ;;  %v1067_v26 = vmul.f32 %v1063_v25, %v6714_v39 }
 0x17f   :  { %1078 = vrot.lane.b32.xlu1 %v1065_v28, %s6403_s14  ;;  %1076 = vrot.lane.b32.xlu0 %v1064_v16, %s6403_s14  ;;  %v1101_v16 = vstv %s5313_s25  ;;  %s8262_s25 = sld [smem:[#allocation15 + $0x18]] }
 0x180   :  { %1080 = vrot.lane.b32.xlu2 %v1066_v9, %s6403_s14  ;;  %v1104_v2 = vmul.f32 %v1101_v16, %v6694_v32 }
 0x181   :  { %v7105_v60 = vpop.permute.xlu1 %811  ;;  %v7107_v10 = vpop.permute.xlu0 %809 }
 0x182   :  { %9543 = vst [vmem:[#allocation124_spill] sm:$0xff] %v7105_v60  ;;  %v7109_v18 = vpop.permute.xlu2 %857  ;;  %v1102_v60 = vmul.f32 %v1101_v16, %v6699_v33 }
 0x183   :  { %9544 = vst [vmem:[#allocation125_spill] sm:$0xff] %v7107_v10 }
 0x184   :  { %9545 = vst [vmem:[#allocation126_spill] sm:$0xff] %v7109_v18  ;;  %v1103_v18 = vmul.f32 %v1101_v16, %v6719_v40 }
 0x187   :  { %1084 = vrot.lane.b32.xlu1 %v1068_v61, %s6403_s14  ;;  %1082 = vrot.lane.b32.xlu0 %v1067_v26, %s6403_s14  ;;  %v1106_v61 = vmul.f32 %v1101_v16, %v6704_v34 }
 0x188   :  { %1086 = vrot.lane.b32.xlu2 %v1069_v47, %s6403_s14 }
 0x189   :  { %v7117_v9 = vpop.permute.xlu1 %817  ;;  %v7119_v28 = vpop.permute.xlu0 %815 }
 0x18a   :  { %9546 = vst [vmem:[#allocation127_spill] sm:$0xff] %v7117_v9  ;;  %v7121_v10 = vpop.permute.xlu2 %889 }
 0x18b   :  { %9547 = vst [vmem:[#allocation128_spill] sm:$0xff] %v7119_v28  ;;  %v1107_v28 = vmul.f32 %v1101_v16, %v6725_v41 }
 0x18c   :  { %9548 = vst [vmem:[#allocation129_spill] sm:$0xff] %v7121_v10  ;;  %v1105_v10 = vmul.f32 %v1101_v16, %v6714_v39 }
 0x18f   :  { %1116 = vrot.lane.b32.xlu1 %v1103_v18, %s6403_s14  ;;  %1114 = vrot.lane.b32.xlu0 %v1102_v60, %s6403_s14  ;;  %v1139_v60 = vstv %s5314_s7  ;;  %s5323_s7 = sld [smem:[#allocation15 + $0x34]] }
 0x190   :  { %1118 = vrot.lane.b32.xlu2 %v1104_v2, %s6403_s14  ;;  %v1142_v9 = vmul.f32 %v1139_v60, %v6694_v32 }
 0x191   :  { %v7129_v47 = vpop.permute.xlu1 %849  ;;  %v7131_v26 = vpop.permute.xlu0 %847 }
 0x192   :  { %9549 = vst [vmem:[#allocation130_spill] sm:$0xff] %v7129_v47  ;;  %v7133_v25 = vpop.permute.xlu2 %895  ;;  %v1140_v47 = vmul.f32 %v1139_v60, %v6699_v33 }
 0x193   :  { %9550 = vst [vmem:[#allocation131_spill] sm:$0xff] %v7131_v26 }
 0x194   :  { %9551 = vst [vmem:[#allocation132_spill] sm:$0xff] %v7133_v25  ;;  %v1141_v25 = vmul.f32 %v1139_v60, %v6719_v40 }
 0x197   :  { %1122 = vrot.lane.b32.xlu1 %v1106_v61, %s6403_s14  ;;  %1120 = vrot.lane.b32.xlu0 %v1105_v10, %s6403_s14  ;;  %v1144_v61 = vmul.f32 %v1139_v60, %v6704_v34 }
 0x198   :  { %1124 = vrot.lane.b32.xlu2 %v1107_v28, %s6403_s14 }
 0x199   :  { %v7141_v2 = vpop.permute.xlu1 %855  ;;  %v7143_v18 = vpop.permute.xlu0 %853 }
 0x19a   :  { %9552 = vst [vmem:[#allocation133_spill] sm:$0xff] %v7141_v2  ;;  %v7145_v26 = vpop.permute.xlu2 %927 }
 0x19b   :  { %9553 = vst [vmem:[#allocation134_spill] sm:$0xff] %v7143_v18  ;;  %v1145_v18 = vmul.f32 %v1139_v60, %v6725_v41 }
 0x19c   :  { %9554 = vst [vmem:[#allocation135_spill] sm:$0xff] %v7145_v26  ;;  %v1143_v26 = vmul.f32 %v1139_v60, %v6714_v39 }
 0x19f   :  { %1154 = vrot.lane.b32.xlu1 %v1141_v25, %s6403_s14  ;;  %1152 = vrot.lane.b32.xlu0 %v1140_v47, %s6403_s14  ;;  %v1177_v47 = vstv %s5315_s24  ;;  %s5324_s24 = sld [smem:[#allocation15 + $0x3c]] }
 0x1a0   :  { %1156 = vrot.lane.b32.xlu2 %v1142_v9, %s6403_s14  ;;  %v1180_v2 = vmul.f32 %v1177_v47, %v6694_v32 }
 0x1a1   :  { %v7153_v10 = vpop.permute.xlu1 %887  ;;  %v7155_v16 = vpop.permute.xlu0 %885 }
 0x1a2   :  { %9555 = vst [vmem:[#allocation136_spill] sm:$0xff] %v7153_v10  ;;  %v7157_v28 = vpop.permute.xlu2 %933  ;;  %v1178_v10 = vmul.f32 %v1177_v47, %v6699_v33 }
 0x1a3   :  { %9556 = vst [vmem:[#allocation137_spill] sm:$0xff] %v7155_v16 }
 0x1a4   :  { %9557 = vst [vmem:[#allocation138_spill] sm:$0xff] %v7157_v28  ;;  %v1179_v28 = vmul.f32 %v1177_v47, %v6719_v40 }
 0x1a7   :  { %1160 = vrot.lane.b32.xlu1 %v1144_v61, %s6403_s14  ;;  %1158 = vrot.lane.b32.xlu0 %v1143_v26, %s6403_s14  ;;  %v1182_v61 = vmul.f32 %v1177_v47, %v6704_v34 }
 0x1a8   :  { %1162 = vrot.lane.b32.xlu2 %v1145_v18, %s6403_s14 }
 0x1a9   :  { %v7165_v9 = vpop.permute.xlu1 %893  ;;  %v7167_v25 = vpop.permute.xlu0 %891 }
 0x1aa   :  { %9558 = vst [vmem:[#allocation139_spill] sm:$0xff] %v7165_v9  ;;  %v7169_v16 = vpop.permute.xlu2 %965  ;;  %v1183_v9 = vmul.f32 %v1177_v47, %v6725_v41 }
 0x1ab   :  { %9559 = vst [vmem:[#allocation140_spill] sm:$0xff] %v7167_v25  ;;  %v1181_v25 = vmul.f32 %v1177_v47, %v6714_v39 }
 0x1af   :  { %1192 = vrot.lane.b32.xlu1 %v1179_v28, %s6403_s14  ;;  %1190 = vrot.lane.b32.xlu0 %v1178_v10, %s6403_s14  ;;  %v1215_v10 = vstv %s5316_s3  ;;  %s5325_s3 = sld [smem:[#allocation15 + $0x5]] }
 0x1b0   :  { %1194 = vrot.lane.b32.xlu2 %v1180_v2, %s6403_s14  ;;  %v1216_v17 = vmul.f32 %v1215_v10, %v6699_v33  ;;  %v1218_v7 = vmul.f32 %v1215_v10, %v6694_v32 }
 0x1b1   :  { %v7177_v26 = vpop.permute.xlu1 %925  ;;  %v7179_v60 = vpop.permute.xlu0 %923 }
 0x1b2   :  { %9560 = vst [vmem:[#allocation141_spill] sm:$0xff] %v7177_v26  ;;  %v7181_v18 = vpop.permute.xlu2 %971  ;;  %v1217_v26 = vmul.f32 %v1215_v10, %v6719_v40 }
 0x1b3   :  { %9561 = vst [vmem:[#allocation142_spill] sm:$0xff] %v7179_v60 }
 0x1b7   :  { %1198 = vrot.lane.b32.xlu1 %v1182_v61, %s6403_s14  ;;  %1196 = vrot.lane.b32.xlu0 %v1181_v25, %s6403_s14  ;;  %v1220_v61 = vmul.f32 %v1215_v10, %v6704_v34 }
 0x1b8   :  { %1200 = vrot.lane.b32.xlu2 %v1183_v9, %s6403_s14 }
 0x1b9   :  { %v7189_v2 = vpop.permute.xlu1 %931  ;;  %v7191_v28 = vpop.permute.xlu0 %929 }
 0x1ba   :  { %9562 = vst [vmem:[#allocation143_spill] sm:$0xff] %v7189_v2  ;;  %v7193_v60 = vpop.permute.xlu2 %1004  ;;  %v1221_v2 = vmul.f32 %v1215_v10, %v6725_v41 }
 0x1bb   :  { %9563 = vst [vmem:[#allocation144_spill] sm:$0xff] %v7191_v28  ;;  %v1219_v28 = vmul.f32 %v1215_v10, %v6714_v39 }
 0x1bf   :  { %1230 = vrot.lane.b32.xlu1 %v1217_v26, %s6403_s14  ;;  %1228 = vrot.lane.b32.xlu0 %v1216_v17, %s6403_s14  ;;  %v1253_v17 = vstv %s5317_s26  ;;  %s6405_s26 = smov 123  }
 0x1c0   :  { %1232 = vrot.lane.b32.xlu2 %v1218_v7, %s6403_s14  ;;  %v1255_v0 = vmul.f32 %v1253_v17, %v6719_v40  ;;  %v1254_v53 = vmul.f32 %v1253_v17, %v6699_v33  ;;  %v1256_v3 = vmul.f32 %v1253_v17, %v6694_v32  ;;  %v1257_v62 = vmul.f32 %v1253_v17, %v6714_v39 }
 0x1c1   :  { %v7201_v47 = vpop.permute.xlu1 %963  ;;  %v7203_v9 = vpop.permute.xlu0 %961  ;;  %v1259_v19 = vmul.f32 %v1253_v17, %v6725_v41 }
 0x1c2   :  { %v7205_v25 = vpop.permute.xlu2 %1010 }
 0x1c3   :  { %9564 = vst [vmem:[#allocation145_spill] sm:$0xff] %v7205_v25 }
 0x1c7   :  { %1236 = vrot.lane.b32.xlu1 %v1220_v61, %s6403_s14  ;;  %1234 = vrot.lane.b32.xlu0 %v1219_v28, %s6403_s14  ;;  %v1258_v61 = vmul.f32 %v1253_v17, %v6704_v34 }
 0x1c8   :  { %1238 = vrot.lane.b32.xlu2 %v1221_v2, %s6403_s14  ;;  %s5343_s14 = sld [smem:[#allocation15 + $0x17]] }
 0x1c9   :  { %v7213_v7 = vpop.permute.xlu1 %969  ;;  %v7215_v26 = vpop.permute.xlu0 %967 }
 0x1ca   :  { %v7217_v24 = vpop.permute.xlu2 %1042 }
 0x1cb   :  { %9565 = vst [vmem:[#allocation146_spill] sm:$0xff] %v7217_v24 }
 0x1cf   :  { %1268 = vrot.lane.b32.xlu1 %v1255_v0, %s6404_s8  ;;  %1266 = vrot.lane.b32.xlu0 %v1254_v53, %s6404_s8  ;;  %v1292_v53 = vstv %s5318_s17  ;;  %s5326_s17 = sld [smem:[#allocation15 + $0xd]] }
 0x1d0   :  { %1270 = vrot.lane.b32.xlu2 %v1256_v3, %s6404_s8  ;;  %v1294_v63 = vmul.f32 %v1292_v53, %v6719_v40  ;;  %v1293_v38 = vmul.f32 %v1292_v53, %v6699_v33  ;;  %v1298_v12 = vmul.f32 %v1292_v53, %v6725_v41 }
 0x1d1   :  { %v7225_v10 = vpop.permute.xlu1 %1002  ;;  %v7227_v2 = vpop.permute.xlu0 %1000 }
 0x1d2   :  { %v7229_v28 = vpop.permute.xlu2 %1048 }
 0x1d3   :  { %9566 = vst [vmem:[#allocation147_spill] sm:$0xff] %v7229_v28  ;;  %v1295_v28 = vmul.f32 %v1292_v53, %v6694_v32 }
 0x1d7   :  { %1274 = vrot.lane.b32.xlu1 %v1258_v61, %s6404_s8  ;;  %1272 = vrot.lane.b32.xlu0 %v1257_v62, %s6404_s8  ;;  %v1297_v61 = vmul.f32 %v1292_v53, %v6704_v34 }
 0x1d8   :  { %1276 = vrot.lane.b32.xlu2 %v1259_v19, %s6404_s8 }
 0x1d9   :  { %v7237_v0 = vpop.permute.xlu1 %1008  ;;  %v7239_v3 = vpop.permute.xlu0 %1006 }
 0x1da   :  { %9567 = vst [vmem:[#allocation148_spill] sm:$0xff] %v7237_v0  ;;  %v7241_v54 = vpop.permute.xlu2 %1080 }
 0x1db   :  { %9568 = vst [vmem:[#allocation149_spill] sm:$0xff] %v7239_v3 }
 0x1dc   :  { %9569 = vst [vmem:[#allocation150_spill] sm:$0xff] %v7241_v54  ;;  %v1296_v54 = vmul.f32 %v1292_v53, %v6714_v39 }
 0x1df   :  { %1307 = vrot.lane.b32.xlu1 %v1294_v63, %s6404_s8  ;;  %1305 = vrot.lane.b32.xlu0 %v1293_v38, %s6404_s8  ;;  %v1330_v38 = vstv %s5319_s19  ;;  %s5328_s19 = sld [smem:[#allocation15 + $0x1d]] }
 0x1e0   :  { %1309 = vrot.lane.b32.xlu2 %v1295_v28, %s6404_s8  ;;  %v1331_v30 = vmul.f32 %v1330_v38, %v6699_v33  ;;  %v1333_v46 = vmul.f32 %v1330_v38, %v6694_v32  ;;  %v1336_v33 = vmul.f32 %v1330_v38, %v6725_v41  ;;  %v1368_v32 = vstv %s5320_s27  ;;  %s5329_s27 = sld [smem:[#allocation15 + $0x25]] }
 0x1e1   :  { %v7249_v19 = vpop.permute.xlu1 %1040  ;;  %v7251_v62 = vpop.permute.xlu0 %1038 }
 0x1e2   :  { %9570 = vst [vmem:[#allocation151_spill] sm:$0xff] %v7249_v19  ;;  %v7253_v17 = vpop.permute.xlu2 %1086 }
 0x1e3   :  { %9571 = vst [vmem:[#allocation152_spill] sm:$0xff] %v7251_v62 }
 0x1e4   :  { %9572 = vst [vmem:[#allocation153_spill] sm:$0xff] %v7253_v17  ;;  %v1332_v17 = vmul.f32 %v1330_v38, %v6719_v40 }
 0x1e7   :  { %1313 = vrot.lane.b32.xlu1 %v1297_v61, %s6404_s8  ;;  %1311 = vrot.lane.b32.xlu0 %v1296_v54, %s6404_s8  ;;  %v1335_v61 = vmul.f32 %v1330_v38, %v6704_v34  ;;  %v7295_v34 = vld [vmem:[%s9485_s6] sm:$0xff] }
 0x1e8   :  { %1315 = vrot.lane.b32.xlu2 %v1298_v12, %s6404_s8 }
 0x1e9   :  { %v7261_v63 = vpop.permute.xlu1 %1046  ;;  %v7263_v28 = vpop.permute.xlu0 %1044 }
 0x1ea   :  { %9573 = vst [vmem:[#allocation154_spill] sm:$0xff] %v7261_v63  ;;  %v7265_v27 = vpop.permute.xlu2 %1118 }
 0x1eb   :  { %9574 = vst [vmem:[#allocation155_spill] sm:$0xff] %v7263_v28 }
 0x1ec   :  { %9575 = vst [vmem:[#allocation156_spill] sm:$0xff] %v7265_v27  ;;  %v1334_v27 = vmul.f32 %v1330_v38, %v6714_v39  ;;  %v1369_v39 = vmul.f32 %v7295_v34, %v1368_v32 }
 0x1ef   :  { %1345 = vrot.lane.b32.xlu1 %v1332_v17, %s6404_s8  ;;  %1343 = vrot.lane.b32.xlu0 %v1331_v30, %s6404_s8 }
 0x1f0   :  { %1347 = vrot.lane.b32.xlu2 %v1333_v46, %s6404_s8 }
 0x1f1   :  { %v7273_v54 = vpop.permute.xlu1 %1078  ;;  %v7275_v12 = vpop.permute.xlu0 %1076 }
 0x1f2   :  { %9576 = vst [vmem:[#allocation157_spill] sm:$0xff] %v7273_v54  ;;  %v7277_v53 = vpop.permute.xlu2 %1124  ;;  %v7357_v54 = vld [vmem:[%s9485_s6 + $0x28] sm:$0xff] }
 0x1f3   :  { %9577 = vst [vmem:[#allocation158_spill] sm:$0xff] %v7275_v12  ;;  %v7338_v12 = vld [vmem:[%s9485_s6 + $0x8] sm:$0xff] }
 0x1f4   :  { %9578 = vst [vmem:[#allocation159_spill] sm:$0xff] %v7277_v53  ;;  %v1370_v53 = vmul.f32 %v1368_v32, %v6719_v40 }
 0x1f7   :  { %1351 = vrot.lane.b32.xlu1 %v1335_v61, %s6404_s8  ;;  %1349 = vrot.lane.b32.xlu0 %v1334_v27, %s6404_s8  ;;  %v7301_v27 = vld [vmem:[%s9485_s6 + $0x10] sm:$0xff] }
 0x1f8   :  { %1353 = vrot.lane.b32.xlu2 %v1336_v33, %s6404_s8  ;;  %v1371_v38 = vmul.f32 %v7301_v27, %v1368_v32 }
 0x1f9   :  { %v7285_v46 = vpop.permute.xlu1 %1084  ;;  %v7287_v30 = vpop.permute.xlu0 %1082 }
 0x1fa   :  { %9579 = vst [vmem:[#allocation160_spill] sm:$0xff] %v7285_v46  ;;  %v7289_v17 = vpop.permute.xlu2 %1156 }
 0x1fb   :  { %9580 = vst [vmem:[#allocation161_spill] sm:$0xff] %v7287_v30 }
 0x1fc   :  { %9581 = vst [vmem:[#allocation162_spill] sm:$0xff] %v7289_v17  ;;  %v7316_v17 = vld [vmem:[%s9485_s6 + $0x20] sm:$0xff] }
 0x1fd   :  { %v1373_v30 = vmul.f32 %v7316_v17, %v1368_v32 }
 0x1ff   :  { %1383 = vrot.lane.b32.xlu1 %v1370_v53, %s6404_s8  ;;  %1381 = vrot.lane.b32.xlu0 %v1369_v39, %s6404_s8  ;;  %v7322_v53 = vld [vmem:[%s9485_s6 + $0x18] sm:$0xff] }
 0x200   :  { %1385 = vrot.lane.b32.xlu2 %v1371_v38, %s6404_s8  ;;  %v1372_v39 = vmul.f32 %v7322_v53, %v1368_v32  ;;  %v1374_v38 = vmul.f32 %v1368_v32, %v6725_v41 }
 0x201   :  { %v7307_v40 = vpop.permute.xlu1 %1116  ;;  %v7309_v61 = vpop.permute.xlu0 %1114 }
 0x202   :  { %9582 = vst [vmem:[#allocation163_spill] sm:$0xff] %v7307_v40  ;;  %v7311_v33 = vpop.permute.xlu2 %1162 }
 0x203   :  { %9583 = vst [vmem:[#allocation164_spill] sm:$0xff] %v7309_v61 }
 0x204   :  { %9584 = vst [vmem:[#allocation165_spill] sm:$0xff] %v7311_v33  ;;  %v1406_v33 = vstv %s5321_s21  ;;  %s6406_s21 = smov 122  }
 0x205   :  { %v1408_v41 = vmul.f32 %v7338_v12, %v1406_v33  ;;  %v1407_v32 = vmul.f32 %v7295_v34, %v1406_v33 }
 0x207   :  { %1389 = vrot.lane.b32.xlu1 %v1373_v30, %s6404_s8  ;;  %1387 = vrot.lane.b32.xlu0 %v1372_v39, %s6404_s8  ;;  %v1409_v30 = vmul.f32 %v7301_v27, %v1406_v33 }
 0x208   :  { %1391 = vrot.lane.b32.xlu2 %v1374_v38, %s6404_s8 }
 0x209   :  { %v7329_v61 = vpop.permute.xlu1 %1122  ;;  %v7331_v40 = vpop.permute.xlu0 %1120 }
 0x20a   :  { %9585 = vst [vmem:[#allocation166_spill] sm:$0xff] %v7329_v61  ;;  %v7333_v46 = vpop.permute.xlu2 %1194  ;;  %v1410_v61 = vmul.f32 %v7322_v53, %v1406_v33 }
 0x20b   :  { %9586 = vst [vmem:[#allocation167_spill] sm:$0xff] %v7331_v40  ;;  %v1411_v40 = vmul.f32 %v7316_v17, %v1406_v33 }
 0x20c   :  { %9587 = vst [vmem:[#allocation168_spill] sm:$0xff] %v7333_v46 }
 0x20f   :  { %1421 = vrot.lane.b32.xlu1 %v1408_v41, %s6404_s8  ;;  %1419 = vrot.lane.b32.xlu0 %v1407_v32, %s6404_s8  ;;  %v1412_v41 = vmul.f32 %v7357_v54, %v1406_v33  ;;  %v1444_v32 = vstv %s5322_s2  ;;  %s8240_s2 = sld [smem:[#allocation15 + $0x37]] }
 0x210   :  { %1423 = vrot.lane.b32.xlu2 %v1409_v30, %s6404_s8  ;;  %v1445_v28 = vmul.f32 %v7295_v34, %v1444_v32  ;;  %v1447_v63 = vmul.f32 %v7301_v27, %v1444_v32 }
 0x211   :  { %v7346_v39 = vpop.permute.xlu1 %1154  ;;  %v7348_v38 = vpop.permute.xlu0 %1152 }
 0x212   :  { %9588 = vst [vmem:[#allocation169_spill] sm:$0xff] %v7346_v39  ;;  %v7350_v46 = vpop.permute.xlu2 %1200  ;;  %v1446_v39 = vmul.f32 %v7338_v12, %v1444_v32 }
 0x213   :  { %9589 = vst [vmem:[#allocation170_spill] sm:$0xff] %v7348_v38 }
 0x214   :  { %9590 = vst [vmem:[#allocation171_spill] sm:$0xff] %v7350_v46 }
 0x217   :  { %1427 = vrot.lane.b32.xlu1 %v1411_v40, %s6404_s8  ;;  %1425 = vrot.lane.b32.xlu0 %v1410_v61, %s6404_s8 }
 0x218   :  { %1429 = vrot.lane.b32.xlu2 %v1412_v41, %s6404_s8  ;;  %v1449_v41 = vmul.f32 %v7316_v17, %v1444_v32 }
 0x219   :  { %v7363_v30 = vpop.permute.xlu1 %1160  ;;  %v7365_v46 = vpop.permute.xlu0 %1158 }
 0x21a   :  { %9591 = vst [vmem:[#allocation172_spill] sm:$0xff] %v7363_v30  ;;  %v7367_v38 = vpop.permute.xlu2 %1232 }
 0x21b   :  { %9592 = vst [vmem:[#allocation173_spill] sm:$0xff] %v7365_v46  ;;  %v1450_v46 = vmul.f32 %v7357_v54, %v1444_v32 }
 0x21c   :  { %9593 = vst [vmem:[#allocation174_spill] sm:$0xff] %v7367_v38  ;;  %v1448_v38 = vmul.f32 %v7322_v53, %v1444_v32 }
 0x21f   :  { %1459 = vrot.lane.b32.xlu1 %v1446_v39, %s6404_s8  ;;  %1457 = vrot.lane.b32.xlu0 %v1445_v28, %s6404_s8  ;;  %v1482_v28 = vstv %s5323_s7  ;;  %s5332_s7 = sld [smem:[#allocation15 + $0x3d]] }
 0x220   :  { %1461 = vrot.lane.b32.xlu2 %v1447_v63, %s6404_s8  ;;  %v1485_v30 = vmul.f32 %v7301_v27, %v1482_v28 }
 0x221   :  { %v7375_v40 = vpop.permute.xlu1 %1192  ;;  %v7377_v61 = vpop.permute.xlu0 %1190 }
 0x222   :  { %9594 = vst [vmem:[#allocation175_spill] sm:$0xff] %v7375_v40  ;;  %v7379_v33 = vpop.permute.xlu2 %1238  ;;  %v1483_v40 = vmul.f32 %v7295_v34, %v1482_v28 }
 0x223   :  { %9595 = vst [vmem:[#allocation176_spill] sm:$0xff] %v7377_v61 }
 0x224   :  { %9596 = vst [vmem:[#allocation177_spill] sm:$0xff] %v7379_v33  ;;  %v1484_v33 = vmul.f32 %v7338_v12, %v1482_v28 }
 0x227   :  { %1465 = vrot.lane.b32.xlu1 %v1449_v41, %s6404_s8  ;;  %1463 = vrot.lane.b32.xlu0 %v1448_v38, %s6404_s8  ;;  %v1487_v41 = vmul.f32 %v7316_v17, %v1482_v28 }
 0x228   :  { %1467 = vrot.lane.b32.xlu2 %v1450_v46, %s6404_s8 }
 0x229   :  { %v7387_v63 = vpop.permute.xlu1 %1198  ;;  %v7389_v39 = vpop.permute.xlu0 %1196 }
 0x22a   :  { %9597 = vst [vmem:[#allocation178_spill] sm:$0xff] %v7387_v63  ;;  %v7391_v61 = vpop.permute.xlu2 %1270  ;;  %v1488_v63 = vmul.f32 %v7357_v54, %v1482_v28 }
 0x22b   :  { %9598 = vst [vmem:[#allocation179_spill] sm:$0xff] %v7389_v39  ;;  %v1486_v39 = vmul.f32 %v7322_v53, %v1482_v28 }
 0x22f   :  { %1497 = vrot.lane.b32.xlu1 %v1484_v33, %s6404_s8  ;;  %1495 = vrot.lane.b32.xlu0 %v1483_v40, %s6404_s8  ;;  %v1520_v40 = vstv %s5324_s24  ;;  %s7919_s24 = sld [smem:[#allocation15 + $0x27]] }
 0x230   :  { %1499 = vrot.lane.b32.xlu2 %v1485_v30, %s6404_s8  ;;  %v1521_v45 = vmul.f32 %v7295_v34, %v1520_v40  ;;  %v1523_v58 = vmul.f32 %v7301_v27, %v1520_v40 }
 0x231   :  { %v7399_v46 = vpop.permute.xlu1 %1230  ;;  %v7401_v38 = vpop.permute.xlu0 %1228 }
 0x232   :  { %9599 = vst [vmem:[#allocation180_spill] sm:$0xff] %v7399_v46  ;;  %v7403_v32 = vpop.permute.xlu2 %1276  ;;  %v1522_v46 = vmul.f32 %v7338_v12, %v1520_v40 }
 0x233   :  { %9600 = vst [vmem:[#allocation181_spill] sm:$0xff] %v7401_v38 }
 0x237   :  { %1503 = vrot.lane.b32.xlu1 %v1487_v41, %s6404_s8  ;;  %1501 = vrot.lane.b32.xlu0 %v1486_v39, %s6404_s8  ;;  %v1525_v41 = vmul.f32 %v7316_v17, %v1520_v40 }
 0x238   :  { %1505 = vrot.lane.b32.xlu2 %v1488_v63, %s6404_s8 }
 0x239   :  { %v7411_v30 = vpop.permute.xlu1 %1236  ;;  %v7413_v33 = vpop.permute.xlu0 %1234 }
 0x23a   :  { %9601 = vst [vmem:[#allocation182_spill] sm:$0xff] %v7411_v30  ;;  %v7415_v38 = vpop.permute.xlu2 %1309  ;;  %v1526_v30 = vmul.f32 %v7357_v54, %v1520_v40 }
 0x23b   :  { %9602 = vst [vmem:[#allocation183_spill] sm:$0xff] %v7413_v33  ;;  %v1524_v33 = vmul.f32 %v7322_v53, %v1520_v40 }
 0x23c   :  { %9603 = vst [vmem:[#allocation184_spill] sm:$0xff] %v7415_v38 }
 0x23f   :  { %1535 = vrot.lane.b32.xlu1 %v1522_v46, %s6404_s8  ;;  %1533 = vrot.lane.b32.xlu0 %v1521_v45, %s6404_s8  ;;  %v1558_v45 = vstv %s5325_s3  ;;  %s8389_s3 = sld [smem:[#allocation15 + $0x3e]] }
 0x240   :  { %1537 = vrot.lane.b32.xlu2 %v1523_v58, %s6404_s8  ;;  %v1560_v19 = vmul.f32 %v7338_v12, %v1558_v45  ;;  %v1559_v24 = vmul.f32 %v7295_v34, %v1558_v45  ;;  %v1561_v13 = vmul.f32 %v7301_v27, %v1558_v45  ;;  %v1564_v8 = vmul.f32 %v7357_v54, %v1558_v45 }
 0x241   :  { %v7423_v28 = vpop.permute.xlu1 %1268  ;;  %v7425_v63 = vpop.permute.xlu0 %1266 }
 0x242   :  { %v7427_v39 = vpop.permute.xlu2 %1315 }
 0x243   :  { %9604 = vst [vmem:[#allocation185_spill] sm:$0xff] %v7427_v39 }
 0x247   :  { %1541 = vrot.lane.b32.xlu1 %v1525_v41, %s6404_s8  ;;  %1539 = vrot.lane.b32.xlu0 %v1524_v33, %s6404_s8  ;;  %v1563_v41 = vmul.f32 %v7316_v17, %v1558_v45 }
 0x248   :  { %1543 = vrot.lane.b32.xlu2 %v1526_v30, %s6404_s8  ;;  %s5327_s8 = sld [smem:[#allocation15 + $0x15]] }
 0x249   :  { %v7435_v58 = vpop.permute.xlu1 %1274  ;;  %v7437_v46 = vpop.permute.xlu0 %1272 }
 0x24a   :  { %v7439_v62 = vpop.permute.xlu2 %1347 }
 0x24b   :  { %9605 = vst [vmem:[#allocation186_spill] sm:$0xff] %v7439_v62  ;;  %v1562_v62 = vmul.f32 %v7322_v53, %v1558_v45 }
 0x24f   :  { %1573 = vrot.lane.b32.xlu1 %v1560_v19, %s6405_s26  ;;  %1571 = vrot.lane.b32.xlu0 %v1559_v24, %s6405_s26  ;;  %v1597_v24 = vstv %s5326_s17  ;;  %s8411_s17 = sld [smem:[#allocation15 + $0x20]] }
 0x250   :  { %1575 = vrot.lane.b32.xlu2 %v1561_v13, %s6405_s26  ;;  %v1598_v52 = vmul.f32 %v7295_v34, %v1597_v24  ;;  %v1600_v48 = vmul.f32 %v7301_v27, %v1597_v24  ;;  %v1603_v51 = vmul.f32 %v7357_v54, %v1597_v24 }
 0x251   :  { %v7447_v40 = vpop.permute.xlu1 %1307  ;;  %v7449_v30 = vpop.permute.xlu0 %1305 }
 0x252   :  { %9606 = vst [vmem:[#allocation187_spill] sm:$0xff] %v7447_v40  ;;  %v7451_v33 = vpop.permute.xlu2 %1353 }
 0x253   :  { %9607 = vst [vmem:[#allocation188_spill] sm:$0xff] %v7449_v30 }
 0x254   :  { %9608 = vst [vmem:[#allocation189_spill] sm:$0xff] %v7451_v33  ;;  %v1599_v33 = vmul.f32 %v7338_v12, %v1597_v24 }
 0x257   :  { %1579 = vrot.lane.b32.xlu1 %v1563_v41, %s6405_s26  ;;  %1577 = vrot.lane.b32.xlu0 %v1562_v62, %s6405_s26  ;;  %v1602_v41 = vmul.f32 %v7316_v17, %v1597_v24 }
 0x258   :  { %1581 = vrot.lane.b32.xlu2 %v1564_v8, %s6405_s26 }
 0x259   :  { %v7459_v13 = vpop.permute.xlu1 %1313  ;;  %v7461_v19 = vpop.permute.xlu0 %1311 }
 0x25a   :  { %9609 = vst [vmem:[#allocation190_spill] sm:$0xff] %v7459_v13  ;;  %v7463_v29 = vpop.permute.xlu2 %1385 }
 0x25b   :  { %9610 = vst [vmem:[#allocation191_spill] sm:$0xff] %v7461_v19 }
 0x25c   :  { %9611 = vst [vmem:[#allocation192_spill] sm:$0xff] %v7463_v29  ;;  %v1601_v29 = vmul.f32 %v7322_v53, %v1597_v24 }
 0x25f   :  { %1612 = vrot.lane.b32.xlu1 %v1599_v33, %s6405_s26  ;;  %1610 = vrot.lane.b32.xlu0 %v1598_v52, %s6405_s26  ;;  %v1635_v52 = vstv %s5327_s8  ;;  %s8426_s8 = sld [smem:[#allocation15 + $0x3f]] }
 0x260   :  { %1614 = vrot.lane.b32.xlu2 %v1600_v48, %s6405_s26  ;;  %v1638_v19 = vmul.f32 %v7301_v27, %v1635_v52 }
 0x261   :  { %v7471_v8 = vpop.permute.xlu1 %1345  ;;  %v7473_v62 = vpop.permute.xlu0 %1343 }
 0x262   :  { %9612 = vst [vmem:[#allocation193_spill] sm:$0xff] %v7471_v8  ;;  %v7475_v45 = vpop.permute.xlu2 %1391  ;;  %v1636_v8 = vmul.f32 %v7295_v34, %v1635_v52 }
 0x263   :  { %9613 = vst [vmem:[#allocation194_spill] sm:$0xff] %v7473_v62 }
 0x264   :  { %9614 = vst [vmem:[#allocation195_spill] sm:$0xff] %v7475_v45  ;;  %v1637_v45 = vmul.f32 %v7338_v12, %v1635_v52 }
 0x267   :  { %1618 = vrot.lane.b32.xlu1 %v1602_v41, %s6405_s26  ;;  %1616 = vrot.lane.b32.xlu0 %v1601_v29, %s6405_s26  ;;  %v1640_v41 = vmul.f32 %v7316_v17, %v1635_v52 }
 0x268   :  { %1620 = vrot.lane.b32.xlu2 %v1603_v51, %s6405_s26 }
 0x269   :  { %v7483_v48 = vpop.permute.xlu1 %1351  ;;  %v7485_v33 = vpop.permute.xlu0 %1349 }
 0x26a   :  { %9615 = vst [vmem:[#allocation196_spill] sm:$0xff] %v7483_v48  ;;  %v7487_v62 = vpop.permute.xlu2 %1423 }
 0x26b   :  { %9616 = vst [vmem:[#allocation197_spill] sm:$0xff] %v7485_v33  ;;  %v1641_v33 = vmul.f32 %v7357_v54, %v1635_v52 }
 0x26c   :  { %9617 = vst [vmem:[#allocation198_spill] sm:$0xff] %v7487_v62  ;;  %v1639_v62 = vmul.f32 %v7322_v53, %v1635_v52 }
 0x26f   :  { %1650 = vrot.lane.b32.xlu1 %v1637_v45, %s6405_s26  ;;  %1648 = vrot.lane.b32.xlu0 %v1636_v8, %s6405_s26  ;;  %v1673_v8 = vstv %s5328_s19  ;;  %s7744_s19 = sld [smem:[#allocation15 + $0x1e]] }
 0x270   :  { %1652 = vrot.lane.b32.xlu2 %v1638_v19, %s6405_s26  ;;  %v1676_v48 = vmul.f32 %v7301_v27, %v1673_v8 }
 0x271   :  { %v7495_v51 = vpop.permute.xlu1 %1383  ;;  %v7497_v29 = vpop.permute.xlu0 %1381 }
 0x272   :  { %9618 = vst [vmem:[#allocation199_spill] sm:$0xff] %v7495_v51  ;;  %v7499_v24 = vpop.permute.xlu2 %1429  ;;  %v1674_v51 = vmul.f32 %v7295_v34, %v1673_v8 }
 0x273   :  { %9619 = vst [vmem:[#allocation200_spill] sm:$0xff] %v7497_v29 }
 0x274   :  { %9620 = vst [vmem:[#allocation201_spill] sm:$0xff] %v7499_v24  ;;  %v1675_v24 = vmul.f32 %v7338_v12, %v1673_v8 }
 0x277   :  { %1656 = vrot.lane.b32.xlu1 %v1640_v41, %s6405_s26  ;;  %1654 = vrot.lane.b32.xlu0 %v1639_v62, %s6405_s26  ;;  %v1678_v41 = vmul.f32 %v7316_v17, %v1673_v8 }
 0x278   :  { %1658 = vrot.lane.b32.xlu2 %v1641_v33, %s6405_s26 }
 0x279   :  { %v7507_v19 = vpop.permute.xlu1 %1389  ;;  %v7509_v45 = vpop.permute.xlu0 %1387 }
 0x27a   :  { %9621 = vst [vmem:[#allocation202_spill] sm:$0xff] %v7507_v19  ;;  %v7511_v29 = vpop.permute.xlu2 %1461 }
 0x27b   :  { %9622 = vst [vmem:[#allocation203_spill] sm:$0xff] %v7509_v45  ;;  %v1679_v45 = vmul.f32 %v7357_v54, %v1673_v8 }
 0x27c   :  { %9623 = vst [vmem:[#allocation204_spill] sm:$0xff] %v7511_v29  ;;  %v1677_v29 = vmul.f32 %v7322_v53, %v1673_v8 }
 0x27f   :  { %1688 = vrot.lane.b32.xlu1 %v1675_v24, %s6405_s26  ;;  %1686 = vrot.lane.b32.xlu0 %v1674_v51, %s6405_s26  ;;  %v1711_v51 = vstv %s5329_s27 }
 0x280   :  { %1690 = vrot.lane.b32.xlu2 %v1676_v48, %s6405_s26  ;;  %v1714_v19 = vmul.f32 %v7301_v27, %v1711_v51 }
 0x281   :  { %v7519_v62 = vpop.permute.xlu1 %1421  ;;  %v7521_v52 = vpop.permute.xlu0 %1419 }
 0x282   :  { %9624 = vst [vmem:[#allocation205_spill] sm:$0xff] %v7519_v62  ;;  %v7523_v33 = vpop.permute.xlu2 %1467  ;;  %v1712_v62 = vmul.f32 %v7295_v34, %v1711_v51 }
 0x283   :  { %9625 = vst [vmem:[#allocation206_spill] sm:$0xff] %v7521_v52 }
 0x284   :  { %9626 = vst [vmem:[#allocation207_spill] sm:$0xff] %v7523_v33  ;;  %v1713_v33 = vmul.f32 %v7338_v12, %v1711_v51 }
 0x287   :  { %1694 = vrot.lane.b32.xlu1 %v1678_v41, %s6405_s26  ;;  %1692 = vrot.lane.b32.xlu0 %v1677_v29, %s6405_s26  ;;  %v1716_v41 = vmul.f32 %v7316_v17, %v1711_v51 }
 0x288   :  { %1696 = vrot.lane.b32.xlu2 %v1679_v45, %s6405_s26 }
 0x289   :  { %v7531_v48 = vpop.permute.xlu1 %1427  ;;  %v7533_v24 = vpop.permute.xlu0 %1425 }
 0x28a   :  { %9627 = vst [vmem:[#allocation208_spill] sm:$0xff] %v7531_v48  ;;  %v7535_v52 = vpop.permute.xlu2 %1499 }
 0x28b   :  { %9628 = vst [vmem:[#allocation209_spill] sm:$0xff] %v7533_v24  ;;  %v1717_v24 = vmul.f32 %v7357_v54, %v1711_v51 }
 0x28c   :  { %9629 = vst [vmem:[#allocation210_spill] sm:$0xff] %v7535_v52  ;;  %v1715_v52 = vmul.f32 %v7322_v53, %v1711_v51 }
 0x28f   :  { %1726 = vrot.lane.b32.xlu1 %v1713_v33, %s6405_s26  ;;  %1724 = vrot.lane.b32.xlu0 %v1712_v62, %s6405_s26  ;;  %v1749_v62 = vstv %s5330_s28 }
 0x290   :  { %1728 = vrot.lane.b32.xlu2 %v1714_v19, %s6405_s26  ;;  %v1752_v48 = vmul.f32 %v7301_v27, %v1749_v62 }
 0x291   :  { %v7543_v29 = vpop.permute.xlu1 %1459  ;;  %v7545_v8 = vpop.permute.xlu0 %1457 }
 0x292   :  { %9630 = vst [vmem:[#allocation211_spill] sm:$0xff] %v7543_v29  ;;  %v7547_v45 = vpop.permute.xlu2 %1505  ;;  %v1750_v29 = vmul.f32 %v7295_v34, %v1749_v62 }
 0x293   :  { %9631 = vst [vmem:[#allocation212_spill] sm:$0xff] %v7545_v8 }
 0x294   :  { %9632 = vst [vmem:[#allocation213_spill] sm:$0xff] %v7547_v45  ;;  %v1751_v45 = vmul.f32 %v7338_v12, %v1749_v62 }
 0x297   :  { %1732 = vrot.lane.b32.xlu1 %v1716_v41, %s6405_s26  ;;  %1730 = vrot.lane.b32.xlu0 %v1715_v52, %s6405_s26  ;;  %v1754_v41 = vmul.f32 %v7316_v17, %v1749_v62 }
 0x298   :  { %1734 = vrot.lane.b32.xlu2 %v1717_v24, %s6405_s26 }
 0x299   :  { %v7555_v19 = vpop.permute.xlu1 %1465  ;;  %v7557_v33 = vpop.permute.xlu0 %1463 }
 0x29a   :  { %9633 = vst [vmem:[#allocation214_spill] sm:$0xff] %v7555_v19  ;;  %v7559_v8 = vpop.permute.xlu2 %1537 }
 0x29b   :  { %9634 = vst [vmem:[#allocation215_spill] sm:$0xff] %v7557_v33  ;;  %v1755_v33 = vmul.f32 %v7357_v54, %v1749_v62 }
 0x29c   :  { %9635 = vst [vmem:[#allocation216_spill] sm:$0xff] %v7559_v8  ;;  %v1753_v8 = vmul.f32 %v7322_v53, %v1749_v62 }
 0x29f   :  { %1764 = vrot.lane.b32.xlu1 %v1751_v45, %s6405_s26  ;;  %1762 = vrot.lane.b32.xlu0 %v1750_v29, %s6405_s26  ;;  %v1787_v45 = vstv %s5331_s29  ;;  %s7960_s29 = sld [smem:[#allocation15 + $0x8]] }
 0x2a0   :  { %1766 = vrot.lane.b32.xlu2 %v1752_v48, %s6405_s26  ;;  %v1788_v19 = vmul.f32 %v7295_v34, %v1787_v45  ;;  %v1790_v13 = vmul.f32 %v7301_v27, %v1787_v45 }
 0x2a1   :  { %v7567_v52 = vpop.permute.xlu1 %1497  ;;  %v7569_v51 = vpop.permute.xlu0 %1495 }
 0x2a2   :  { %9636 = vst [vmem:[#allocation217_spill] sm:$0xff] %v7567_v52  ;;  %v1544_v24 = vpop.permute.xlu2 %1543 }
 0x2a3   :  { %9637 = vst [vmem:[#allocation218_spill] sm:$0xff] %v7569_v51  ;;  %v1789_v51 = vmul.f32 %v7338_v12, %v1787_v45 }
 0x2a7   :  { %1770 = vrot.lane.b32.xlu1 %v1754_v41, %s6405_s26  ;;  %1768 = vrot.lane.b32.xlu0 %v1753_v8, %s6405_s26  ;;  %v1792_v41 = vmul.f32 %v7316_v17, %v1787_v45 }
 0x2a8   :  { %1772 = vrot.lane.b32.xlu2 %v1755_v33, %s6405_s26 }
 0x2a9   :  { %v7577_v29 = vpop.permute.xlu1 %1503  ;;  %v7579_v48 = vpop.permute.xlu0 %1501 }
 0x2aa   :  { %9638 = vst [vmem:[#allocation219_spill] sm:$0xff] %v7577_v29  ;;  %v1576_v52 = vpop.permute.xlu2 %1575  ;;  %v1793_v29 = vmul.f32 %v7357_v54, %v1787_v45 }
 0x2ab   :  { %9639 = vst [vmem:[#allocation220_spill] sm:$0xff] %v7579_v48  ;;  %v1791_v48 = vmul.f32 %v7322_v53, %v1787_v45 }
 0x2af   :  { %1802 = vrot.lane.b32.xlu1 %v1789_v51, %s6405_s26  ;;  %1800 = vrot.lane.b32.xlu0 %v1788_v19, %s6405_s26  ;;  %v1863_v51 = vstv %s5333_s0 }
 0x2b0   :  { %1804 = vrot.lane.b32.xlu2 %v1790_v13, %s6405_s26  ;;  %v1865_v45 = vmul.f32 %v7338_v12, %v1863_v51  ;;  %v1868_v25 = vmul.f32 %v7316_v17, %v1863_v51  ;;  %v1867_v5 = vmul.f32 %v7322_v53, %v1863_v51  ;;  %v1869_v20 = vmul.f32 %v7357_v54, %v1863_v51 }
 0x2b1   :  { %v7587_v8 = vpop.permute.xlu1 %1535  ;;  %v7589_v62 = vpop.permute.xlu0 %1533 }
 0x2b2   :  { %9640 = vst [vmem:[#allocation221_spill] sm:$0xff] %v7587_v8  ;;  %v1582_v33 = vpop.permute.xlu2 %1581 }
 0x2b3   :  { %9641 = vst [vmem:[#allocation222_spill] sm:$0xff] %v7589_v62 }
 0x2b7   :  { %1808 = vrot.lane.b32.xlu1 %v1792_v41, %s6405_s26  ;;  %1806 = vrot.lane.b32.xlu0 %v1791_v48, %s6405_s26  ;;  %v1864_v41 = vmul.f32 %v7295_v34, %v1863_v51  ;;  %v1866_v48 = vmul.f32 %v7301_v27, %v1863_v51 }
 0x2b8   :  { %1810 = vrot.lane.b32.xlu2 %v1793_v29, %s6405_s26  ;;  %v2168_v29 = vstv %s5341_s30 }
 0x2b9   :  { %v1542_v13 = vpop.permute.xlu1 %1541  ;;  %v1540_v19 = vpop.permute.xlu0 %1539  ;;  %v2170_v3 = vmul.f32 %v7338_v12, %v2168_v29  ;;  %v2169_v0 = vmul.f32 %v7295_v34, %v2168_v29  ;;  %v2172_v51 = vmul.f32 %v7322_v53, %v2168_v29 }
 0x2ba   :  { %v7598_v62 = vsel %vm1278_vm0, %v1542_v13, %v1544_v24  ;;  %v7601_v8 = vsel %vm1278_vm0, %v1540_v19, %v1542_v13  ;;  %v1615_v39 = vpop.permute.xlu2 %1614 }
 0x2bb   :  { %9642 = vst [vmem:[#allocation223_spill] sm:$0xff] %v7598_v62 }
 0x2bc   :  { %9643 = vst [vmem:[#allocation224_spill] sm:$0xff] %v7601_v8 }
 0x2bf   :  { %1878 = vrot.lane.b32.xlu1 %v1865_v45, %s6406_s21  ;;  %1876 = vrot.lane.b32.xlu0 %v1864_v41, %s6406_s21  ;;  %v2171_v45 = vmul.f32 %v7301_v27, %v2168_v29 }
 0x2c0   :  { %1880 = vrot.lane.b32.xlu2 %v1866_v48, %s6406_s21 }
 0x2c1   :  { %v1574_v24 = vpop.permute.xlu1 %1573  ;;  %v1572_v62 = vpop.permute.xlu0 %1571 }
 0x2c2   :  { %v7610_v13 = vsel %vm1583_vm1, %v1574_v24, %v1576_v52  ;;  %v7613_v19 = vsel %vm1583_vm1, %v1572_v62, %v1574_v24  ;;  %v1621_v8 = vpop.permute.xlu2 %1620 }
 0x2c7   :  { %2183 = vrot.lane.b32.xlu1 %v2170_v3, %s6407_s18  ;;  %2181 = vrot.lane.b32.xlu0 %v2169_v0, %s6407_s18 }
 0x2c8   :  { %2185 = vrot.lane.b32.xlu2 %v2171_v45, %s6407_s18 }
 0x2c9   :  { %v1580_v41 = vpop.permute.xlu1 %1579  ;;  %v1578_v52 = vpop.permute.xlu0 %1577 }
 0x2ca   :  { %v7622_v48 = vsel %vm1583_vm1, %v1580_v41, %v1582_v33  ;;  %v7625_v62 = vsel %vm1583_vm1, %v1578_v52, %v1580_v41  ;;  %v1653_v24 = vpop.permute.xlu2 %1652  ;;  %v2173_v52 = vmul.f32 %v7316_v17, %v2168_v29 }
 0x2cf   :  { %1884 = vrot.lane.b32.xlu1 %v1868_v25, %s6406_s21  ;;  %1882 = vrot.lane.b32.xlu0 %v1867_v5, %s6406_s21  ;;  %v2174_v25 = vmul.f32 %v7357_v54, %v2168_v29 }
 0x2d0   :  { %1886 = vrot.lane.b32.xlu2 %v1869_v20, %s6406_s21  ;;  %v1902_v20 = vstv %s5334_s22  ;;  %s5338_s22 = sld [smem:[#allocation15 + $0x2e]] }
 0x2d1   :  { %v1613_v0 = vpop.permute.xlu1 %1612  ;;  %v1611_v3 = vpop.permute.xlu0 %1610  ;;  %v1904_v37 = vmul.f32 %v7338_v12, %v1902_v20  ;;  %v1903_v29 = vmul.f32 %v7295_v34, %v1902_v20  ;;  %v1908_v44 = vmul.f32 %v7357_v54, %v1902_v20 }
 0x2d2   :  { %v7634_v33 = vsel %vm1583_vm1, %v1613_v0, %v1615_v39  ;;  %v7637_v45 = vsel %vm1583_vm1, %v1611_v3, %v1613_v0  ;;  %v1659_v41 = vpop.permute.xlu2 %1658 }
 0x2d3   :  { %9644 = vst [vmem:[#allocation225_spill] sm:$0xff] %v7634_v33 }
 0x2d4   :  { %9645 = vst [vmem:[#allocation226_spill] sm:$0xff] %v7637_v45 }
 0x2d7   :  { %2189 = vrot.lane.b32.xlu1 %v2173_v52, %s6407_s18  ;;  %2187 = vrot.lane.b32.xlu0 %v2172_v51, %s6407_s18  ;;  %v1905_v52 = vmul.f32 %v7301_v27, %v1902_v20  ;;  %v2207_v51 = vstv %s5342_s15  ;;  %s7772_s15 = sld [smem:[#allocation15 + $0x1f]] }
 0x2d8   :  { %2191 = vrot.lane.b32.xlu2 %v2174_v25, %s6407_s18  ;;  %v2208_v36 = vmul.f32 %v7295_v34, %v2207_v51 }
 0x2d9   :  { %v1619_v5 = vpop.permute.xlu1 %1618  ;;  %v1617_v39 = vpop.permute.xlu0 %1616 }
 0x2da   :  { %v7646_v0 = vsel %vm1583_vm1, %v1619_v5, %v1621_v8  ;;  %v7649_v3 = vsel %vm1583_vm1, %v1617_v39, %v1619_v5  ;;  %v1691_v4 = vpop.permute.xlu2 %1690 }
 0x2db   :  { %9646 = vst [vmem:[#allocation227_spill] sm:$0xff] %v7646_v0 }
 0x2dc   :  { %9647 = vst [vmem:[#allocation228_spill] sm:$0xff] %v7649_v3  ;;  %v2209_v3 = vmul.f32 %v7338_v12, %v2207_v51 }
 0x2df   :  { %1917 = vrot.lane.b32.xlu1 %v1904_v37, %s6406_s21  ;;  %1915 = vrot.lane.b32.xlu0 %v1903_v29, %s6406_s21  ;;  %v2210_v37 = vmul.f32 %v7301_v27, %v2207_v51 }
 0x2e0   :  { %1919 = vrot.lane.b32.xlu2 %v1905_v52, %s6406_s21 }
 0x2e1   :  { %v1651_v25 = vpop.permute.xlu1 %1650  ;;  %v1649_v8 = vpop.permute.xlu0 %1648 }
 0x2e2   :  { %v7658_v0 = vsel %vm1583_vm1, %v1651_v25, %v1653_v24  ;;  %v7661_v5 = vsel %vm1583_vm1, %v1649_v8, %v1651_v25  ;;  %v1697_v39 = vpop.permute.xlu2 %1696 }
 0x2e3   :  { %9648 = vst [vmem:[#allocation229_spill] sm:$0xff] %v7658_v0  ;;  %v1906_v0 = vmul.f32 %v7322_v53, %v1902_v20 }
 0x2e4   :  { %9649 = vst [vmem:[#allocation230_spill] sm:$0xff] %v7661_v5  ;;  %v1907_v5 = vmul.f32 %v7316_v17, %v1902_v20  ;;  %v2211_v20 = vmul.f32 %v7322_v53, %v2207_v51 }
 0x2e7   :  { %2222 = vrot.lane.b32.xlu1 %v2209_v3, %s6407_s18  ;;  %2220 = vrot.lane.b32.xlu0 %v2208_v36, %s6407_s18 }
 0x2e8   :  { %2224 = vrot.lane.b32.xlu2 %v2210_v37, %s6407_s18 }
 0x2e9   :  { %v1657_v29 = vpop.permute.xlu1 %1656  ;;  %v1655_v52 = vpop.permute.xlu0 %1654 }
 0x2ea   :  { %v7670_v24 = vsel %vm1583_vm1, %v1657_v29, %v1659_v41  ;;  %v7673_v25 = vsel %vm1583_vm1, %v1655_v52, %v1657_v29  ;;  %v1729_v8 = vpop.permute.xlu2 %1728  ;;  %v2212_v52 = vmul.f32 %v7316_v17, %v2207_v51 }
 0x2eb   :  { %9650 = vst [vmem:[#allocation231_spill] sm:$0xff] %v7670_v24  ;;  %v5954_v24 = vld [vmem:[%s9660_s23 + $0x70] sm:$0xff]  }
 0x2ec   :  { %9651 = vst [vmem:[#allocation232_spill] sm:$0xff] %v7673_v25  ;;  %v5551_v33 = vunpack.c.l.bf16 %v5954_v24 }
 0x2ef   :  { %1923 = vrot.lane.b32.xlu1 %v1907_v5, %s6406_s21  ;;  %1921 = vrot.lane.b32.xlu0 %v1906_v0, %s6406_s21  ;;  %v2213_v5 = vmul.f32 %v7357_v54, %v2207_v51 }
 0x2f0   :  { %1925 = vrot.lane.b32.xlu2 %v1908_v44, %s6406_s21  ;;  %v1940_v44 = vstv %s5335_s20  ;;  %s8091_s20 = sld [smem:[#allocation15 + $0x2f]] }
 0x2f1   :  { %v1689_v36 = vpop.permute.xlu1 %1688  ;;  %v1687_v41 = vpop.permute.xlu0 %1686  ;;  %v1941_v51 = vmul.f32 %v7295_v34, %v1940_v44 }
 0x2f2   :  { %v7682_v3 = vsel %vm1583_vm1, %v1689_v36, %v1691_v4  ;;  %v7685_v37 = vsel %vm1583_vm1, %v1687_v41, %v1689_v36  ;;  %v1735_v29 = vpop.permute.xlu2 %1734 }
 0x2f3   :  { %9652 = vst [vmem:[#allocation233_spill] sm:$0xff] %v7682_v3  ;;  %v1942_v3 = vmul.f32 %v7338_v12, %v1940_v44 }
 0x2f4   :  { %9653 = vst [vmem:[#allocation234_spill] sm:$0xff] %v7685_v37 }
 0x2f7   :  { %2228 = vrot.lane.b32.xlu1 %v2212_v52, %s6407_s18  ;;  %2226 = vrot.lane.b32.xlu0 %v2211_v20, %s6407_s18  ;;  %v1943_v52 = vmul.f32 %v7301_v27, %v1940_v44  ;;  %v2245_v20 = vstv %s5343_s14  ;;  %s2472_s14 = sld [smem:[#allocation16]] }
 0x2f8   :  { %2230 = vrot.lane.b32.xlu2 %v2213_v5, %s6407_s18  ;;  %v2246_v25 = vmul.f32 %v7295_v34, %v2245_v20  ;;  %v2250_v30 = vmul.f32 %v7316_v17, %v2245_v20 }
 0x2f9   :  { %v1695_v4 = vpop.permute.xlu1 %1694  ;;  %v1693_v0 = vpop.permute.xlu0 %1692 }
 0x2fa   :  { %v7694_v36 = vsel %vm1583_vm1, %v1695_v4, %v1697_v39  ;;  %v7697_v41 = vsel %vm1583_vm1, %v1693_v0, %v1695_v4  ;;  %v1767_v37 = vpop.permute.xlu2 %1766 }
 0x2fb   :  { %9654 = vst [vmem:[#allocation235_spill] sm:$0xff] %v7694_v36 }
 0x2fc   :  { %9655 = vst [vmem:[#allocation236_spill] sm:$0xff] %v7697_v41  ;;  %v2247_v41 = vmul.f32 %v7338_v12, %v2245_v20 }
 0x2ff   :  { %1955 = vrot.lane.b32.xlu1 %v1942_v3, %s6406_s21  ;;  %1953 = vrot.lane.b32.xlu0 %v1941_v51, %s6406_s21  ;;  %v2248_v3 = vmul.f32 %v7301_v27, %v2245_v20 }
 0x300   :  { %1957 = vrot.lane.b32.xlu2 %v1943_v52, %s6406_s21 }
 0x301   :  { %v1727_v5 = vpop.permute.xlu1 %1726  ;;  %v1725_v39 = vpop.permute.xlu0 %1724 }
 0x302   :  { %v7706_v36 = vsel %vm1583_vm1, %v1727_v5, %v1729_v8  ;;  %v7709_v4 = vsel %vm1583_vm1, %v1725_v39, %v1727_v5  ;;  %v7711_v0 = vpop.permute.xlu2 %1772 }
 0x303   :  { %9656 = vst [vmem:[#allocation237_spill] sm:$0xff] %v7706_v36  ;;  %v1944_v36 = vmul.f32 %v7322_v53, %v1940_v44 }
 0x304   :  { %9657 = vst [vmem:[#allocation238_spill] sm:$0xff] %v7709_v4  ;;  %v1945_v4 = vmul.f32 %v7316_v17, %v1940_v44 }
 0x307   :  { %2260 = vrot.lane.b32.xlu1 %v2247_v41, %s6407_s18  ;;  %2258 = vrot.lane.b32.xlu0 %v2246_v25, %s6407_s18  ;;  %v5947_v25 = vld [vmem:[%s9660_s23 + $0x38] sm:$0xff]  }
 0x308   :  { %2262 = vrot.lane.b32.xlu2 %v2248_v3, %s6407_s18  ;;  %v5955_v41 = vld [vmem:[%s9660_s23 + $0x78] sm:$0xff]   ;;  %v5524_v3 = vunpack.c.h.bf16 %v5947_v25 }
 0x309   :  { %v1733_v51 = vpop.permute.xlu1 %1732  ;;  %v1731_v8 = vpop.permute.xlu0 %1730 }
 0x30a   :  { %v7720_v52 = vsel %vm1583_vm1, %v1733_v51, %v1735_v29  ;;  %v7723_v5 = vsel %vm1583_vm1, %v1731_v8, %v1733_v51  ;;  %v7725_v39 = vpop.permute.xlu2 %1804  ;;  %v1946_v29 = vmul.f32 %v7357_v54, %v1940_v44  ;;  %2776 = vmatpush.msra.mxu0 %v5524_v3  ;;  %v5523_v51 = vunpack.c.l.bf16 %v5947_v25 }
 0x30b   :  { %9658 = vst [vmem:[#allocation239_spill] sm:$0xff] %v7720_v52  ;;  %v5556_v52 = vunpack.c.h.bf16 %v5955_v41  ;;  %v5555_v8 = vunpack.c.l.bf16 %v5955_v41 }
 0x30c   :  { %9659 = vst [vmem:[#allocation240_spill] sm:$0xff] %v7723_v5  ;;  %v5946_v5 = vld [vmem:[%s9660_s23 + $0x30] sm:$0xff]   ;;  %2777 = vmatpush.msra.mxu0 %v5523_v51  ;;  %v5945_v51 = vld [vmem:[%s9660_s23 + $0x28] sm:$0xff]  }
 0x30d   :  { %2841 = vmatpush.msra.mxu1 %v5556_v52  ;;  %v5520_v44 = vunpack.c.h.bf16 %v5946_v5  ;;  %v5552_v52 = vunpack.c.h.bf16 %v5954_v24  ;;  %v5519_v45 = vunpack.c.l.bf16 %v5946_v5  ;;  %v5515_v24 = vunpack.c.l.bf16 %v5945_v51 }
 0x30f   :  { %1961 = vrot.lane.b32.xlu1 %v1945_v4, %s6406_s21  ;;  %1959 = vrot.lane.b32.xlu0 %v1944_v36, %s6406_s21 }
 0x310   :  { %1963 = vrot.lane.b32.xlu2 %v1946_v29, %s6406_s21  ;;  %2842 = vmatpush.msra.mxu1 %v5555_v8  ;;  %v2249_v29 = vmul.f32 %v7322_v53, %v2245_v20  ;;  %v2251_v8 = vmul.f32 %v7357_v54, %v2245_v20 }
 0x311   :  { %v1765_v25 = vpop.permute.xlu1 %1764  ;;  %v1763_v41 = vpop.permute.xlu0 %1762  ;;  %2778 = vmatpush.msra.mxu0 %v5520_v44  ;;  %v5516_v44 = vunpack.c.h.bf16 %v5945_v51 }
 0x312   :  { %v7748_v36 = vsel %vm1583_vm1, %v1765_v25, %v1767_v37  ;;  %v7751_v4 = vsel %vm1583_vm1, %v1763_v41, %v1765_v25  ;;  %v7753_v3 = vpop.permute.xlu2 %1810  ;;  %2843 = vmatpush.msra.mxu1 %v5552_v52  ;;  %v5953_v37 = vld [vmem:[%s9660_s23 + $0x68] sm:$0xff]   ;;  %v5944_v52 = vld [vmem:[%s9660_s23 + $0x20] sm:$0xff]   ;;  %v7770_v41 = vstv %s7744_s19  ;;  %s7807_s19 = sld [smem:[#allocation15]] }
 0x313   :  { %9661 = vst [vmem:[#allocation241_spill] sm:$0xff] %v7748_v36  ;;  %2779 = vmatpush.msra.mxu0 %v5519_v45  ;;  %v5548_v5 = vunpack.c.h.bf16 %v5953_v37  ;;  %v5547_v25 = vunpack.c.l.bf16 %v5953_v37  ;;  %v5512_v45 = vunpack.c.h.bf16 %v5944_v52  ;;  %v1979_v36 = vmul.f32 %v7295_v34, %v7770_v41 }
 0x314   :  { %9662 = vst [vmem:[#allocation242_spill] sm:$0xff] %v7751_v4  ;;  %2844 = vmatpush.msra.mxu1 %v5551_v33  ;;  %v5952_v33 = vld [vmem:[%s9660_s23 + $0x60] sm:$0xff]   ;;  %v1980_v4 = vmul.f32 %v7338_v12, %v7770_v41 }
 0x315   :  { %2780 = vmatpush.msra.mxu0 %v5516_v44 }
 0x316   :  { %2845 = vmatpush.msra.mxu1 %v5548_v5  ;;  %v5543_v5 = vunpack.c.l.bf16 %v5952_v33 }
 0x317   :  { %2266 = vrot.lane.b32.xlu1 %v2250_v30, %s6407_s18  ;;  %2264 = vrot.lane.b32.xlu0 %v2249_v29, %s6407_s18  ;;  %v5544_v29 = vunpack.c.h.bf16 %v5952_v33 }
 0x318   :  { %2268 = vrot.lane.b32.xlu2 %v2251_v8, %s6407_s18  ;;  %2781 = vmatpush.msra.mxu0 %v5515_v24  ;;  %v5511_v8 = vunpack.c.l.bf16 %v5944_v52  ;;  %v5951_v24 = vld [vmem:[%s9660_s23 + $0x58] sm:$0xff]  }
 0x319   :  { %v1771_v20 = vpop.permute.xlu1 %1770  ;;  %v1769_v30 = vpop.permute.xlu0 %1768  ;;  %2846 = vmatpush.msra.mxu1 %v5547_v25  ;;  %v1981_v25 = vmul.f32 %v7301_v27, %v7770_v41  ;;  %v5540_v33 = vunpack.c.h.bf16 %v5951_v24 }
 0x31a   :  { %v7780_v51 = vsel %vm1583_vm1, %v1771_v20, %v7711_v0  ;;  %v7783_v37 = vsel %vm1583_vm1, %v1769_v30, %v1771_v20  ;;  %v7785_v44 = vpop.permute.xlu2 %1880  ;;  %2782 = vmatpush.msra.mxu0 %v5512_v45  ;;  %v5943_v0 = vld [vmem:[%s9660_s23 + $0x18] sm:$0xff]   ;;  %v5539_v45 = vunpack.c.l.bf16 %v5951_v24  ;;  %v5942_v30 = vld [vmem:[%s9660_s23 + $0x10] sm:$0xff]  }
 0x31b   :  { %9663 = vst [vmem:[#allocation243_spill] sm:$0xff] %v7780_v51  ;;  %2847 = vmatpush.msra.mxu1 %v5544_v29  ;;  %v5508_v52 = vunpack.c.h.bf16 %v5943_v0  ;;  %v5507_v20 = vunpack.c.l.bf16 %v5943_v0  ;;  %v7810_v29 = vstv %s7772_s15  ;;  %v5503_v40 = vunpack.c.l.bf16 %v5942_v30  ;;  %s5349_s15 = sld [smem:[#allocation16 + $0x1]] }
 0x31c   :  { %9664 = vst [vmem:[#allocation244_spill] sm:$0xff] %v7783_v37  ;;  %2783 = vmatpush.msra.mxu0 %v5511_v8  ;;  %v5950_v37 = vld [vmem:[%s9660_s23 + $0x50] sm:$0xff]   ;;  %v5504_v8 = vunpack.c.h.bf16 %v5942_v30 }
 0x31d   :  { %2848 = vmatpush.msra.mxu1 %v5543_v5  ;;  %v5535_v30 = vunpack.c.l.bf16 %v5950_v37 }
 0x31e   :  { %2784 = vmatpush.msra.mxu0 %v5508_v52  ;;  %v2284_v52 = vmul.f32 %v7295_v34, %v7810_v29 }
 0x31f   :  { %1993 = vrot.lane.b32.xlu1 %v1980_v4, %s6406_s21  ;;  %1991 = vrot.lane.b32.xlu0 %v1979_v36, %s6406_s21  ;;  %v5536_v36 = vunpack.c.h.bf16 %v5950_v37 }
 0x320   :  { %1995 = vrot.lane.b32.xlu2 %v1981_v25, %s6406_s21  ;;  %2849 = vmatpush.msra.mxu1 %v5540_v33  ;;  %v2285_v25 = vmul.f32 %v7338_v12, %v7810_v29  ;;  %v5949_v33 = vld [vmem:[%s9660_s23 + $0x48] sm:$0xff]  }
 0x321   :  { %v1803_v4 = vpop.permute.xlu1 %1802  ;;  %v1801_v5 = vpop.permute.xlu0 %1800  ;;  %2785 = vmatpush.msra.mxu0 %v5507_v20  ;;  %v2286_v20 = vmul.f32 %v7301_v27, %v7810_v29  ;;  %v7843_v27 = vstv %s7807_s19  ;;  %s5352_s19 = sld [smem:[#allocation16 + $0x4]] }
 0x322   :  { %v7815_v0 = vsel %vm1583_vm1, %v1803_v4, %v7725_v39  ;;  %v7818_v24 = vsel %vm1583_vm1, %v1801_v5, %v1803_v4  ;;  %v7820_v51 = vpop.permute.xlu2 %2185  ;;  %2850 = vmatpush.msra.mxu1 %v5539_v45  ;;  %v5941_v39 = vld [vmem:[%s9660_s23 + $0x8] sm:$0xff]   ;;  %v5532_v5 = vunpack.c.h.bf16 %v5949_v33  ;;  %v254_v37 = vmul.f32 %v7338_v12, %v7843_v27 }
 0x323   :  { %9665 = vst [vmem:[#allocation245_spill] sm:$0xff] %v7815_v0  ;;  %2786 = vmatpush.msra.mxu0 %v5504_v8  ;;  %v5500_v4 = vunpack.c.h.bf16 %v5941_v39  ;;  %v5499_v45 = vunpack.c.l.bf16 %v5941_v39  ;;  %v5948_v0 = vld [vmem:[%s9660_s23 + $0x40] sm:$0xff]   ;;  %v365_v12 = vsel %vm363_vm2, %v6831_v50, %v6817_v42  ;;  %v670_v42 = vsel %vm668_vm3, %v7009_v15, %v6977_v21 }
 0x324   :  { %9666 = vst [vmem:[#allocation246_spill] sm:$0xff] %v7818_v24  ;;  %2851 = vmatpush.msra.mxu1 %v5536_v36  ;;  %v5494_v24 = vld [vmem:[%s9660_s23] sm:$0xff]   ;;  %v974_v21 = vsel %vm973_vm4, %v7203_v9, %v7201_v47  ;;  %s5337_s23 = sld [smem:[#allocation15 + $0x26]] }
 0x325   :  { %2787 = vmatpush.msra.mxu0 %v5503_v40  ;;  %v5531_v40 = vunpack.c.l.bf16 %v5949_v33  ;;  %v5528_v33 = vunpack.c.h.bf16 %v5948_v0  ;;  %v7897_v9 = vld [vmem:[%s9485_s6 + $0x20] sm:$0xff] }
 0x326   :  { %2852 = vmatpush.msra.mxu1 %v5535_v30  ;;  %v1983_v30 = vmul.f32 %v7316_v17, %v7770_v41  ;;  %v5527_v17 = vunpack.c.l.bf16 %v5948_v0 }
 0x327   :  { %2298 = vrot.lane.b32.xlu1 %v2285_v25, %s6407_s18  ;;  %2296 = vrot.lane.b32.xlu0 %v2284_v52, %s6407_s18  ;;  %v5496_v25 = vunpack.c.h.bf16 %v5494_v24 }
 0x328   :  { %2300 = vrot.lane.b32.xlu2 %v2286_v20, %s6407_s18  ;;  %2788 = vmatpush.msra.mxu0 %v5500_v4  ;;  %v253_v20 = vmul.f32 %v7295_v34, %v7843_v27  ;;  %v364_v4 = vsel %vm363_vm2, %v6819_v43, %v6831_v50  ;;  %v5495_v34 = vunpack.c.l.bf16 %v5494_v24  ;;  %v975_v43 = vsel %vm973_vm4, %v7201_v47, %v7169_v16 }
 0x329   :  { %v1809_v8 = vpop.permute.xlu1 %1808  ;;  %v1807_v36 = vpop.permute.xlu0 %1806  ;;  %2853 = vmatpush.msra.mxu1 %v5532_v5  ;;  %v1984_v5 = vmul.f32 %v7357_v54, %v7770_v41  ;;  %v1280_v16 = vsel %vm1278_vm0, %v7423_v28, %v7391_v61  ;;  %v1279_v24 = vsel %vm1278_vm0, %v7425_v63, %v7423_v28  ;;  %v7904_v61 = vld [vmem:[%s9485_s6 + $0x18] sm:$0xff]  ;;  %v2289_v63 = vmul.f32 %v7357_v54, %v7810_v29 }
 0x32a   :  { %v7850_v52 = vsel %vm1583_vm1, %v1809_v8, %v7753_v3  ;;  %v7853_v39 = vsel %vm1583_vm1, %v1807_v36, %v1809_v8  ;;  %v7855_v38 = vpop.permute.xlu2 %1886  ;;  %v1982_v3 = vmul.f32 %v7322_v53, %v7770_v41  ;;  %2789 = vmatpush.msra.mxu0 %v5499_v45  ;;  %v373_v8 = vadd.f32 %v365_v12, %v254_v37 }
 0x32b   :  { %2854 = vmatpush.msra.mxu1 %v5531_v40  ;;  %v669_v53 = vsel %vm668_vm3, %v7011_v22, %v7009_v15  ;;  %v372_v45 = vadd.f32 %v364_v4, %v253_v20  ;;  %v2288_v37 = vmul.f32 %v7897_v9, %v7810_v29  ;;  %v2287_v28 = vmul.f32 %v7904_v61, %v7810_v29 }
 0x32c   :  { %2790 = vmatpush.msra.mxu0 %v5496_v25  ;;  %v678_v50 = vadd.f32 %v670_v42, %v373_v8  ;;  %v256_v54 = vmul.f32 %v7897_v9, %v7843_v27 }
 0x32d   :  { %2855 = vmatpush.msra.mxu1 %v5528_v33  ;;  %v677_v15 = vadd.f32 %v669_v53, %v372_v45 }
 0x32e   :  { %2791 = vmatpush.msra.mxu0 %v5495_v34  ;;  %v983_v0 = vadd.f32 %v975_v43, %v678_v50  ;;  %v7929_v34 = vstv %s2472_s14  ;;  %v366_v50 = vsel %vm363_vm2, %v6829_v49, %v6793_v55  ;;  %s5339_s14 = sld [smem:[#allocation15 + $0x36]] }
 0x32f   :  { %1999 = vrot.lane.b32.xlu1 %v1983_v30, %s6406_s21  ;;  %1997 = vrot.lane.b32.xlu0 %v1982_v3, %s6406_s21  ;;  %v982_v47 = vadd.f32 %v974_v21, %v677_v15  ;;  %v7917_v3 = vstv %s5337_s23  ;;  %v7956_v21 = vld [vmem:[%s9485_s6 + $0x10] sm:$0xff]  ;;  %s8113_s23 = sld [smem:[#allocation15 + $0x10]] }
 0x330   :  { %2001 = vrot.lane.b32.xlu2 %v1984_v5, %s6406_s21  ;;  %2856 = vmatpush.msra.mxu1 %v5527_v17  ;;  %v1288_v36 = vadd.f32 %v1280_v16, %v983_v0  ;;  %v367_v5 = vsel %vm363_vm2, %v6793_v55, %v6801_v59  ;;  %v7946_v59 = vld [vmem:[%s9485_s6] sm:$0xff]  ;;  %v2019_v15 = vmul.f32 %v7956_v21, %v7917_v3 }
 0x331   :  { %v1879_v22 = vpop.permute.xlu1 %1878  ;;  %v1877_v41 = vpop.permute.xlu0 %1876  ;;  %v1287_v25 = vadd.f32 %v1279_v24, %v982_v47  ;;  %v375_v49 = vadd.f32 %v367_v5, %v256_v54  ;;  %v671_v0 = vsel %vm668_vm3, %v7023_v1, %v7021_v23  ;;  %v977_v24 = vsel %vm973_vm4, %v7213_v7, %v7181_v18 }
 0x332   :  { %v7892_v40 = vpop.permute.xlu2 %2191  ;;  %v1890_v33 = vsel %vm1888_vm5, %v1879_v22, %v7785_v44  ;;  %v1889_v20 = vsel %vm1888_vm5, %v1877_v41, %v1879_v22  ;;  %v1593_v12 = vadd.f32 %v7610_v13, %v1288_v36  ;;  %v255_v44 = vmul.f32 %v7904_v61, %v7843_v27  ;;  %v7939_v27 = vld [vmem:[%s9485_s6 + $0x8] sm:$0xff] }
 0x333   :  { %v1592_v30 = vadd.f32 %v7613_v19, %v1287_v25  ;;  %v2018_v43 = vmul.f32 %v7939_v27, %v7917_v3  ;;  %v672_v22 = vsel %vm668_vm3, %v7021_v23, %v6989_v11 }
 0x334   :  { %v1898_v13 = vadd.f32 %v1890_v33, %v1593_v12  ;;  %v374_v16 = vadd.f32 %v366_v50, %v255_v44  ;;  %v1281_v12 = vsel %vm1278_vm0, %v7437_v46, %v7435_v58 }
 0x335   :  { %v1897_v29 = vadd.f32 %v1889_v20, %v1592_v30  ;;  %v1282_v20 = vsel %vm1278_vm0, %v7435_v58, %v7403_v32 }
 0x336   :  { %v679_v23 = vadd.f32 %v671_v0, %v374_v16 }
 0x337   :  { %2304 = vrot.lane.b32.xlu1 %v2288_v37, %s6407_s18  ;;  %2302 = vrot.lane.b32.xlu0 %v2287_v28, %s6407_s18  ;;  %v680_v37 = vadd.f32 %v672_v22, %v375_v49  ;;  %v976_v28 = vsel %vm973_vm4, %v7215_v26, %v7213_v7  ;;  %v2020_v49 = vmul.f32 %v7904_v61, %v7917_v3 }
 0x338   :  { %2306 = vrot.lane.b32.xlu2 %v2289_v63, %s6407_s18  ;;  %v7982_v63 = vstv %s7919_s24  ;;  %v984_v26 = vadd.f32 %v976_v28, %v679_v23  ;;  %v708_v28 = vsel %vm668_vm3, %v7033_v14, %v7001_v31  ;;  %v1013_v31 = vsel %vm973_vm4, %v7225_v10, %v7193_v60  ;;  %s5351_s24 = sld [smem:[#allocation16 + $0x3]] }
 0x339   :  { %v2184_v19 = vpop.permute.xlu1 %2183  ;;  %v2182_v4 = vpop.permute.xlu0 %2181  ;;  %v985_v33 = vadd.f32 %v977_v24, %v680_v37  ;;  %v2323_v30 = vmul.f32 %v7939_v27, %v7982_v63  ;;  %v2322_v54 = vmul.f32 %v7946_v59, %v7982_v63  ;;  %v2324_v44 = vmul.f32 %v7956_v21, %v7982_v63 }
 0x33a   :  { %v2195_v42 = vsel %vm2193_vm6, %v2184_v19, %v7820_v51  ;;  %v2194_v17 = vsel %vm2193_vm6, %v2182_v4, %v2184_v19  ;;  %v7934_v8 = vpop.permute.xlu2 %1919  ;;  %v2017_v51 = vmul.f32 %v7946_v59, %v7917_v3 }
 0x33b   :  { %v2203_v53 = vadd.f32 %v2195_v42, %v1898_v13  ;;  %v2202_v45 = vadd.f32 %v2194_v17, %v1897_v29  ;;  %v8000_v13 = vstv %s7960_s29  ;;  %v1290_v32 = vadd.f32 %v1282_v20, %v985_v33 }
 0x33c   :  { %v1289_v29 = vadd.f32 %v1281_v12, %v984_v26  ;;  %v264_v5 = vmul.f32 %v7939_v27, %v8000_v13  ;;  %v263_v42 = vmul.f32 %v7946_v59, %v8000_v13  ;;  %v9667_v12 = vld [vmem:[#allocation184_spill] sm:$0xff]  ;;  %v9668_v26 = vld [vmem:[#allocation187_spill] sm:$0xff] }
 0x33d   :  { %v7966_v41 = vadd.f32 %v7929_v34, %v2203_v53  ;;  %v2474_v55 = vadd.f32 %v7929_v34, %v2202_v45  ;;  %v1595_v19 = vadd.f32 %v7622_v48, %v1290_v32 }
 0x33e   :  { %v1594_v4 = vadd.f32 %v7625_v62, %v1289_v29  ;;  %v2325_v29 = vmul.f32 %v7904_v61, %v7982_v63 }
 0x33f   :  { %2031 = vrot.lane.b32.xlu1 %v2018_v43, %s6406_s21  ;;  %2029 = vrot.lane.b32.xlu0 %v2017_v51, %s6406_s21  ;;  %v2552_v11 = vmin.f32 %v2474_v55, 0.0  ;;  %v2553_v47 = vmin.f32 %v7966_v41, 0.0  ;;  %v2021_v43 = vmul.f32 %v7897_v9, %v7917_v3  ;;  %vm2520_vm7 = vcmp.gt.f32.partialorder %v2474_v55, 0.0 }
 0x340   :  { %2033 = vrot.lane.b32.xlu2 %v2019_v15, %s6406_s21  ;;  %vm2521_vm8 = vcmp.gt.f32.partialorder %v7966_v41, 0.0 }
 0x341   :  { %v1885_v1 = vpop.permute.xlu1 %1884  ;;  %v1883_v18 = vpop.permute.xlu0 %1882  ;;  %v2584_v36 = vmul.f32 1.442695, %v2552_v11  ;;  %v2586_v25 = vmul.f32 1.442695, %v2553_v47  ;;  %v402_v11 = vsel %vm363_vm2, %v6843_v57, %v6841_v56 }
 0x342   :  { %v7991_v7 = vpop.permute.xlu2 %2224  ;;  %v1892_v58 = vsel %vm1888_vm5, %v1885_v1, %v7855_v38  ;;  %v1891_v46 = vsel %vm1888_vm5, %v1883_v18, %v1885_v1  ;;  %v403_v38 = vsel %vm363_vm2, %v6841_v56, %v6809_v35  ;;  %v707_v1 = vsel %vm668_vm3, %v7035_v6, %v7033_v14 }
 0x343   :  { %6073 = vpow2.f32 %v2584_v36  ;;  %v1900_v48 = vadd.f32 %v1892_v58, %v1595_v19  ;;  %v1899_v53 = vadd.f32 %v1891_v46, %v1594_v4  ;;  %v1012_v14 = vsel %vm973_vm4, %v7227_v2, %v7225_v10 }
 0x344   :  { %6075 = vpow2.f32 %v2586_v25  ;;  %v2326_v2 = vmul.f32 %v7897_v9, %v7982_v63 }
 0x347   :  { %2336 = vrot.lane.b32.xlu1 %v2323_v30, %s6407_s18  ;;  %2334 = vrot.lane.b32.xlu0 %v2322_v54, %s6407_s18  ;;  %v1318_v30 = vsel %vm1278_vm0, %v9668_v26, %v9667_v12  ;;  %v9669_v54 = vld [vmem:[#allocation188_spill] sm:$0xff]  ;;  %v9678_v12 = vld [vmem:[#allocation145_spill] sm:$0xff] }
 0x348   :  { %2338 = vrot.lane.b32.xlu2 %v2324_v44, %s6407_s18  ;;  %v1317_v44 = vsel %vm1278_vm0, %v9669_v54, %v9668_v26  ;;  %v9679_v26 = vld [vmem:[#allocation148_spill] sm:$0xff] }
 0x349   :  { %v6074_v17 = vpop.eup %6073  ;;  %v2190_v62 = vpop.permute.xlu1 %2189 }
 0x34a   :  { %v2188_v45 = vpop.permute.xlu0 %2187  ;;  %v6076_v51 = vpop.eup %6075  ;;  %v2197_v50 = vsel %vm2193_vm6, %v2190_v62, %v7892_v40  ;;  %v5356_v22 = vadd.f32 -1.0, %v6074_v17  ;;  %v8033_v40 = vld [vmem:[%s9485_s6 + $0x28] sm:$0xff]  ;;  %v9670_v17 = vld [vmem:[#allocation225_spill] sm:$0xff] }
 0x34b   :  { %v2196_v15 = vsel %vm2193_vm6, %v2188_v45, %v2190_v62  ;;  %v8024_v0 = vpop.permute.xlu2 %1925  ;;  %v2205_v35 = vadd.f32 %v2197_v50, %v1900_v48  ;;  %v5357_v24 = vadd.f32 -1.0, %v6076_v51  ;;  %v2022_v37 = vmul.f32 %v8033_v40, %v7917_v3  ;;  %v9671_v48 = vld [vmem:[#allocation226_spill] sm:$0xff]  ;;  %v9672_v62 = vld [vmem:[#allocation67_spill] sm:$0xff] }
 0x34c   :  { %v2204_v16 = vadd.f32 %v2196_v15, %v1899_v53  ;;  %v2680_v47 = vsel %vm2520_vm7, %v2474_v55, %v5356_v22  ;;  %v411_v55 = vadd.f32 %v403_v38, %v264_v5  ;;  %v410_v3 = vadd.f32 %v402_v11, %v263_v42  ;;  %v9673_v45 = vld [vmem:[#allocation70_spill] sm:$0xff] }
 0x34d   :  { %v8041_v23 = vadd.f32 %v7929_v34, %v2205_v35  ;;  %2792 = vmatmul.f32.vlgmr.msra.gmra.mxu0 %v2680_v47  ;;  %v2681_v57 = vsel %vm2521_vm8, %v7966_v41, %v5357_v24  ;;  %v2327_v58 = vmul.f32 %v8033_v40, %v7982_v63  ;;  %v8078_v42 = vstv %s5338_s22 }
 0x34e   :  { %v8044_v56 = vadd.f32 %v7929_v34, %v2204_v16  ;;  %2857 = vmatmul.f32.vlgmr.msra.gmra.mxu1 %v2681_v57  ;;  %v716_v18 = vadd.f32 %v708_v28, %v411_v55  ;;  %v715_v6 = vadd.f32 %v707_v1, %v410_v3  ;;  %v266_v63 = vmul.f32 %v7897_v9, %v8000_v13  ;;  %v9674_v3 = vld [vmem:[#allocation71_spill] sm:$0xff] }
 0x34f   :  { %2037 = vrot.lane.b32.xlu1 %v2021_v43, %s6406_s21  ;;  %2035 = vrot.lane.b32.xlu0 %v2020_v49, %s6406_s21  ;;  %v2555_v41 = vmin.f32 %v8041_v23, 0.0  ;;  %v405_v43 = vsel %vm363_vm2, %v9673_v45, %v9672_v62  ;;  %v8094_v22 = vstv %s5349_s15  ;;  %v2056_v16 = vmul.f32 %v7939_v27, %v8078_v42 }
 0x350   :  { %v2554_v34 = vmin.f32 %v8044_v56, 0.0  ;;  %2039 = vrot.lane.b32.xlu2 %v2022_v37, %s6406_s21  ;;  %v1021_v20 = vadd.f32 %v1013_v31, %v716_v18  ;;  %v1020_v10 = vadd.f32 %v1012_v14, %v715_v6  ;;  %v2055_v37 = vmul.f32 %v7946_v59, %v8078_v42  ;;  %v9676_v18 = vld [vmem:[#allocation109_spill] sm:$0xff] }
 0x351   :  { %v1918_v36 = vpop.permute.xlu1 %1917  ;;  %v2590_v33 = vmul.f32 1.442695, %v2555_v41  ;;  %vm2522_vm9 = vcmp.gt.f32.partialorder %v8044_v56, 0.0  ;;  %v404_v31 = vsel %vm363_vm2, %v9674_v3, %v9673_v45  ;;  %vm2523_vm10 = vcmp.gt.f32.partialorder %v8041_v23, 0.0  ;;  %v9675_v41 = vld [vmem:[#allocation106_spill] sm:$0xff]  ;;  %v9687_v3 = vld [vmem:[#allocation73_spill] sm:$0xff] }
 0x352   :  { %v1916_v25 = vpop.permute.xlu0 %1915  ;;  %v2588_v60 = vmul.f32 1.442695, %v2554_v34  ;;  %v1326_v46 = vadd.f32 %v1318_v30, %v1021_v20  ;;  %v1325_v19 = vadd.f32 %v1317_v44, %v1020_v10  ;;  %v1928_v4 = vsel %vm1888_vm5, %v1918_v36, %v7934_v8 }
 0x353   :  { %v8067_v32 = vpop.permute.xlu2 %2230  ;;  %v1927_v5 = vsel %vm1888_vm5, %v1916_v25, %v1918_v36  ;;  %v265_v8 = vmul.f32 %v7904_v61, %v8000_v13  ;;  %v710_v14 = vsel %vm668_vm3, %v9676_v18, %v9675_v41  ;;  %v413_v25 = vadd.f32 %v405_v43, %v266_v63  ;;  %v9683_v63 = vld [vmem:[#allocation191_spill] sm:$0xff] }
 0x354   :  { %6077 = vpow2.f32 %v2588_v60  ;;  %v1631_v38 = vadd.f32 %v9670_v17, %v1326_v46  ;;  %v1630_v53 = vadd.f32 %v9671_v48, %v1325_v19  ;;  %v9677_v60 = vld [vmem:[#allocation110_spill] sm:$0xff]  ;;  %v1015_v30 = vsel %vm973_vm4, %v9679_v26, %v9678_v12 }
 0x355   :  { %6079 = vpow2.f32 %v2590_v33  ;;  %v709_v33 = vsel %vm668_vm3, %v9677_v60, %v9676_v18  ;;  %v412_v20 = vadd.f32 %v404_v31, %v265_v8  ;;  %v718_v10 = vadd.f32 %v710_v14, %v413_v25  ;;  %v9682_v48 = vld [vmem:[#allocation190_spill] sm:$0xff] }
 0x356   :  { %v1936_v50 = vadd.f32 %v1928_v4, %v1631_v38  ;;  %v1935_v15 = vadd.f32 %v1927_v5, %v1630_v53  ;;  %v9681_v38 = vld [vmem:[#allocation185_spill] sm:$0xff]  ;;  %v1319_v62 = vsel %vm1278_vm0, %v9683_v63, %v9682_v48  ;;  %v2059_v14 = vmul.f32 %v7897_v9, %v8078_v42 }
 0x357   :  { %2342 = vrot.lane.b32.xlu1 %v2326_v2, %s6407_s18  ;;  %2340 = vrot.lane.b32.xlu0 %v2325_v29, %s6407_s18  ;;  %v8136_v29 = vstv %s8091_s20  ;;  %v1023_v17 = vadd.f32 %v1015_v30, %v718_v10  ;;  %v1320_v53 = vsel %vm1278_vm0, %v9682_v48, %v9681_v38  ;;  %v9692_v48 = vld [vmem:[#allocation146_spill] sm:$0xff]  ;;  %s5354_s20 = sld [smem:[#allocation16 + $0x6]] }
 0x358   :  { %2344 = vrot.lane.b32.xlu2 %v2327_v58, %s6407_s18  ;;  %v717_v58 = vadd.f32 %v709_v33, %v412_v20  ;;  %v2361_v8 = vmul.f32 %v7939_v27, %v8136_v29  ;;  %v2058_v20 = vmul.f32 %v7904_v61, %v8078_v42 }
 0x359   :  { %v2223_v49 = vpop.permute.xlu1 %2222 }
 0x35a   :  { %v6078_v51 = vpop.eup %6077  ;;  %v2221_v35 = vpop.permute.xlu0 %2220  ;;  %v2233_v11 = vsel %vm2193_vm6, %v2223_v49, %v7991_v7  ;;  %v2057_v7 = vmul.f32 %v7956_v21, %v8078_v42 }
 0x35b   :  { %v6080_v24 = vpop.eup %6079  ;;  %v2232_v13 = vsel %vm2193_vm6, %v2221_v35, %v2223_v49  ;;  %v5358_v47 = vadd.f32 -1.0, %v6078_v51  ;;  %v8103_v28 = vpop.permute.xlu2 %1957  ;;  %v2241_v57 = vadd.f32 %v2233_v11, %v1936_v50  ;;  %v2360_v51 = vmul.f32 %v7946_v59, %v8136_v29  ;;  %v9684_v11 = vld [vmem:[#allocation227_spill] sm:$0xff] }
 0x35c   :  { %v2240_v55 = vadd.f32 %v2232_v13, %v1935_v15  ;;  %v5359_v1 = vadd.f32 -1.0, %v6080_v24  ;;  %v2362_v50 = vmul.f32 %v7956_v21, %v8136_v29  ;;  %v8154_v15 = vstv %s8113_s23  ;;  %s5292_s23 = sld [smem:[#allocation15 + $0x38]] }
 0x35d   :  { %v2682_v34 = vsel %vm2522_vm9, %v8044_v56, %v5358_v47  ;;  %v8119_v6 = vadd.f32 %v8094_v22, %v2241_v57  ;;  %v1328_v49 = vadd.f32 %v1320_v53, %v1023_v17  ;;  %v9685_v47 = vld [vmem:[#allocation228_spill] sm:$0xff]  ;;  %v274_v57 = vmul.f32 %v7939_v27, %v8154_v15  ;;  %v9693_v53 = vld [vmem:[#allocation151_spill] sm:$0xff] }
 0x35e   :  { %v2480_v36 = vadd.f32 %v8094_v22, %v2240_v55  ;;  %2795 = vmatmul.f32.gmra.mxu0 %v2682_v34  ;;  %v2683_v56 = vsel %vm2523_vm10, %v8041_v23, %v5359_v1  ;;  %v9680_v23 = vld [vmem:[#allocation149_spill] sm:$0xff]  ;;  %v273_v55 = vmul.f32 %v7946_v59, %v8154_v15  ;;  %v1051_v63 = vsel %vm973_vm4, %v9693_v53, %v9692_v48 }
 0x35f   :  { %2860 = vmatmul.f32.gmra.mxu1 %v2683_v56  ;;  %2069 = vrot.lane.b32.xlu1 %v2056_v16, %s6406_s21  ;;  %v2557_v44 = vmin.f32 %v8119_v6, 0.0  ;;  %v1014_v2 = vsel %vm973_vm4, %v9680_v23, %v9679_v26  ;;  %v1633_v13 = vadd.f32 %v9684_v11, %v1328_v49  ;;  %vm2525_vm12 = vcmp.gt.f32.partialorder %v8119_v6, 0.0  ;;  %v9695_v11 = vld [vmem:[#allocation186_spill] sm:$0xff] }
 0x360   :  { %2067 = vrot.lane.b32.xlu0 %v2055_v37, %s6406_s21  ;;  %v2556_v54 = vmin.f32 %v2480_v36, 0.0  ;;  %2071 = vrot.lane.b32.xlu2 %v2057_v7, %s6406_s21  ;;  %v1022_v43 = vadd.f32 %v1014_v2, %v717_v58  ;;  %vm2524_vm11 = vcmp.gt.f32.partialorder %v2480_v36, 0.0  ;;  %v9689_v2 = vld [vmem:[#allocation107_spill] sm:$0xff]  ;;  %v9690_v58 = vld [vmem:[#allocation112_spill] sm:$0xff] }
 0x361   :  { %v1924_v46 = vpop.permute.xlu1 %1923  ;;  %v2594_v5 = vmul.f32 1.442695, %v2557_v44  ;;  %v9688_v44 = vld [vmem:[#allocation74_spill] sm:$0xff] }
 0x362   :  { %v1922_v19 = vpop.permute.xlu0 %1921  ;;  %v2592_v4 = vmul.f32 1.442695, %v2556_v54  ;;  %v1327_v35 = vadd.f32 %v1319_v62, %v1022_v43  ;;  %v1930_v16 = vsel %vm1888_vm5, %v1924_v46, %v8024_v0  ;;  %v9686_v0 = vld [vmem:[#allocation68_spill] sm:$0xff]  ;;  %v440_v10 = vsel %vm363_vm2, %v9688_v44, %v9687_v3 }
 0x363   :  { %v8145_v45 = vpop.permute.xlu2 %2262  ;;  %v1929_v24 = vsel %vm1888_vm5, %v1922_v19, %v1924_v46  ;;  %v441_v31 = vsel %vm363_vm2, %v9687_v3, %v9686_v0  ;;  %v1938_v34 = vadd.f32 %v1930_v16, %v1633_v13  ;;  %v746_v46 = vsel %vm668_vm3, %v9690_v58, %v9689_v2  ;;  %v9694_v43 = vld [vmem:[#allocation152_spill] sm:$0xff]  ;;  %v9696_v13 = vld [vmem:[#allocation193_spill] sm:$0xff] }
 0x364   :  { %6081 = vpow2.f32 %v2592_v4  ;;  %v1632_v37 = vadd.f32 %v9685_v47, %v1327_v35  ;;  %v449_v17 = vadd.f32 %v441_v31, %v274_v57  ;;  %v1356_v47 = vsel %vm1278_vm0, %v9696_v13, %v9695_v11  ;;  %v9706_v11 = vld [vmem:[#allocation147_spill] sm:$0xff] }
 0x365   :  { %6083 = vpow2.f32 %v2594_v5  ;;  %v2364_v0 = vmul.f32 %v7897_v9, %v8136_v29  ;;  %v2363_v3 = vmul.f32 %v7904_v61, %v8136_v29  ;;  %v2365_v31 = vmul.f32 %v8033_v40, %v8136_v29 }
 0x366   :  { %v1937_v7 = vadd.f32 %v1929_v24, %v1632_v37  ;;  %v754_v62 = vadd.f32 %v746_v46, %v449_v17  ;;  %v9697_v37 = vld [vmem:[#allocation194_spill] sm:$0xff]  ;;  %v276_v29 = vmul.f32 %v7897_v9, %v8154_v15 }
 0x367   :  { %2374 = vrot.lane.b32.xlu1 %v2361_v8, %s6407_s18  ;;  %v1050_v8 = vsel %vm973_vm4, %v9694_v43, %v9693_v53  ;;  %v1355_v57 = vsel %vm1278_vm0, %v9697_v37, %v9696_v13  ;;  %v9704_v43 = vld [vmem:[#allocation115_spill] sm:$0xff]  ;;  %v9707_v13 = vld [vmem:[#allocation154_spill] sm:$0xff] }
 0x368   :  { %2372 = vrot.lane.b32.xlu0 %v2360_v51, %s6407_s18  ;;  %2376 = vrot.lane.b32.xlu2 %v2362_v50, %s6407_s18  ;;  %v1059_v24 = vadd.f32 %v1051_v63, %v754_v62  ;;  %v9702_v63 = vld [vmem:[#allocation77_spill] sm:$0xff]  ;;  %v9703_v62 = vld [vmem:[#allocation108_spill] sm:$0xff] }
 0x369   :  { %v2229_v41 = vpop.permute.xlu1 %2228 }
 0x36a   :  { %v6082_v1 = vpop.eup %6081  ;;  %v2227_v18 = vpop.permute.xlu0 %2226  ;;  %v2235_v25 = vsel %vm2193_vm6, %v2229_v41, %v8067_v32  ;;  %v2060_v32 = vmul.f32 %v8033_v40, %v8078_v42  ;;  %v448_v42 = vadd.f32 %v440_v10, %v273_v55 }
 0x36b   :  { %v6084_v56 = vpop.eup %6083  ;;  %v2234_v60 = vsel %vm2193_vm6, %v2227_v18, %v2229_v41  ;;  %v5360_v33 = vadd.f32 -1.0, %v6082_v1  ;;  %v8178_v12 = vpop.permute.xlu2 %1963  ;;  %v2243_v26 = vadd.f32 %v2235_v25, %v1938_v34  ;;  %v1364_v34 = vadd.f32 %v1356_v47, %v1059_v24 }
 0x36c   :  { %v2242_v30 = vadd.f32 %v2234_v60, %v1937_v7  ;;  %v5361_v54 = vadd.f32 -1.0, %v6084_v56  ;;  %v9698_v56 = vld [vmem:[#allocation229_spill] sm:$0xff]  ;;  %v9699_v60 = vld [vmem:[#allocation230_spill] sm:$0xff]  ;;  %v1053_v47 = vsel %vm973_vm4, %v9707_v13, %v9706_v11 }
 0x36d   :  { %v2684_v23 = vsel %vm2524_vm11, %v2480_v36, %v5360_v33  ;;  %v8190_v19 = vadd.f32 %v8094_v22, %v2243_v26  ;;  %v9691_v36 = vld [vmem:[#allocation113_spill] sm:$0xff]  ;;  %v1669_v25 = vadd.f32 %v9698_v56, %v1364_v34  ;;  %v9701_v26 = vld [vmem:[#allocation76_spill] sm:$0xff] }
 0x36e   :  { %v8193_v4 = vadd.f32 %v8094_v22, %v2242_v30  ;;  %2798 = vmatmul.f32.gmra.mxu0 %v2684_v23  ;;  %v2685_v5 = vsel %vm2525_vm12, %v8119_v6, %v5361_v54  ;;  %v745_v38 = vsel %vm668_vm3, %v9691_v36, %v9690_v58  ;;  %v8243_v23 = vstv %s5350_s1 }
 0x36f   :  { %2863 = vmatmul.f32.gmra.mxu1 %v2685_v5  ;;  %2075 = vrot.lane.b32.xlu1 %v2059_v14, %s6406_s21  ;;  %v2559_v6 = vmin.f32 %v8190_v19, 0.0  ;;  %v753_v51 = vadd.f32 %v745_v38, %v448_v42  ;;  %v8227_v14 = vstv %s5339_s14  ;;  %vm2527_vm14 = vcmp.gt.f32.partialorder %v8190_v19, 0.0  ;;  %s5355_s14 = sld [smem:[#allocation16 + $0x7]] }
 0x370   :  { %2073 = vrot.lane.b32.xlu0 %v2058_v20, %s6406_s21  ;;  %v2558_v22 = vmin.f32 %v8193_v4, 0.0  ;;  %2077 = vrot.lane.b32.xlu2 %v2060_v32, %s6406_s21  ;;  %v9700_v20 = vld [vmem:[#allocation69_spill] sm:$0xff]  ;;  %v2094_v58 = vmul.f32 %v7939_v27, %v8227_v14  ;;  %v2093_v36 = vmul.f32 %v7946_v59, %v8227_v14  ;;  %vm2526_vm13 = vcmp.gt.f32.partialorder %v8193_v4, 0.0 }
 0x371   :  { %v1956_v50 = vpop.permute.xlu1 %1955  ;;  %v2598_v16 = vmul.f32 1.442695, %v2559_v6  ;;  %v1058_v1 = vadd.f32 %v1050_v8, %v753_v51  ;;  %v443_v30 = vsel %vm363_vm2, %v9701_v26, %v9700_v20  ;;  %v748_v8 = vsel %vm668_vm3, %v9704_v43, %v9703_v62 }
 0x372   :  { %v1954_v49 = vpop.permute.xlu0 %1953  ;;  %v2596_v35 = vmul.f32 1.442695, %v2558_v22  ;;  %v1966_v41 = vsel %vm1888_vm5, %v1956_v50, %v8103_v28  ;;  %v275_v28 = vmul.f32 %v7904_v61, %v8154_v15  ;;  %v442_v22 = vsel %vm363_vm2, %v9702_v63, %v9701_v26  ;;  %v9715_v63 = vld [vmem:[#allocation79_spill] sm:$0xff] }
 0x373   :  { %v8216_v55 = vpop.permute.xlu2 %2268  ;;  %v1363_v7 = vadd.f32 %v1355_v57, %v1058_v1  ;;  %v1965_v18 = vsel %vm1888_vm5, %v1954_v49, %v1956_v50  ;;  %v1974_v44 = vadd.f32 %v1966_v41, %v1669_v25  ;;  %v451_v49 = vadd.f32 %v443_v30, %v276_v29  ;;  %v9709_v25 = vld [vmem:[#allocation189_spill] sm:$0xff] }
 0x374   :  { %6085 = vpow2.f32 %v2596_v35  ;;  %v9705_v35 = vld [vmem:[#allocation116_spill] sm:$0xff]  ;;  %v450_v24 = vadd.f32 %v442_v22, %v275_v28  ;;  %v9711_v29 = vld [vmem:[#allocation197_spill] sm:$0xff] }
 0x375   :  { %6087 = vpow2.f32 %v2598_v16  ;;  %v1668_v33 = vadd.f32 %v9699_v60, %v1363_v7  ;;  %v747_v16 = vsel %vm668_vm3, %v9705_v35, %v9704_v43  ;;  %v756_v1 = vadd.f32 %v748_v8, %v451_v49  ;;  %v9710_v60 = vld [vmem:[#allocation196_spill] sm:$0xff] }
 0x376   :  { %v1357_v20 = vsel %vm1278_vm0, %v9711_v29, %v9710_v60  ;;  %v2097_v8 = vmul.f32 %v7897_v9, %v8227_v14 }
 0x377   :  { %2380 = vrot.lane.b32.xlu1 %v2364_v0, %s6407_s18  ;;  %v1973_v10 = vadd.f32 %v1965_v18, %v1668_v33  ;;  %v1061_v56 = vadd.f32 %v1053_v47, %v756_v1  ;;  %v1358_v33 = vsel %vm1278_vm0, %v9710_v60, %v9709_v25  ;;  %v9720_v60 = vld [vmem:[#allocation150_spill] sm:$0xff] }
 0x378   :  { %2378 = vrot.lane.b32.xlu0 %v2363_v3, %s6407_s18  ;;  %2382 = vrot.lane.b32.xlu2 %v2365_v31, %s6407_s18  ;;  %v8285_v3 = vstv %s8240_s2  ;;  %v755_v31 = vadd.f32 %v747_v16, %v450_v24  ;;  %v2096_v24 = vmul.f32 %v7904_v61, %v8227_v14 }
 0x379   :  { %v2261_v32 = vpop.permute.xlu1 %2260  ;;  %v2399_v28 = vmul.f32 %v7939_v27, %v8285_v3 }
 0x37a   :  { %v6086_v54 = vpop.eup %6085  ;;  %v2259_v2 = vpop.permute.xlu0 %2258  ;;  %v2271_v5 = vsel %vm2193_vm6, %v2261_v32, %v8145_v45  ;;  %v2095_v45 = vmul.f32 %v7956_v21, %v8227_v14 }
 0x37b   :  { %v6088_v46 = vpop.eup %6087  ;;  %v2270_v15 = vsel %vm2193_vm6, %v2259_v2, %v2261_v32  ;;  %v5362_v17 = vadd.f32 -1.0, %v6086_v54  ;;  %v8252_v38 = vpop.permute.xlu2 %1995  ;;  %v2279_v42 = vadd.f32 %v2271_v5, %v1974_v44  ;;  %v2398_v54 = vmul.f32 %v7946_v59, %v8285_v3  ;;  %v9712_v5 = vld [vmem:[#allocation231_spill] sm:$0xff] }
 0x37c   :  { %v2278_v48 = vadd.f32 %v2270_v15, %v1973_v10  ;;  %v5363_v53 = vadd.f32 -1.0, %v6088_v46  ;;  %v2400_v44 = vmul.f32 %v7956_v21, %v8285_v3  ;;  %v8303_v10 = vstv %s8262_s25  ;;  %s241_s25 = sshll.u32 %s9357_s16, 4  ;;  %s242_s25 = int_to_ptr.hbm [resolvable:$true] %s241_s25 }
 0x37d   :  { %v2686_v6 = vsel %vm2526_vm13, %v8193_v4, %v5362_v17  ;;  %v8268_v51 = vadd.f32 %v8243_v23, %v2279_v42  ;;  %v1366_v32 = vadd.f32 %v1358_v33, %v1061_v56  ;;  %v9713_v17 = vld [vmem:[#allocation232_spill] sm:$0xff]  ;;  %v284_v42 = vmul.f32 %v7939_v27, %v8303_v10  ;;  %v9721_v33 = vld [vmem:[#allocation157_spill] sm:$0xff] }
 0x37e   :  { %v2486_v50 = vadd.f32 %v8243_v23, %v2278_v48  ;;  %2801 = vmatmul.f32.gmra.mxu0 %v2686_v6  ;;  %v2687_v4 = vsel %vm2527_vm14, %v8190_v19, %v5363_v53  ;;  %v9708_v19 = vld [vmem:[#allocation155_spill] sm:$0xff]  ;;  %v283_v48 = vmul.f32 %v7946_v59, %v8303_v10  ;;  %v1089_v29 = vsel %vm973_vm4, %v9721_v33, %v9720_v60 }
 0x37f   :  { %2866 = vmatmul.f32.gmra.mxu1 %v2687_v4  ;;  %2107 = vrot.lane.b32.xlu1 %v2094_v58, %s6406_s21  ;;  %v2561_v57 = vmin.f32 %v8268_v51, 0.0  ;;  %v1052_v0 = vsel %vm973_vm4, %v9708_v19, %v9707_v13  ;;  %v1671_v15 = vadd.f32 %v9712_v5, %v1366_v32  ;;  %vm2529_vm7 = vcmp.gt.f32.partialorder %v8268_v51, 0.0  ;;  %v9723_v5 = vld [vmem:[#allocation192_spill] sm:$0xff]  ;;  %v9730_v60 = vld [vmem:[#allocation83_spill] sm:$0xff] }
 0x380   :  { %2105 = vrot.lane.b32.xlu0 %v2093_v36, %s6406_s21  ;;  %v2560_v37 = vmin.f32 %v2486_v50, 0.0  ;;  %2109 = vrot.lane.b32.xlu2 %v2095_v45, %s6406_s21  ;;  %v1060_v30 = vadd.f32 %v1052_v0, %v755_v31  ;;  %vm2528_vm15 = vcmp.gt.f32.partialorder %v2486_v50, 0.0  ;;  %v9717_v0 = vld [vmem:[#allocation111_spill] sm:$0xff]  ;;  %v9718_v31 = vld [vmem:[#allocation118_spill] sm:$0xff] }
 0x381   :  { %v1962_v34 = vpop.permute.xlu1 %1961  ;;  %v2602_v18 = vmul.f32 1.442695, %v2561_v57  ;;  %v9716_v57 = vld [vmem:[#allocation80_spill] sm:$0xff] }
 0x382   :  { %v1960_v7 = vpop.permute.xlu0 %1959  ;;  %v2600_v41 = vmul.f32 1.442695, %v2560_v37  ;;  %v1365_v2 = vadd.f32 %v1357_v20, %v1060_v30  ;;  %v1968_v58 = vsel %vm1888_vm5, %v1962_v34, %v8178_v12  ;;  %v9714_v12 = vld [vmem:[#allocation72_spill] sm:$0xff]  ;;  %v478_v1 = vsel %vm363_vm2, %v9716_v57, %v9715_v63  ;;  %v9722_v30 = vld [vmem:[#allocation158_spill] sm:$0xff] }
 0x383   :  { %v8294_v26 = vpop.permute.xlu2 %2300  ;;  %v1967_v46 = vsel %vm1888_vm5, %v1960_v7, %v1962_v34  ;;  %v479_v22 = vsel %vm363_vm2, %v9715_v63, %v9714_v12  ;;  %v1976_v6 = vadd.f32 %v1968_v58, %v1671_v15  ;;  %v784_v34 = vsel %vm668_vm3, %v9718_v31, %v9717_v0  ;;  %v9724_v15 = vld [vmem:[#allocation199_spill] sm:$0xff] }
 0x384   :  { %6089 = vpow2.f32 %v2600_v41  ;;  %v1670_v36 = vadd.f32 %v9713_v17, %v1365_v2  ;;  %v487_v56 = vadd.f32 %v479_v22, %v284_v42  ;;  %v1394_v17 = vsel %vm1278_vm0, %v9724_v15, %v9723_v5 }
 0x385   :  { %6091 = vpow2.f32 %v2602_v18  ;;  %v2402_v12 = vmul.f32 %v7897_v9, %v8285_v3  ;;  %v2401_v63 = vmul.f32 %v7904_v61, %v8285_v3  ;;  %v2403_v22 = vmul.f32 %v8033_v40, %v8285_v3 }
 0x386   :  { %v1975_v45 = vadd.f32 %v1967_v46, %v1670_v36  ;;  %v792_v20 = vadd.f32 %v784_v34, %v487_v56  ;;  %v9725_v36 = vld [vmem:[#allocation200_spill] sm:$0xff]  ;;  %v286_v3 = vmul.f32 %v7897_v9, %v8303_v10 }
 0x387   :  { %2412 = vrot.lane.b32.xlu1 %v2399_v28, %s6407_s18  ;;  %v1088_v28 = vsel %vm973_vm4, %v9722_v30, %v9721_v33  ;;  %v1393_v42 = vsel %vm1278_vm0, %v9725_v36, %v9724_v15  ;;  %v9736_v36 = vld [vmem:[#allocation161_spill] sm:$0xff] }
 0x388   :  { %2410 = vrot.lane.b32.xlu0 %v2398_v54, %s6407_s18  ;;  %2414 = vrot.lane.b32.xlu2 %v2400_v44, %s6407_s18  ;;  %v1097_v46 = vadd.f32 %v1089_v29, %v792_v20 }
 0x389   :  { %v2267_v62 = vpop.permute.xlu1 %2266 }
 0x38a   :  { %v6090_v53 = vpop.eup %6089  ;;  %v2265_v43 = vpop.permute.xlu0 %2264  ;;  %v2273_v49 = vsel %vm2193_vm6, %v2267_v62, %v8216_v55  ;;  %v2098_v55 = vmul.f32 %v8033_v40, %v8227_v14  ;;  %v486_v14 = vadd.f32 %v478_v1, %v283_v48 }
 0x38b   :  { %v6092_v4 = vpop.eup %6091  ;;  %v2272_v35 = vsel %vm2193_vm6, %v2265_v43, %v2267_v62  ;;  %v5364_v16 = vadd.f32 -1.0, %v6090_v53  ;;  %v8327_v11 = vpop.permute.xlu2 %2001  ;;  %v2281_v13 = vadd.f32 %v2273_v49, %v1976_v6  ;;  %v1402_v6 = vadd.f32 %v1394_v17, %v1097_v46  ;;  %v9735_v46 = vld [vmem:[#allocation160_spill] sm:$0xff] }
 0x38c   :  { %v2280_v47 = vadd.f32 %v2272_v35, %v1975_v45  ;;  %v5365_v37 = vadd.f32 -1.0, %v6092_v4  ;;  %v9726_v4 = vld [vmem:[#allocation233_spill] sm:$0xff]  ;;  %v9727_v35 = vld [vmem:[#allocation234_spill] sm:$0xff] }
 0x38d   :  { %v2688_v19 = vsel %vm2528_vm15, %v2486_v50, %v5364_v16  ;;  %v8339_v7 = vadd.f32 %v8243_v23, %v2281_v13  ;;  %v9719_v50 = vld [vmem:[#allocation119_spill] sm:$0xff]  ;;  %v1707_v49 = vadd.f32 %v9726_v4, %v1402_v6  ;;  %v9729_v13 = vld [vmem:[#allocation82_spill] sm:$0xff] }
 0x38e   :  { %v8342_v41 = vadd.f32 %v8243_v23, %v2280_v47  ;;  %2804 = vmatmul.f32.gmra.mxu0 %v2688_v19  ;;  %v2689_v18 = vsel %vm2529_vm7, %v8268_v51, %v5365_v37  ;;  %v783_v25 = vsel %vm668_vm3, %v9719_v50, %v9718_v31  ;;  %v8392_v19 = vstv %s5351_s24  ;;  %v9738_v4 = vld [vmem:[#allocation202_spill] sm:$0xff] }
 0x38f   :  { %2869 = vmatmul.f32.gmra.mxu1 %v2689_v18  ;;  %2113 = vrot.lane.b32.xlu1 %v2097_v8, %s6406_s21  ;;  %v2563_v51 = vmin.f32 %v8339_v7, 0.0  ;;  %v791_v54 = vadd.f32 %v783_v25, %v486_v14  ;;  %v8376_v8 = vstv %s5332_s7  ;;  %v480_v33 = vsel %vm363_vm2, %v9730_v60, %v9729_v13  ;;  %s6408_s7 = smov [#allocation4]  }
 0x390   :  { %2111 = vrot.lane.b32.xlu0 %v2096_v24, %s6406_s21  ;;  %v2562_v23 = vmin.f32 %v8342_v41, 0.0  ;;  %2115 = vrot.lane.b32.xlu2 %v2098_v55, %s6406_s21  ;;  %v9728_v24 = vld [vmem:[#allocation75_spill] sm:$0xff]  ;;  %v1827_v9 = vmul.f32 %v7939_v27, %v8376_v8  ;;  %v1826_v18 = vmul.f32 %v7946_v59, %v8376_v8  ;;  %vm2530_vm8 = vcmp.gt.f32.partialorder %v8342_v41, 0.0  ;;  %s243_s24 = sshll.u32 %s6408_s7, 4  ;;  %s244_s24 = int_to_ptr.vmem [resolvable:$true] %s243_s24 }
 0x391   :  { %v1994_v44 = vpop.permute.xlu1 %1993  ;;  %v2606_v58 = vmul.f32 1.442695, %v2563_v51  ;;  %v1096_v53 = vadd.f32 %v1088_v28, %v791_v54  ;;  %v481_v47 = vsel %vm363_vm2, %v9729_v13, %v9728_v24  ;;  %vm2531_vm9 = vcmp.gt.f32.partialorder %v8339_v7, 0.0  ;;  %v9732_v51 = vld [vmem:[#allocation121_spill] sm:$0xff]  ;;  %246 = dma.hbm_to_vmem [thread:$0]  %s242_s25, 8192, %s244_s24, [#allocation5 + $0x2] }
 0x392   :  { %v1992_v32 = vpop.permute.xlu0 %1991  ;;  %v2604_v2 = vmul.f32 1.442695, %v2562_v23  ;;  %v2004_v62 = vsel %vm1888_vm5, %v1994_v44, %v8252_v38  ;;  %v285_v38 = vmul.f32 %v7904_v61, %v8303_v10  ;;  %v9731_v23 = vld [vmem:[#allocation114_spill] sm:$0xff]  ;;  %v489_v54 = vadd.f32 %v481_v47, %v286_v3 }
 0x393   :  { %v8365_v48 = vpop.permute.xlu2 %2306  ;;  %v1401_v45 = vadd.f32 %v1393_v42, %v1096_v53  ;;  %v2003_v43 = vsel %vm1888_vm5, %v1992_v32, %v1994_v44  ;;  %v2012_v57 = vadd.f32 %v2004_v62, %v1707_v49  ;;  %v786_v20 = vsel %vm668_vm3, %v9732_v51, %v9731_v23  ;;  %v9733_v44 = vld [vmem:[#allocation122_spill] sm:$0xff] }
 0x394   :  { %6093 = vpow2.f32 %v2604_v2  ;;  %v785_v32 = vsel %vm668_vm3, %v9733_v44, %v9732_v51  ;;  %v488_v2 = vadd.f32 %v480_v33, %v285_v38  ;;  %v794_v17 = vadd.f32 %v786_v20, %v489_v54 }
 0x395   :  { %6095 = vpow2.f32 %v2606_v58  ;;  %v1706_v16 = vadd.f32 %v9727_v35, %v1401_v45  ;;  %v9734_v58 = vld [vmem:[#allocation153_spill] sm:$0xff]  ;;  %v1090_v42 = vsel %vm973_vm4, %v9736_v36, %v9735_v46  ;;  %v8439_v53 = vstv %s8389_s3  ;;  %v9739_v35 = vld [vmem:[#allocation203_spill] sm:$0xff] }
 0x396   :  { %v1091_v5 = vsel %vm973_vm4, %v9735_v46, %v9734_v58  ;;  %v2132_v13 = vmul.f32 %v7939_v27, %v8439_v53  ;;  %v2131_v47 = vmul.f32 %v7946_v59, %v8439_v53  ;;  %v2133_v38 = vmul.f32 %v7956_v21, %v8439_v53 }
 0x397   :  { %2418 = vrot.lane.b32.xlu1 %v2402_v12, %s6407_s18  ;;  %v2011_v1 = vadd.f32 %v2003_v43, %v1706_v16  ;;  %v793_v12 = vadd.f32 %v785_v32, %v488_v2  ;;  %v1099_v62 = vadd.f32 %v1091_v5, %v794_v17  ;;  %v9737_v43 = vld [vmem:[#allocation195_spill] sm:$0xff]  ;;  %v1395_v16 = vsel %vm1278_vm0, %v9739_v35, %v9738_v4  ;;  %v9745_v17 = vld [vmem:[#allocation117_spill] sm:$0xff] }
 0x398   :  { %2416 = vrot.lane.b32.xlu0 %v2401_v63, %s6407_s18  ;;  %2420 = vrot.lane.b32.xlu2 %v2403_v22, %s6407_s18  ;;  %v1396_v49 = vsel %vm1278_vm0, %v9738_v4, %v9737_v43 }
 0x399   :  { %v2299_v55 = vpop.permute.xlu1 %2298  ;;  %v1098_v24 = vadd.f32 %v1090_v42, %v793_v12 }
 0x39a   :  { %v6094_v37 = vpop.eup %6093  ;;  %v2297_v0 = vpop.permute.xlu0 %2296  ;;  %v2309_v34 = vsel %vm2193_vm6, %v2299_v55, %v8294_v26  ;;  %v1828_v26 = vmul.f32 %v7956_v21, %v8376_v8 }
 0x39b   :  { %v6096_v31 = vpop.eup %6095  ;;  %v2308_v61 = vsel %vm2193_vm6, %v2297_v0, %v2299_v55  ;;  %v5366_v10 = vadd.f32 -1.0, %v6094_v37  ;;  %v8401_v56 = vpop.permute.xlu2 %2033  ;;  %v2317_v50 = vadd.f32 %v2309_v34, %v2012_v57  ;;  %v8457_v37 = vstv %s8411_s17 }
 0x39c   :  { %v2316_v25 = vadd.f32 %v2308_v61, %v2011_v1  ;;  %v5367_v14 = vadd.f32 -1.0, %v6096_v31  ;;  %v1404_v57 = vadd.f32 %v1396_v49, %v1099_v62  ;;  %v1403_v1 = vadd.f32 %v1395_v16, %v1098_v24  ;;  %v9740_v31 = vld [vmem:[#allocation235_spill] sm:$0xff]  ;;  %v9741_v61 = vld [vmem:[#allocation236_spill] sm:$0xff] }
 0x39d   :  { %v2690_v29 = vsel %vm2530_vm8, %v8342_v41, %v5366_v10  ;;  %v8417_v30 = vadd.f32 %v8392_v19, %v2317_v50  ;;  %v293_v50 = vmul.f32 %v7946_v59, %v8457_v37  ;;  %v9749_v62 = vld [vmem:[#allocation163_spill] sm:$0xff]  ;;  %v9750_v49 = vld [vmem:[#allocation164_spill] sm:$0xff] }
 0x39e   :  { %v8420_v28 = vadd.f32 %v8392_v19, %v2316_v25  ;;  %2807 = vmatmul.f32.gmra.mxu0 %v2690_v29  ;;  %v2691_v41 = vsel %vm2531_vm9, %v8339_v7, %v5367_v14  ;;  %v1709_v34 = vadd.f32 %v9740_v31, %v1404_v57  ;;  %v1708_v10 = vadd.f32 %v9741_v61, %v1403_v1  ;;  %v9742_v25 = vld [vmem:[#allocation78_spill] sm:$0xff]  ;;  %v9743_v14 = vld [vmem:[#allocation85_spill] sm:$0xff] }
 0x39f   :  { %2872 = vmatmul.f32.gmra.mxu1 %v2691_v41  ;;  %1840 = vrot.lane.b32.xlu1 %v1827_v9, %s6405_s26  ;;  %v2565_v7 = vmin.f32 %v8417_v30, 0.0  ;;  %v8463_v9 = vstv %s8426_s8  ;;  %v517_v60 = vsel %vm363_vm2, %v9743_v14, %v9742_v25  ;;  %vm2533_vm11 = vcmp.gt.f32.partialorder %v8417_v30, 0.0  ;;  %v9751_v1 = vld [vmem:[#allocation198_spill] sm:$0xff] }
 0x3a0   :  { %1838 = vrot.lane.b32.xlu0 %v1826_v18, %s6405_s26  ;;  %v2564_v15 = vmin.f32 %v8420_v28, 0.0  ;;  %1842 = vrot.lane.b32.xlu2 %v1828_v26, %s6405_s26  ;;  %v294_v18 = vmul.f32 %v7939_v27, %v8457_v37  ;;  %v2437_v51 = vmul.f32 %v7939_v27, %v8463_v9  ;;  %v2436_v32 = vmul.f32 %v7946_v59, %v8463_v9  ;;  %v9746_v59 = vld [vmem:[#allocation124_spill] sm:$0xff]  ;;  %v9753_v31 = vld [vmem:[#allocation206_spill] sm:$0xff] }
 0x3a1   :  { %v2000_v63 = vpop.permute.xlu1 %1999  ;;  %v2610_v45 = vmul.f32 1.442695, %v2565_v7  ;;  %vm2532_vm10 = vcmp.gt.f32.partialorder %v8420_v28, 0.0  ;;  %v822_v36 = vsel %vm668_vm3, %v9746_v59, %v9745_v17  ;;  %v1126_v35 = vsel %vm973_vm4, %v9750_v49, %v9749_v62 }
 0x3a2   :  { %v1998_v22 = vpop.permute.xlu0 %1997  ;;  %v2608_v6 = vmul.f32 1.442695, %v2564_v15  ;;  %v2006_v55 = vsel %vm1888_vm5, %v2000_v63, %v8327_v11  ;;  %v9744_v15 = vld [vmem:[#allocation86_spill] sm:$0xff] }
 0x3a3   :  { %v8448_v3 = vpop.permute.xlu2 %2338  ;;  %v2005_v0 = vsel %vm1888_vm5, %v1998_v22, %v2000_v63  ;;  %v2014_v33 = vadd.f32 %v2006_v55, %v1709_v34  ;;  %v516_v27 = vsel %vm363_vm2, %v9744_v15, %v9743_v14  ;;  %v525_v22 = vadd.f32 %v517_v60, %v294_v18  ;;  %v9752_v55 = vld [vmem:[#allocation205_spill] sm:$0xff] }
 0x3a4   :  { %6097 = vpow2.f32 %v2608_v6  ;;  %v2013_v29 = vadd.f32 %v2005_v0, %v1708_v10  ;;  %v1432_v0 = vsel %vm1278_vm0, %v9752_v55, %v9751_v1  ;;  %v1431_v34 = vsel %vm1278_vm0, %v9753_v31, %v9752_v55  ;;  %v8529_v18 = vld [vmem:[%s9485_s6 + $0x20] sm:$0xff] }
 0x3a5   :  { %6099 = vpow2.f32 %v2610_v45  ;;  %v9748_v45 = vld [vmem:[#allocation156_spill] sm:$0xff]  ;;  %v1831_v14 = vmul.f32 %v8033_v40, %v8376_v8  ;;  %v8557_v15 = vstv %s5352_s19 }
 0x3a6   :  { %v1127_v43 = vsel %vm973_vm4, %v9749_v62, %v9748_v45  ;;  %v9758_v45 = vld [vmem:[#allocation89_spill] sm:$0xff] }
 0x3a7   :  { %2145 = vrot.lane.b32.xlu1 %v2132_v13, %s6406_s21 }
 0x3a8   :  { %2143 = vrot.lane.b32.xlu0 %v2131_v47, %s6406_s21  ;;  %2147 = vrot.lane.b32.xlu2 %v2133_v38, %s6406_s21 }
 0x3a9   :  { %v2305_v26 = vpop.permute.xlu1 %2304 }
 0x3aa   :  { %v6098_v11 = vpop.eup %6097  ;;  %v2303_v23 = vpop.permute.xlu0 %2302  ;;  %v2311_v41 = vsel %vm2193_vm6, %v2305_v26, %v8365_v48  ;;  %v2438_v48 = vmul.f32 %v7956_v21, %v8463_v9  ;;  %v524_v21 = vadd.f32 %v516_v27, %v293_v50  ;;  %v1830_v50 = vmul.f32 %v8529_v18, %v8376_v8 }
 0x3ab   :  { %v6100_v20 = vpop.eup %6099  ;;  %v2310_v54 = vsel %vm2193_vm6, %v2303_v23, %v2305_v26  ;;  %v5368_v44 = vadd.f32 -1.0, %v6098_v11  ;;  %v8484_v2 = vpop.permute.xlu2 %2039  ;;  %v2319_v58 = vadd.f32 %v2311_v41, %v2014_v33  ;;  %v8536_v11 = vld [vmem:[%s9485_s6 + $0x18] sm:$0xff] }
 0x3ac   :  { %v2318_v46 = vadd.f32 %v2310_v54, %v2013_v29  ;;  %v5369_v5 = vadd.f32 -1.0, %v6100_v20  ;;  %v1829_v25 = vmul.f32 %v8536_v11, %v8376_v8  ;;  %v9754_v23 = vld [vmem:[#allocation237_spill] sm:$0xff]  ;;  %v9755_v20 = vld [vmem:[#allocation238_spill] sm:$0xff]  ;;  %v296_v54 = vmul.f32 %v8529_v18, %v8457_v37  ;;  %v9757_v8 = vld [vmem:[#allocation88_spill] sm:$0xff] }
 0x3ad   :  { %v2692_v7 = vsel %vm2532_vm10, %v8420_v28, %v5368_v44  ;;  %v8498_v42 = vadd.f32 %v8392_v19, %v2319_v58  ;;  %v9747_v28 = vld [vmem:[#allocation125_spill] sm:$0xff]  ;;  %v518_v62 = vsel %vm363_vm2, %v9758_v45, %v9757_v8  ;;  %v9770_v45 = vld [vmem:[#allocation84_spill] sm:$0xff] }
 0x3ae   :  { %v8501_v12 = vadd.f32 %v8392_v19, %v2318_v46  ;;  %2810 = vmatmul.f32.gmra.mxu0 %v2692_v7  ;;  %v2693_v63 = vsel %vm2533_vm11, %v8417_v30, %v5369_v5  ;;  %v821_v6 = vsel %vm668_vm3, %v9747_v28, %v9746_v59  ;;  %v830_v30 = vadd.f32 %v822_v36, %v525_v22  ;;  %v9756_v44 = vld [vmem:[#allocation81_spill] sm:$0xff] }
 0x3af   :  { %2875 = vmatmul.f32.gmra.mxu1 %v2693_v63  ;;  %2450 = vrot.lane.b32.xlu1 %v2437_v51, %s6407_s18  ;;  %v2567_v4 = vmin.f32 %v8498_v42, 0.0  ;;  %v829_v16 = vadd.f32 %v821_v6, %v524_v21  ;;  %vm2535_vm13 = vcmp.gt.f32.partialorder %v8498_v42, 0.0 }
 0x3b0   :  { %2448 = vrot.lane.b32.xlu0 %v2436_v32, %s6407_s18  ;;  %v2566_v19 = vmin.f32 %v8501_v12, 0.0  ;;  %2452 = vrot.lane.b32.xlu2 %v2438_v48, %s6407_s18  ;;  %v1135_v57 = vadd.f32 %v1127_v43, %v830_v30  ;;  %v519_v32 = vsel %vm363_vm2, %v9757_v8, %v9756_v44  ;;  %v2135_v48 = vmul.f32 %v8529_v18, %v8439_v53 }
 0x3b1   :  { %v2032_v24 = vpop.permute.xlu1 %2031  ;;  %v2614_v38 = vmul.f32 1.442695, %v2567_v4  ;;  %v1134_v10 = vadd.f32 %v1126_v35, %v829_v16  ;;  %vm2534_vm12 = vcmp.gt.f32.partialorder %v8501_v12, 0.0  ;;  %v9760_v4 = vld [vmem:[#allocation127_spill] sm:$0xff]  ;;  %v2439_v44 = vmul.f32 %v8536_v11, %v8463_v9 }
 0x3b2   :  { %v2030_v13 = vpop.permute.xlu0 %2029  ;;  %v2612_v47 = vmul.f32 1.442695, %v2566_v19  ;;  %v1440_v60 = vadd.f32 %v1432_v0, %v1135_v57  ;;  %v2042_v29 = vsel %vm1888_vm5, %v2032_v24, %v8401_v56  ;;  %v295_v56 = vmul.f32 %v8536_v11, %v8457_v37  ;;  %v9759_v19 = vld [vmem:[#allocation120_spill] sm:$0xff]  ;;  %v9764_v0 = vld [vmem:[#allocation167_spill] sm:$0xff] }
 0x3b3   :  { %v8524_v61 = vpop.permute.xlu2 %2344  ;;  %v1439_v33 = vadd.f32 %v1431_v34, %v1134_v10  ;;  %v2041_v26 = vsel %vm1888_vm5, %v2030_v13, %v2032_v24  ;;  %v2134_v37 = vmul.f32 %v8536_v11, %v8439_v53  ;;  %v824_v30 = vsel %vm668_vm3, %v9760_v4, %v9759_v19 }
 0x3b4   :  { %6101 = vpow2.f32 %v2612_v47  ;;  %v1745_v51 = vadd.f32 %v9754_v23, %v1440_v60  ;;  %v527_v24 = vadd.f32 %v519_v32, %v296_v54  ;;  %v9762_v47 = vld [vmem:[#allocation159_spill] sm:$0xff]  ;;  %v9767_v23 = vld [vmem:[#allocation209_spill] sm:$0xff]  ;;  %v2440_v54 = vmul.f32 %v8529_v18, %v8463_v9 }
 0x3b5   :  { %6103 = vpow2.f32 %v2614_v38  ;;  %v1744_v41 = vadd.f32 %v9755_v20, %v1439_v33  ;;  %v9763_v38 = vld [vmem:[#allocation166_spill] sm:$0xff]  ;;  %v9765_v33 = vld [vmem:[#allocation201_spill] sm:$0xff]  ;;  %v2441_v8 = vmul.f32 %v8033_v40, %v8463_v9 }
 0x3b6   :  { %v2050_v46 = vadd.f32 %v2042_v29, %v1745_v51  ;;  %v1129_v57 = vsel %vm973_vm4, %v9763_v38, %v9762_v47  ;;  %v832_v55 = vadd.f32 %v824_v30, %v527_v24  ;;  %v1128_v31 = vsel %vm973_vm4, %v9764_v0, %v9763_v38  ;;  %v9766_v29 = vld [vmem:[#allocation208_spill] sm:$0xff]  ;;  %v8627_v9 = vld [vmem:[%s9485_s6 + $0x8] sm:$0xff] }
 0x3b7   :  { %1846 = vrot.lane.b32.xlu1 %v1830_v50, %s6405_s26  ;;  %v2049_v5 = vadd.f32 %v2041_v26, %v1744_v41  ;;  %v1434_v26 = vsel %vm1278_vm0, %v9766_v29, %v9765_v33  ;;  %v1433_v51 = vsel %vm1278_vm0, %v9767_v23, %v9766_v29  ;;  %v9772_v47 = vld [vmem:[#allocation92_spill] sm:$0xff]  ;;  %v9773_v0 = vld [vmem:[#allocation123_spill] sm:$0xff]  ;;  %v9776_v33 = vld [vmem:[#allocation162_spill] sm:$0xff] }
 0x3b8   :  { %1844 = vrot.lane.b32.xlu0 %v1829_v25, %s6405_s26  ;;  %1848 = vrot.lane.b32.xlu2 %v1831_v14, %s6405_s26  ;;  %s5290_s26 = sld [smem:[#allocation15 + $0x28]]  ;;  %v1137_v60 = vadd.f32 %v1129_v57, %v832_v55  ;;  %v9777_v29 = vld [vmem:[#allocation169_spill] sm:$0xff] }
 0x3b9   :  { %v2337_v27 = vpop.permute.xlu1 %2336 }
 0x3ba   :  { %v6102_v58 = vpop.eup %6101  ;;  %v2335_v7 = vpop.permute.xlu0 %2334  ;;  %v2347_v59 = vsel %vm2193_vm6, %v2337_v27, %v8448_v3  ;;  %v2136_v3 = vmul.f32 %v8033_v40, %v8439_v53  ;;  %v526_v53 = vadd.f32 %v518_v62, %v295_v56  ;;  %v1442_v32 = vadd.f32 %v1434_v26, %v1137_v60  ;;  %v9771_v62 = vld [vmem:[#allocation91_spill] sm:$0xff]  ;;  %v9778_v26 = vld [vmem:[#allocation170_spill] sm:$0xff] }
 0x3bb   :  { %v6104_v17 = vpop.eup %6103  ;;  %v2346_v36 = vsel %vm2193_vm6, %v2335_v7, %v2337_v27  ;;  %v5370_v63 = vadd.f32 -1.0, %v6102_v58  ;;  %v8566_v22 = vpop.permute.xlu2 %2071  ;;  %v2355_v28 = vadd.f32 %v2347_v59, %v2050_v46  ;;  %v9768_v27 = vld [vmem:[#allocation239_spill] sm:$0xff]  ;;  %v8634_v59 = vld [vmem:[%s9485_s6] sm:$0xff]  ;;  %v554_v38 = vsel %vm363_vm2, %v9772_v47, %v9771_v62  ;;  %s5353_s6 = sld [smem:[#allocation16 + $0x5]] }
 0x3bc   :  { %v2354_v6 = vadd.f32 %v2346_v36, %v2049_v5  ;;  %v5371_v21 = vadd.f32 -1.0, %v6104_v17  ;;  %v1747_v7 = vadd.f32 %v9768_v27, %v1442_v32  ;;  %v9779_v32 = vld [vmem:[#allocation204_spill] sm:$0xff] }
 0x3bd   :  { %v2694_v43 = vsel %vm2534_vm12, %v8501_v12, %v5370_v63  ;;  %v8580_v49 = vadd.f32 %v8557_v15, %v2355_v28  ;;  %v9761_v12 = vld [vmem:[#allocation128_spill] sm:$0xff] }
 0x3be   :  { %v8583_v35 = vadd.f32 %v8557_v15, %v2354_v6  ;;  %2813 = vmatmul.f32.gmra.mxu0 %v2694_v43  ;;  %v2695_v16 = vsel %vm2535_vm13, %v8498_v42, %v5371_v21  ;;  %v823_v13 = vsel %vm668_vm3, %v9761_v12, %v9760_v4  ;;  %v8614_v58 = vstv %s5290_s26 }
 0x3bf   :  { %2878 = vmatmul.f32.gmra.mxu1 %v2695_v16  ;;  %2151 = vrot.lane.b32.xlu1 %v2135_v48, %s6406_s21  ;;  %v2569_v42 = vmin.f32 %v8580_v49, 0.0  ;;  %v831_v34 = vadd.f32 %v823_v13, %v526_v53  ;;  %v9769_v48 = vld [vmem:[#allocation240_spill] sm:$0xff]  ;;  %v303_v36 = vmul.f32 %v8634_v59, %v8614_v58  ;;  %v555_v43 = vsel %vm363_vm2, %v9771_v62, %v9770_v45 }
 0x3c0   :  { %2149 = vrot.lane.b32.xlu0 %v2134_v37, %s6406_s21  ;;  %v2568_v1 = vmin.f32 %v8583_v35, 0.0  ;;  %2153 = vrot.lane.b32.xlu2 %v2136_v3, %s6406_s21  ;;  %vm2536_vm14 = vcmp.gt.f32.partialorder %v8583_v35, 0.0  ;;  %vm2537_vm15 = vcmp.gt.f32.partialorder %v8580_v49, 0.0  ;;  %v306_v45 = vmul.f32 %v8529_v18, %v8614_v58 }
 0x3c1   :  { %v2038_v10 = vpop.permute.xlu1 %2037  ;;  %v2618_v14 = vmul.f32 1.442695, %v2569_v42  ;;  %v1136_v41 = vadd.f32 %v1128_v31, %v831_v34  ;;  %v9774_v31 = vld [vmem:[#allocation130_spill] sm:$0xff] }
 0x3c2   :  { %v2036_v50 = vpop.permute.xlu0 %2035  ;;  %v2616_v25 = vmul.f32 1.442695, %v2568_v1  ;;  %v2044_v46 = vsel %vm1888_vm5, %v2038_v10, %v8484_v2  ;;  %v304_v2 = vmul.f32 %v8627_v9, %v8614_v58  ;;  %v860_v34 = vsel %vm668_vm3, %v9774_v31, %v9773_v0 }
 0x3c3   :  { %v8606_v20 = vpop.permute.xlu2 %2376  ;;  %v1441_v56 = vadd.f32 %v1433_v51, %v1136_v41  ;;  %v2043_v5 = vsel %vm1888_vm5, %v2036_v50, %v2038_v10  ;;  %v2052_v63 = vadd.f32 %v2044_v46, %v1747_v7  ;;  %v9775_v10 = vld [vmem:[#allocation131_spill] sm:$0xff] }
 0x3c4   :  { %6105 = vpow2.f32 %v2616_v25  ;;  %v859_v50 = vsel %vm668_vm3, %v9775_v10, %v9774_v31  ;;  %v563_v25 = vadd.f32 %v555_v43, %v304_v2  ;;  %v9784_v43 = vld [vmem:[#allocation87_spill] sm:$0xff] }
 0x3c5   :  { %6107 = vpow2.f32 %v2618_v14  ;;  %v1746_v17 = vadd.f32 %v9769_v48, %v1441_v56  ;;  %v9780_v56 = vld [vmem:[#allocation211_spill] sm:$0xff] }
 0x3c6   :  { %v868_v23 = vadd.f32 %v860_v34, %v563_v25  ;;  %v1470_v46 = vsel %vm1278_vm0, %v9780_v56, %v9779_v32 }
 0x3c7   :  { %2456 = vrot.lane.b32.xlu1 %v2440_v54, %s6407_s18  ;;  %v2051_v37 = vadd.f32 %v2043_v5, %v1746_v17  ;;  %v9781_v5 = vld [vmem:[#allocation212_spill] sm:$0xff] }
 0x3c8   :  { %2454 = vrot.lane.b32.xlu0 %v2439_v44, %s6407_s18  ;;  %2458 = vrot.lane.b32.xlu2 %v2441_v8, %s6407_s18  ;;  %v1469_v27 = vsel %vm1278_vm0, %v9781_v5, %v9780_v56  ;;  %s5291_s18 = sld [smem:[#allocation15 + $0x30]] }
 0x3c9   :  { %v2343_v28 = vpop.permute.xlu1 %2342 }
 0x3ca   :  { %v6106_v40 = vpop.eup %6105  ;;  %v2341_v6 = vpop.permute.xlu0 %2340  ;;  %v2349_v3 = vsel %vm2193_vm6, %v2343_v28, %v8524_v61 }
 0x3cb   :  { %v6108_v21 = vpop.eup %6107  ;;  %v2348_v19 = vsel %vm2193_vm6, %v2341_v6, %v2343_v28  ;;  %v2793_v4 = vpop.f32.mrf.mxu0  ;;  %v5372_v30 = vadd.f32 -1.0, %v6106_v40  ;;  %v2357_v24 = vadd.f32 %v2349_v3, %v2052_v63  ;;  %v9783_v6 = vld [vmem:[#allocation242_spill] sm:$0xff] }
 0x3cc   :  { %v8644_v16 = vpop.permute.xlu2 %2077  ;;  %v2356_v12 = vadd.f32 %v2348_v19, %v2051_v37  ;;  %v2858_v13 = vpop.f32.mrf.mxu1  ;;  %v5373_v53 = vadd.f32 -1.0, %v6108_v21  ;;  %v9782_v37 = vld [vmem:[#allocation241_spill] sm:$0xff]  ;;  %v9785_v3 = vld [vmem:[#allocation94_spill] sm:$0xff] }
 0x3cd   :  { %v8650_v57 = vadd.f32 %v2858_v13, %v2793_v4  ;;  %v2696_v61 = vsel %vm2536_vm14, %v8583_v35, %v5372_v30  ;;  %v2501_v1 = vadd.f32 %v8557_v15, %v2357_v24  ;;  %v562_v35 = vadd.f32 %v554_v38, %v303_v36 }
 0x3ce   :  { %v2500_v42 = vadd.f32 %v8557_v15, %v2356_v12  ;;  %2816 = vmatmul.f32.gmra.mxu0 %v2696_v61  ;;  %v2697_v55 = vsel %vm2537_vm15, %v8580_v49, %v5373_v53  ;;  %v1165_v15 = vsel %vm973_vm4, %v9777_v29, %v9776_v33  ;;  %v1164_v49 = vsel %vm973_vm4, %v9778_v26, %v9777_v29  ;;  %v9787_v29 = vld [vmem:[#allocation126_spill] sm:$0xff] }
 0x3cf   :  { %2881 = vmatmul.f32.gmra.mxu1 %v2697_v55  ;;  %v2571_v60 = vmin.f32 %v2501_v1, 0.0  ;;  %v867_v51 = vadd.f32 %v859_v50, %v562_v35  ;;  %v1173_v48 = vadd.f32 %v1165_v15, %v868_v23  ;;  %v557_v19 = vsel %vm363_vm2, %v9785_v3, %v9784_v43  ;;  %v9788_v15 = vld [vmem:[#allocation133_spill] sm:$0xff] }
 0x3d0   :  { %v2570_v14 = vmin.f32 %v2500_v42, 0.0  ;;  %v305_v4 = vmul.f32 %v8536_v11, %v8614_v58  ;;  %v8689_v53 = vstv %s5353_s6  ;;  %vm2538_vm7 = vcmp.gt.f32.partialorder %v2500_v42, 0.0  ;;  %v9786_v58 = vld [vmem:[#allocation95_spill] sm:$0xff] }
 0x3d1   :  { %v2070_v41 = vpop.permute.xlu1 %2069  ;;  %v2622_v8 = vmul.f32 1.442695, %v2571_v60  ;;  %v1172_v17 = vadd.f32 %v1164_v49, %v867_v51  ;;  %v1478_v40 = vadd.f32 %v1470_v46, %v1173_v48  ;;  %v556_v50 = vsel %vm363_vm2, %v9786_v58, %v9785_v3  ;;  %v9789_v49 = vld [vmem:[#allocation134_spill] sm:$0xff] }
 0x3d2   :  { %v2068_v54 = vpop.permute.xlu0 %2067  ;;  %v2620_v44 = vmul.f32 1.442695, %v2570_v14  ;;  %v2080_v36 = vsel %vm1888_vm5, %v2070_v41, %v8566_v22  ;;  %vm2539_vm8 = vcmp.gt.f32.partialorder %v2501_v1, 0.0  ;;  %v862_v26 = vsel %vm668_vm3, %v9788_v15, %v9787_v29 }
 0x3d3   :  { %v1477_v2 = vadd.f32 %v1469_v27, %v1172_v17  ;;  %v2079_v63 = vsel %vm1888_vm5, %v2068_v54, %v2070_v41  ;;  %v1783_v28 = vadd.f32 %v9782_v37, %v1478_v40  ;;  %v861_v23 = vsel %vm668_vm3, %v9789_v49, %v9788_v15  ;;  %v9795_v37 = vld [vmem:[#allocation215_spill] sm:$0xff] }
 0x3d4   :  { %v8675_v7 = vpop.permute.xlu2 %2382  ;;  %6109 = vpow2.f32 %v2620_v44  ;;  %v564_v51 = vadd.f32 %v556_v50, %v305_v4  ;;  %v9790_v44 = vld [vmem:[#allocation165_spill] sm:$0xff]  ;;  %v8721_v43 = vstv %s5291_s18 }
 0x3d5   :  { %6111 = vpow2.f32 %v2622_v8  ;;  %v1782_v21 = vadd.f32 %v9783_v6, %v1477_v2  ;;  %v2088_v30 = vadd.f32 %v2080_v36, %v1783_v28  ;;  %v9791_v8 = vld [vmem:[#allocation172_spill] sm:$0xff]  ;;  %v9793_v2 = vld [vmem:[#allocation207_spill] sm:$0xff]  ;;  %v9794_v36 = vld [vmem:[#allocation214_spill] sm:$0xff] }
 0x3d6   :  { %v1167_v32 = vsel %vm973_vm4, %v9791_v8, %v9790_v44  ;;  %v869_v5 = vadd.f32 %v861_v23, %v564_v51  ;;  %v1471_v28 = vsel %vm1278_vm0, %v9795_v37, %v9794_v36 }
 0x3d7   :  { %v2087_v24 = vadd.f32 %v2079_v63, %v1782_v21  ;;  %v1472_v63 = vsel %vm1278_vm0, %v9794_v36, %v9793_v2  ;;  %v9805_v2 = vld [vmem:[#allocation175_spill] sm:$0xff] }
 0x3d9   :  { %v2375_v22 = vpop.permute.xlu1 %2374 }
 0x3da   :  { %v6110_v62 = vpop.eup %6109  ;;  %v2373_v12 = vpop.permute.xlu0 %2372  ;;  %v2385_v47 = vsel %vm2193_vm6, %v2375_v22, %v8606_v20 }
 0x3db   :  { %v6112_v13 = vpop.eup %6111  ;;  %v2384_v38 = vsel %vm2193_vm6, %v2373_v12, %v2375_v22  ;;  %v2796_v61 = vpop.f32.mrf.mxu0  ;;  %v5374_v55 = vadd.f32 -1.0, %v6110_v62  ;;  %v2393_v0 = vadd.f32 %v2385_v47, %v2088_v30  ;;  %v9796_v30 = vld [vmem:[#allocation243_spill] sm:$0xff]  ;;  %v9797_v22 = vld [vmem:[#allocation244_spill] sm:$0xff]  ;;  %v314_v47 = vmul.f32 %v8627_v9, %v8721_v43 }
 0x3dc   :  { %v2392_v31 = vadd.f32 %v2384_v38, %v2087_v24  ;;  %v2861_v34 = vpop.f32.mrf.mxu1  ;;  %v5375_v10 = vadd.f32 -1.0, %v6112_v13  ;;  %v8699_v14 = vpop.permute.xlu2 %2109  ;;  %v313_v38 = vmul.f32 %v8634_v59, %v8721_v43 }
 0x3dd   :  { %v8697_v25 = vadd.f32 %v2861_v34, %v2796_v61  ;;  %v2698_v35 = vsel %vm2538_vm7, %v2500_v42, %v5374_v55  ;;  %v2505_v20 = vadd.f32 %v8689_v53, %v2393_v0  ;;  %v565_v42 = vadd.f32 %v557_v19, %v306_v45  ;;  %v9798_v34 = vld [vmem:[#allocation90_spill] sm:$0xff] }
 0x3de   :  { %v2504_v60 = vadd.f32 %v8689_v53, %v2392_v31  ;;  %2819 = vmatmul.f32.gmra.mxu0 %v2698_v35  ;;  %v2699_v33 = vsel %vm2539_vm8, %v2501_v1, %v5375_v10  ;;  %v9792_v1 = vld [vmem:[#allocation173_spill] sm:$0xff] }
 0x3df   :  { %2884 = vmatmul.f32.gmra.mxu1 %v2699_v33  ;;  %v2573_v54 = vmin.f32 %v2505_v20, 0.0  ;;  %v1166_v56 = vsel %vm973_vm4, %v9792_v1, %v9791_v8  ;;  %v870_v46 = vadd.f32 %v862_v26, %v565_v42  ;;  %v9799_v10 = vld [vmem:[#allocation97_spill] sm:$0xff]  ;;  %v9800_v42 = vld [vmem:[#allocation98_spill] sm:$0xff]  ;;  %vm2541_vm10 = vcmp.gt.f32.partialorder %v2505_v20, 0.0  ;;  %v9802_v1 = vld [vmem:[#allocation136_spill] sm:$0xff] }
 0x3e0   :  { %v2572_v41 = vmin.f32 %v2504_v60, 0.0  ;;  %v1174_v21 = vadd.f32 %v1166_v56, %v869_v5  ;;  %v593_v58 = vsel %vm363_vm2, %v9799_v10, %v9798_v34  ;;  %vm2540_vm9 = vcmp.gt.f32.partialorder %v2504_v60, 0.0 }
 0x3e1   :  { %v2076_v27 = vpop.permute.xlu1 %2075  ;;  %v2626_v40 = vmul.f32 1.442695, %v2573_v54  ;;  %v1175_v6 = vadd.f32 %v1167_v32, %v870_v46  ;;  %v592_v51 = vsel %vm363_vm2, %v9800_v42, %v9799_v10  ;;  %v9801_v32 = vld [vmem:[#allocation129_spill] sm:$0xff]  ;;  %v316_v10 = vmul.f32 %v8529_v18, %v8721_v43 }
 0x3e2   :  { %v2074_v48 = vpop.permute.xlu0 %2073  ;;  %v2624_v17 = vmul.f32 1.442695, %v2572_v41  ;;  %v1479_v62 = vadd.f32 %v1471_v28, %v1174_v21  ;;  %v2082_v3 = vsel %vm1888_vm5, %v2076_v27, %v8644_v16  ;;  %v898_v56 = vsel %vm668_vm3, %v9802_v1, %v9801_v32  ;;  %v9803_v46 = vld [vmem:[#allocation137_spill] sm:$0xff] }
 0x3e3   :  { %v1480_v45 = vadd.f32 %v1472_v63, %v1175_v6  ;;  %v2081_v19 = vsel %vm1888_vm5, %v2074_v48, %v2076_v27  ;;  %v897_v5 = vsel %vm668_vm3, %v9803_v46, %v9802_v1  ;;  %v601_v27 = vadd.f32 %v593_v58, %v314_v47 }
 0x3e4   :  { %6113 = vpow2.f32 %v2624_v17  ;;  %v8726_v4 = vpop.permute.xlu2 %2414  ;;  %v1784_v12 = vadd.f32 %v9797_v22, %v1479_v62  ;;  %v600_v48 = vadd.f32 %v592_v51, %v313_v38  ;;  %v8779_v42 = vstv %s5354_s20 }
 0x3e5   :  { %6115 = vpow2.f32 %v2626_v40  ;;  %v1785_v24 = vadd.f32 %v9796_v30, %v1480_v45  ;;  %v9804_v40 = vld [vmem:[#allocation168_spill] sm:$0xff]  ;;  %v906_v37 = vadd.f32 %v898_v56, %v601_v27  ;;  %v9814_v27 = vld [vmem:[#allocation101_spill] sm:$0xff] }
 0x3e6   :  { %v2089_v55 = vadd.f32 %v2081_v19, %v1784_v12  ;;  %v1203_v36 = vsel %vm973_vm4, %v9805_v2, %v9804_v40  ;;  %v905_v28 = vadd.f32 %v897_v5, %v600_v48  ;;  %v9808_v19 = vld [vmem:[#allocation217_spill] sm:$0xff] }
 0x3e7   :  { %v2090_v61 = vadd.f32 %v2082_v3, %v1785_v24  ;;  %v9807_v3 = vld [vmem:[#allocation210_spill] sm:$0xff]  ;;  %v1211_v12 = vadd.f32 %v1203_v36, %v906_v37  ;;  %v9815_v36 = vld [vmem:[#allocation132_spill] sm:$0xff] }
 0x3e8   :  { %v1508_v30 = vsel %vm1278_vm0, %v9808_v19, %v9807_v3  ;;  %v9809_v24 = vld [vmem:[#allocation218_spill] sm:$0xff]  ;;  %v9817_v37 = vld [vmem:[#allocation140_spill] sm:$0xff] }
 0x3e9   :  { %v2381_v0 = vpop.permute.xlu1 %2380  ;;  %v1507_v22 = vsel %vm1278_vm0, %v9809_v24, %v9808_v19  ;;  %v1516_v47 = vadd.f32 %v1508_v30, %v1211_v12  ;;  %v9819_v3 = vld [vmem:[#allocation178_spill] sm:$0xff]  ;;  %v9820_v30 = vld [vmem:[#allocation179_spill] sm:$0xff] }
 0x3ea   :  { %v6114_v13 = vpop.eup %6113  ;;  %v2379_v31 = vpop.permute.xlu0 %2378  ;;  %v2387_v50 = vsel %vm2193_vm6, %v2381_v0, %v8675_v7 }
 0x3eb   :  { %v6116_v16 = vpop.eup %6115  ;;  %v2386_v35 = vsel %vm2193_vm6, %v2379_v31, %v2381_v0  ;;  %v2799_v33 = vpop.f32.mrf.mxu0  ;;  %v5376_v29 = vadd.f32 -1.0, %v6114_v13  ;;  %v2395_v15 = vadd.f32 %v2387_v50, %v2090_v61  ;;  %v9810_v0 = vld [vmem:[#allocation245_spill] sm:$0xff] }
 0x3ec   :  { %v2394_v26 = vadd.f32 %v2386_v35, %v2089_v55  ;;  %v2864_v49 = vpop.f32.mrf.mxu1  ;;  %v5377_v23 = vadd.f32 -1.0, %v6116_v16  ;;  %v8759_v63 = vpop.permute.xlu2 %2115  ;;  %v1821_v31 = vadd.f32 %v9810_v0, %v1516_v47  ;;  %v9811_v16 = vld [vmem:[#allocation246_spill] sm:$0xff]  ;;  %v9812_v50 = vld [vmem:[#allocation93_spill] sm:$0xff]  ;;  %v9813_v35 = vld [vmem:[#allocation100_spill] sm:$0xff] }
 0x3ed   :  { %v8743_v41 = vadd.f32 %v2864_v49, %v2799_v33  ;;  %v2700_v54 = vsel %vm2540_vm9, %v2504_v60, %v5376_v29  ;;  %v2507_v44 = vadd.f32 %v8689_v53, %v2395_v15  ;;  %v595_v33 = vsel %vm363_vm2, %v9813_v35, %v9812_v50 }
 0x3ee   :  { %v2506_v7 = vadd.f32 %v8689_v53, %v2394_v26  ;;  %2822 = vmatmul.f32.gmra.mxu0 %v2700_v54  ;;  %v2701_v8 = vsel %vm2541_vm10, %v2505_v20, %v5377_v23  ;;  %v9806_v53 = vld [vmem:[#allocation176_spill] sm:$0xff]  ;;  %v315_v29 = vmul.f32 %v8536_v11, %v8721_v43  ;;  %v594_v48 = vsel %vm363_vm2, %v9814_v27, %v9813_v35 }
 0x3ef   :  { %2887 = vmatmul.f32.gmra.mxu1 %v2701_v8  ;;  %v2575_v60 = vmin.f32 %v2507_v44, 0.0  ;;  %v1202_v20 = vsel %vm973_vm4, %v9806_v53, %v9805_v2  ;;  %vm2543_vm12 = vcmp.gt.f32.partialorder %v2507_v44, 0.0  ;;  %v9816_v53 = vld [vmem:[#allocation139_spill] sm:$0xff] }
 0x3f0   :  { %v2574_v17 = vmin.f32 %v2506_v7, 0.0  ;;  %v1210_v13 = vadd.f32 %v1202_v20, %v905_v28  ;;  %vm2542_vm11 = vcmp.gt.f32.partialorder %v2506_v7, 0.0  ;;  %v900_v20 = vsel %vm668_vm3, %v9816_v53, %v9815_v36 }
 0x3f1   :  { %v2108_v6 = vpop.permute.xlu1 %2107  ;;  %v2630_v62 = vmul.f32 1.442695, %v2575_v60  ;;  %v899_v28 = vsel %vm668_vm3, %v9817_v37, %v9816_v53  ;;  %v8822_v53 = vstv %s5292_s23 }
 0x3f2   :  { %v2106_v21 = vpop.permute.xlu0 %2105  ;;  %v2628_v45 = vmul.f32 1.442695, %v2574_v17  ;;  %v1515_v38 = vadd.f32 %v1507_v22, %v1210_v13  ;;  %v2118_v61 = vsel %vm1888_vm5, %v2108_v6, %v8699_v14 }
 0x3f3   :  { %v2117_v55 = vsel %vm1888_vm5, %v2106_v21, %v2108_v6  ;;  %v2126_v15 = vadd.f32 %v2118_v61, %v1821_v31  ;;  %v603_v6 = vadd.f32 %v595_v33, %v316_v10  ;;  %v602_v21 = vadd.f32 %v594_v48, %v315_v29  ;;  %v9821_v61 = vld [vmem:[#allocation213_spill] sm:$0xff]  ;;  %v9823_v31 = vld [vmem:[#allocation220_spill] sm:$0xff] }
 0x3f4   :  { %6117 = vpow2.f32 %v2628_v45  ;;  %v1820_v34 = vadd.f32 %v9811_v16, %v1515_v38  ;;  %v2421_v1 = vpop.permute.xlu2 %2420 }
 0x3f5   :  { %6119 = vpow2.f32 %v2630_v62  ;;  %v9818_v62 = vld [vmem:[#allocation171_spill] sm:$0xff]  ;;  %v908_v24 = vadd.f32 %v900_v20, %v603_v6  ;;  %v907_v22 = vadd.f32 %v899_v28, %v602_v21 }
 0x3f6   :  { %v2125_v26 = vadd.f32 %v2117_v55, %v1820_v34  ;;  %v1205_v19 = vsel %vm973_vm4, %v9819_v3, %v9818_v62  ;;  %v9822_v55 = vld [vmem:[#allocation219_spill] sm:$0xff]  ;;  %v9825_v62 = vld [vmem:[#allocation102_spill] sm:$0xff] }
 0x3f7   :  { %v1510_v0 = vsel %vm1278_vm0, %v9822_v55, %v9821_v61  ;;  %v1509_v16 = vsel %vm1278_vm0, %v9823_v31, %v9822_v55  ;;  %v1213_v34 = vadd.f32 %v1205_v19, %v908_v24  ;;  %v9832_v55 = vld [vmem:[#allocation181_spill] sm:$0xff] }
 0x3f9   :  { %v2413_v14 = vpop.permute.xlu1 %2412  ;;  %v1518_v50 = vadd.f32 %v1510_v0, %v1213_v34 }
 0x3fa   :  { %v6118_v58 = vpop.eup %6117  ;;  %v2411_v49 = vpop.permute.xlu0 %2410  ;;  %v2423_v51 = vsel %vm2193_vm6, %v2413_v14, %v8726_v4 }
 0x3fb   :  { %v6120_v23 = vpop.eup %6119  ;;  %v2422_v54 = vsel %vm2193_vm6, %v2411_v49, %v2413_v14  ;;  %v2802_v8 = vpop.f32.mrf.mxu0  ;;  %v5378_v32 = vadd.f32 -1.0, %v6118_v58  ;;  %v2431_v56 = vadd.f32 %v2423_v51, %v2126_v15  ;;  %v1823_v15 = vadd.f32 %v7850_v52, %v1518_v50 }
 0x3fc   :  { %v2430_v46 = vadd.f32 %v2422_v54, %v2125_v26  ;;  %v2867_v5 = vpop.f32.mrf.mxu1  ;;  %v5379_v43 = vadd.f32 -1.0, %v6120_v23  ;;  %v8809_v58 = vpop.permute.xlu2 %1842 }
 0x3fd   :  { %v8787_v17 = vadd.f32 %v2867_v5, %v2802_v8  ;;  %v2702_v60 = vsel %vm2542_vm11, %v2506_v7, %v5378_v32  ;;  %v2511_v4 = vadd.f32 %v8779_v42, %v2431_v56 }
 0x3fe   :  { %v2510_v40 = vadd.f32 %v8779_v42, %v2430_v46  ;;  %2825 = vmatmul.f32.gmra.mxu0 %v2702_v60  ;;  %v2703_v2 = vsel %vm2543_vm12, %v2507_v44, %v5379_v43  ;;  %v1204_v44 = vsel %vm973_vm4, %v9820_v30, %v9819_v3  ;;  %v9827_v30 = vld [vmem:[#allocation135_spill] sm:$0xff] }
 0x3ff   :  { %2890 = vmatmul.f32.gmra.mxu1 %v2703_v2  ;;  %v2577_v7 = vmin.f32 %v2511_v4, 0.0  ;;  %v1212_v10 = vadd.f32 %v1204_v44, %v907_v22  ;;  %vm2545_vm14 = vcmp.gt.f32.partialorder %v2511_v4, 0.0  ;;  %v9828_v44 = vld [vmem:[#allocation141_spill] sm:$0xff] }
 0x400   :  { %v2576_v45 = vmin.f32 %v2510_v40, 0.0  ;;  %vm2544_vm13 = vcmp.gt.f32.partialorder %v2510_v40, 0.0  ;;  %v936_v24 = vsel %vm668_vm3, %v9828_v44, %v9827_v30 }
 0x401   :  { %v2114_v12 = vpop.permute.xlu1 %2113  ;;  %v2634_v38 = vmul.f32 1.442695, %v2577_v7  ;;  %v1517_v35 = vadd.f32 %v1509_v16, %v1212_v10  ;;  %v9824_v7 = vld [vmem:[#allocation96_spill] sm:$0xff] }
 0x402   :  { %v2112_v13 = vpop.permute.xlu0 %2111  ;;  %v2632_v47 = vmul.f32 1.442695, %v2576_v45  ;;  %v2120_v33 = vsel %vm1888_vm5, %v2114_v12, %v8759_v63  ;;  %v631_v3 = vsel %vm363_vm2, %v9825_v62, %v9824_v7  ;;  %v8859_v7 = vstv %s5355_s14 }
 0x403   :  { %v2119_v29 = vsel %vm1888_vm5, %v2112_v13, %v2114_v12  ;;  %v1822_v26 = vadd.f32 %v7853_v39, %v1517_v35  ;;  %v2128_v49 = vadd.f32 %v2120_v33, %v1823_v15  ;;  %v9834_v15 = vld [vmem:[#allocation221_spill] sm:$0xff] }
 0x404   :  { %6121 = vpow2.f32 %v2632_v47  ;;  %v9830_v47 = vld [vmem:[#allocation174_spill] sm:$0xff] }
 0x405   :  { %6123 = vpow2.f32 %v2634_v38  ;;  %v2127_v23 = vadd.f32 %v2119_v29, %v1822_v26  ;;  %v9831_v38 = vld [vmem:[#allocation180_spill] sm:$0xff] }
 0x406   :  { %v1240_v0 = vsel %vm973_vm4, %v9832_v55, %v9831_v38  ;;  %v9833_v29 = vld [vmem:[#allocation216_spill] sm:$0xff] }
 0x407   :  { %v1546_v26 = vsel %vm1278_vm0, %v9834_v15, %v9833_v29 }
 0x409   :  { %v2419_v51 = vpop.permute.xlu1 %2418 }
 0x40a   :  { %v6122_v14 = vpop.eup %6121  ;;  %v2417_v54 = vpop.permute.xlu0 %2416  ;;  %v2425_v32 = vsel %vm2193_vm6, %v2419_v51, %v2421_v1 }
 0x40b   :  { %v6124_v8 = vpop.eup %6123  ;;  %v2424_v56 = vsel %vm2193_vm6, %v2417_v54, %v2419_v51  ;;  %v2805_v46 = vpop.f32.mrf.mxu0  ;;  %v5380_v5 = vadd.f32 -1.0, %v6122_v14  ;;  %v2433_v63 = vadd.f32 %v2425_v32, %v2128_v49  ;;  %v9835_v14 = vld [vmem:[#allocation222_spill] sm:$0xff] }
 0x40c   :  { %v2432_v43 = vadd.f32 %v2424_v56, %v2127_v23  ;;  %v2870_v27 = vpop.f32.mrf.mxu1  ;;  %v5381_v48 = vadd.f32 -1.0, %v6124_v8  ;;  %v2148_v1 = vpop.permute.xlu2 %2147  ;;  %v1545_v49 = vsel %vm1278_vm0, %v9835_v14, %v9834_v15  ;;  %v9844_v15 = vld [vmem:[#allocation183_spill] sm:$0xff] }
 0x40d   :  { %v8818_v52 = vadd.f32 %v2870_v27, %v2805_v46  ;;  %v2704_v39 = vsel %vm2544_vm13, %v2510_v40, %v5380_v5  ;;  %v2513_v60 = vadd.f32 %v8779_v42, %v2433_v63  ;;  %v324_v40 = vmul.f32 %v8627_v9, %v8822_v53  ;;  %v9829_v9 = vld [vmem:[#allocation142_spill] sm:$0xff] }
 0x40e   :  { %v2512_v2 = vadd.f32 %v8779_v42, %v2432_v43  ;;  %2828 = vmatmul.f32.gmra.mxu0 %v2704_v39  ;;  %v2705_v36 = vsel %vm2545_vm14, %v2511_v4, %v5381_v48  ;;  %v323_v42 = vmul.f32 %v8634_v59, %v8822_v53  ;;  %v9826_v4 = vld [vmem:[#allocation103_spill] sm:$0xff]  ;;  %v935_v12 = vsel %vm668_vm3, %v9829_v9, %v9828_v44 }
 0x40f   :  { %2893 = vmatmul.f32.gmra.mxu1 %v2705_v36  ;;  %v2579_v37 = vmin.f32 %v2513_v60, 0.0  ;;  %v630_v19 = vsel %vm363_vm2, %v9826_v4, %v9825_v62  ;;  %v639_v22 = vadd.f32 %v631_v3, %v324_v40  ;;  %v1241_v59 = vsel %vm973_vm4, %v9831_v38, %v9830_v47  ;;  %v9836_v47 = vld [vmem:[#allocation99_spill] sm:$0xff]  ;;  %v9837_v38 = vld [vmem:[#allocation104_spill] sm:$0xff] }
 0x410   :  { %v2578_v20 = vmin.f32 %v2512_v2, 0.0  ;;  %v638_v13 = vadd.f32 %v630_v19, %v323_v42  ;;  %vm2546_vm15 = vcmp.gt.f32.partialorder %v2512_v2, 0.0  ;;  %vm2547_vm7 = vcmp.gt.f32.partialorder %v2513_v60, 0.0 }
 0x411   :  { %v1841_v28 = vpop.permute.xlu1 %1840  ;;  %v2638_v45 = vmul.f32 1.442695, %v2579_v37  ;;  %v944_v61 = vadd.f32 %v936_v24, %v639_v22  ;;  %v326_v9 = vmul.f32 %v8529_v18, %v8822_v53 }
 0x412   :  { %v1839_v6 = vpop.permute.xlu0 %1838  ;;  %v2636_v21 = vmul.f32 1.442695, %v2578_v20  ;;  %v943_v34 = vadd.f32 %v935_v12, %v638_v13  ;;  %v1851_v56 = vsel %vm1583_vm1, %v1841_v28, %v8809_v58  ;;  %v325_v12 = vmul.f32 %v8536_v11, %v8822_v53  ;;  %v9841_v11 = vld [vmem:[#allocation144_spill] sm:$0xff] }
 0x413   :  { %v1249_v33 = vadd.f32 %v1241_v59, %v944_v61  ;;  %v1850_v46 = vsel %vm1583_vm1, %v1839_v6, %v1841_v28  ;;  %v633_v59 = vsel %vm363_vm2, %v9837_v38, %v9836_v47  ;;  %v9838_v61 = vld [vmem:[#allocation105_spill] sm:$0xff] }
 0x414   :  { %6125 = vpow2.f32 %v2636_v21  ;;  %v2453_v31 = vpop.permute.xlu2 %2452  ;;  %v1248_v54 = vadd.f32 %v1240_v0, %v943_v34  ;;  %v632_v55 = vsel %vm363_vm2, %v9838_v61, %v9837_v38  ;;  %v9840_v34 = vld [vmem:[#allocation143_spill] sm:$0xff] }
 0x415   :  { %6127 = vpow2.f32 %v2638_v45  ;;  %v1554_v43 = vadd.f32 %v1546_v26, %v1249_v33  ;;  %v937_v53 = vsel %vm668_vm3, %v9841_v11, %v9840_v34  ;;  %v9843_v33 = vld [vmem:[#allocation182_spill] sm:$0xff] }
 0x416   :  { %v1553_v27 = vadd.f32 %v1545_v49, %v1248_v54  ;;  %v1242_v26 = vsel %vm973_vm4, %v9844_v15, %v9843_v33 }
 0x417   :  { %v1859_v20 = vadd.f32 %v1851_v56, %v1554_v43 }
 0x418   :  { %v1858_v37 = vadd.f32 %v1850_v46, %v1553_v27 }
 0x419   :  { %v2146_v10 = vpop.permute.xlu1 %2145 }
 0x41a   :  { %v6126_v16 = vpop.eup %6125  ;;  %v2144_v50 = vpop.permute.xlu0 %2143  ;;  %v2156_v39 = vsel %vm1888_vm5, %v2146_v10, %v2148_v1 }
 0x41b   :  { %v6128_v35 = vpop.eup %6127  ;;  %v2808_v23 = vpop.f32.mrf.mxu0  ;;  %v5382_v51 = vadd.f32 -1.0, %v6126_v16  ;;  %v2155_v36 = vsel %vm1888_vm5, %v2144_v50, %v2146_v10  ;;  %v2164_v21 = vadd.f32 %v2156_v39, %v1859_v20  ;;  %v9839_v16 = vld [vmem:[#allocation138_spill] sm:$0xff]  ;;  %v641_v10 = vadd.f32 %v633_v59, %v326_v9  ;;  %v9845_v39 = vld [vmem:[#allocation223_spill] sm:$0xff]  ;;  %v9846_v20 = vld [vmem:[#allocation224_spill] sm:$0xff] }
 0x41c   :  { %v2873_v8 = vpop.f32.mrf.mxu1  ;;  %v5383_v32 = vadd.f32 -1.0, %v6128_v35  ;;  %v2163_v45 = vadd.f32 %v2155_v36, %v1858_v37  ;;  %v938_v18 = vsel %vm668_vm3, %v9840_v34, %v9839_v16  ;;  %v640_v50 = vadd.f32 %v632_v55, %v325_v12  ;;  %v9842_v35 = vld [vmem:[#allocation177_spill] sm:$0xff] }
 0x41d   :  { %v8855_v5 = vadd.f32 %v2873_v8, %v2808_v23  ;;  %v2706_v63 = vsel %vm2546_vm15, %v2512_v2, %v5382_v51  ;;  %v1243_v29 = vsel %vm973_vm4, %v9843_v33, %v9842_v35  ;;  %v946_v49 = vadd.f32 %v938_v18, %v641_v10 }
 0x41e   :  { %2831 = vmatmul.f32.gmra.mxu0 %v2706_v63  ;;  %v2707_v48 = vsel %vm2547_vm7, %v2513_v60, %v5383_v32  ;;  %v1849_v60 = vpop.permute.xlu2 %1848  ;;  %v945_v23 = vadd.f32 %v937_v53, %v640_v50 }
 0x41f   :  { %2896 = vmatmul.f32.gmra.mxu1 %v2707_v48  ;;  %v1251_v56 = vadd.f32 %v1243_v29, %v946_v49 }
 0x420   :  { %v1250_v46 = vadd.f32 %v1242_v26, %v945_v23 }
 0x421   :  { %v2451_v40 = vpop.permute.xlu1 %2450  ;;  %v1556_v36 = vadd.f32 %v9845_v39, %v1251_v56 }
 0x422   :  { %v2449_v58 = vpop.permute.xlu0 %2448  ;;  %v2461_v28 = vsel %vm2193_vm6, %v2451_v40, %v2453_v31  ;;  %v1555_v37 = vadd.f32 %v9846_v20, %v1250_v46 }
 0x423   :  { %v2460_v2 = vsel %vm2193_vm6, %v2449_v58, %v2451_v40  ;;  %v2469_v6 = vadd.f32 %v2461_v28, %v2164_v21 }
 0x424   :  { %v2468_v62 = vadd.f32 %v2460_v2, %v2163_v45 }
 0x425   :  { %v2517_v1 = vadd.f32 %v8859_v7, %v2469_v6 }
 0x426   :  { %v2516_v3 = vadd.f32 %v8859_v7, %v2468_v62  ;;  %v2154_v31 = vpop.permute.xlu2 %2153 }
 0x427   :  { %v2581_v4 = vmin.f32 %v2517_v1, 0.0  ;;  %vm2549_vm2 = vcmp.gt.f32.partialorder %v2517_v1, 0.0 }
 0x428   :  { %v2580_v42 = vmin.f32 %v2516_v3, 0.0  ;;  %vm2548_vm0 = vcmp.gt.f32.partialorder %v2516_v3, 0.0 }
 0x429   :  { %v1847_v19 = vpop.permute.xlu1 %1846  ;;  %v2642_v24 = vmul.f32 1.442695, %v2581_v4 }
 0x42a   :  { %v1845_v30 = vpop.permute.xlu0 %1844  ;;  %v2640_v44 = vmul.f32 1.442695, %v2580_v42  ;;  %v1853_v43 = vsel %vm1583_vm1, %v1847_v19, %v1849_v60 }
 0x42b   :  { %v2811_v22 = vpop.f32.mrf.mxu0  ;;  %v1852_v27 = vsel %vm1583_vm1, %v1845_v30, %v1847_v19  ;;  %v1861_v58 = vadd.f32 %v1853_v43, %v1556_v36 }
 0x42c   :  { %v2876_v13 = vpop.f32.mrf.mxu1  ;;  %6129 = vpow2.f32 %v2640_v44  ;;  %v1860_v28 = vadd.f32 %v1852_v27, %v1555_v37 }
 0x42d   :  { %v8875_v0 = vadd.f32 %v2876_v13, %v2811_v22  ;;  %6131 = vpow2.f32 %v2642_v24 }
 0x42e   :  { %v2459_v2 = vpop.permute.xlu2 %2458 }
 0x431   :  { %v2152_v51 = vpop.permute.xlu1 %2151 }
 0x432   :  { %v6130_v14 = vpop.eup %6129  ;;  %v2150_v54 = vpop.permute.xlu0 %2149  ;;  %v2158_v45 = vsel %vm1888_vm5, %v2152_v51, %v2154_v31 }
 0x433   :  { %v6132_v8 = vpop.eup %6131  ;;  %v5384_v32 = vadd.f32 -1.0, %v6130_v14  ;;  %v2157_v40 = vsel %vm1888_vm5, %v2150_v54, %v2152_v51  ;;  %v2166_v6 = vadd.f32 %v2158_v45, %v1861_v58 }
 0x434   :  { %v5385_v63 = vadd.f32 -1.0, %v6132_v8  ;;  %v2165_v62 = vadd.f32 %v2157_v40, %v1860_v28 }
 0x435   :  { %v2708_v48 = vsel %vm2548_vm0, %v2516_v3, %v5384_v32 }
 0x436   :  { %2834 = vmatmul.f32.gmra.mxu0 %v2708_v48  ;;  %v2709_v21 = vsel %vm2549_vm2, %v2517_v1, %v5385_v63 }
 0x437   :  { %2899 = vmatmul.f32.gmra.mxu1 %v2709_v21 }
 0x439   :  { %v2457_v60 = vpop.permute.xlu1 %2456 }
 0x43a   :  { %v2455_v42 = vpop.permute.xlu0 %2454  ;;  %v2463_v3 = vsel %vm2193_vm6, %v2457_v60, %v2459_v2 }
 0x43b   :  { %v2462_v4 = vsel %vm2193_vm6, %v2455_v42, %v2457_v60  ;;  %v2814_v19 = vpop.f32.mrf.mxu0  ;;  %v2471_v30 = vadd.f32 %v2463_v3, %v2166_v6 }
 0x43c   :  { %v2470_v44 = vadd.f32 %v2462_v4, %v2165_v62  ;;  %v2879_v1 = vpop.f32.mrf.mxu1 }
 0x43d   :  { %v8897_v24 = vadd.f32 %v2879_v1, %v2814_v19  ;;  %v2519_v22 = vadd.f32 %v8859_v7, %v2471_v30 }
 0x43e   :  { %v2518_v9 = vadd.f32 %v8859_v7, %v2470_v44 }
 0x43f   :  { %v2583_v13 = vmin.f32 %v2519_v22, 0.0  ;;  %vm2551_vm3 = vcmp.gt.f32.partialorder %v2519_v22, 0.0 }
 0x440   :  { %v2582_v12 = vmin.f32 %v2518_v9, 0.0  ;;  %vm2550_vm1 = vcmp.gt.f32.partialorder %v2518_v9, 0.0 }
 0x441   :  { %v2646_v38 = vmul.f32 1.442695, %v2583_v13 }
 0x442   :  { %v2644_v47 = vmul.f32 1.442695, %v2582_v12 }
 0x444   :  { %6133 = vpow2.f32 %v2644_v47 }
 0x445   :  { %6135 = vpow2.f32 %v2646_v38 }
 0x44a   :  { %v6134_v59 = vpop.eup %6133 }
 0x44b   :  { %v6136_v61 = vpop.eup %6135  ;;  %v2817_v55 = vpop.f32.mrf.mxu0  ;;  %v5386_v31 = vadd.f32 -1.0, %v6134_v59 }
 0x44c   :  { %v2882_v16 = vpop.f32.mrf.mxu1  ;;  %v5387_v34 = vadd.f32 -1.0, %v6136_v61 }
 0x44d   :  { %v8904_v7 = vadd.f32 %v2882_v16, %v2817_v55  ;;  %v2710_v18 = vsel %vm2550_vm1, %v2518_v9, %v5386_v31 }
 0x44e   :  { %2837 = vmatmul.f32.gmra.mxu0 %v2710_v18  ;;  %v2711_v11 = vsel %vm2551_vm3, %v2519_v22, %v5387_v34 }
 0x44f   :  { %2902 = vmatmul.f32.gmra.mxu1 %v2711_v11 }
 0x45b   :  { %v2820_v53 = vpop.f32.mrf.mxu0 }
 0x45c   :  { %v2885_v10 = vpop.f32.mrf.mxu1 }
 0x45d   :  { %v8906_v50 = vadd.f32 %v2885_v10, %v2820_v53 }
 0x46b   :  { %v2823_v35 = vpop.f32.mrf.mxu0 }
 0x46c   :  { %v2888_v33 = vpop.f32.mrf.mxu1 }
 0x46d   :  { %v8908_v29 = vadd.f32 %v2888_v33, %v2823_v35 }
 0x47b   :  { %v2826_v15 = vpop.f32.mrf.mxu0 }
 0x47c   :  { %v2891_v26 = vpop.f32.mrf.mxu1 }
 0x47d   :  { %v8910_v14 = vadd.f32 %v2891_v26, %v2826_v15 }
 0x48b   :  { %v2829_v49 = vpop.f32.mrf.mxu0 }
 0x48c   :  { %v2894_v23 = vpop.f32.mrf.mxu1 }
 0x48d   :  { %v8912_v51 = vadd.f32 %v2894_v23, %v2829_v49 }
 0x49b   :  { %v2832_v54 = vpop.f32.mrf.mxu0 }
 0x49c   :  { %v2897_v8 = vpop.f32.mrf.mxu1 }
 0x49d   :  { %v8914_v32 = vadd.f32 %v2897_v8, %v2832_v54 }
 0x4b3   :  { %v2835_v56 = vpop.f32.mrf.mxu0 }
 0x4b4   :  { %v2900_v46 = vpop.f32.mrf.mxu1 }
 0x4b5   :  { %v8916_v63 = vadd.f32 %v2900_v46, %v2835_v56 }
 0x4cb   :  { %v2838_v43 = vpop.f32.mrf.mxu0 }
 0x4cc   :  { %v2903_v27 = vpop.f32.mrf.mxu1 }
 0x4cd   :  { %v8918_v48 = vadd.f32 %v2903_v27, %v2838_v43 }
 0x4ce   :  { %6384 = dma.done.wait [#allocation5], 10240 }
 0x4cf   :  { %6385 = vsyncadd [#allocation5], 4294957056  ;;  %v2950_v39 = vld [vmem:[#allocation2 + $0x90] sm:$0xff]  ;;  %v2948_v36 = vld [vmem:[#allocation2 + $0x80] sm:$0xff]  ;;  %vm2972_vm4 = vcmask 326656   ;;  %s9847_s17 = sld [smem:[#allocation249_spill]] }
 0x4d0   :  { %v2946_v20 = vld [vmem:[#allocation2 + $0x70] sm:$0xff]  ;;  %v2968_v37 = vunpack.c.l.bf16 %v2950_v39  ;;  %v2969_v21 = vunpack.c.h.bf16 %v2950_v39  ;;  %v2964_v45 = vunpack.c.l.bf16 %v2948_v36  ;;  %v2965_v40 = vunpack.c.h.bf16 %v2948_v36  ;;  %v2944_v58 = vld [vmem:[#allocation2 + $0x60] sm:$0xff]  ;;  %v2951_v42 = vld [vmem:[#allocation2 + $0x98] sm:$0xff] }
 0x4d1   :  { %v2960_v28 = vunpack.c.l.bf16 %v2946_v20  ;;  %v2961_v2 = vunpack.c.h.bf16 %v2946_v20  ;;  %v2942_v6 = vld [vmem:[#allocation2 + $0x50] sm:$0xff]  ;;  %v2956_v62 = vunpack.c.l.bf16 %v2944_v58  ;;  %v2957_v60 = vunpack.c.h.bf16 %v2944_v58  ;;  %v2949_v19 = vld [vmem:[#allocation2 + $0x88] sm:$0xff]  ;;  %v2947_v1 = vld [vmem:[#allocation2 + $0x78] sm:$0xff] }
 0x4d2   :  { %2990 = vmatpush.msra.mxu2 %v2968_v37  ;;  %3013 = vmatpush.msra.mxu3 %v2969_v21  ;;  %v2952_v3 = vunpack.c.l.bf16 %v2942_v6  ;;  %v2953_v4 = vunpack.c.h.bf16 %v2942_v6  ;;  %v2970_v30 = vunpack.c.l.bf16 %v2951_v42  ;;  %v2971_v44 = vunpack.c.h.bf16 %v2951_v42  ;;  %v2945_v12 = vld [vmem:[#allocation2 + $0x68] sm:$0xff]  ;;  %v2943_v38 = vld [vmem:[#allocation2 + $0x58] sm:$0xff]  ;;  %v2919_v55 = vld [vmem:[#allocation2 + $0x40] sm:$0xff] }
 0x4d3   :  { %v2966_v22 = vunpack.c.l.bf16 %v2949_v19  ;;  %v2967_v9 = vunpack.c.h.bf16 %v2949_v19  ;;  %v2962_v13 = vunpack.c.l.bf16 %v2947_v1  ;;  %v2963_v47 = vunpack.c.h.bf16 %v2947_v1  ;;  %v2917_v34 = vld [vmem:[#allocation2 + $0x30] sm:$0xff]  ;;  %v2915_v53 = vld [vmem:[#allocation2 + $0x20] sm:$0xff]  ;;  %v2920_v8 = vld [vmem:[#allocation2 + $0x48] sm:$0xff] }
 0x4d4   :  { %2991 = vmatpush.msra.mxu2 %v2964_v45  ;;  %3014 = vmatpush.msra.mxu3 %v2965_v40  ;;  %v2958_v59 = vunpack.c.l.bf16 %v2945_v12  ;;  %v2959_v61 = vunpack.c.h.bf16 %v2945_v12  ;;  %v2954_v31 = vunpack.c.l.bf16 %v2943_v38  ;;  %v2955_v16 = vunpack.c.h.bf16 %v2943_v38  ;;  %v2913_v26 = vld [vmem:[#allocation2 + $0x10] sm:$0xff]  ;;  %v2911_v49 = vld [vmem:[#allocation2] sm:$0xff]  ;;  %v2918_v43 = vld [vmem:[#allocation2 + $0x38] sm:$0xff] }
 0x4d5   :  { %v2937_v18 = vunpack.c.l.bf16 %v2919_v55  ;;  %v2938_v11 = vunpack.c.h.bf16 %v2919_v55  ;;  %v2933_v10 = vunpack.c.l.bf16 %v2917_v34  ;;  %v2934_v35 = vunpack.c.h.bf16 %v2917_v34  ;;  %v2916_v37 = vld [vmem:[#allocation2 + $0x28] sm:$0xff]  ;;  %v2914_v21 = vld [vmem:[#allocation2 + $0x18] sm:$0xff] }
 0x4d6   :  { %2992 = vmatpush.msra.mxu2 %v2960_v28  ;;  %3015 = vmatpush.msra.mxu3 %v2961_v2  ;;  %v2929_v33 = vunpack.c.l.bf16 %v2915_v53  ;;  %v2930_v15 = vunpack.c.h.bf16 %v2915_v53  ;;  %v2925_v23 = vunpack.c.l.bf16 %v2913_v26  ;;  %v2926_v54 = vunpack.c.h.bf16 %v2913_v26  ;;  %v2912_v58 = vld [vmem:[#allocation2 + $0x8] sm:$0xff] }
 0x4d7   :  { %v2921_v56 = vunpack.c.l.bf16 %v2911_v49  ;;  %v2922_v46 = vunpack.c.h.bf16 %v2911_v49  ;;  %v2939_v27 = vunpack.c.l.bf16 %v2920_v8  ;;  %v2940_v39 = vunpack.c.h.bf16 %v2920_v8  ;;  %v3179_v38 = vld [vmem:[#allocation2 + $0xe8] sm:$0xff] }
 0x4d8   :  { %2993 = vmatpush.msra.mxu2 %v2956_v62  ;;  %3016 = vmatpush.msra.mxu3 %v2957_v60  ;;  %v2935_v36 = vunpack.c.l.bf16 %v2918_v43  ;;  %v2936_v20 = vunpack.c.h.bf16 %v2918_v43  ;;  %v2931_v45 = vunpack.c.l.bf16 %v2916_v37  ;;  %v2932_v40 = vunpack.c.h.bf16 %v2916_v37  ;;  %v3178_v62 = vld [vmem:[#allocation2 + $0xe0] sm:$0xff]  ;;  %v3176_v60 = vld [vmem:[#allocation2 + $0xd0] sm:$0xff] }
 0x4d9   :  { %v2927_v28 = vunpack.c.l.bf16 %v2914_v21  ;;  %v2928_v2 = vunpack.c.h.bf16 %v2914_v21  ;;  %v2924_v6 = vunpack.c.h.bf16 %v2912_v58  ;;  %v3196_v42 = vunpack.c.l.bf16 %v3178_v62 }
 0x4da   :  { %2994 = vmatpush.msra.mxu2 %v2952_v3  ;;  %3017 = vmatpush.msra.mxu3 %v2953_v4  ;;  %v3197_v3 = vunpack.c.h.bf16 %v3178_v62  ;;  %v3174_v4 = vld [vmem:[#allocation2 + $0xc0] sm:$0xff]  ;;  %v3192_v19 = vunpack.c.l.bf16 %v3176_v60  ;;  %v3199_v55 = vunpack.c.h.bf16 %v3179_v38  ;;  %v8976_v62 = vld [vmem:[#allocation2 + $0x210] sm:$0xff] }
 0x4db   :  { %5388 = vmatmul.msk.f32.vlgmr.msra.gmra.mxu2 %vm2972_vm4, %v8743_v41  ;;  %5390 = vmatmul.msk.f32.vlgmr.msra.gmra.mxu3 %vm2972_vm4, %v8743_v41  ;;  %v3189_v1 = vunpack.c.h.bf16 %v3174_v4 }
 0x4dc   :  { %3036 = vmatpush.msrb.mxu2 %v2970_v30  ;;  %3059 = vmatpush.msrb.mxu3 %v2971_v44  ;;  %v3193_v30 = vunpack.c.h.bf16 %v3176_v60  ;;  %v3188_v44 = vunpack.c.l.bf16 %v3174_v4  ;;  %v3307_v60 = vld [vmem:[#allocation2 + $0xf0] sm:$0xff] }
 0x4de   :  { %3037 = vmatpush.msrb.mxu2 %v2966_v22  ;;  %3060 = vmatpush.msrb.mxu3 %v2967_v9  ;;  %v3170_v22 = vld [vmem:[#allocation2 + $0xa0] sm:$0xff] }
 0x4e0   :  { %3038 = vmatpush.msrb.mxu2 %v2962_v13  ;;  %3061 = vmatpush.msrb.mxu3 %v2963_v47  ;;  %v3180_v13 = vunpack.c.l.bf16 %v3170_v22  ;;  %v3181_v47 = vunpack.c.h.bf16 %v3170_v22 }
 0x4e2   :  { %3039 = vmatpush.msrb.mxu2 %v2958_v59  ;;  %3062 = vmatpush.msrb.mxu3 %v2959_v61  ;;  %v3177_v59 = vld [vmem:[#allocation2 + $0xd8] sm:$0xff]  ;;  %v3198_v61 = vunpack.c.l.bf16 %v3179_v38 }
 0x4e3   :  { %5389 = vmatmul.msk.f32.gmra.mxu2 %vm2972_vm4, %v8787_v17  ;;  %5391 = vmatmul.msk.f32.gmra.mxu3 %vm2972_vm4, %v8787_v17  ;;  %v3195_v34 = vunpack.c.h.bf16 %v3177_v59 }
 0x4e4   :  { %3040 = vmatpush.msrb.mxu2 %v2954_v31  ;;  %3063 = vmatpush.msrb.mxu3 %v2955_v16  ;;  %v3175_v31 = vld [vmem:[#allocation2 + $0xc8] sm:$0xff]  ;;  %v3194_v16 = vunpack.c.l.bf16 %v3177_v59 }
 0x4e5   :  { %v3190_v53 = vunpack.c.l.bf16 %v3175_v31 }
 0x4e6   :  { %3088 = vmatpush.msra.mxu2 %v2937_v18  ;;  %3111 = vmatpush.msra.mxu3 %v2938_v11  ;;  %v3173_v18 = vld [vmem:[#allocation2 + $0xb8] sm:$0xff]  ;;  %v8948_v11 = vld [vmem:[#allocation2 + $0x1d0] sm:$0xff] }
 0x4e7   :  { %v3186_v49 = vunpack.c.l.bf16 %v3173_v18  ;;  %v3608_v22 = vunpack.c.h.bf16 %v8948_v11 }
 0x4e8   :  { %3089 = vmatpush.msra.mxu2 %v2933_v10  ;;  %3112 = vmatpush.msra.mxu3 %v2934_v35  ;;  %v3191_v10 = vunpack.c.h.bf16 %v3175_v31  ;;  %v3607_v35 = vunpack.c.l.bf16 %v8948_v11 }
 0x4e9   :  { %3651 = vmatpush.msrb.mxu1 %v3608_v22 }
 0x4ea   :  { %3090 = vmatpush.msra.mxu2 %v2929_v33  ;;  %3113 = vmatpush.msra.mxu3 %v2930_v15  ;;  %v8951_v33 = vld [vmem:[#allocation2 + $0x1c0] sm:$0xff]  ;;  %v3171_v15 = vld [vmem:[#allocation2 + $0xa8] sm:$0xff] }
 0x4eb   :  { %5392 = vmatmul.msk.f32.vlgmr.msrb.gmra.mxu2 %vm2972_vm4, %v8743_v41  ;;  %5394 = vmatmul.msk.f32.vlgmr.msrb.gmra.mxu3 %vm2972_vm4, %v8743_v41  ;;  %v2923_v41 = vunpack.c.l.bf16 %v2912_v58  ;;  %v3603_v26 = vunpack.c.l.bf16 %v8951_v33  ;;  %v3183_v8 = vunpack.c.h.bf16 %v3171_v15 }
 0x4ec   :  { %3091 = vmatpush.msra.mxu2 %v2925_v23  ;;  %3114 = vmatpush.msra.mxu3 %v2926_v54  ;;  %v3187_v23 = vunpack.c.h.bf16 %v3173_v18  ;;  %v8954_v54 = vld [vmem:[#allocation2 + $0x1b0] sm:$0xff] }
 0x4ed   :  { %3628 = vmatpush.msrb.mxu0 %v3607_v35  ;;  %v3600_v38 = vunpack.c.h.bf16 %v8954_v54  ;;  %v9003_v35 = vld [vmem:[#allocation2 + $0x270] sm:$0xff] }
 0x4ee   :  { %3092 = vmatpush.msra.mxu2 %v2921_v56  ;;  %3115 = vmatpush.msra.mxu3 %v2922_v46  ;;  %v3599_v56 = vunpack.c.l.bf16 %v8954_v54  ;;  %v8957_v46 = vld [vmem:[#allocation2 + $0x1a0] sm:$0xff] }
 0x4ef   :  { %3629 = vmatpush.msrb.mxu0 %v3603_v26  ;;  %v3595_v43 = vunpack.c.l.bf16 %v8957_v46  ;;  %v3596_v11 = vunpack.c.h.bf16 %v8957_v46  ;;  %v3881_v26 = vunpack.c.l.bf16 %v9003_v35 }
 0x4f0   :  { %3134 = vmatpush.msrb.mxu2 %v2939_v27  ;;  %3157 = vmatpush.msrb.mxu3 %v2940_v39  ;;  %v8964_v27 = vld [vmem:[#allocation2 + $0x190] sm:$0xff] }
 0x4f1   :  { %v3315_v39 = vld [vmem:[#allocation2 + $0x130] sm:$0xff]  ;;  %3630 = vmatpush.msrb.mxu0 %v3599_v56 }
 0x4f2   :  { %3135 = vmatpush.msrb.mxu2 %v2935_v36  ;;  %3158 = vmatpush.msrb.mxu3 %v2936_v20  ;;  %v3591_v36 = vunpack.c.l.bf16 %v8964_v27  ;;  %v3313_v20 = vld [vmem:[#allocation2 + $0x120] sm:$0xff]  ;;  %v3333_v37 = vunpack.c.l.bf16 %v3315_v39  ;;  %v3334_v21 = vunpack.c.h.bf16 %v3315_v39 }
 0x4f3   :  { %5393 = vmatmul.msk.f32.gmra.mxu2 %vm2972_vm4, %v8787_v17  ;;  %5395 = vmatmul.msk.f32.gmra.mxu3 %vm2972_vm4, %v8787_v17  ;;  %v3172_v17 = vld [vmem:[#allocation2 + $0xb0] sm:$0xff]  ;;  %v3330_v58 = vunpack.c.h.bf16 %v3313_v20 }
 0x4f4   :  { %3136 = vmatpush.msrb.mxu2 %v2931_v45  ;;  %3159 = vmatpush.msrb.mxu3 %v2932_v40  ;;  %v3184_v9 = vunpack.c.l.bf16 %v3172_v17  ;;  %v3185_v12 = vunpack.c.h.bf16 %v3172_v17  ;;  %v3311_v45 = vld [vmem:[#allocation2 + $0x110] sm:$0xff]  ;;  %v3329_v40 = vunpack.c.l.bf16 %v3313_v20  ;;  %v3318_v17 = vunpack.c.h.bf16 %v3307_v60 }
 0x4f5   :  { %3631 = vmatpush.msrb.mxu0 %v3595_v43  ;;  %v9015_v43 = vld [vmem:[#allocation2 + $0x240] sm:$0xff]  ;;  %v3741_v20 = vunpack.c.h.bf16 %v8976_v62 }
 0x4f6   :  { %3137 = vmatpush.msrb.mxu2 %v2927_v28  ;;  %3160 = vmatpush.msrb.mxu3 %v2928_v2  ;;  %v8973_v28 = vld [vmem:[#allocation2 + $0x220] sm:$0xff]  ;;  %v3325_v2 = vunpack.c.l.bf16 %v3311_v45 }
 0x4f7   :  { %3632 = vmatpush.msrb.mxu0 %v3591_v36  ;;  %v3745_v39 = vunpack.c.h.bf16 %v8973_v28  ;;  %v9023_v36 = vld [vmem:[#allocation2 + $0x230] sm:$0xff] }
 0x4f8   :  { %3138 = vmatpush.msrb.mxu2 %v2923_v41  ;;  %3161 = vmatpush.msrb.mxu3 %v2924_v6  ;;  %v3326_v41 = vunpack.c.h.bf16 %v3311_v45  ;;  %v3744_v6 = vunpack.c.l.bf16 %v8973_v28  ;;  %v3865_v45 = vunpack.c.l.bf16 %v9023_v36  ;;  %v3448_v28 = vld [vmem:[#allocation2 + $0x160] sm:$0xff] }
 0x4f9   :  { %5428 = vmatmul.msk.f32.vlgmr.msrb.gmra.mxu0 %vm2972_vm4, %v8908_v29 }
 0x4fa   :  { %3765 = vmatpush.msra.mxu0 %v3744_v6 }
 0x4fb   :  { %5396 = vmatmul.msk.f32.vlgmr.msra.gmra.mxu2 %vm2972_vm4, %v8650_v57  ;;  %5398 = vmatmul.msk.f32.vlgmr.msra.gmra.mxu3 %vm2972_vm4, %v8650_v57 }
 0x4fc   :  { %3217 = vmatpush.msra.mxu2 %v3196_v42  ;;  %3240 = vmatpush.msra.mxu3 %v3197_v3  ;;  %v3740_v42 = vunpack.c.l.bf16 %v8976_v62  ;;  %v3446_v62 = vld [vmem:[#allocation2 + $0x150] sm:$0xff] }
 0x4fe   :  { %3218 = vmatpush.msra.mxu2 %v3192_v19  ;;  %3241 = vmatpush.msra.mxu3 %v3193_v30  ;;  %v8979_v19 = vld [vmem:[#allocation2 + $0x200] sm:$0xff]  ;;  %v3317_v30 = vunpack.c.l.bf16 %v3307_v60  ;;  %v3462_v60 = vunpack.c.l.bf16 %v3448_v28 }
 0x4ff   :  { %3766 = vmatpush.msra.mxu0 %v3740_v42  ;;  %v3463_v42 = vunpack.c.h.bf16 %v3448_v28  ;;  %v3723_v28 = vld [vmem:[#allocation2 + $0x208] sm:$0xff] }
 0x500   :  { %3219 = vmatpush.msra.mxu2 %v3188_v44  ;;  %3242 = vmatpush.msra.mxu3 %v3189_v1  ;;  %v8981_v44 = vld [vmem:[#allocation2 + $0x1f0] sm:$0xff]  ;;  %v3736_v1 = vunpack.c.l.bf16 %v8979_v19 }
 0x501   :  { %5429 = vmatmul.msk.f32.gmra.mxu0 %vm2972_vm4, %v8910_v14  ;;  %v3733_v6 = vunpack.c.h.bf16 %v8981_v44 }
 0x502   :  { %3220 = vmatpush.msra.mxu2 %v3184_v9  ;;  %3243 = vmatpush.msra.mxu3 %v3185_v12  ;;  %v8989_v9 = vld [vmem:[#allocation2 + $0x1e0] sm:$0xff]  ;;  %v3604_v12 = vunpack.c.h.bf16 %v8951_v33 }
 0x503   :  { %5397 = vmatmul.msk.f32.gmra.mxu2 %vm2972_vm4, %v8697_v25  ;;  %5399 = vmatmul.msk.f32.gmra.mxu3 %vm2972_vm4, %v8697_v25  ;;  %v3728_v59 = vunpack.c.l.bf16 %v8989_v9 }
 0x504   :  { %3221 = vmatpush.msra.mxu2 %v3180_v13  ;;  %3244 = vmatpush.msra.mxu3 %v3181_v47  ;;  %v3732_v13 = vunpack.c.l.bf16 %v8981_v44  ;;  %v3316_v47 = vld [vmem:[#allocation2 + $0x138] sm:$0xff] }
 0x505   :  { %3767 = vmatpush.msra.mxu0 %v3736_v1  ;;  %3652 = vmatpush.msrb.mxu1 %v3604_v12  ;;  %v3336_v31 = vunpack.c.h.bf16 %v3316_v47  ;;  %v3870_v12 = vunpack.c.h.bf16 %v9015_v43 }
 0x507   :  { %3768 = vmatpush.msra.mxu0 %v3732_v13  ;;  %3653 = vmatpush.msrb.mxu1 %v3600_v38  ;;  %v3453_v13 = vld [vmem:[#allocation2 + $0x188] sm:$0xff]  ;;  %v3451_v38 = vld [vmem:[#allocation2 + $0x178] sm:$0xff] }
 0x509   :  { %3769 = vmatpush.msra.mxu0 %v3728_v59  ;;  %3654 = vmatpush.msrb.mxu1 %v3596_v11  ;;  %v3472_v59 = vunpack.c.l.bf16 %v3453_v13 }
 0x50a   :  { %5436 = vmatmul.msk.f32.vlgmr.msra.gmra.mxu0 %vm2972_vm4, %v8912_v51 }
 0x50b   :  { %5400 = vmatmul.msk.f32.vlgmr.msrb.gmra.mxu2 %vm2972_vm4, %v8650_v57  ;;  %5402 = vmatmul.msk.f32.vlgmr.msrb.gmra.mxu3 %vm2972_vm4, %v8650_v57  ;;  %v3182_v57 = vunpack.c.l.bf16 %v3171_v15 }
 0x50c   :  { %3263 = vmatpush.msrb.mxu2 %v3198_v61  ;;  %3286 = vmatpush.msrb.mxu3 %v3199_v55  ;;  %v3314_v61 = vld [vmem:[#allocation2 + $0x128] sm:$0xff]  ;;  %v3335_v55 = vunpack.c.l.bf16 %v3316_v47  ;;  %v3866_v47 = vunpack.c.h.bf16 %v9023_v36 }
 0x50d   :  { %v3332_v18 = vunpack.c.h.bf16 %v3314_v61  ;;  %3902 = vmatpush.msrb.mxu0 %v3881_v26  ;;  %v3588_v26 = vld [vmem:[#allocation2 + $0x1c8] sm:$0xff] }
 0x50e   :  { %3264 = vmatpush.msrb.mxu2 %v3194_v16  ;;  %3287 = vmatpush.msrb.mxu3 %v3195_v34  ;;  %v3312_v16 = vld [vmem:[#allocation2 + $0x118] sm:$0xff]  ;;  %v3331_v34 = vunpack.c.l.bf16 %v3314_v61  ;;  %v3473_v61 = vunpack.c.h.bf16 %v3453_v13 }
 0x50f   :  { %v3327_v33 = vunpack.c.l.bf16 %v3312_v16  ;;  %v3328_v15 = vunpack.c.h.bf16 %v3312_v16  ;;  %v3469_v16 = vunpack.c.h.bf16 %v3451_v38 }
 0x510   :  { %3265 = vmatpush.msrb.mxu2 %v3190_v53  ;;  %3288 = vmatpush.msrb.mxu3 %v3191_v10  ;;  %v3310_v53 = vld [vmem:[#allocation2 + $0x108] sm:$0xff]  ;;  %v3592_v10 = vunpack.c.h.bf16 %v8964_v27 }
 0x511   :  { %v3323_v54 = vunpack.c.l.bf16 %v3310_v53 }
 0x512   :  { %3266 = vmatpush.msrb.mxu2 %v3186_v49  ;;  %3289 = vmatpush.msrb.mxu3 %v3187_v23  ;;  %v9006_v49 = vld [vmem:[#allocation2 + $0x260] sm:$0xff]  ;;  %v3308_v23 = vld [vmem:[#allocation2 + $0xf8] sm:$0xff] }
 0x513   :  { %5401 = vmatmul.msk.f32.gmra.mxu2 %vm2972_vm4, %v8697_v25  ;;  %5403 = vmatmul.msk.f32.gmra.mxu3 %vm2972_vm4, %v8697_v25  ;;  %v3309_v25 = vld [vmem:[#allocation2 + $0x100] sm:$0xff]  ;;  %v3319_v56 = vunpack.c.l.bf16 %v3308_v23  ;;  %v3320_v46 = vunpack.c.h.bf16 %v3308_v23  ;;  %v3878_v44 = vunpack.c.h.bf16 %v9006_v49 }
 0x514   :  { %3267 = vmatpush.msrb.mxu2 %v3182_v57  ;;  %3290 = vmatpush.msrb.mxu3 %v3183_v8  ;;  %v3321_v3 = vunpack.c.l.bf16 %v3309_v25  ;;  %v3322_v4 = vunpack.c.h.bf16 %v3309_v25  ;;  %v3324_v57 = vunpack.c.h.bf16 %v3310_v53  ;;  %v9011_v8 = vld [vmem:[#allocation2 + $0x250] sm:$0xff]  ;;  %v3445_v53 = vld [vmem:[#allocation2 + $0x148] sm:$0xff] }
 0x515   :  { %3655 = vmatpush.msrb.mxu1 %v3592_v10  ;;  %v3873_v27 = vunpack.c.l.bf16 %v9011_v8  ;;  %5437 = vmatmul.msk.f32.gmra.mxu0 %vm2972_vm4, %v8914_v32 }
 0x516   :  { %5430 = vmatmul.msk.f32.vlgmr.msrb.gmra.mxu1 %vm2972_vm4, %v8908_v29 }
 0x517   :  { %3788 = vmatpush.msra.mxu1 %v3745_v39 }
 0x519   :  { %3789 = vmatpush.msra.mxu1 %v3741_v20 }
 0x51b   :  { %5404 = vmatmul.msk.f32.vlgmr.msra.gmra.mxu2 %vm2972_vm4, %v8818_v52  ;;  %5406 = vmatmul.msk.f32.vlgmr.msra.gmra.mxu3 %vm2972_vm4, %v8818_v52 }
 0x51c   :  { %3354 = vmatpush.msra.mxu2 %v3333_v37  ;;  %3377 = vmatpush.msra.mxu3 %v3334_v21  ;;  %v3869_v37 = vunpack.c.l.bf16 %v9015_v43  ;;  %v3452_v21 = vld [vmem:[#allocation2 + $0x180] sm:$0xff] }
 0x51d   :  { %v3471_v25 = vunpack.c.h.bf16 %v3452_v21 }
 0x51e   :  { %3355 = vmatpush.msra.mxu2 %v3329_v40  ;;  %3378 = vmatpush.msra.mxu3 %v3330_v58  ;;  %v3450_v40 = vld [vmem:[#allocation2 + $0x170] sm:$0xff]  ;;  %v3470_v58 = vunpack.c.l.bf16 %v3452_v21  ;;  %v3727_v21 = vld [vmem:[#allocation2 + $0x228] sm:$0xff] }
 0x51f   :  { %5431 = vmatmul.msk.f32.gmra.mxu1 %vm2972_vm4, %v8910_v14 }
 0x520   :  { %3356 = vmatpush.msra.mxu2 %v3325_v2  ;;  %3379 = vmatpush.msra.mxu3 %v3326_v41  ;;  %v3466_v2 = vunpack.c.l.bf16 %v3450_v40  ;;  %v3467_v41 = vunpack.c.h.bf16 %v3450_v40  ;;  %v3725_v40 = vld [vmem:[#allocation2 + $0x218] sm:$0xff] }
 0x522   :  { %3357 = vmatpush.msra.mxu2 %v3321_v3  ;;  %3380 = vmatpush.msra.mxu3 %v3322_v4  ;;  %v3729_v3 = vunpack.c.h.bf16 %v8989_v9  ;;  %v3882_v4 = vunpack.c.h.bf16 %v9003_v35  ;;  %v3874_v9 = vunpack.c.h.bf16 %v9011_v8  ;;  %v3584_v8 = vld [vmem:[#allocation2 + $0x1a8] sm:$0xff] }
 0x523   :  { %5405 = vmatmul.msk.f32.gmra.mxu2 %vm2972_vm4, %v8855_v5  ;;  %5407 = vmatmul.msk.f32.gmra.mxu3 %vm2972_vm4, %v8855_v5  ;;  %v3597_v39 = vunpack.c.l.bf16 %v3584_v8  ;;  %v3598_v36 = vunpack.c.h.bf16 %v3584_v8 }
 0x524   :  { %3358 = vmatpush.msra.mxu2 %v3317_v30  ;;  %3381 = vmatpush.msra.mxu3 %v3318_v17  ;;  %v3458_v30 = vunpack.c.l.bf16 %v3446_v62  ;;  %v3459_v17 = vunpack.c.h.bf16 %v3446_v62  ;;  %v3738_v62 = vunpack.c.l.bf16 %v3723_v28 }
 0x52b   :  { %5408 = vmatmul.msk.f32.vlgmr.msrb.gmra.mxu2 %vm2972_vm4, %v8818_v52  ;;  %5410 = vmatmul.msk.f32.vlgmr.msrb.gmra.mxu3 %vm2972_vm4, %v8818_v52  ;;  %v3877_v52 = vunpack.c.l.bf16 %v9006_v49 }
 0x52c   :  { %3400 = vmatpush.msrb.mxu2 %v3335_v55  ;;  %3423 = vmatpush.msrb.mxu3 %v3336_v31  ;;  %v3449_v55 = vld [vmem:[#allocation2 + $0x168] sm:$0xff]  ;;  %v3468_v31 = vunpack.c.l.bf16 %v3451_v38 }
 0x52d   :  { %3903 = vmatpush.msrb.mxu0 %v3877_v52  ;;  %v3465_v11 = vunpack.c.h.bf16 %v3449_v55  ;;  %v3586_v52 = vld [vmem:[#allocation2 + $0x1b8] sm:$0xff] }
 0x52e   :  { %3401 = vmatpush.msrb.mxu2 %v3331_v34  ;;  %3424 = vmatpush.msrb.mxu3 %v3332_v18  ;;  %v3447_v34 = vld [vmem:[#allocation2 + $0x158] sm:$0xff]  ;;  %v3464_v18 = vunpack.c.l.bf16 %v3449_v55 }
 0x52f   :  { %3904 = vmatpush.msrb.mxu0 %v3873_v27  ;;  %v3460_v10 = vunpack.c.l.bf16 %v3447_v34  ;;  %v3461_v35 = vunpack.c.h.bf16 %v3447_v34 }
 0x530   :  { %3402 = vmatpush.msrb.mxu2 %v3327_v33  ;;  %3425 = vmatpush.msrb.mxu3 %v3328_v15  ;;  %v3456_v33 = vunpack.c.l.bf16 %v3445_v53  ;;  %v3457_v15 = vunpack.c.h.bf16 %v3445_v53 }
 0x531   :  { %3905 = vmatpush.msrb.mxu0 %v3869_v37 }
 0x532   :  { %3403 = vmatpush.msrb.mxu2 %v3323_v54  ;;  %3426 = vmatpush.msrb.mxu3 %v3324_v57  ;;  %v3605_v54 = vunpack.c.l.bf16 %v3588_v26  ;;  %v3606_v57 = vunpack.c.h.bf16 %v3588_v26 }
 0x533   :  { %5409 = vmatmul.msk.f32.gmra.mxu2 %vm2972_vm4, %v8855_v5  ;;  %5411 = vmatmul.msk.f32.gmra.mxu3 %vm2972_vm4, %v8855_v5  ;;  %v3737_v5 = vunpack.c.h.bf16 %v8979_v19  ;;  %v3444_v19 = vld [vmem:[#allocation2 + $0x140] sm:$0xff] }
 0x534   :  { %3404 = vmatpush.msrb.mxu2 %v3319_v56  ;;  %3427 = vmatpush.msrb.mxu3 %v3320_v46  ;;  %v3454_v1 = vunpack.c.l.bf16 %v3444_v19  ;;  %v3455_v22 = vunpack.c.h.bf16 %v3444_v19  ;;  %v3601_v56 = vunpack.c.l.bf16 %v3586_v52  ;;  %v3582_v46 = vld [vmem:[#allocation2 + $0x198] sm:$0xff] }
 0x535   :  { %3906 = vmatpush.msrb.mxu0 %v3865_v45  ;;  %3790 = vmatpush.msra.mxu1 %v3737_v5  ;;  %v3593_v20 = vunpack.c.l.bf16 %v3582_v46  ;;  %v3594_v37 = vunpack.c.h.bf16 %v3582_v46 }
 0x536   :  { %5444 = vmatmul.msk.f32.vlgmr.msrb.gmra.mxu0 %vm2972_vm4, %v8916_v63 }
 0x537   :  { %3791 = vmatpush.msra.mxu1 %v3733_v6  ;;  %3925 = vmatpush.msra.mxu0 %v3882_v4  ;;  %v3721_v6 = vld [vmem:[#allocation2 + $0x1f8] sm:$0xff] }
 0x538   :  { %v3734_v19 = vunpack.c.l.bf16 %v3721_v6 }
 0x539   :  { %3792 = vmatpush.msra.mxu1 %v3729_v3  ;;  %3926 = vmatpush.msra.mxu0 %v3878_v44 }
 0x53a   :  { %5438 = vmatmul.msk.f32.vlgmr.msra.gmra.mxu1 %vm2972_vm4, %v8912_v51 }
 0x53b   :  { %5412 = vmatmul.msk.f32.vlgmr.msra.gmra.mxu2 %vm2972_vm4, %v8875_v0  ;;  %5414 = vmatmul.msk.f32.vlgmr.msra.gmra.mxu3 %vm2972_vm4, %v8875_v0 }
 0x53c   :  { %3491 = vmatpush.msra.mxu2 %v3470_v58  ;;  %3514 = vmatpush.msra.mxu3 %v3471_v25  ;;  %v3746_v58 = vunpack.c.l.bf16 %v3727_v21  ;;  %v3747_v25 = vunpack.c.h.bf16 %v3727_v21 }
 0x53d   :  { %6050 = vmatpush.msrb.mxu1 %v3882_v4  ;;  %3927 = vmatpush.msra.mxu0 %v3874_v9 }
 0x53e   :  { %3492 = vmatpush.msra.mxu2 %v3466_v2  ;;  %3515 = vmatpush.msra.mxu3 %v3467_v41  ;;  %v3742_v2 = vunpack.c.l.bf16 %v3725_v40  ;;  %v3743_v41 = vunpack.c.h.bf16 %v3725_v40 }
 0x53f   :  { %5445 = vmatmul.msk.f32.gmra.mxu0 %vm2972_vm4, %v8918_v48  ;;  %6051 = vmatpush.msrb.mxu1 %v3878_v44 }
 0x540   :  { %3493 = vmatpush.msra.mxu2 %v3462_v60  ;;  %3516 = vmatpush.msra.mxu3 %v3463_v42  ;;  %v3739_v60 = vunpack.c.h.bf16 %v3723_v28  ;;  %v3719_v42 = vld [vmem:[#allocation2 + $0x1e8] sm:$0xff] }
 0x541   :  { %3928 = vmatpush.msra.mxu0 %v3870_v12  ;;  %6052 = vmatpush.msrb.mxu1 %v3874_v9  ;;  %v3731_v44 = vunpack.c.h.bf16 %v3719_v42  ;;  %v3862_v9 = vld [vmem:[#allocation2 + $0x268] sm:$0xff] }
 0x542   :  { %3494 = vmatpush.msra.mxu2 %v3458_v30  ;;  %3517 = vmatpush.msra.mxu3 %v3459_v17  ;;  %v3735_v30 = vunpack.c.h.bf16 %v3721_v6  ;;  %v3730_v17 = vunpack.c.l.bf16 %v3719_v42  ;;  %v3879_v38 = vunpack.c.l.bf16 %v3862_v9 }
 0x543   :  { %5413 = vmatmul.msk.f32.gmra.mxu2 %vm2972_vm4, %v8897_v24  ;;  %5415 = vmatmul.msk.f32.gmra.mxu3 %vm2972_vm4, %v8897_v24 }
 0x544   :  { %3495 = vmatpush.msra.mxu2 %v3454_v1  ;;  %3518 = vmatpush.msra.mxu3 %v3455_v22 }
 0x545   :  { %5439 = vmatmul.msk.f32.gmra.mxu1 %vm2972_vm4, %v8914_v32  ;;  %3929 = vmatpush.msra.mxu0 %v3866_v47 }
 0x546   :  { %6053 = vmatpush.msrb.mxu1 %v3870_v12 }
 0x547   :  { %5446 = vmatmul.msk.f32.vlgmr.msra.gmra.mxu0 %vm2972_vm4, %v8916_v63 }
 0x548   :  { %6054 = vmatpush.msrb.mxu1 %v3866_v47  ;;  %v3860_v47 = vld [vmem:[#allocation2 + $0x258] sm:$0xff] }
 0x549   :  { %v3876_v55 = vunpack.c.h.bf16 %v3860_v47 }
 0x54b   :  { %5416 = vmatmul.msk.f32.vlgmr.msrb.gmra.mxu2 %vm2972_vm4, %v8875_v0  ;;  %5418 = vmatmul.msk.f32.vlgmr.msrb.gmra.mxu3 %vm2972_vm4, %v8875_v0  ;;  %v3590_v0 = vld [vmem:[#allocation2 + $0x1d8] sm:$0xff] }
 0x54c   :  { %3537 = vmatpush.msrb.mxu2 %v3472_v59  ;;  %3560 = vmatpush.msrb.mxu3 %v3473_v61  ;;  %v3609_v49 = vunpack.c.l.bf16 %v3590_v0  ;;  %v3610_v23 = vunpack.c.h.bf16 %v3590_v0  ;;  %v3880_v59 = vunpack.c.h.bf16 %v3862_v9  ;;  %v3858_v61 = vld [vmem:[#allocation2 + $0x248] sm:$0xff] }
 0x54d   :  { %5447 = vmatmul.msk.f32.vlgmr.msrb.gmra.mxu1 %vm2972_vm4, %v8918_v48 }
 0x54e   :  { %3538 = vmatpush.msrb.mxu2 %v3468_v31  ;;  %3561 = vmatpush.msrb.mxu3 %v3469_v16  ;;  %v3856_v31 = vld [vmem:[#allocation2 + $0x238] sm:$0xff] }
 0x550   :  { %3539 = vmatpush.msrb.mxu2 %v3464_v18  ;;  %3562 = vmatpush.msrb.mxu3 %v3465_v11  ;;  %v3871_v18 = vunpack.c.l.bf16 %v3858_v61  ;;  %v3872_v11 = vunpack.c.h.bf16 %v3858_v61 }
 0x552   :  { %3540 = vmatpush.msrb.mxu2 %v3460_v10  ;;  %3563 = vmatpush.msrb.mxu3 %v3461_v35  ;;  %v3867_v35 = vunpack.c.l.bf16 %v3856_v31 }
 0x553   :  { %5417 = vmatmul.msk.f32.gmra.mxu2 %vm2972_vm4, %v8897_v24  ;;  %5419 = vmatmul.msk.f32.gmra.mxu3 %vm2972_vm4, %v8897_v24  ;;  %v3602_v24 = vunpack.c.h.bf16 %v3586_v52 }
 0x554   :  { %3541 = vmatpush.msrb.mxu2 %v3456_v33  ;;  %3564 = vmatpush.msrb.mxu3 %v3457_v15 }
 0x55b   :  { %5420 = vmatmul.msk.f32.vlgmr.msra.gmra.mxu2 %vm2972_vm4, %v8904_v7  ;;  %5422 = vmatmul.msk.f32.vlgmr.msra.gmra.mxu3 %vm2972_vm4, %v8904_v7 }
 0x55c   :  { %3674 = vmatpush.msra.mxu2 %v3609_v49  ;;  %3697 = vmatpush.msra.mxu3 %v3610_v23 }
 0x55e   :  { %v9072_v43 = vpop.f32.mrf.mxu2  ;;  %v9074_v27 = vpop.f32.mrf.mxu3  ;;  %3675 = vmatpush.msra.mxu2 %v3605_v54  ;;  %3698 = vmatpush.msra.mxu3 %v3606_v57 }
 0x560   :  { %3676 = vmatpush.msra.mxu2 %v3601_v56  ;;  %3699 = vmatpush.msra.mxu3 %v3602_v24 }
 0x562   :  { %3677 = vmatpush.msra.mxu2 %v3597_v39  ;;  %3700 = vmatpush.msra.mxu3 %v3598_v36 }
 0x563   :  { %5421 = vmatmul.msk.f32.gmra.mxu2 %vm2972_vm4, %v8906_v50  ;;  %5423 = vmatmul.msk.f32.gmra.mxu3 %vm2972_vm4, %v8906_v50 }
 0x564   :  { %3678 = vmatpush.msra.mxu2 %v3593_v20  ;;  %3701 = vmatpush.msra.mxu3 %v3594_v37 }
 0x566   :  { %v9080_v45 = vpop.f32.mrf.mxu2  ;;  %v9082_v5 = vpop.f32.mrf.mxu3 }
 0x56b   :  { %5424 = vmatmul.msk.f32.vlgmr.msrb.gmra.mxu2 %vm2972_vm4, %v8904_v7  ;;  %5426 = vmatmul.msk.f32.vlgmr.msrb.gmra.mxu3 %vm2972_vm4, %v8904_v7  ;;  %v3864_v7 = vld [vmem:[#allocation2 + $0x278] sm:$0xff] }
 0x56c   :  { %3811 = vmatpush.msrb.mxu2 %v3746_v58  ;;  %3834 = vmatpush.msrb.mxu3 %v3747_v25  ;;  %v3883_v12 = vunpack.c.l.bf16 %v3864_v7  ;;  %v3884_v13 = vunpack.c.h.bf16 %v3864_v7 }
 0x56e   :  { %v3042_v3 = vpop.f32.mrf.mxu2  ;;  %v3065_v4 = vpop.f32.mrf.mxu3  ;;  %3812 = vmatpush.msrb.mxu2 %v3742_v2  ;;  %3835 = vmatpush.msrb.mxu3 %v3743_v41 }
 0x570   :  { %3813 = vmatpush.msrb.mxu2 %v3738_v62  ;;  %3836 = vmatpush.msrb.mxu3 %v3739_v60 }
 0x572   :  { %3814 = vmatpush.msrb.mxu2 %v3734_v19  ;;  %3837 = vmatpush.msrb.mxu3 %v3735_v30 }
 0x573   :  { %5425 = vmatmul.msk.f32.gmra.mxu2 %vm2972_vm4, %v8906_v50  ;;  %5427 = vmatmul.msk.f32.gmra.mxu3 %vm2972_vm4, %v8906_v50  ;;  %v3875_v50 = vunpack.c.l.bf16 %v3860_v47 }
 0x574   :  { %3815 = vmatpush.msrb.mxu2 %v3730_v17  ;;  %3838 = vmatpush.msrb.mxu3 %v3731_v44 }
 0x576   :  { %v3045_v1 = vpop.f32.mrf.mxu2  ;;  %v3068_v22 = vpop.f32.mrf.mxu3 }
 0x57b   :  { %5432 = vmatmul.msk.f32.vlgmr.msra.gmra.mxu2 %vm2972_vm4, %v8908_v29  ;;  %5434 = vmatmul.msk.f32.vlgmr.msra.gmra.mxu3 %vm2972_vm4, %v8908_v29  ;;  %v3868_v29 = vunpack.c.h.bf16 %v3856_v31 }
 0x57c   :  { %3948 = vmatpush.msra.mxu2 %v3883_v12  ;;  %3971 = vmatpush.msra.mxu3 %v3884_v13 }
 0x57e   :  { %v3094_v16 = vpop.f32.mrf.mxu2  ;;  %v3117_v34 = vpop.f32.mrf.mxu3  ;;  %3949 = vmatpush.msra.mxu2 %v3879_v38  ;;  %3972 = vmatpush.msra.mxu3 %v3880_v59 }
 0x57f   :  { %v3095_v53 = vadd.f32 %v3094_v16, %v9072_v43  ;;  %v3118_v10 = vadd.f32 %v3117_v34, %v9074_v27  ;;  %v9131_v34 = vld [vmem:[%s9847_s17] sm:$0xf] }
 0x580   :  { %3950 = vmatpush.msra.mxu2 %v3875_v50  ;;  %3973 = vmatpush.msra.mxu3 %v3876_v55 }
 0x582   :  { %3951 = vmatpush.msra.mxu2 %v3871_v18  ;;  %3974 = vmatpush.msra.mxu3 %v3872_v11 }
 0x583   :  { %5433 = vmatmul.msk.f32.gmra.mxu2 %vm2972_vm4, %v8910_v14  ;;  %5435 = vmatmul.msk.f32.gmra.mxu3 %vm2972_vm4, %v8910_v14 }
 0x584   :  { %3952 = vmatpush.msra.mxu2 %v3867_v35  ;;  %3975 = vmatpush.msra.mxu3 %v3868_v29 }
 0x586   :  { %v3097_v33 = vpop.f32.mrf.mxu2  ;;  %v3120_v15 = vpop.f32.mrf.mxu3 }
 0x587   :  { %v3098_v0 = vadd.f32 %v3097_v33, %v9080_v45  ;;  %v3121_v26 = vadd.f32 %v3120_v15, %v9082_v5  ;;  %v3993_v33 = vperm.slane %v9131_v34, 0 }
 0x58b   :  { %5440 = vmatmul.msk.f32.vlgmr.msrb.gmra.mxu2 %vm2972_vm4, %v8912_v51  ;;  %5442 = vmatmul.msk.f32.vlgmr.msrb.gmra.mxu3 %vm2972_vm4, %v8912_v51 }
 0x58e   :  { %v3140_v49 = vpop.f32.mrf.mxu2  ;;  %v3163_v23 = vpop.f32.mrf.mxu3 }
 0x58f   :  { %v3141_v52 = vadd.f32 %v3140_v49, %v3042_v3  ;;  %v3164_v54 = vadd.f32 %v3163_v23, %v3065_v4 }
 0x593   :  { %5441 = vmatmul.msk.f32.gmra.mxu2 %vm2972_vm4, %v8914_v32  ;;  %5443 = vmatmul.msk.f32.gmra.mxu3 %vm2972_vm4, %v8914_v32  ;;  %v3634_v32 = vpop.f32.mrf.mxu0 }
 0x596   :  { %v3143_v14 = vpop.f32.mrf.mxu2  ;;  %v3166_v57 = vpop.f32.mrf.mxu3 }
 0x597   :  { %v3144_v8 = vadd.f32 %v3143_v14, %v3045_v1  ;;  %v3167_v56 = vadd.f32 %v3166_v57, %v3068_v22 }
 0x59b   :  { %5448 = vmatmul.msk.f32.vlgmr.msra.gmra.mxu2 %vm2972_vm4, %v8916_v63  ;;  %5450 = vmatmul.msk.f32.vlgmr.msra.gmra.mxu3 %vm2972_vm4, %v8916_v63  ;;  %v3637_v63 = vpop.f32.mrf.mxu0 }
 0x59e   :  { %v3223_v51 = vpop.f32.mrf.mxu2  ;;  %v3246_v24 = vpop.f32.mrf.mxu3 }
 0x59f   :  { %v3298_v46 = vadd.f32 %v3223_v51, %v3095_v53  ;;  %v3299_v43 = vadd.f32 %v3246_v24, %v3118_v10  ;;  %v9133_v10 = vld [vmem:[#allocation6] sm:$0xf] }
 0x5a0   :  { %v4011_v49 = vperm.slane %v9133_v10, 0 }
 0x5a3   :  { %5449 = vmatmul.msk.f32.gmra.mxu2 %vm2972_vm4, %v8918_v48  ;;  %5451 = vmatmul.msk.f32.gmra.mxu3 %vm2972_vm4, %v8918_v48  ;;  %v3771_v2 = vpop.f32.mrf.mxu0  ;;  %v3657_v48 = vpop.f32.mrf.mxu1 }
 0x5a6   :  { %v3226_v27 = vpop.f32.mrf.mxu2  ;;  %v3249_v39 = vpop.f32.mrf.mxu3 }
 0x5a7   :  { %v3302_v36 = vadd.f32 %v3226_v27, %v3098_v0  ;;  %v3303_v20 = vadd.f32 %v3249_v39, %v3121_v26  ;;  %v3994_v0 = vperm.slane %v9131_v34, 1 }
 0x5ab   :  { %v3774_v42 = vpop.f32.mrf.mxu0  ;;  %v3660_v17 = vpop.f32.mrf.mxu1 }
 0x5ae   :  { %v3269_v37 = vpop.f32.mrf.mxu2  ;;  %v3292_v21 = vpop.f32.mrf.mxu3 }
 0x5af   :  { %v3300_v45 = vadd.f32 %v3269_v37, %v3141_v52  ;;  %v3301_v5 = vadd.f32 %v3292_v21, %v3164_v54  ;;  %v4012_v52 = vperm.slane %v9133_v10, 1 }
 0x5b3   :  { %v3908_v44 = vpop.f32.mrf.mxu0 }
 0x5b6   :  { %v3272_v40 = vpop.f32.mrf.mxu2  ;;  %v3295_v58 = vpop.f32.mrf.mxu3 }
 0x5b7   :  { %v3304_v25 = vadd.f32 %v3272_v40, %v3144_v8  ;;  %v3305_v28 = vadd.f32 %v3295_v58, %v3167_v56  ;;  %v3794_v59 = vpop.f32.mrf.mxu1 }
 0x5bc   :  { %v3911_v61 = vpop.f32.mrf.mxu0 }
 0x5be   :  { %v3360_v41 = vpop.f32.mrf.mxu2  ;;  %v3383_v6 = vpop.f32.mrf.mxu3 }
 0x5bf   :  { %v3435_v62 = vadd.f32 %v3360_v41, %v3298_v46  ;;  %v3436_v60 = vadd.f32 %v3383_v6, %v3299_v43 }
 0x5c2   :  { %v3797_v53 = vpop.f32.mrf.mxu1 }
 0x5c4   :  { %v3931_v35 = vpop.f32.mrf.mxu0 }
 0x5c6   :  { %v3363_v3 = vpop.f32.mrf.mxu2  ;;  %v3386_v4 = vpop.f32.mrf.mxu3 }
 0x5c7   :  { %v3439_v19 = vadd.f32 %v3363_v3, %v3302_v36  ;;  %v3440_v30 = vadd.f32 %v3386_v4, %v3303_v20 }
 0x5ca   :  { %v3934_v36 = vpop.f32.mrf.mxu1 }
 0x5ce   :  { %v3406_v7 = vpop.f32.mrf.mxu2  ;;  %v3429_v1 = vpop.f32.mrf.mxu3 }
 0x5cf   :  { %v9120_v22 = vadd.f32 %v3406_v7, %v3300_v45  ;;  %v9122_v9 = vadd.f32 %v3429_v1, %v3301_v5 }
 0x5d6   :  { %v3409_v12 = vpop.f32.mrf.mxu2  ;;  %v3432_v13 = vpop.f32.mrf.mxu3 }
 0x5d7   :  { %v9124_v47 = vadd.f32 %v3409_v12, %v3304_v25  ;;  %v9126_v38 = vadd.f32 %v3432_v13, %v3305_v28 }
 0x5de   :  { %v3497_v50 = vpop.f32.mrf.mxu2  ;;  %v3520_v55 = vpop.f32.mrf.mxu3 }
 0x5df   :  { %v3572_v31 = vadd.f32 %v3497_v50, %v3435_v62  ;;  %v3573_v16 = vadd.f32 %v3520_v55, %v3436_v60 }
 0x5e1   :  { %v3709_v18 = vadd.f32 %v3634_v32, %v3572_v31  ;;  %v3710_v11 = vadd.f32 %v3657_v48, %v3573_v16 }
 0x5e3   :  { %v3846_v29 = vadd.f32 %v3771_v2, %v3709_v18  ;;  %v3847_v15 = vadd.f32 %v3794_v59, %v3710_v11 }
 0x5e5   :  { %v3983_v26 = vadd.f32 %v3908_v44, %v3846_v29  ;;  %v3984_v23 = vadd.f32 %v3931_v35, %v3847_v15 }
 0x5e6   :  { %v3500_v54 = vpop.f32.mrf.mxu2  ;;  %v3523_v14 = vpop.f32.mrf.mxu3 }
 0x5e7   :  { %v4001_v57 = vmul.f32 %v3993_v33, %v3983_v26  ;;  %v4002_v8 = vmul.f32 %v3994_v0, %v3984_v23  ;;  %v3576_v56 = vadd.f32 %v3500_v54, %v3439_v19  ;;  %v3577_v51 = vadd.f32 %v3523_v14, %v3440_v30 }
 0x5e8   :  { %v3996_v54 = vperm.slane %v9131_v34, 3 }
 0x5e9   :  { %v4019_v24 = vadd.f32 %v4011_v49, %v4001_v57  ;;  %v4020_v46 = vadd.f32 %v4012_v52, %v4002_v8  ;;  %v3713_v43 = vadd.f32 %v3637_v63, %v3576_v56  ;;  %v3714_v32 = vadd.f32 %v3660_v17, %v3577_v51 }
 0x5ea   :  { %v4013_v56 = vperm.slane %v9133_v10, 2 }
 0x5eb   :  { %v4035_v27 = vmin.f32 %v4019_v24, 0.0  ;;  %v4036_v39 = vmin.f32 %v4020_v46, 0.0  ;;  %v3850_v20 = vadd.f32 %v3774_v42, %v3713_v43  ;;  %v3851_v37 = vadd.f32 %v3797_v53, %v3714_v32 }
 0x5ec   :  { %vm4027_vm5 = vcmp.gt.f32.partialorder %v4019_v24, 0.0  ;;  %vm4028_vm6 = vcmp.gt.f32.partialorder %v4020_v46, 0.0 }
 0x5ed   :  { %v4043_v21 = vmul.f32 1.442695, %v4035_v27  ;;  %v4045_v45 = vmul.f32 1.442695, %v4036_v39  ;;  %v3987_v5 = vadd.f32 %v3911_v61, %v3850_v20  ;;  %v3988_v40 = vadd.f32 %v3934_v36, %v3851_v37 }
 0x5ee   :  { %v3543_v58 = vpop.f32.mrf.mxu2  ;;  %v3566_v25 = vpop.f32.mrf.mxu3 }
 0x5ef   :  { %6153 = vpow2.f32 %v4043_v21  ;;  %v4005_v28 = vmul.f32 %v3993_v33, %v3987_v5  ;;  %v4006_v2 = vmul.f32 %v3994_v0, %v3988_v40  ;;  %v3574_v33 = vadd.f32 %v3543_v58, %v9120_v22 }
 0x5f0   :  { %6155 = vpow2.f32 %v4045_v45  ;;  %v3575_v15 = vadd.f32 %v3566_v25, %v9122_v9 }
 0x5f1   :  { %v4023_v41 = vadd.f32 %v4011_v49, %v4005_v28  ;;  %v4024_v6 = vadd.f32 %v4012_v52, %v4006_v2  ;;  %v3995_v52 = vperm.slane %v9131_v34, 2 }
 0x5f3   :  { %v4039_v62 = vmin.f32 %v4023_v41, 0.0  ;;  %v4040_v63 = vmin.f32 %v4024_v6, 0.0  ;;  %vm4031_vm8 = vcmp.gt.f32.partialorder %v4023_v41, 0.0  ;;  %vm4032_vm9 = vcmp.gt.f32.partialorder %v4024_v6, 0.0 }
 0x5f5   :  { %v6154_v60 = vpop.eup %6153  ;;  %v4051_v4 = vmul.f32 1.442695, %v4039_v62  ;;  %v4053_v42 = vmul.f32 1.442695, %v4040_v63 }
 0x5f6   :  { %v6156_v48 = vpop.eup %6155  ;;  %v5452_v3 = vadd.f32 -1.0, %v6154_v60  ;;  %v3546_v19 = vpop.f32.mrf.mxu2 }
 0x5f7   :  { %v3569_v30 = vpop.f32.mrf.mxu3  ;;  %v5453_v17 = vadd.f32 -1.0, %v6156_v48  ;;  %6157 = vpow2.f32 %v4051_v4  ;;  %v3578_v22 = vadd.f32 %v3546_v19, %v9124_v47 }
 0x5f8   :  { %v9139_v44 = vsel %vm4027_vm5, %v4019_v24, %v5452_v3  ;;  %6159 = vpow2.f32 %v4053_v42  ;;  %v4014_v24 = vperm.slane %v9133_v10, 3  ;;  %v3579_v9 = vadd.f32 %v3569_v30, %v9126_v38 }
 0x5f9   :  { %v9141_v7 = vsel %vm4028_vm6, %v4020_v46, %v5453_v17 }
 0x5fd   :  { %v6158_v1 = vpop.eup %6157 }
 0x5fe   :  { %v3680_v12 = vpop.f32.mrf.mxu2  ;;  %v6160_v59 = vpop.eup %6159  ;;  %v5456_v61 = vadd.f32 -1.0, %v6158_v1 }
 0x5ff   :  { %v3703_v13 = vpop.f32.mrf.mxu3  ;;  %v5457_v50 = vadd.f32 -1.0, %v6160_v59  ;;  %v3711_v0 = vadd.f32 %v3680_v12, %v3574_v33 }
 0x600   :  { %v9143_v55 = vsel %vm4031_vm8, %v4023_v41, %v5456_v61  ;;  %v3712_v26 = vadd.f32 %v3703_v13, %v3575_v15 }
 0x601   :  { %v9145_v31 = vsel %vm4032_vm9, %v4024_v6, %v5457_v50 }
 0x606   :  { %v3683_v16 = vpop.f32.mrf.mxu2 }
 0x607   :  { %v3706_v18 = vpop.f32.mrf.mxu3  ;;  %v3715_v32 = vadd.f32 %v3683_v16, %v3578_v22 }
 0x608   :  { %v3716_v27 = vadd.f32 %v3706_v18, %v3579_v9 }
 0x60e   :  { %v3817_v11 = vpop.f32.mrf.mxu2 }
 0x60f   :  { %v3840_v53 = vpop.f32.mrf.mxu3  ;;  %v3848_v49 = vadd.f32 %v3817_v11, %v3711_v0 }
 0x610   :  { %v3849_v23 = vadd.f32 %v3840_v53, %v3712_v26 }
 0x616   :  { %v3820_v35 = vpop.f32.mrf.mxu2 }
 0x617   :  { %v3843_v29 = vpop.f32.mrf.mxu3  ;;  %v3852_v20 = vadd.f32 %v3820_v35, %v3715_v32 }
 0x618   :  { %v3853_v34 = vadd.f32 %v3843_v29, %v3716_v27 }
 0x61e   :  { %v3954_v14 = vpop.f32.mrf.mxu2 }
 0x61f   :  { %v3977_v57 = vpop.f32.mrf.mxu3  ;;  %v3985_v8 = vadd.f32 %v3954_v14, %v3848_v49 }
 0x620   :  { %v3986_v51 = vadd.f32 %v3977_v57, %v3849_v23 }
 0x621   :  { %v4003_v46 = vmul.f32 %v3995_v52, %v3985_v8 }
 0x622   :  { %v4004_v43 = vmul.f32 %v3996_v54, %v3986_v51 }
 0x623   :  { %v4021_v39 = vadd.f32 %v4013_v56, %v4003_v46 }
 0x624   :  { %v4022_v36 = vadd.f32 %v4014_v24, %v4004_v43 }
 0x625   :  { %v4037_v37 = vmin.f32 %v4021_v39, 0.0  ;;  %vm4029_vm10 = vcmp.gt.f32.partialorder %v4021_v39, 0.0 }
 0x626   :  { %v4038_v21 = vmin.f32 %v4022_v36, 0.0  ;;  %v3957_v45 = vpop.f32.mrf.mxu2  ;;  %vm4030_vm11 = vcmp.gt.f32.partialorder %v4022_v36, 0.0 }
 0x627   :  { %v3980_v5 = vpop.f32.mrf.mxu3  ;;  %v4047_v40 = vmul.f32 1.442695, %v4037_v37  ;;  %v3989_v25 = vadd.f32 %v3957_v45, %v3852_v20 }
 0x628   :  { %v4049_v58 = vmul.f32 1.442695, %v4038_v21  ;;  %v3990_v10 = vadd.f32 %v3980_v5, %v3853_v34 }
 0x629   :  { %6161 = vpow2.f32 %v4047_v40  ;;  %v4007_v47 = vmul.f32 %v3995_v52, %v3989_v25 }
 0x62a   :  { %v4008_v28 = vmul.f32 %v3996_v54, %v3990_v10  ;;  %6163 = vpow2.f32 %v4049_v58 }
 0x62b   :  { %v4025_v38 = vadd.f32 %v4013_v56, %v4007_v47 }
 0x62c   :  { %v4026_v2 = vadd.f32 %v4014_v24, %v4008_v28 }
 0x62d   :  { %v4041_v41 = vmin.f32 %v4025_v38, 0.0  ;;  %vm4033_vm12 = vcmp.gt.f32.partialorder %v4025_v38, 0.0 }
 0x62e   :  { %v4042_v6 = vmin.f32 %v4026_v2, 0.0  ;;  %vm4034_vm13 = vcmp.gt.f32.partialorder %v4026_v2, 0.0 }
 0x62f   :  { %v6162_v62 = vpop.eup %6161  ;;  %v4055_v63 = vmul.f32 1.442695, %v4041_v41 }
 0x630   :  { %v4057_v60 = vmul.f32 1.442695, %v4042_v6  ;;  %v6164_v48 = vpop.eup %6163  ;;  %v5454_v3 = vadd.f32 -1.0, %v6162_v62 }
 0x631   :  { %v5455_v4 = vadd.f32 -1.0, %v6164_v48  ;;  %6165 = vpow2.f32 %v4055_v63 }
 0x632   :  { %v4069_v42 = vsel %vm4029_vm10, %v4021_v39, %v5454_v3  ;;  %6167 = vpow2.f32 %v4057_v60 }
 0x633   :  { %v4070_v19 = vsel %vm4030_vm11, %v4022_v36, %v5455_v4 }
 0x637   :  { %v6166_v30 = vpop.eup %6165 }
 0x638   :  { %v6168_v17 = vpop.eup %6167  ;;  %v5458_v1 = vadd.f32 -1.0, %v6166_v30 }
 0x639   :  { %v5459_v12 = vadd.f32 -1.0, %v6168_v17 }
 0x63a   :  { %v4073_v13 = vsel %vm4033_vm12, %v4025_v38, %v5458_v1 }
 0x63b   :  { %v4074_v59 = vsel %vm4034_vm13, %v4026_v2, %v5459_v12 }
 0x63c   :  { %6386 = dma.done.wait [#allocation5 + $0x1], 4096 }
 0x63d   :  { %6387 = vsyncadd [#allocation5 + $0x1], 4294963200  ;;  %4148 = vmatpush.msrb.mxu2 %v4073_v13  ;;  %4171 = vmatpush.msrb.mxu3 %v4074_v59  ;;  %v9848_v61 = vld [vmem:[#allocation58_spill] sm:$0xff]  ;;  %vm4081_vm14 = vcmask 130048   ;;  %v9853_v49 = vld [vmem:[#allocation41_spill] sm:$0xff] }
 0x63e   :  { %v5652_v50 = vunpack.c.h.bf16 %v9848_v61  ;;  %v9849_v16 = vld [vmem:[#allocation42_spill] sm:$0xff]  ;;  %4102 = vmatpush.msrb.mxu0 %v9143_v55  ;;  %4125 = vmatpush.msra.mxu1 %v9145_v31  ;;  %v5651_v33 = vunpack.c.l.bf16 %v9848_v61  ;;  %v9852_v31 = vld [vmem:[#allocation57_spill] sm:$0xff]  ;;  %v5584_v23 = vunpack.c.h.bf16 %v9853_v49  ;;  %v5583_v8 = vunpack.c.l.bf16 %v9853_v49  ;;  %v9856_v24 = vld [vmem:[#allocation56_spill] sm:$0xff] }
 0x63f   :  { %v5588_v18 = vunpack.c.h.bf16 %v9849_v16  ;;  %v9850_v11 = vld [vmem:[#allocation66_spill] sm:$0xff]  ;;  %4149 = vmatpush.msrb.mxu2 %v4069_v42  ;;  %4172 = vmatpush.msrb.mxu3 %v4070_v19  ;;  %v5587_v15 = vunpack.c.l.bf16 %v9849_v16  ;;  %v5648_v26 = vunpack.c.h.bf16 %v9852_v31  ;;  %v9855_v54 = vld [vmem:[#allocation49_spill] sm:$0xff]  ;;  %v5647_v57 = vunpack.c.l.bf16 %v9852_v31  ;;  %v9857_v9 = vld [vmem:[#allocation40_spill] sm:$0xff] }
 0x640   :  { %v5684_v53 = vunpack.c.h.bf16 %v9850_v11  ;;  %v9851_v35 = vld [vmem:[#allocation50_spill] sm:$0xff]  ;;  %4103 = vmatpush.msrb.mxu0 %v9139_v44  ;;  %4126 = vmatpush.msra.mxu1 %v9141_v7  ;;  %v5683_v0 = vunpack.c.l.bf16 %v9850_v11  ;;  %v9854_v7 = vld [vmem:[#allocation65_spill] sm:$0xff]  ;;  %v5616_v14 = vunpack.c.h.bf16 %v9855_v54  ;;  %v5615_v51 = vunpack.c.l.bf16 %v9855_v54  ;;  %v9858_v43 = vld [vmem:[#allocation64_spill] sm:$0xff] }
 0x641   :  { %v5620_v29 = vunpack.c.h.bf16 %v9851_v35  ;;  %v5619_v55 = vunpack.c.l.bf16 %v9851_v35  ;;  %4358 = vmatpush.msra.mxu2 %v5652_v50  ;;  %v4079_v44 = vld [vmem:[%s9345_s4] sm:$0xff]  ;;  %v5680_v52 = vunpack.c.h.bf16 %v9854_v7  ;;  %v5679_v56 = vunpack.c.l.bf16 %v9854_v7  ;;  %v9859_v27 = vld [vmem:[#allocation48_spill] sm:$0xff]  ;;  %v4080_v36 = vld [vmem:[%s9345_s4 + $0x8] sm:$0xff] }
 0x642   :  { %4312 = vmatpush.msra.mxu0 %v5588_v18  ;;  %4381 = vmatpush.msra.mxu3 %v5684_v53  ;;  %v5644_v22 = vunpack.c.h.bf16 %v9856_v24  ;;  %v5580_v46 = vunpack.c.h.bf16 %v9857_v9  ;;  %v5676_v32 = vunpack.c.h.bf16 %v9858_v43  ;;  %v5612_v39 = vunpack.c.h.bf16 %v9859_v27  ;;  %v9860_v45 = vld [vmem:[#allocation55_spill] sm:$0xff]  ;;  %v9864_v62 = vld [vmem:[#allocation54_spill] sm:$0xff]  ;;  %v9868_v13 = vld [vmem:[#allocation53_spill] sm:$0xff] }
 0x643   :  { %4335 = vmatpush.msrb.mxu1 %v5620_v29  ;;  %4359 = vmatpush.msra.mxu2 %v5651_v33  ;;  %v5643_v20 = vunpack.c.l.bf16 %v9856_v24  ;;  %v5579_v34 = vunpack.c.l.bf16 %v9857_v9  ;;  %v5675_v37 = vunpack.c.l.bf16 %v9858_v43  ;;  %v5611_v21 = vunpack.c.l.bf16 %v9859_v27  ;;  %v9861_v40 = vld [vmem:[#allocation39_spill] sm:$0xff]  ;;  %v9865_v60 = vld [vmem:[#allocation38_spill] sm:$0xff]  ;;  %v9869_v61 = vld [vmem:[#allocation37_spill] sm:$0xff] }
 0x644   :  { %4313 = vmatpush.msra.mxu0 %v5587_v15  ;;  %4382 = vmatpush.msra.mxu3 %v5683_v0  ;;  %v5640_v5 = vunpack.c.h.bf16 %v9860_v45  ;;  %v5576_v58 = vunpack.c.h.bf16 %v9861_v40  ;;  %v9862_v25 = vld [vmem:[#allocation63_spill] sm:$0xff]  ;;  %v5639_v38 = vunpack.c.l.bf16 %v9860_v45  ;;  %v5575_v2 = vunpack.c.l.bf16 %v9861_v40  ;;  %v9866_v3 = vld [vmem:[#allocation62_spill] sm:$0xff]  ;;  %v9870_v16 = vld [vmem:[#allocation61_spill] sm:$0xff] }
 0x645   :  { %4336 = vmatpush.msrb.mxu1 %v5619_v55  ;;  %5464 = vmatmul.msk.f32.vlgmr.msrb.gmra.mxu2 %vm4081_vm14, %v4079_v44  ;;  %v5672_v10 = vunpack.c.h.bf16 %v9862_v25  ;;  %v9863_v47 = vld [vmem:[#allocation47_spill] sm:$0xff]  ;;  %v5671_v41 = vunpack.c.l.bf16 %v9862_v25  ;;  %v5636_v63 = vunpack.c.h.bf16 %v9864_v62  ;;  %v5572_v48 = vunpack.c.h.bf16 %v9865_v60  ;;  %v9867_v42 = vld [vmem:[#allocation46_spill] sm:$0xff]  ;;  %v9871_v11 = vld [vmem:[#allocation45_spill] sm:$0xff] }
 0x646   :  { %5466 = vmatmul.msk.f32.vlgmr.msrb.gmra.mxu3 %vm4081_vm14, %v4079_v44  ;;  %5460 = vmatmul.msk.f32.vlgmr.msrb.gmra.mxu0 %vm4081_vm14, %v4079_v44  ;;  %v5608_v28 = vunpack.c.h.bf16 %v9863_v47  ;;  %v5607_v6 = vunpack.c.l.bf16 %v9863_v47  ;;  %v5668_v4 = vunpack.c.h.bf16 %v9866_v3  ;;  %v5604_v19 = vunpack.c.h.bf16 %v9867_v42  ;;  %v9872_v0 = vld [vmem:[#allocation52_spill] sm:$0xff]  ;;  %v9878_v9 = vld [vmem:[#allocation59_spill] sm:$0xff]  ;;  %v6169_v25 = vld [vmem:[%s9346_s5] ss:$0 sm:$0xff] }
 0x647   :  { %5462 = vmatmul.msk.f32.vlgmr.msra.gmra.mxu1 %vm4081_vm14, %v4079_v44  ;;  %4360 = vmatpush.msra.mxu2 %v5648_v26  ;;  %v5635_v30 = vunpack.c.l.bf16 %v9864_v62  ;;  %v5571_v17 = vunpack.c.l.bf16 %v9865_v60  ;;  %v5667_v1 = vunpack.c.l.bf16 %v9866_v3  ;;  %v5603_v12 = vunpack.c.l.bf16 %v9867_v42  ;;  %v9873_v31 = vld [vmem:[#allocation36_spill] sm:$0xff] }
 0x648   :  { %4314 = vmatpush.msra.mxu0 %v5584_v23  ;;  %4383 = vmatpush.msra.mxu3 %v5680_v52  ;;  %v5632_v59 = vunpack.c.h.bf16 %v9868_v13  ;;  %v5568_v50 = vunpack.c.h.bf16 %v9869_v61  ;;  %v5664_v18 = vunpack.c.h.bf16 %v9870_v16  ;;  %v5600_v53 = vunpack.c.h.bf16 %v9871_v11  ;;  %v9874_v49 = vld [vmem:[#allocation60_spill] sm:$0xff] }
 0x649   :  { %4337 = vmatpush.msrb.mxu1 %v5616_v14  ;;  %4361 = vmatpush.msra.mxu2 %v5647_v57  ;;  %v5631_v35 = vunpack.c.l.bf16 %v9868_v13  ;;  %v5567_v29 = vunpack.c.l.bf16 %v9869_v61  ;;  %v5663_v33 = vunpack.c.l.bf16 %v9870_v16  ;;  %v5599_v15 = vunpack.c.l.bf16 %v9871_v11  ;;  %v9875_v44 = vld [vmem:[#allocation44_spill] sm:$0xff]  ;;  %v9876_v57 = vld [vmem:[#allocation51_spill] sm:$0xff] }
 0x64a   :  { %4315 = vmatpush.msra.mxu0 %v5583_v8  ;;  %4384 = vmatpush.msra.mxu3 %v5679_v56  ;;  %v5628_v55 = vunpack.c.h.bf16 %v9872_v0  ;;  %v5564_v26 = vunpack.c.h.bf16 %v9873_v31  ;;  %v5660_v23 = vunpack.c.h.bf16 %v9874_v49  ;;  %v5596_v7 = vunpack.c.h.bf16 %v9875_v44  ;;  %v9877_v56 = vld [vmem:[#allocation35_spill] sm:$0xff] }
 0x64b   :  { %4338 = vmatpush.msrb.mxu1 %v5615_v51  ;;  %4362 = vmatpush.msra.mxu2 %v5644_v22  ;;  %v5627_v52 = vunpack.c.l.bf16 %v9872_v0  ;;  %v5563_v54 = vunpack.c.l.bf16 %v9873_v31  ;;  %v5659_v14 = vunpack.c.l.bf16 %v9874_v49  ;;  %v5624_v8 = vunpack.c.h.bf16 %v9876_v57 }
 0x64c   :  { %4316 = vmatpush.msra.mxu0 %v5580_v46  ;;  %4385 = vmatpush.msra.mxu3 %v5676_v32  ;;  %v5560_v51 = vunpack.c.h.bf16 %v9877_v56  ;;  %v5595_v24 = vunpack.c.l.bf16 %v9875_v44  ;;  %v5623_v22 = vunpack.c.l.bf16 %v9876_v57  ;;  %v5656_v46 = vunpack.c.h.bf16 %v9878_v9  ;;  %v9879_v32 = vld [vmem:[#allocation43_spill] sm:$0xff] }
 0x64d   :  { %4339 = vmatpush.msrb.mxu1 %v5612_v39  ;;  %5465 = vmatmul.msk.f32.gmra.mxu2 %vm4081_vm14, %v4080_v36  ;;  %v5559_v43 = vunpack.c.l.bf16 %v9877_v56  ;;  %v5592_v27 = vunpack.c.h.bf16 %v9879_v32  ;;  %v5655_v39 = vunpack.c.l.bf16 %v9878_v9 }
 0x64e   :  { %5467 = vmatmul.msk.f32.gmra.mxu3 %vm4081_vm14, %v4080_v36  ;;  %5461 = vmatmul.msk.f32.gmra.mxu0 %vm4081_vm14, %v4080_v36 }
 0x64f   :  { %5463 = vmatmul.msk.f32.gmra.mxu1 %vm4081_vm14, %v4080_v36  ;;  %4363 = vmatpush.msra.mxu2 %v5643_v20  ;;  %v5591_v36 = vunpack.c.l.bf16 %v9879_v32 }
 0x650   :  { %4317 = vmatpush.msra.mxu0 %v5579_v34  ;;  %4386 = vmatpush.msra.mxu3 %v5675_v37 }
 0x651   :  { %4340 = vmatpush.msrb.mxu1 %v5611_v21  ;;  %4364 = vmatpush.msra.mxu2 %v5640_v5 }
 0x652   :  { %4318 = vmatpush.msra.mxu0 %v5576_v58  ;;  %4387 = vmatpush.msra.mxu3 %v5672_v10 }
 0x653   :  { %4341 = vmatpush.msrb.mxu1 %v5608_v28  ;;  %4365 = vmatpush.msra.mxu2 %v5639_v38 }
 0x654   :  { %4319 = vmatpush.msra.mxu0 %v5575_v2  ;;  %4388 = vmatpush.msra.mxu3 %v5671_v41 }
 0x655   :  { %4342 = vmatpush.msrb.mxu1 %v5607_v6  ;;  %4366 = vmatpush.msra.mxu2 %v5636_v63 }
 0x656   :  { %4320 = vmatpush.msra.mxu0 %v5572_v48  ;;  %4389 = vmatpush.msra.mxu3 %v5668_v4 }
 0x657   :  { %4343 = vmatpush.msrb.mxu1 %v5604_v19  ;;  %4367 = vmatpush.msra.mxu2 %v5635_v30 }
 0x658   :  { %4321 = vmatpush.msra.mxu0 %v5571_v17  ;;  %4390 = vmatpush.msra.mxu3 %v5667_v1 }
 0x659   :  { %4344 = vmatpush.msrb.mxu1 %v5603_v12  ;;  %4368 = vmatpush.msra.mxu2 %v5632_v59 }
 0x65a   :  { %4322 = vmatpush.msra.mxu0 %v5568_v50  ;;  %4391 = vmatpush.msra.mxu3 %v5664_v18 }
 0x65b   :  { %4345 = vmatpush.msrb.mxu1 %v5600_v53  ;;  %4369 = vmatpush.msra.mxu2 %v5631_v35 }
 0x65c   :  { %4323 = vmatpush.msra.mxu0 %v5567_v29  ;;  %4392 = vmatpush.msra.mxu3 %v5663_v33 }
 0x65d   :  { %4346 = vmatpush.msrb.mxu1 %v5599_v15  ;;  %4370 = vmatpush.msra.mxu2 %v5628_v55 }
 0x65e   :  { %4324 = vmatpush.msra.mxu0 %v5564_v26  ;;  %4393 = vmatpush.msra.mxu3 %v5660_v23 }
 0x65f   :  { %4347 = vmatpush.msrb.mxu1 %v5596_v7  ;;  %4371 = vmatpush.msra.mxu2 %v5627_v52 }
 0x660   :  { %4325 = vmatpush.msra.mxu0 %v5563_v54  ;;  %4394 = vmatpush.msra.mxu3 %v5659_v14 }
 0x661   :  { %4372 = vmatpush.msra.mxu2 %v5624_v8  ;;  %4348 = vmatpush.msrb.mxu1 %v5595_v24 }
 0x662   :  { %4326 = vmatpush.msra.mxu0 %v5560_v51  ;;  %4395 = vmatpush.msra.mxu3 %v5656_v46 }
 0x663   :  { %4373 = vmatpush.msra.mxu2 %v5623_v22  ;;  %4349 = vmatpush.msrb.mxu1 %v5592_v27 }
 0x664   :  { %4327 = vmatpush.msra.mxu0 %v5559_v43  ;;  %4396 = vmatpush.msra.mxu3 %v5655_v39 }
 0x665   :  { %4350 = vmatpush.msrb.mxu1 %v5591_v36 }
 0x6c3   :  { %v4105_v20 = vpop.f32.mrf.mxu0 }
 0x6c4   :  { %v4128_v34 = vpop.f32.mrf.mxu1  ;;  %4328 = vmatmul.f32.vlgmr.msra.gmra.mxu0 %v4105_v20 }
 0x6c5   :  { %4351 = vmatmul.f32.vlgmr.msrb.gmra.mxu1 %v4128_v34 }
 0x6c8   :  { %v4151_v37 = vpop.f32.mrf.mxu2 }
 0x6c9   :  { %v4174_v21 = vpop.f32.mrf.mxu3  ;;  %4374 = vmatmul.f32.vlgmr.msra.gmra.mxu2 %v4151_v37 }
 0x6ca   :  { %4397 = vmatmul.f32.vlgmr.msra.gmra.mxu3 %v4174_v21 }
 0x6cb   :  { %v4108_v45 = vpop.f32.mrf.mxu0 }
 0x6cc   :  { %v4131_v5 = vpop.f32.mrf.mxu1  ;;  %4331 = vmatmul.f32.gmra.mxu0 %v4108_v45 }
 0x6cd   :  { %4354 = vmatmul.f32.gmra.mxu1 %v4131_v5 }
 0x6d0   :  { %v4154_v40 = vpop.f32.mrf.mxu2 }
 0x6d1   :  { %v4177_v58 = vpop.f32.mrf.mxu3  ;;  %4377 = vmatmul.f32.gmra.mxu2 %v4154_v40 }
 0x6d2   :  { %4400 = vmatmul.f32.gmra.mxu3 %v4177_v58 }
 0x741   :  { %v4329_v10 = vpop.f32.mrf.mxu0 }
 0x742   :  { %v4352_v47 = vpop.f32.mrf.mxu1  ;;  %v4330_v28 = vadd.f32 %v6169_v25, %v4329_v10 }
 0x744   :  { %v4353_v38 = vadd.f32 %v4352_v47, %v4330_v28 }
 0x749   :  { %v4332_v2 = vpop.f32.mrf.mxu0 }
 0x74a   :  { %v4333_v63 = vadd.f32 %v6169_v25, %v4332_v2  ;;  %v4355_v60 = vpop.f32.mrf.mxu1 }
 0x74c   :  { %v4375_v41 = vpop.f32.mrf.mxu2  ;;  %v4356_v4 = vadd.f32 %v4355_v60, %v4333_v63 }
 0x74d   :  { %v4398_v6 = vpop.f32.mrf.mxu3  ;;  %v4376_v62 = vadd.f32 %v4375_v41, %v4353_v38 }
 0x74f   :  { %v4399_v48 = vadd.f32 %v4398_v6, %v4376_v62 }
 0x751   :  { %v4406_v3 = vmin.f32 %v4399_v48, 0.0  ;;  %vm4404_vm15 = vcmp.gt.f32.partialorder %v4399_v48, 0.0 }
 0x753   :  { %v4408_v42 = vmul.f32 1.442695, %v4406_v3 }
 0x754   :  { %v4378_v19 = vpop.f32.mrf.mxu2 }
 0x755   :  { %v4401_v30 = vpop.f32.mrf.mxu3  ;;  %6170 = vpow2.f32 %v4408_v42  ;;  %v4379_v17 = vadd.f32 %v4378_v19, %v4356_v4 }
 0x757   :  { %v4402_v1 = vadd.f32 %v4401_v30, %v4379_v17 }
 0x759   :  { %v4407_v12 = vmin.f32 %v4402_v1, 0.0  ;;  %vm4405_vm7 = vcmp.gt.f32.partialorder %v4402_v1, 0.0 }
 0x75b   :  { %v6171_v13 = vpop.eup %6170  ;;  %v4410_v59 = vmul.f32 1.442695, %v4407_v12 }
 0x75c   :  { %v5468_v61 = vadd.f32 -1.0, %v6171_v13 }
 0x75d   :  { %6172 = vpow2.f32 %v4410_v59 }
 0x75e   :  { %v4414_v50 = vsel %vm4404_vm15, %v4399_v48, %v5468_v61 }
 0x763   :  { %v6173_v16 = vpop.eup %6172 }
 0x764   :  { %v5469_v18 = vadd.f32 -1.0, %v6173_v16 }
 0x766   :  { %v4415_v11 = vsel %vm4405_vm7, %v4402_v1, %v5469_v18 }
 0x767   :  { %6388 = dma.done.wait [#allocation5 + $0x2], 8192 }
 0x768   :  { %6389 = vsyncadd [#allocation5 + $0x2], 4294959104  ;;  %4442 = vmatpush.msrb.mxu0 %v4415_v11  ;;  %4506 = vmatpush.msrb.mxu2 %v4415_v11  ;;  %v4420_v53 = vld [vmem:[#allocation10] sm:$0xff]  ;;  %v4452_v29 = vld [vmem:[#allocation10 + $0x10] sm:$0xff]  ;;  %vm5215_vm1 = vcmask 523264   ;;  %s6409_s5 = smov [#allocation18]  }
 0x769   :  { %4474 = vmatpush.msra.mxu1 %v4415_v11  ;;  %4538 = vmatpush.msrb.mxu3 %v4415_v11  ;;  %v4484_v35 = vld [vmem:[#allocation10 + $0x20] sm:$0xff]  ;;  %v4516_v33 = vld [vmem:[#allocation10 + $0x30] sm:$0xff]  ;;  %v4421_v15 = vld [vmem:[#allocation10 + $0x8] sm:$0xff]  ;;  %s5246_s0 = sshll.u32 %s6409_s5, 4  ;;  %s9880_s30 = sld [smem:[#allocation251_spill]]  ;;  %vm5239_vm3 = vcmask 25600   ;;  %s5247_s0 = int_to_ptr.vmem [resolvable:$true] %s5246_s0 }
 0x76a   :  { %4443 = vmatpush.msrb.mxu0 %v4414_v50  ;;  %4507 = vmatpush.msrb.mxu2 %v4414_v50  ;;  %v4485_v0 = vld [vmem:[#allocation10 + $0x28] sm:$0xff]  ;;  %v5993_v55 = vld [vmem:[#allocation4 + $0x38] sm:$0xff]   ;;  %v4548_v21 = vld [vmem:[#allocation10 + $0x40] sm:$0xff] }
 0x76b   :  { %4475 = vmatpush.msra.mxu1 %v4414_v50  ;;  %4539 = vmatpush.msrb.mxu3 %v4414_v50  ;;  %v6001_v31 = vld [vmem:[#allocation4 + $0x78] sm:$0xff]   ;;  %v5716_v26 = vunpack.c.h.bf16 %v5993_v55  ;;  %v5992_v23 = vld [vmem:[#allocation4 + $0x30] sm:$0xff]   ;;  %v5715_v14 = vunpack.c.l.bf16 %v5993_v55  ;;  %v5991_v36 = vld [vmem:[#allocation4 + $0x28] sm:$0xff]  }
 0x76c   :  { %4570 = vmatpush.msra.mxu0 %v4415_v11  ;;  %4634 = vmatpush.msra.mxu2 %v4415_v11  ;;  %v5748_v49 = vunpack.c.h.bf16 %v6001_v31  ;;  %v6000_v44 = vld [vmem:[#allocation4 + $0x70] sm:$0xff]   ;;  %v6009_v7 = vld [vmem:[#allocation4 + $0xb8] sm:$0xff]   ;;  %v5747_v57 = vunpack.c.l.bf16 %v6001_v31  ;;  %v5712_v24 = vunpack.c.h.bf16 %v5992_v23  ;;  %v5711_v27 = vunpack.c.l.bf16 %v5992_v23  ;;  %v5999_v20 = vld [vmem:[#allocation4 + $0x68] sm:$0xff]  }
 0x76d   :  { %4602 = vmatpush.msrb.mxu1 %v4415_v11  ;;  %4666 = vmatpush.msra.mxu3 %v4415_v11  ;;  %v4453_v52 = vld [vmem:[#allocation10 + $0x18] sm:$0xff]  ;;  %v5780_v56 = vunpack.c.h.bf16 %v6009_v7  ;;  %v5744_v22 = vunpack.c.h.bf16 %v6000_v44  ;;  %v6008_v9 = vld [vmem:[#allocation4 + $0xb0] sm:$0xff]   ;;  %v5779_v43 = vunpack.c.l.bf16 %v6009_v7  ;;  %v5743_v39 = vunpack.c.l.bf16 %v6000_v44  ;;  %v4612_v45 = vld [vmem:[#allocation10 + $0x60] sm:$0xff] }
 0x76e   :  { %4571 = vmatpush.msra.mxu0 %v4414_v50  ;;  %4635 = vmatpush.msra.mxu2 %v4414_v50  ;;  %v4517_v54 = vld [vmem:[#allocation10 + $0x38] sm:$0xff]  ;;  %v6016_v46 = vld [vmem:[#allocation4 + $0xf0] sm:$0xff]   ;;  %v5776_v34 = vunpack.c.h.bf16 %v6008_v9  ;;  %v5708_v58 = vunpack.c.h.bf16 %v5991_v36  ;;  %v5740_v25 = vunpack.c.h.bf16 %v5999_v20  ;;  %v6007_v10 = vld [vmem:[#allocation4 + $0xa8] sm:$0xff]   ;;  %v5775_v38 = vunpack.c.l.bf16 %v6008_v9 }
 0x76f   :  { %4603 = vmatpush.msrb.mxu1 %v4414_v50  ;;  %4667 = vmatpush.msra.mxu3 %v4414_v50  ;;  %v6017_v8 = vld [vmem:[#allocation4 + $0xf8] sm:$0xff]   ;;  %v5808_v37 = vunpack.c.h.bf16 %v6016_v46  ;;  %v6015_v47 = vld [vmem:[#allocation4 + $0xe8] sm:$0xff]   ;;  %v5990_v28 = vld [vmem:[#allocation4 + $0x20] sm:$0xff]   ;;  %v5807_v41 = vunpack.c.l.bf16 %v6016_v46  ;;  %v5707_v6 = vunpack.c.l.bf16 %v5991_v36  ;;  %v5739_v62 = vunpack.c.l.bf16 %v5999_v20  ;;  %s5248_s22 = sshll.u32 %s9880_s30, 4  ;;  %s5249_s22 = int_to_ptr.hbm [resolvable:$true] %s5248_s22 }
 0x770   :  { %5470 = vmatmul.msk.f32.vlgmr.msrb.gmra.mxu0 %vm4081_vm14, %v4420_v53  ;;  %5474 = vmatmul.msk.f32.vlgmr.msrb.gmra.mxu2 %vm4081_vm14, %v4484_v35  ;;  %v5812_v51 = vunpack.c.h.bf16 %v6017_v8  ;;  %v5811_v32 = vunpack.c.l.bf16 %v6017_v8  ;;  %v4580_v5 = vld [vmem:[#allocation10 + $0x50] sm:$0xff]  ;;  %v5998_v2 = vld [vmem:[#allocation4 + $0x60] sm:$0xff]   ;;  %v5772_v63 = vunpack.c.h.bf16 %v6007_v10  ;;  %v5804_v60 = vunpack.c.h.bf16 %v6015_v47  ;;  %v4549_v19 = vld [vmem:[#allocation10 + $0x48] sm:$0xff] }
 0x771   :  { %5472 = vmatmul.msk.f32.vlgmr.msra.gmra.mxu1 %vm4081_vm14, %v4452_v29  ;;  %5476 = vmatmul.msk.f32.vlgmr.msrb.gmra.mxu3 %vm4081_vm14, %v4516_v33  ;;  %v4644_v40 = vld [vmem:[#allocation10 + $0x70] sm:$0xff]  ;;  %v5704_v48 = vunpack.c.h.bf16 %v5990_v28  ;;  %v5736_v3 = vunpack.c.h.bf16 %v5998_v2  ;;  %v5771_v4 = vunpack.c.l.bf16 %v6007_v10  ;;  %v5803_v42 = vunpack.c.l.bf16 %v6015_v47  ;;  %v6006_v30 = vld [vmem:[#allocation4 + $0xa0] sm:$0xff]   ;;  %v4613_v1 = vld [vmem:[#allocation10 + $0x68] sm:$0xff] }
 0x772   :  { %4931 = vmatpush.msrb.mxu0 %v5716_v26  ;;  %4954 = vmatpush.msra.mxu1 %v5748_v49  ;;  %v6014_v17 = vld [vmem:[#allocation4 + $0xe0] sm:$0xff]   ;;  %v5989_v12 = vld [vmem:[#allocation4 + $0x18] sm:$0xff]   ;;  %v5703_v50 = vunpack.c.l.bf16 %v5990_v28  ;;  %v5735_v16 = vunpack.c.l.bf16 %v5998_v2  ;;  %v5768_v18 = vunpack.c.h.bf16 %v6006_v30  ;;  %v5996_v55 = vld [vmem:[#allocation4 + $0x50] sm:$0xff]  }
 0x773   :  { %4977 = vmatpush.msrb.mxu2 %v5780_v56  ;;  %5000 = vmatpush.msrb.mxu3 %v5812_v51  ;;  %v5997_v13 = vld [vmem:[#allocation4 + $0x58] sm:$0xff]   ;;  %v5800_v11 = vunpack.c.h.bf16 %v6014_v17  ;;  %v5700_v53 = vunpack.c.h.bf16 %v5989_v12  ;;  %v5799_v31 = vunpack.c.l.bf16 %v6014_v17  ;;  %v5699_v26 = vunpack.c.l.bf16 %v5989_v12  ;;  %v5995_v56 = vld [vmem:[#allocation4 + $0x48] sm:$0xff]   ;;  %v5686_v36 = vld [vmem:[#allocation4] sm:$0xff]  }
 0x774   :  { %4932 = vmatpush.msrb.mxu0 %v5715_v14  ;;  %4955 = vmatpush.msra.mxu1 %v5747_v57  ;;  %v4581_v59 = vld [vmem:[#allocation10 + $0x58] sm:$0xff]  ;;  %v5732_v35 = vunpack.c.h.bf16 %v5997_v13  ;;  %v5731_v49 = vunpack.c.l.bf16 %v5997_v13  ;;  %v6012_v14 = vld [vmem:[#allocation4 + $0xd0] sm:$0xff]   ;;  %v5987_v57 = vld [vmem:[#allocation4 + $0x8] sm:$0xff]  }
 0x775   :  { %4978 = vmatpush.msrb.mxu2 %v5779_v43  ;;  %5001 = vmatpush.msrb.mxu3 %v5811_v32  ;;  %v4645_v61 = vld [vmem:[#allocation10 + $0x78] sm:$0xff]  ;;  %v5792_v46 = vunpack.c.h.bf16 %v6012_v14  ;;  %v5692_v43 = vunpack.c.h.bf16 %v5987_v57  ;;  %v5724_v32 = vunpack.c.h.bf16 %v5995_v56 }
 0x776   :  { %4933 = vmatpush.msrb.mxu0 %v5712_v24  ;;  %4956 = vmatpush.msra.mxu1 %v5744_v22  ;;  %v6005_v29 = vld [vmem:[#allocation4 + $0x98] sm:$0xff]   ;;  %v5727_v22 = vunpack.c.l.bf16 %v5996_v55 }
 0x777   :  { %4979 = vmatpush.msrb.mxu2 %v5776_v34  ;;  %5002 = vmatpush.msrb.mxu3 %v5808_v37  ;;  %v6013_v33 = vld [vmem:[#allocation4 + $0xd8] sm:$0xff]   ;;  %v5764_v23 = vunpack.c.h.bf16 %v6005_v29  ;;  %v5763_v8 = vunpack.c.l.bf16 %v6005_v29  ;;  %v5994_v34 = vld [vmem:[#allocation4 + $0x40] sm:$0xff]   ;;  %v5791_v37 = vunpack.c.l.bf16 %v6012_v14  ;;  %v6040_v29 = vld [vmem:[#allocation4 + $0x1b0] sm:$0xff]  }
 0x778   :  { %5471 = vmatmul.msk.f32.gmra.mxu0 %vm4081_vm14, %v4421_v15  ;;  %5475 = vmatmul.msk.f32.gmra.mxu2 %vm4081_vm14, %v4485_v0  ;;  %v5988_v15 = vld [vmem:[#allocation4 + $0x10] sm:$0xff]   ;;  %v5767_v0 = vunpack.c.l.bf16 %v6006_v30  ;;  %v5796_v44 = vunpack.c.h.bf16 %v6013_v33  ;;  %v5795_v51 = vunpack.c.l.bf16 %v6013_v33  ;;  %v6025_v10 = vld [vmem:[#allocation4 + $0x138] sm:$0xff]   ;;  %v6030_v14 = vld [vmem:[#allocation4 + $0x160] sm:$0xff]  }
 0x779   :  { %5473 = vmatmul.msk.f32.gmra.mxu1 %vm4081_vm14, %v4453_v52  ;;  %5477 = vmatmul.msk.f32.gmra.mxu3 %vm4081_vm14, %v4517_v54  ;;  %v5696_v7 = vunpack.c.h.bf16 %v5988_v15  ;;  %v5728_v52 = vunpack.c.h.bf16 %v5996_v55  ;;  %v6004_v54 = vld [vmem:[#allocation4 + $0x90] sm:$0xff]   ;;  %v5695_v24 = vunpack.c.l.bf16 %v5988_v15  ;;  %v6033_v47 = vld [vmem:[#allocation4 + $0x178] sm:$0xff]  }
 0x77a   :  { %4934 = vmatpush.msrb.mxu0 %v5711_v27  ;;  %4957 = vmatpush.msra.mxu1 %v5743_v39  ;;  %v5760_v9 = vunpack.c.h.bf16 %v6004_v54  ;;  %v6003_v27 = vld [vmem:[#allocation4 + $0x88] sm:$0xff]   ;;  %v5759_v20 = vunpack.c.l.bf16 %v6004_v54  ;;  %v5875_v30 = vunpack.c.l.bf16 %v6033_v47  ;;  %v6041_v17 = vld [vmem:[#allocation4 + $0x1b8] sm:$0xff]   ;;  %v6048_v33 = vld [vmem:[#allocation4 + $0x1f0] sm:$0xff]  }
 0x77b   :  { %4980 = vmatpush.msrb.mxu2 %v5775_v38  ;;  %5003 = vmatpush.msrb.mxu3 %v5807_v41  ;;  %v6011_v39 = vld [vmem:[#allocation4 + $0xc8] sm:$0xff]   ;;  %v5755_v28 = vunpack.c.l.bf16 %v6003_v27  ;;  %v6002_v38 = vld [vmem:[#allocation4 + $0x80] sm:$0xff]   ;;  %v5907_v15 = vunpack.c.l.bf16 %v6041_v17 }
 0x77c   :  { %4935 = vmatpush.msrb.mxu0 %v5708_v58  ;;  %4958 = vmatpush.msra.mxu1 %v5740_v25  ;;  %v5688_v58 = vunpack.c.h.bf16 %v5686_v36  ;;  %v5720_v25 = vunpack.c.h.bf16 %v5994_v34  ;;  %v5787_v2 = vunpack.c.l.bf16 %v6011_v39  ;;  %v6010_v41 = vld [vmem:[#allocation4 + $0xc0] sm:$0xff]   ;;  %v5751_v12 = vunpack.c.l.bf16 %v6002_v38 }
 0x77d   :  { %4981 = vmatpush.msrb.mxu2 %v5772_v63  ;;  %5004 = vmatpush.msrb.mxu3 %v5804_v60  ;;  %v5844_v63 = vunpack.c.h.bf16 %v6025_v10  ;;  %v5876_v60 = vunpack.c.h.bf16 %v6033_v47  ;;  %v5783_v13 = vunpack.c.l.bf16 %v6010_v41  ;;  %v6028_v47 = vld [vmem:[#allocation4 + $0x150] sm:$0xff]  }
 0x77e   :  { %4936 = vmatpush.msrb.mxu0 %v5707_v6  ;;  %4959 = vmatpush.msra.mxu1 %v5739_v62  ;;  %v5687_v6 = vunpack.c.l.bf16 %v5686_v36  ;;  %v5719_v62 = vunpack.c.l.bf16 %v5994_v34  ;;  %v6038_v36 = vld [vmem:[#allocation4 + $0x1a0] sm:$0xff]  }
 0x77f   :  { %4982 = vmatpush.msrb.mxu2 %v5771_v4  ;;  %5005 = vmatpush.msrb.mxu3 %v5803_v42  ;;  %v5784_v4 = vunpack.c.h.bf16 %v6010_v41  ;;  %v6032_v42 = vld [vmem:[#allocation4 + $0x170] sm:$0xff]  }
 0x780   :  { %5478 = vmatmul.msk.f32.vlgmr.msra.gmra.mxu0 %vm4081_vm14, %v4548_v21  ;;  %5482 = vmatmul.msk.f32.vlgmr.msra.gmra.mxu2 %vm4081_vm14, %v4612_v45  ;;  %v5691_v21 = vunpack.c.l.bf16 %v5987_v57  ;;  %v5723_v45 = vunpack.c.l.bf16 %v5995_v56  ;;  %v6039_v57 = vld [vmem:[#allocation4 + $0x1a8] sm:$0xff]   ;;  %v5864_v56 = vunpack.c.h.bf16 %v6030_v14 }
 0x781   :  { %5480 = vmatmul.msk.f32.vlgmr.msrb.gmra.mxu1 %vm4081_vm14, %v4580_v5  ;;  %5484 = vmatmul.msk.f32.vlgmr.msra.gmra.mxu3 %vm4081_vm14, %v4644_v40  ;;  %v5756_v5 = vunpack.c.h.bf16 %v6003_v27  ;;  %v5788_v40 = vunpack.c.h.bf16 %v6011_v39  ;;  %v6029_v39 = vld [vmem:[#allocation4 + $0x158] sm:$0xff]  }
 0x782   :  { %4937 = vmatpush.msrb.mxu0 %v5704_v48  ;;  %4960 = vmatpush.msra.mxu1 %v5736_v3  ;;  %v5752_v48 = vunpack.c.h.bf16 %v6002_v38  ;;  %v6024_v3 = vld [vmem:[#allocation4 + $0x130] sm:$0xff]   ;;  %v5860_v34 = vunpack.c.h.bf16 %v6029_v39 }
 0x783   :  { %4983 = vmatpush.msrb.mxu2 %v5768_v18  ;;  %5006 = vmatpush.msrb.mxu3 %v5800_v11  ;;  %v6031_v11 = vld [vmem:[#allocation4 + $0x168] sm:$0xff]  }
 0x784   :  { %4938 = vmatpush.msrb.mxu0 %v5703_v50  ;;  %4961 = vmatpush.msra.mxu1 %v5735_v16  ;;  %v5908_v50 = vunpack.c.h.bf16 %v6041_v17  ;;  %v6023_v16 = vld [vmem:[#allocation4 + $0x128] sm:$0xff]  }
 0x785   :  { %4984 = vmatpush.msrb.mxu2 %v5767_v0  ;;  %5007 = vmatpush.msrb.mxu3 %v5799_v31  ;;  %v5836_v55 = vunpack.c.h.bf16 %v6023_v16  ;;  %v5868_v31 = vunpack.c.h.bf16 %v6031_v11 }
 0x786   :  { %4939 = vmatpush.msrb.mxu0 %v5700_v53  ;;  %4962 = vmatpush.msra.mxu1 %v5732_v35  ;;  %v5839_v53 = vunpack.c.l.bf16 %v6024_v3  ;;  %v5871_v35 = vunpack.c.l.bf16 %v6032_v42 }
 0x787   :  { %4985 = vmatpush.msrb.mxu2 %v5764_v23  ;;  %5008 = vmatpush.msrb.mxu3 %v5796_v44  ;;  %v5936_v23 = vunpack.c.h.bf16 %v6048_v33  ;;  %v5835_v44 = vunpack.c.l.bf16 %v6023_v16 }
 0x788   :  { %5479 = vmatmul.msk.f32.gmra.mxu0 %vm4081_vm14, %v4549_v19  ;;  %5483 = vmatmul.msk.f32.gmra.mxu2 %vm4081_vm14, %v4613_v1  ;;  %v5843_v19 = vunpack.c.l.bf16 %v6025_v10  ;;  %v6049_v1 = vld [vmem:[#allocation4 + $0x1f8] sm:$0xff]  }
 0x789   :  { %5481 = vmatmul.msk.f32.gmra.mxu1 %vm4081_vm14, %v4581_v59  ;;  %5485 = vmatmul.msk.f32.gmra.mxu3 %vm4081_vm14, %v4645_v61  ;;  %v5840_v59 = vunpack.c.h.bf16 %v6024_v3  ;;  %v5872_v61 = vunpack.c.h.bf16 %v6032_v42  ;;  %v5940_v18 = vunpack.c.h.bf16 %v6049_v1  ;;  %v5939_v0 = vunpack.c.l.bf16 %v6049_v1  ;;  %v6027_v42 = vld [vmem:[#allocation4 + $0x148] sm:$0xff]  }
 0x78a   :  { %4940 = vmatpush.msrb.mxu0 %v5699_v26  ;;  %4963 = vmatpush.msra.mxu1 %v5731_v49  ;;  %v5904_v26 = vunpack.c.h.bf16 %v6040_v29  ;;  %v6022_v49 = vld [vmem:[#allocation4 + $0x120] sm:$0xff]   ;;  %v5852_v17 = vunpack.c.h.bf16 %v6027_v42 }
 0x78b   :  { %4986 = vmatpush.msrb.mxu2 %v5763_v8  ;;  %5009 = vmatpush.msrb.mxu3 %v5795_v51  ;;  %v5832_v54 = vunpack.c.h.bf16 %v6022_v49  ;;  %v5831_v8 = vunpack.c.l.bf16 %v6022_v49  ;;  %v5900_v51 = vunpack.c.h.bf16 %v6039_v57  ;;  %v6034_v49 = vld [vmem:[#allocation4 + $0x180] sm:$0xff]  }
 0x78c   :  { %4941 = vmatpush.msrb.mxu0 %v5696_v7  ;;  %4964 = vmatpush.msra.mxu1 %v5728_v52  ;;  %v5867_v7 = vunpack.c.l.bf16 %v6031_v11  ;;  %v5903_v52 = vunpack.c.l.bf16 %v6040_v29  ;;  %v6026_v11 = vld [vmem:[#allocation4 + $0x140] sm:$0xff]  }
 0x78d   :  { %4987 = vmatpush.msrb.mxu2 %v5760_v9  ;;  %5010 = vmatpush.msrb.mxu3 %v5792_v46  ;;  %v6047_v9 = vld [vmem:[#allocation4 + $0x1e8] sm:$0xff]   ;;  %v5848_v29 = vunpack.c.h.bf16 %v6026_v11 }
 0x78e   :  { %4942 = vmatpush.msrb.mxu0 %v5695_v24  ;;  %4965 = vmatpush.msra.mxu1 %v5727_v22  ;;  %v5935_v24 = vunpack.c.l.bf16 %v6048_v33  ;;  %v6021_v22 = vld [vmem:[#allocation4 + $0x118] sm:$0xff]   ;;  %v5932_v27 = vunpack.c.h.bf16 %v6047_v9 }
 0x78f   :  { %4988 = vmatpush.msrb.mxu2 %v5759_v20  ;;  %5011 = vmatpush.msrb.mxu3 %v5791_v37  ;;  %v5828_v46 = vunpack.c.h.bf16 %v6021_v22  ;;  %v5827_v20 = vunpack.c.l.bf16 %v6021_v22  ;;  %v5896_v37 = vunpack.c.h.bf16 %v6038_v36 }
 0x790   :  { %4943 = vmatpush.msrb.mxu0 %v5692_v43  ;;  %4966 = vmatpush.msra.mxu1 %v5724_v32  ;;  %v5863_v43 = vunpack.c.l.bf16 %v6030_v14  ;;  %v5899_v32 = vunpack.c.l.bf16 %v6039_v57 }
 0x791   :  { %4989 = vmatpush.msrb.mxu2 %v5756_v5  ;;  %5012 = vmatpush.msrb.mxu3 %v5788_v40  ;;  %v6046_v5 = vld [vmem:[#allocation4 + $0x1e0] sm:$0xff]  }
 0x792   :  { %4944 = vmatpush.msrb.mxu0 %v5691_v21  ;;  %4967 = vmatpush.msra.mxu1 %v5723_v45  ;;  %v5931_v21 = vunpack.c.l.bf16 %v6047_v9  ;;  %v6020_v45 = vld [vmem:[#allocation4 + $0x110] sm:$0xff]   ;;  %v5928_v10 = vunpack.c.h.bf16 %v6046_v5 }
 0x793   :  { %4990 = vmatpush.msrb.mxu2 %v5755_v28  ;;  %5013 = vmatpush.msrb.mxu3 %v5787_v2  ;;  %v5824_v40 = vunpack.c.h.bf16 %v6020_v45  ;;  %v6037_v28 = vld [vmem:[#allocation4 + $0x198] sm:$0xff]   ;;  %v5823_v38 = vunpack.c.l.bf16 %v6020_v45  ;;  %v5856_v2 = vunpack.c.h.bf16 %v6028_v47 }
 0x794   :  { %4945 = vmatpush.msrb.mxu0 %v5688_v58  ;;  %4968 = vmatpush.msra.mxu1 %v5720_v25  ;;  %v5859_v58 = vunpack.c.l.bf16 %v6029_v39  ;;  %v5895_v25 = vunpack.c.l.bf16 %v6038_v36  ;;  %v5892_v41 = vunpack.c.h.bf16 %v6037_v28  ;;  %v5891_v3 = vunpack.c.l.bf16 %v6037_v28 }
 0x795   :  { %4991 = vmatpush.msrb.mxu2 %v5752_v48  ;;  %5014 = vmatpush.msrb.mxu3 %v5784_v4  ;;  %v5855_v48 = vunpack.c.l.bf16 %v6028_v47 }
 0x796   :  { %4946 = vmatpush.msrb.mxu0 %v5687_v6  ;;  %4969 = vmatpush.msra.mxu1 %v5719_v62  ;;  %v5927_v6 = vunpack.c.l.bf16 %v6046_v5  ;;  %v6019_v62 = vld [vmem:[#allocation4 + $0x108] sm:$0xff]  }
 0x797   :  { %4992 = vmatpush.msrb.mxu2 %v5751_v12  ;;  %5015 = vmatpush.msrb.mxu3 %v5783_v13  ;;  %v6018_v13 = vld [vmem:[#allocation4 + $0x100] sm:$0xff]  }
 0x798   :  { %5023 = vmatpush.msra.mxu0 %v5844_v63  ;;  %5046 = vmatpush.msrb.mxu1 %v5876_v60  ;;  %v6045_v63 = vld [vmem:[#allocation4 + $0x1d8] sm:$0xff]   ;;  %v5820_v60 = vunpack.c.h.bf16 %v6019_v62 }
 0x799   :  { %5069 = vmatpush.msra.mxu2 %v5908_v50  ;;  %5092 = vmatpush.msra.mxu3 %v5940_v18  ;;  %v5924_v4 = vunpack.c.h.bf16 %v6045_v63  ;;  %v5923_v12 = vunpack.c.l.bf16 %v6045_v63  ;;  %v5851_v50 = vunpack.c.l.bf16 %v6027_v42 }
 0x79a   :  { %5024 = vmatpush.msra.mxu0 %v5843_v19  ;;  %5047 = vmatpush.msrb.mxu1 %v5875_v30  ;;  %v6036_v19 = vld [vmem:[#allocation4 + $0x190] sm:$0xff]   ;;  %v5819_v30 = vunpack.c.l.bf16 %v6019_v62 }
 0x79b   :  { %5070 = vmatpush.msra.mxu2 %v5907_v15  ;;  %5093 = vmatpush.msra.mxu3 %v5939_v0  ;;  %v5888_v1 = vunpack.c.h.bf16 %v6036_v19  ;;  %v5887_v16 = vunpack.c.l.bf16 %v6036_v19  ;;  %v6043_v0 = vld [vmem:[#allocation4 + $0x1c8] sm:$0xff]  }
 0x79c   :  { %5025 = vmatpush.msra.mxu0 %v5840_v59  ;;  %5048 = vmatpush.msrb.mxu1 %v5872_v61  ;;  %v6044_v59 = vld [vmem:[#allocation4 + $0x1d0] sm:$0xff]   ;;  %v5816_v61 = vunpack.c.h.bf16 %v6018_v13 }
 0x79d   :  { %5071 = vmatpush.msra.mxu2 %v5904_v26  ;;  %5094 = vmatpush.msra.mxu3 %v5936_v23  ;;  %v5920_v18 = vunpack.c.h.bf16 %v6044_v59  ;;  %v5919_v15 = vunpack.c.l.bf16 %v6044_v59  ;;  %v5916_v26 = vunpack.c.h.bf16 %v6043_v0  ;;  %v5880_v23 = vunpack.c.h.bf16 %v6034_v49 }
 0x79e   :  { %5026 = vmatpush.msra.mxu0 %v5839_v53  ;;  %5049 = vmatpush.msrb.mxu1 %v5871_v35  ;;  %v6035_v53 = vld [vmem:[#allocation4 + $0x188] sm:$0xff]   ;;  %v5815_v35 = vunpack.c.l.bf16 %v6018_v13 }
 0x79f   :  { %5072 = vmatpush.msra.mxu2 %v5903_v52  ;;  %5095 = vmatpush.msra.mxu3 %v5935_v24  ;;  %v5884_v33 = vunpack.c.h.bf16 %v6035_v53  ;;  %v5879_v52 = vunpack.c.l.bf16 %v6034_v49  ;;  %v5172_v49 = vld [vmem:[%s9351_s10 + $0x48] sm:$0xff] }
 0x7a0   :  { %5027 = vmatpush.msra.mxu0 %v5836_v55  ;;  %5050 = vmatpush.msrb.mxu1 %v5868_v31  ;;  %v5847_v55 = vunpack.c.l.bf16 %v6026_v11  ;;  %v5883_v31 = vunpack.c.l.bf16 %v6035_v53  ;;  %v5175_v11 = vld [vmem:[%s9351_s10 + $0x60] sm:$0xff] }
 0x7a1   :  { %5073 = vmatpush.msra.mxu2 %v5900_v51  ;;  %5096 = vmatpush.msra.mxu3 %v5932_v27 }
 0x7a2   :  { %5028 = vmatpush.msra.mxu0 %v5835_v44  ;;  %5051 = vmatpush.msrb.mxu1 %v5867_v7  ;;  %v5915_v44 = vunpack.c.l.bf16 %v6043_v0  ;;  %v6042_v7 = vld [vmem:[#allocation4 + $0x1c0] sm:$0xff]  }
 0x7a3   :  { %5074 = vmatpush.msra.mxu2 %v5899_v32  ;;  %5097 = vmatpush.msra.mxu3 %v5931_v21  ;;  %v5911_v14 = vunpack.c.l.bf16 %v6042_v7 }
 0x7a4   :  { %5029 = vmatpush.msra.mxu0 %v5832_v54  ;;  %5052 = vmatpush.msrb.mxu1 %v5864_v56  ;;  %v5912_v54 = vunpack.c.h.bf16 %v6042_v7 }
 0x7a5   :  { %5075 = vmatpush.msra.mxu2 %v5896_v37  ;;  %5098 = vmatpush.msra.mxu3 %v5928_v10 }
 0x7a6   :  { %5030 = vmatpush.msra.mxu0 %v5831_v8  ;;  %5053 = vmatpush.msrb.mxu1 %v5863_v43 }
 0x7a7   :  { %5076 = vmatpush.msra.mxu2 %v5895_v25  ;;  %5099 = vmatpush.msra.mxu3 %v5927_v6 }
 0x7a8   :  { %5031 = vmatpush.msra.mxu0 %v5828_v46  ;;  %5054 = vmatpush.msrb.mxu1 %v5860_v34 }
 0x7a9   :  { %5077 = vmatpush.msra.mxu2 %v5892_v41  ;;  %5100 = vmatpush.msra.mxu3 %v5924_v4 }
 0x7aa   :  { %5032 = vmatpush.msra.mxu0 %v5827_v20  ;;  %5055 = vmatpush.msrb.mxu1 %v5859_v58 }
 0x7ab   :  { %5078 = vmatpush.msra.mxu2 %v5891_v3  ;;  %5101 = vmatpush.msra.mxu3 %v5923_v12  ;;  %v5177_v12 = vld [vmem:[%s9351_s10 + $0x70] sm:$0xff] }
 0x7ac   :  { %5033 = vmatpush.msra.mxu0 %v5824_v40  ;;  %5056 = vmatpush.msrb.mxu1 %v5856_v2 }
 0x7ad   :  { %5079 = vmatpush.msra.mxu2 %v5888_v1  ;;  %5102 = vmatpush.msra.mxu3 %v5920_v18  ;;  %v5178_v1 = vld [vmem:[%s9351_s10 + $0x78] sm:$0xff] }
 0x7ae   :  { %5034 = vmatpush.msra.mxu0 %v5823_v38  ;;  %5057 = vmatpush.msrb.mxu1 %v5855_v48 }
 0x7af   :  { %5080 = vmatpush.msra.mxu2 %v5887_v16  ;;  %5103 = vmatpush.msra.mxu3 %v5919_v15  ;;  %v5176_v16 = vld [vmem:[%s9351_s10 + $0x68] sm:$0xff] }
 0x7b0   :  { %5035 = vmatpush.msra.mxu0 %v5820_v60  ;;  %5058 = vmatpush.msrb.mxu1 %v5852_v17  ;;  %v6174_v17 = vld [vmem:[#allocation12] ss:$0 sm:$0xff] }
 0x7b1   :  { %5081 = vmatpush.msra.mxu2 %v5884_v33  ;;  %5104 = vmatpush.msra.mxu3 %v5916_v26  ;;  %v5174_v33 = vld [vmem:[%s9351_s10 + $0x58] sm:$0xff] }
 0x7b2   :  { %5036 = vmatpush.msra.mxu0 %v5819_v30  ;;  %5059 = vmatpush.msrb.mxu1 %v5851_v50 }
 0x7b3   :  { %5082 = vmatpush.msra.mxu2 %v5883_v31  ;;  %5105 = vmatpush.msra.mxu3 %v5915_v44  ;;  %v5171_v44 = vld [vmem:[%s9351_s10 + $0x40] sm:$0xff] }
 0x7b4   :  { %5037 = vmatpush.msra.mxu0 %v5816_v61  ;;  %5060 = vmatpush.msrb.mxu1 %v5848_v29  ;;  %v6175_v61 = vld [vmem:[#allocation13] ss:$0 sm:$0xff] }
 0x7b5   :  { %5083 = vmatpush.msra.mxu2 %v5880_v23  ;;  %5106 = vmatpush.msra.mxu3 %v5912_v54  ;;  %v5170_v54 = vld [vmem:[%s9351_s10 + $0x38] sm:$0xff] }
 0x7b6   :  { %5038 = vmatpush.msra.mxu0 %v5815_v35  ;;  %5061 = vmatpush.msrb.mxu1 %v5847_v55  ;;  %v5173_v55 = vld [vmem:[%s9351_s10 + $0x50] sm:$0xff] }
 0x7b7   :  { %5084 = vmatpush.msra.mxu2 %v5879_v52  ;;  %5107 = vmatpush.msra.mxu3 %v5911_v14 }
 0x7ed   :  { %v4445_v57 = vpop.f32.mrf.mxu0 }
 0x7ee   :  { %4947 = vmatmul.f32.vlgmr.msrb.gmra.mxu0 %v4445_v57  ;;  %v4477_v8 = vpop.f32.mrf.mxu1  ;;  %v5169_v57 = vld [vmem:[%s9351_s10 + $0x30] sm:$0xff] }
 0x7ef   :  { %4970 = vmatmul.f32.vlgmr.msra.gmra.mxu1 %v4477_v8 }
 0x7f0   :  { %5183 = vmatpush.msra.mxu1 %v5178_v1 }
 0x7f2   :  { %5184 = vmatpush.msra.mxu1 %v5177_v12 }
 0x7f3   :  { %v4509_v56 = vpop.f32.mrf.mxu2 }
 0x7f4   :  { %4993 = vmatmul.f32.vlgmr.msrb.gmra.mxu2 %v4509_v56  ;;  %v4541_v51 = vpop.f32.mrf.mxu3  ;;  %5185 = vmatpush.msra.mxu1 %v5176_v16  ;;  %v5168_v56 = vld [vmem:[%s9351_s10 + $0x28] sm:$0xff] }
 0x7f5   :  { %v4448_v24 = vpop.f32.mrf.mxu0  ;;  %5016 = vmatmul.f32.vlgmr.msrb.gmra.mxu3 %v4541_v51  ;;  %v5167_v51 = vld [vmem:[%s9351_s10 + $0x20] sm:$0xff] }
 0x7f6   :  { %4950 = vmatmul.f32.gmra.mxu0 %v4448_v24  ;;  %v4480_v22 = vpop.f32.mrf.mxu1  ;;  %5186 = vmatpush.msra.mxu1 %v5175_v11  ;;  %v5166_v24 = vld [vmem:[%s9351_s10 + $0x18] sm:$0xff] }
 0x7f7   :  { %4973 = vmatmul.f32.gmra.mxu1 %v4480_v22 }
 0x7f8   :  { %5187 = vmatpush.msra.mxu1 %v5174_v33 }
 0x7fa   :  { %5188 = vmatpush.msra.mxu1 %v5173_v55 }
 0x7fb   :  { %v4512_v9 = vpop.f32.mrf.mxu2 }
 0x7fc   :  { %4996 = vmatmul.f32.gmra.mxu2 %v4512_v9  ;;  %v4544_v46 = vpop.f32.mrf.mxu3  ;;  %5189 = vmatpush.msra.mxu1 %v5172_v49  ;;  %v5165_v9 = vld [vmem:[%s9351_s10 + $0x10] sm:$0xff] }
 0x7fd   :  { %v4573_v43 = vpop.f32.mrf.mxu0  ;;  %5019 = vmatmul.f32.gmra.mxu3 %v4544_v46 }
 0x7fe   :  { %5039 = vmatmul.f32.vlgmr.msra.gmra.mxu0 %v4573_v43  ;;  %v4605_v32 = vpop.f32.mrf.mxu1  ;;  %5190 = vmatpush.msra.mxu1 %v5171_v44 }
 0x7ff   :  { %5062 = vmatmul.f32.vlgmr.msrb.gmra.mxu1 %v4605_v32 }
 0x800   :  { %5191 = vmatpush.msra.mxu1 %v5170_v54 }
 0x802   :  { %5192 = vmatpush.msra.mxu1 %v5169_v57 }
 0x803   :  { %v4637_v27 = vpop.f32.mrf.mxu2 }
 0x804   :  { %5085 = vmatmul.f32.vlgmr.msra.gmra.mxu2 %v4637_v27  ;;  %v4669_v39 = vpop.f32.mrf.mxu3  ;;  %5193 = vmatpush.msra.mxu1 %v5168_v56  ;;  %v5164_v27 = vld [vmem:[%s9351_s10 + $0x8] sm:$0xff] }
 0x805   :  { %v4576_v36 = vpop.f32.mrf.mxu0  ;;  %5108 = vmatmul.f32.vlgmr.msra.gmra.mxu3 %v4669_v39 }
 0x806   :  { %5042 = vmatmul.f32.gmra.mxu0 %v4576_v36  ;;  %v4608_v20 = vpop.f32.mrf.mxu1  ;;  %5194 = vmatpush.msra.mxu1 %v5167_v51  ;;  %v5139_v36 = vld [vmem:[%s9350_s9] sm:$0x3] }
 0x807   :  { %5065 = vmatmul.f32.gmra.mxu1 %v4608_v20 }
 0x808   :  { %5195 = vmatpush.msra.mxu1 %v5166_v24 }
 0x80a   :  { %5196 = vmatpush.msra.mxu1 %v5165_v9 }
 0x80b   :  { %v4640_v34 = vpop.f32.mrf.mxu2 }
 0x80c   :  { %5088 = vmatmul.f32.gmra.mxu2 %v4640_v34  ;;  %v4672_v37 = vpop.f32.mrf.mxu3  ;;  %5197 = vmatpush.msra.mxu1 %v5164_v27  ;;  %v5163_v34 = vld [vmem:[%s9351_s10] sm:$0xff] }
 0x80d   :  { %5111 = vmatmul.f32.gmra.mxu3 %v4672_v37  ;;  %v5210_v37 = vld [vmem:[%s9353_s12 + $0x38] sm:$0xff] }
 0x80e   :  { %5198 = vmatpush.msra.mxu1 %v5163_v34  ;;  %5227 = vmatpush.msrb.mxu2 %v5210_v37 }
 0x86b   :  { %v4948_v21 = vpop.f32.mrf.mxu0 }
 0x86c   :  { %v4971_v45 = vpop.f32.mrf.mxu1 }
 0x86d   :  { %v4972_v25 = vadd.f32 %v4971_v45, %v4948_v21  ;;  %v5209_v21 = vld [vmem:[%s9353_s12 + $0x30] sm:$0xff]  ;;  %v5208_v45 = vld [vmem:[%s9353_s12 + $0x28] sm:$0xff] }
 0x86e   :  { %5228 = vmatpush.msrb.mxu2 %v5209_v21 }
 0x870   :  { %5229 = vmatpush.msrb.mxu2 %v5208_v45 }
 0x873   :  { %v4951_v5 = vpop.f32.mrf.mxu0 }
 0x874   :  { %v4974_v40 = vpop.f32.mrf.mxu1 }
 0x875   :  { %v4975_v41 = vadd.f32 %v4974_v40, %v4951_v5  ;;  %v5207_v5 = vld [vmem:[%s9353_s12 + $0x20] sm:$0xff]  ;;  %v5206_v40 = vld [vmem:[%s9353_s12 + $0x18] sm:$0xff] }
 0x876   :  { %5230 = vmatpush.msrb.mxu2 %v5207_v5 }
 0x877   :  { %v4994_v58 = vpop.f32.mrf.mxu2 }
 0x878   :  { %v5017_v10 = vpop.f32.mrf.mxu3  ;;  %v4995_v47 = vadd.f32 %v4994_v58, %v4972_v25  ;;  %v5205_v58 = vld [vmem:[%s9353_s12 + $0x10] sm:$0xff]  ;;  %5231 = vmatpush.msrb.mxu2 %v5206_v40  ;;  %v5204_v25 = vld [vmem:[%s9353_s12 + $0x8] sm:$0xff] }
 0x87a   :  { %v5018_v38 = vadd.f32 %v5017_v10, %v4995_v47  ;;  %5232 = vmatpush.msrb.mxu2 %v5205_v58  ;;  %v5203_v47 = vld [vmem:[%s9353_s12] sm:$0xff] }
 0x87b   :  { %v5040_v28 = vpop.f32.mrf.mxu0 }
 0x87c   :  { %v5063_v62 = vpop.f32.mrf.mxu1  ;;  %v5041_v63 = vadd.f32 %v5040_v28, %v5018_v38  ;;  %5233 = vmatpush.msrb.mxu2 %v5204_v25  ;;  %v6176_v28 = vld [vmem:[%s9352_s11] ss:$0 sm:$0xff] }
 0x87e   :  { %v5064_v48 = vadd.f32 %v5063_v62, %v5041_v63  ;;  %5234 = vmatpush.msrb.mxu2 %v5203_v47 }
 0x87f   :  { %v4997_v2 = vpop.f32.mrf.mxu2 }
 0x880   :  { %v5020_v6 = vpop.f32.mrf.mxu3  ;;  %v4998_v60 = vadd.f32 %v4997_v2, %v4975_v41  ;;  %v6177_v41 = vld [vmem:[%s9354_s13] ss:$0 sm:$0xff] }
 0x882   :  { %v5021_v3 = vadd.f32 %v5020_v6, %v4998_v60 }
 0x883   :  { %v5043_v4 = vpop.f32.mrf.mxu0 }
 0x884   :  { %v5044_v13 = vadd.f32 %v5043_v4, %v5021_v3  ;;  %v5066_v50 = vpop.f32.mrf.mxu1 }
 0x886   :  { %v5067_v53 = vadd.f32 %v5066_v50, %v5044_v13 }
 0x887   :  { %v5086_v42 = vpop.f32.mrf.mxu2 }
 0x888   :  { %v5087_v19 = vadd.f32 %v5086_v42, %v5064_v48  ;;  %v5109_v30 = vpop.f32.mrf.mxu3 }
 0x88a   :  { %v5110_v59 = vadd.f32 %v5109_v30, %v5087_v19 }
 0x88c   :  { %v5119_v18 = vmul.f32 %v6174_v17, %v5110_v59 }
 0x88e   :  { %v5125_v35 = vadd.f32 %v6175_v61, %v5119_v18 }
 0x88f   :  { %v5089_v29 = vpop.f32.mrf.mxu2 }
 0x890   :  { %v5090_v15 = vadd.f32 %v5089_v29, %v5067_v53  ;;  %v5112_v0 = vpop.f32.mrf.mxu3  ;;  %v5129_v26 = vmin.f32 %v5125_v35, 0.0  ;;  %vm5127_vm2 = vcmp.gt.f32.partialorder %v5125_v35, 0.0 }
 0x892   :  { %v5113_v31 = vadd.f32 %v5112_v0, %v5090_v15  ;;  %v5131_v52 = vmul.f32 1.442695, %v5129_v26 }
 0x894   :  { %v5120_v23 = vmul.f32 %v6174_v17, %v5113_v31  ;;  %6178 = vpow2.f32 %v5131_v52 }
 0x896   :  { %v5126_v7 = vadd.f32 %v6175_v61, %v5120_v23 }
 0x898   :  { %v5130_v14 = vmin.f32 %v5126_v7, 0.0  ;;  %vm5128_vm0 = vcmp.gt.f32.partialorder %v5126_v7, 0.0 }
 0x89a   :  { %v5133_v8 = vmul.f32 1.442695, %v5130_v14  ;;  %v6179_v22 = vpop.eup %6178 }
 0x89b   :  { %v5486_v32 = vadd.f32 -1.0, %v6179_v22 }
 0x89c   :  { %6180 = vpow2.f32 %v5133_v8 }
 0x89d   :  { %v5137_v20 = vsel %vm5127_vm2, %v5125_v35, %v5486_v32 }
 0x8a2   :  { %v6181_v46 = vpop.eup %6180 }
 0x8a3   :  { %v5487_v43 = vadd.f32 -1.0, %v6181_v46 }
 0x8a5   :  { %v5138_v39 = vsel %vm5128_vm0, %v5126_v7, %v5487_v43 }
 0x8a6   :  { %5157 = vmatpush.msrb.mxu0 %v5138_v39 }
 0x8a8   :  { %5158 = vmatpush.msrb.mxu0 %v5137_v20 }
 0x8a9   :  { %5488 = vmatmul.msk.f32.vlgmr.msrb.gmra.mxu0 %vm4081_vm14, %v5139_v36 }
 0x926   :  { %v5160_v10 = vpop.f32.mrf.mxu0 }
 0x927   :  { %5199 = vmatmul.f32.vlgmr.msra.gmra.mxu1 %v5160_v10 }
 0x9a4   :  { %v5200_v38 = vpop.f32.mrf.mxu1 }
 0x9a5   :  { %v5201_v2 = vadd.f32 %v6176_v28, %v5200_v38 }
 0x9a7   :  { %5489 = vmatmul.msk.f32.vlgmr.msrb.gmra.mxu2 %vm5215_vm1, %v5201_v2 }
 0xa2a   :  { %v5236_v6 = vpop.f32.mrf.mxu2 }
 0xa2b   :  { %v5237_v62 = vadd.f32 %v6177_v41, %v5236_v6 }
 0xa2d   :  { %5240 = vst.msk [vmem:[#allocation18] sm:$0x3] %vm5239_vm3, %v5237_v62 }
 0xa2e   :  { %5251 = dma.vmem_to_hbm [thread:$0]  %s5247_s0, 32, %s5249_s22, [#allocation8]  }
 0xa2f   :  { %6390 = dma.done.wait [#allocation8], 32  }
 0xa30   :  { %6391 = vsyncadd [#allocation8], 4294967264 }
 0xa31   :  { %5256 = vsyncpa [#allocation7], 1 }
 0xa32   :  { %5257 = vsyncpa [#allocation11], 1 }
 0xa33   :  { %5258 = vsyncpa [#allocation14], 1 }
 0xa34   :  { %5259 = vsyncpa [#allocation8], 1 }
 0xa35   :  { %5260 = vsyncpa [#allocation9], 1 }
 0xa36   :  { %5261 = vsyncpa [#allocation17], 1 }
 0xa37   :  { %5262 = vsyncmov [#allocation5] }
 0xa3a   :  { %s5263_s11 = vpop.sfrf %5262 }
 0xa3b   :  { %p5490_p0 = scmp.ne.s32.totalorder %s5263_s11, 0 }
 0xa3d   :  { %5267 = shalt.err (%p5490_p0)  }
 0xa3e   :  { %5269 = vsyncmov [#allocation5 + $0x1] }
 0xa41   :  { %s5270_s12 = vpop.sfrf %5269 }
 0xa42   :  { %p5491_p1 = scmp.ne.s32.totalorder %s5270_s12, 0 }
 0xa44   :  { %5274 = shalt.err (%p5491_p1)  }
 0xa45   :  { %5276 = vsyncmov [#allocation5 + $0x2] }
 0xa48   :  { %s5277_s13 = vpop.sfrf %5276 }
 0xa49   :  { %p5492_p2 = scmp.ne.s32.totalorder %s5277_s13, 0 }
 0xa4b   :  { %5281 = shalt.err (%p5492_p2)  }

</bundles_post_ra>
